<compile_context>
chip_gen: v5e
topology: v5e:2x2
jax: 0.10.0
libtpu: 0.0.40
codegen_flags: <defaults>
</compile_context>

<pallas_src>
import jax
import jax.numpy as jnp
from jax.experimental import pallas as pl
from jax.experimental.pallas import tpu as pltpu

POINT_CHANNEL = 3
HIDDEN = (64, 64, 128, 128, 256)
OUT_DIM = 256


def _gelu_exact(v):
    # PyTorch nn.GELU() default: exact erf-based GELU (kept in f32).
    return 0.5 * v * (1.0 + jax.lax.erf(v * 0.7071067811865476))


def pointnet_kernel(x_ref,
                    w1, b1, w2, b2, w3, b3, w4, b4, w5, b5, w6, b6,
                    out_ref, acc_ref):
    n = pl.program_id(1)

    @pl.when(n == 0)
    def _init():
        acc_ref[...] = jnp.full(acc_ref.shape, -jnp.inf, dtype=acc_ref.dtype)

    tb, tn, c = x_ref.shape
    x = x_ref[...].astype(jnp.float32).reshape(tb * tn, c)   # (M, 3)

    # ---- Layer 1 (K = 3): three broadcast FMAs on the VPU, no MXU pass. ----
    w1f = w1[...].astype(jnp.float32)          # (3, 64)
    b1f = b1[...].astype(jnp.float32)          # (1, 64)
    h = (x[:, 0:1] * w1f[0:1, :]
         + x[:, 1:2] * w1f[1:2, :]
         + x[:, 2:3] * w1f[2:3, :]
         + b1f)
    h = _gelu_exact(h)

    # ---- Layers 2..6: bf16 MXU matmuls with f32 accumulation + bias. ----
    def lin(v, w_ref, b_ref):
        return (jnp.dot(v.astype(jnp.bfloat16),
                        w_ref[...].astype(jnp.bfloat16),
                        preferred_element_type=jnp.float32)
                + b_ref[...].astype(jnp.float32))

    h = _gelu_exact(lin(h, w2, b2))
    h = _gelu_exact(lin(h, w3, b3))
    h = _gelu_exact(lin(h, w4, b4))
    h = _gelu_exact(lin(h, w5, b5))
    h = lin(h, w6, b6)                         # (M, 256) f32

    # Per-batch max over this point tile, fused into the running accumulator.
    pooled = jnp.concatenate(
        [jnp.max(h[t * tn:(t + 1) * tn], axis=0, keepdims=True)
         for t in range(tb)], axis=0)          # (tb, 256)
    acc_ref[...] = jnp.maximum(acc_ref[...], pooled)

    @pl.when(n == pl.num_programs(1) - 1)
    def _write():
        out_ref[...] = acc_ref[...].reshape(tb, 1, OUT_DIM).astype(out_ref.dtype)


def init_params(key, point_channel=POINT_CHANNEL, output_dim=OUT_DIM):
    """Deterministic trunc-normal(std=0.02) weights, zero biases (spec init)."""
    dims = (point_channel,) + HIDDEN + (output_dim,)
    params = []
    for i in range(len(dims) - 1):
        key, sub = jax.random.split(key)
        w = 0.02 * jax.random.truncated_normal(
            sub, -2.0, 2.0, (dims[i], dims[i + 1]), dtype=jnp.float32)
        b = jnp.zeros((1, dims[i + 1]), dtype=jnp.float32)
        params.append((w, b))
    return params


def _round_up(x, m):
    return ((x + m - 1) // m) * m


def pointnet_large_forward(x, params, *, tn=None, tb=None, vmem_limit_bytes=None):
    """x: [B, N, 3] float32 -> [B, OUT_DIM] float32."""
    B, N, C = x.shape
    assert C == POINT_CHANNEL

    # ---- tile selection -----------------------------------------------------
    if tn is None:
        tn = min(_round_up(N, 8), 1024)        # points per grid step
    tn = _round_up(tn, 8)
    n_pad = _round_up(N, tn)

    if tb is None:
        # Grow the batch block (over divisors of B) until the MXU sees >= 256
        # rows per step; prefer tb == 1 when the point tile alone is enough so
        # the batch axis stays available for megacore sharding.
        tb = 1
        for cand in range(1, B + 1):
            if B % cand != 0:
                continue
            if cand * tn > 2048:
                break
            tb = cand
            if cand * tn >= 256:
                break
    assert B % tb == 0

    # Pad the point axis by replicating the last point: padded rows duplicate
    # an existing point's features, so the max over points is exactly unchanged.
    if n_pad != N:
        x = jnp.pad(x, ((0, 0), (0, n_pad - N), (0, 0)), mode="edge")

    grid = (B // tb, n_pad // tn)

    # ---- operands & specs ---------------------------------------------------
    flat_params = []
    in_specs = [pl.BlockSpec((tb, tn, C), lambda b, n: (b, n, 0))]
    for i, (w, bias) in enumerate(params):
        # Layer 1 stays f32 (VPU path); layers 2..6 ship bf16 weights (halves
        # weight VMEM / HBM traffic, native bf16 MXU inputs).
        w_in = w if i == 0 else w.astype(jnp.bfloat16)
        flat_params += [w_in, bias]
        in_specs.append(pl.BlockSpec(w_in.shape, lambda b, n: (0, 0)))
        in_specs.append(pl.BlockSpec(bias.shape, lambda b, n: (0, 0)))

    compiler_kwargs = dict(dimension_semantics=("parallel", "arbitrary"))
    if vmem_limit_bytes is not None:
        # Raise the scoped VMEM limit when running with large tn/tb tiles
        # (keep ~25% headroom below physical: 128 MiB v5e/v6e, 64 MiB v7x).
        compiler_kwargs["vmem_limit_bytes"] = int(vmem_limit_bytes)

    out = pl.pallas_call(
        pointnet_kernel,
        out_shape=jax.ShapeDtypeStruct((B, 1, OUT_DIM), jnp.float32),
        grid_spec=pltpu.PrefetchScalarGridSpec(
            num_scalar_prefetch=0,
            grid=grid,
            in_specs=in_specs,
            out_specs=pl.BlockSpec((tb, 1, OUT_DIM), lambda b, n: (b, 0, 0)),
            scratch_shapes=[pltpu.VMEM((tb, OUT_DIM), jnp.float32)],
        ),
        compiler_params=pltpu.CompilerParams(**compiler_kwargs),
    )(x, *flat_params)

    return out.reshape(B, OUT_DIM)


def _reference_forward(x, params):
    # Pure f32 reference matching the PyTorch module.
    h = x
    n_layers = len(params)
    for i, (w, b) in enumerate(params):
        h = h @ w + b[0]
        if i < n_layers - 1:
            h = 0.5 * h * (1.0 + jax.lax.erf(h * 0.7071067811865476))
    return jnp.max(h, axis=1)


if __name__ == "__main__":
    key = jax.random.PRNGKey(0)
    k_x, k_p, k_p2 = jax.random.split(key, 3)

    # Small shapes: 2 clouds of 200 points, 3 channels.  N=200 with tn=64
    # exercises both the multi-step point reduction and the replicate-padding
    # of the remainder tile.
    B, N = 2, 200
    x = jax.random.normal(k_x, (B, N, POINT_CHANNEL), dtype=jnp.float32)

    # Spec-faithful init (trunc-normal std=0.02, zero bias).
    params = init_params(k_p)
    out = jax.block_until_ready(pointnet_large_forward(x, params, tn=64))
    ref = _reference_forward(x, params)
    assert out.shape == (B, OUT_DIM)
    assert jnp.allclose(out, ref, atol=1e-4, rtol=5e-2), "mismatch (std=0.02 init)"

    # Larger-magnitude weights to meaningfully exercise the bf16 matmul path.
    params_big = [(5.0 * w, b) for (w, b) in init_params(k_p2)]
    out2 = jax.block_until_ready(pointnet_large_forward(x, params_big, tn=64))
    ref2 = _reference_forward(x, params_big)
    assert jnp.allclose(out2, ref2, atol=2e-3, rtol=5e-2), "mismatch (scaled init)"

    print("KERNEL_OK")
</pallas_src>

<mosaic_0001>
module attributes {stable_mosaic.version = 11 : i64} {
  func.func @pointnet_kernel(%arg0: i32, %arg1: i32, %arg2: memref<2x64x3xf32, #tpu.memory_space<vmem>>, %arg3: memref<3x64xf32, #tpu.memory_space<vmem>>, %arg4: memref<1x64xf32, #tpu.memory_space<vmem>>, %arg5: memref<64x64xbf16, #tpu.memory_space<vmem>>, %arg6: memref<1x64xf32, #tpu.memory_space<vmem>>, %arg7: memref<64x128xbf16, #tpu.memory_space<vmem>>, %arg8: memref<1x128xf32, #tpu.memory_space<vmem>>, %arg9: memref<128x128xbf16, #tpu.memory_space<vmem>>, %arg10: memref<1x128xf32, #tpu.memory_space<vmem>>, %arg11: memref<128x256xbf16, #tpu.memory_space<vmem>>, %arg12: memref<1x256xf32, #tpu.memory_space<vmem>>, %arg13: memref<256x256xbf16, #tpu.memory_space<vmem>>, %arg14: memref<1x256xf32, #tpu.memory_space<vmem>>, %arg15: memref<2x1x256xf32, #tpu.memory_space<vmem>>, %arg16: memref<2x256xf32, #tpu.memory_space<vmem>>) attributes {dimension_semantics = [#tpu.dimension_semantics<parallel>, #tpu.dimension_semantics<arbitrary>], iteration_bounds = array<i64: 1, 4>, scalar_prefetch = 0 : i64, scratch_operands = 1 : i64, tpu.core_type = #tpu.core_type<tc>, window_params = [{transform_indices = @transform_0, window_bounds = array<i64: 2, 64, 3>}, {pipeline_mode = #tpu.pipeline_mode<synchronous>, transform_indices = @transform_1, window_bounds = array<i64: 3, 64>}, {pipeline_mode = #tpu.pipeline_mode<synchronous>, transform_indices = @transform_2, window_bounds = array<i64: 1, 64>}, {pipeline_mode = #tpu.pipeline_mode<synchronous>, transform_indices = @transform_3, window_bounds = array<i64: 64, 64>}, {pipeline_mode = #tpu.pipeline_mode<synchronous>, transform_indices = @transform_4, window_bounds = array<i64: 1, 64>}, {pipeline_mode = #tpu.pipeline_mode<synchronous>, transform_indices = @transform_5, window_bounds = array<i64: 64, 128>}, {pipeline_mode = #tpu.pipeline_mode<synchronous>, transform_indices = @transform_6, window_bounds = array<i64: 1, 128>}, {pipeline_mode = #tpu.pipeline_mode<synchronous>, transform_indices = @transform_7, window_bounds = array<i64: 128, 128>}, {pipeline_mode = #tpu.pipeline_mode<synchronous>, transform_indices = @transform_8, window_bounds = array<i64: 1, 128>}, {pipeline_mode = #tpu.pipeline_mode<synchronous>, transform_indices = @transform_9, window_bounds = array<i64: 128, 256>}, {pipeline_mode = #tpu.pipeline_mode<synchronous>, transform_indices = @transform_10, window_bounds = array<i64: 1, 256>}, {pipeline_mode = #tpu.pipeline_mode<synchronous>, transform_indices = @transform_11, window_bounds = array<i64: 256, 256>}, {pipeline_mode = #tpu.pipeline_mode<synchronous>, transform_indices = @transform_12, window_bounds = array<i64: 1, 256>}, {transform_indices = @transform_13, window_bounds = array<i64: 2, 1, 256>}]} {
    %c0_i32 = arith.constant 0 : i32
    %0 = arith.cmpi eq, %arg1, %c0_i32 : i32
    %1 = arith.extui %0 : i1 to i32
    %c0_i32_0 = arith.constant 0 : i32
    %2 = arith.cmpi ne, %1, %c0_i32_0 : i32
    scf.if %2 {
      %cst_53 = arith.constant 0xFF800000 : f32
      %109 = vector.broadcast %cst_53 : f32 to vector<2x256xf32>
      %c0_54 = arith.constant 0 : index
      %c0_55 = arith.constant 0 : index
      %110 = vector.load %arg16[%c0_54, %c0_55] : memref<2x256xf32, #tpu.memory_space<vmem>>, vector<2x256xf32>
      tpu.vector_store %arg16[%c0_54, %c0_55], %109 {strides = array<i32>} : memref<2x256xf32, #tpu.memory_space<vmem>>, vector<2x256xf32>,
    } else {
    }
    %c0 = arith.constant 0 : index
    %c0_1 = arith.constant 0 : index
    %c0_2 = arith.constant 0 : index
    %3 = vector.load %arg2[%c0, %c0_1, %c0_2] : memref<2x64x3xf32, #tpu.memory_space<vmem>>, vector<2x64x3xf32>
    %4 = vector.shape_cast %3 : vector<2x64x3xf32> to vector<128x3xf32>
    %c0_3 = arith.constant 0 : index
    %c0_4 = arith.constant 0 : index
    %5 = vector.load %arg3[%c0_3, %c0_4] : memref<3x64xf32, #tpu.memory_space<vmem>>, vector<3x64xf32>
    %c0_5 = arith.constant 0 : index
    %c0_6 = arith.constant 0 : index
    %6 = vector.load %arg4[%c0_5, %c0_6] : memref<1x64xf32, #tpu.memory_space<vmem>>, vector<1x64xf32>
    %7 = vector.extract_strided_slice %4 {offsets = [0, 0], sizes = [128, 1], strides = [1, 1]} : vector<128x3xf32> to vector<128x1xf32>
    %8 = vector.extract_strided_slice %5 {offsets = [0, 0], sizes = [1, 64], strides = [1, 1]} : vector<3x64xf32> to vector<1x64xf32>
    %9 = vector.broadcast %7 : vector<128x1xf32> to vector<128x64xf32>
    %10 = vector.broadcast %8 : vector<1x64xf32> to vector<128x64xf32>
    %11 = arith.mulf %9, %10 : vector<128x64xf32>
    %12 = vector.extract_strided_slice %4 {offsets = [0, 1], sizes = [128, 1], strides = [1, 1]} : vector<128x3xf32> to vector<128x1xf32>
    %13 = vector.extract_strided_slice %5 {offsets = [1, 0], sizes = [1, 64], strides = [1, 1]} : vector<3x64xf32> to vector<1x64xf32>
    %14 = vector.broadcast %12 : vector<128x1xf32> to vector<128x64xf32>
    %15 = vector.broadcast %13 : vector<1x64xf32> to vector<128x64xf32>
    %16 = arith.mulf %14, %15 : vector<128x64xf32>
    %17 = arith.addf %11, %16 : vector<128x64xf32>
    %18 = vector.extract_strided_slice %4 {offsets = [0, 2], sizes = [128, 1], strides = [1, 1]} : vector<128x3xf32> to vector<128x1xf32>
    %19 = vector.extract_strided_slice %5 {offsets = [2, 0], sizes = [1, 64], strides = [1, 1]} : vector<3x64xf32> to vector<1x64xf32>
    %20 = vector.broadcast %18 : vector<128x1xf32> to vector<128x64xf32>
    %21 = vector.broadcast %19 : vector<1x64xf32> to vector<128x64xf32>
    %22 = arith.mulf %20, %21 : vector<128x64xf32>
    %23 = arith.addf %17, %22 : vector<128x64xf32>
    %24 = vector.broadcast %6 : vector<1x64xf32> to vector<128x64xf32>
    %25 = arith.addf %23, %24 : vector<128x64xf32>
    %cst = arith.constant 5.000000e-01 : f32
    %26 = vector.broadcast %cst : f32 to vector<128x64xf32>
    %27 = arith.mulf %26, %25 : vector<128x64xf32>
    %cst_7 = arith.constant 0.707106769 : f32
    %28 = vector.broadcast %cst_7 : f32 to vector<128x64xf32>
    %29 = arith.mulf %25, %28 : vector<128x64xf32>
    %30 = math.erf %29 : vector<128x64xf32>
    %cst_8 = arith.constant 1.000000e+00 : f32
    %31 = vector.broadcast %cst_8 : f32 to vector<128x64xf32>
    %32 = arith.addf %31, %30 : vector<128x64xf32>
    %33 = arith.mulf %27, %32 : vector<128x64xf32>
    %34 = arith.truncf %33 : vector<128x64xf32> to vector<128x64xbf16>
    %c0_9 = arith.constant 0 : index
    %c0_10 = arith.constant 0 : index
    %35 = vector.load %arg5[%c0_9, %c0_10] : memref<64x64xbf16, #tpu.memory_space<vmem>>, vector<64x64xbf16>
    %cst_11 = arith.constant dense<0.000000e+00> : vector<128x64xf32>
    %36 = tpu.matmul %34, %35, %cst_11 {dimension_numbers = #tpu.dot_dimension_numbers<[1], [0], [0], [1], [0, 0, 1, 1], [], []>} : vector<128x64xbf16>, vector<64x64xbf16>, vector<128x64xf32> -> vector<128x64xf32>
    %c0_12 = arith.constant 0 : index
    %c0_13 = arith.constant 0 : index
    %37 = vector.load %arg6[%c0_12, %c0_13] : memref<1x64xf32, #tpu.memory_space<vmem>>, vector<1x64xf32>
    %38 = vector.broadcast %37 : vector<1x64xf32> to vector<128x64xf32>
    %39 = arith.addf %36, %38 : vector<128x64xf32>
    %cst_14 = arith.constant 5.000000e-01 : f32
    %40 = vector.broadcast %cst_14 : f32 to vector<128x64xf32>
    %41 = arith.mulf %40, %39 : vector<128x64xf32>
    %cst_15 = arith.constant 0.707106769 : f32
    %42 = vector.broadcast %cst_15 : f32 to vector<128x64xf32>
    %43 = arith.mulf %39, %42 : vector<128x64xf32>
    %44 = math.erf %43 : vector<128x64xf32>
    %cst_16 = arith.constant 1.000000e+00 : f32
    %45 = vector.broadcast %cst_16 : f32 to vector<128x64xf32>
    %46 = arith.addf %45, %44 : vector<128x64xf32>
    %47 = arith.mulf %41, %46 : vector<128x64xf32>
    %48 = arith.truncf %47 : vector<128x64xf32> to vector<128x64xbf16>
    %c0_17 = arith.constant 0 : index
    %c0_18 = arith.constant 0 : index
    %49 = vector.load %arg7[%c0_17, %c0_18] : memref<64x128xbf16, #tpu.memory_space<vmem>>, vector<64x128xbf16>
    %cst_19 = arith.constant dense<0.000000e+00> : vector<128x128xf32>
    %50 = tpu.matmul %48, %49, %cst_19 {dimension_numbers = #tpu.dot_dimension_numbers<[1], [0], [0], [1], [0, 0, 1, 1], [], []>} : vector<128x64xbf16>, vector<64x128xbf16>, vector<128x128xf32> -> vector<128x128xf32>
    %c0_20 = arith.constant 0 : index
    %c0_21 = arith.constant 0 : index
    %51 = vector.load %arg8[%c0_20, %c0_21] : memref<1x128xf32, #tpu.memory_space<vmem>>, vector<1x128xf32>
    %52 = vector.broadcast %51 : vector<1x128xf32> to vector<128x128xf32>
    %53 = arith.addf %50, %52 : vector<128x128xf32>
    %cst_22 = arith.constant 5.000000e-01 : f32
    %54 = vector.broadcast %cst_22 : f32 to vector<128x128xf32>
    %55 = arith.mulf %54, %53 : vector<128x128xf32>
    %cst_23 = arith.constant 0.707106769 : f32
    %56 = vector.broadcast %cst_23 : f32 to vector<128x128xf32>
    %57 = arith.mulf %53, %56 : vector<128x128xf32>
    %58 = math.erf %57 : vector<128x128xf32>
    %cst_24 = arith.constant 1.000000e+00 : f32
    %59 = vector.broadcast %cst_24 : f32 to vector<128x128xf32>
    %60 = arith.addf %59, %58 : vector<128x128xf32>
    %61 = arith.mulf %55, %60 : vector<128x128xf32>
    %62 = arith.truncf %61 : vector<128x128xf32> to vector<128x128xbf16>
    %c0_25 = arith.constant 0 : index
    %c0_26 = arith.constant 0 : index
    %63 = vector.load %arg9[%c0_25, %c0_26] : memref<128x128xbf16, #tpu.memory_space<vmem>>, vector<128x128xbf16>
    %cst_27 = arith.constant dense<0.000000e+00> : vector<128x128xf32>
    %64 = tpu.matmul %62, %63, %cst_27 {dimension_numbers = #tpu.dot_dimension_numbers<[1], [0], [0], [1], [0, 0, 1, 1], [], []>} : vector<128x128xbf16>, vector<128x128xbf16>, vector<128x128xf32> -> vector<128x128xf32>
    %c0_28 = arith.constant 0 : index
    %c0_29 = arith.constant 0 : index
    %65 = vector.load %arg10[%c0_28, %c0_29] : memref<1x128xf32, #tpu.memory_space<vmem>>, vector<1x128xf32>
    %66 = vector.broadcast %65 : vector<1x128xf32> to vector<128x128xf32>
    %67 = arith.addf %64, %66 : vector<128x128xf32>
    %cst_30 = arith.constant 5.000000e-01 : f32
    %68 = vector.broadcast %cst_30 : f32 to vector<128x128xf32>
    %69 = arith.mulf %68, %67 : vector<128x128xf32>
    %cst_31 = arith.constant 0.707106769 : f32
    %70 = vector.broadcast %cst_31 : f32 to vector<128x128xf32>
    %71 = arith.mulf %67, %70 : vector<128x128xf32>
    %72 = math.erf %71 : vector<128x128xf32>
    %cst_32 = arith.constant 1.000000e+00 : f32
    %73 = vector.broadcast %cst_32 : f32 to vector<128x128xf32>
    %74 = arith.addf %73, %72 : vector<128x128xf32>
    %75 = arith.mulf %69, %74 : vector<128x128xf32>
    %76 = arith.truncf %75 : vector<128x128xf32> to vector<128x128xbf16>
    %c0_33 = arith.constant 0 : index
    %c0_34 = arith.constant 0 : index
    %77 = vector.load %arg11[%c0_33, %c0_34] : memref<128x256xbf16, #tpu.memory_space<vmem>>, vector<128x256xbf16>
    %cst_35 = arith.constant dense<0.000000e+00> : vector<128x256xf32>
    %78 = tpu.matmul %76, %77, %cst_35 {dimension_numbers = #tpu.dot_dimension_numbers<[1], [0], [0], [1], [0, 0, 1, 1], [], []>} : vector<128x128xbf16>, vector<128x256xbf16>, vector<128x256xf32> -> vector<128x256xf32>
    %c0_36 = arith.constant 0 : index
    %c0_37 = arith.constant 0 : index
    %79 = vector.load %arg12[%c0_36, %c0_37] : memref<1x256xf32, #tpu.memory_space<vmem>>, vector<1x256xf32>
    %80 = vector.broadcast %79 : vector<1x256xf32> to vector<128x256xf32>
    %81 = arith.addf %78, %80 : vector<128x256xf32>
    %cst_38 = arith.constant 5.000000e-01 : f32
    %82 = vector.broadcast %cst_38 : f32 to vector<128x256xf32>
    %83 = arith.mulf %82, %81 : vector<128x256xf32>
    %cst_39 = arith.constant 0.707106769 : f32
    %84 = vector.broadcast %cst_39 : f32 to vector<128x256xf32>
    %85 = arith.mulf %81, %84 : vector<128x256xf32>
    %86 = math.erf %85 : vector<128x256xf32>
    %cst_40 = arith.constant 1.000000e+00 : f32
    %87 = vector.broadcast %cst_40 : f32 to vector<128x256xf32>
    %88 = arith.addf %87, %86 : vector<128x256xf32>
    %89 = arith.mulf %83, %88 : vector<128x256xf32>
    %90 = arith.truncf %89 : vector<128x256xf32> to vector<128x256xbf16>
    %c0_41 = arith.constant 0 : index
    %c0_42 = arith.constant 0 : index
    %91 = vector.load %arg13[%c0_41, %c0_42] : memref<256x256xbf16, #tpu.memory_space<vmem>>, vector<256x256xbf16>
    %cst_43 = arith.constant dense<0.000000e+00> : vector<128x256xf32>
    %92 = tpu.matmul %90, %91, %cst_43 {dimension_numbers = #tpu.dot_dimension_numbers<[1], [0], [0], [1], [0, 0, 1, 1], [], []>} : vector<128x256xbf16>, vector<256x256xbf16>, vector<128x256xf32> -> vector<128x256xf32>
    %c0_44 = arith.constant 0 : index
    %c0_45 = arith.constant 0 : index
    %93 = vector.load %arg14[%c0_44, %c0_45] : memref<1x256xf32, #tpu.memory_space<vmem>>, vector<1x256xf32>
    %94 = vector.broadcast %93 : vector<1x256xf32> to vector<128x256xf32>
    %95 = arith.addf %92, %94 : vector<128x256xf32>
    %96 = vector.extract_strided_slice %95 {offsets = [0, 0], sizes = [64, 256], strides = [1, 1]} : vector<128x256xf32> to vector<64x256xf32>
    %cst_46 = arith.constant dense<0xFF800000> : vector<256xf32>
    %97 = vector.multi_reduction <maximumf>, %96, %cst_46 [0] : vector<64x256xf32> to vector<256xf32>
    %98 = vector.shape_cast %97 : vector<256xf32> to vector<1x256xf32>
    %99 = vector.extract_strided_slice %95 {offsets = [64, 0], sizes = [64, 256], strides = [1, 1]} : vector<128x256xf32> to vector<64x256xf32>
    %cst_47 = arith.constant dense<0xFF800000> : vector<256xf32>
    %100 = vector.multi_reduction <maximumf>, %99, %cst_47 [0] : vector<64x256xf32> to vector<256xf32>
    %101 = vector.shape_cast %100 : vector<256xf32> to vector<1x256xf32>
    %102 = tpu.concatenate %98, %101 in 0 : vector<1x256xf32>, vector<1x256xf32> -> vector<2x256xf32>
    %c0_48 = arith.constant 0 : index
    %c0_49 = arith.constant 0 : index
    %103 = vector.load %arg16[%c0_48, %c0_49] : memref<2x256xf32, #tpu.memory_space<vmem>>, vector<2x256xf32>
    %104 = arith.maximumf %103, %102 : vector<2x256xf32>
    %c0_50 = arith.constant 0 : index
    %c0_51 = arith.constant 0 : index
    %105 = vector.load %arg16[%c0_50, %c0_51] : memref<2x256xf32, #tpu.memory_space<vmem>>, vector<2x256xf32>
    tpu.vector_store %arg16[%c0_50, %c0_51], %104 {strides = array<i32>} : memref<2x256xf32, #tpu.memory_space<vmem>>, vector<2x256xf32>,
    %c3_i32 = arith.constant 3 : i32
    %106 = arith.cmpi eq, %arg1, %c3_i32 : i32
    %107 = arith.extui %106 : i1 to i32
    %c0_i32_52 = arith.constant 0 : i32
    %108 = arith.cmpi ne, %107, %c0_i32_52 : i32
    scf.if %108 {
      %c0_53 = arith.constant 0 : index
      %c0_54 = arith.constant 0 : index
      %109 = vector.load %arg16[%c0_53, %c0_54] : memref<2x256xf32, #tpu.memory_space<vmem>>, vector<2x256xf32>
      %110 = vector.shape_cast %109 : vector<2x256xf32> to vector<2x1x256xf32>
      %c0_55 = arith.constant 0 : index
      %c0_56 = arith.constant 0 : index
      %c0_57 = arith.constant 0 : index
      %111 = vector.load %arg15[%c0_55, %c0_56, %c0_57] : memref<2x1x256xf32, #tpu.memory_space<vmem>>, vector<2x1x256xf32>
      tpu.vector_store %arg15[%c0_55, %c0_56, %c0_57], %110 {strides = array<i32>} : memref<2x1x256xf32, #tpu.memory_space<vmem>>, vector<2x1x256xf32>,
    } else {
    }
    return
  }
  func.func @transform_0(%arg0: i32, %arg1: i32) -> (i32, i32, i32) {
    %c0_i32 = arith.constant 0 : i32
    %c0_i32_0 = arith.constant 0 : i32
    return %arg0, %arg1, %c0_i32 : i32, i32, i32
  }
  func.func @transform_1(%arg0: i32, %arg1: i32) -> (i32, i32) {
    %c0_i32 = arith.constant 0 : i32
    %c0_i32_0 = arith.constant 0 : i32
    %c0_i32_1 = arith.constant 0 : i32
    return %c0_i32, %c0_i32_0 : i32, i32
  }
  func.func @transform_2(%arg0: i32, %arg1: i32) -> (i32, i32) {
    %c0_i32 = arith.constant 0 : i32
    %c0_i32_0 = arith.constant 0 : i32
    %c0_i32_1 = arith.constant 0 : i32
    return %c0_i32, %c0_i32_0 : i32, i32
  }
  func.func @transform_3(%arg0: i32, %arg1: i32) -> (i32, i32) {
    %c0_i32 = arith.constant 0 : i32
    %c0_i32_0 = arith.constant 0 : i32
    %c0_i32_1 = arith.constant 0 : i32
    return %c0_i32, %c0_i32_0 : i32, i32
  }
  func.func @transform_4(%arg0: i32, %arg1: i32) -> (i32, i32) {
    %c0_i32 = arith.constant 0 : i32
    %c0_i32_0 = arith.constant 0 : i32
    %c0_i32_1 = arith.constant 0 : i32
    return %c0_i32, %c0_i32_0 : i32, i32
  }
  func.func @transform_5(%arg0: i32, %arg1: i32) -> (i32, i32) {
    %c0_i32 = arith.constant 0 : i32
    %c0_i32_0 = arith.constant 0 : i32
    %c0_i32_1 = arith.constant 0 : i32
    return %c0_i32, %c0_i32_0 : i32, i32
  }
  func.func @transform_6(%arg0: i32, %arg1: i32) -> (i32, i32) {
    %c0_i32 = arith.constant 0 : i32
    %c0_i32_0 = arith.constant 0 : i32
    %c0_i32_1 = arith.constant 0 : i32
    return %c0_i32, %c0_i32_0 : i32, i32
  }
  func.func @transform_7(%arg0: i32, %arg1: i32) -> (i32, i32) {
    %c0_i32 = arith.constant 0 : i32
    %c0_i32_0 = arith.constant 0 : i32
    %c0_i32_1 = arith.constant 0 : i32
    return %c0_i32, %c0_i32_0 : i32, i32
  }
  func.func @transform_8(%arg0: i32, %arg1: i32) -> (i32, i32) {
    %c0_i32 = arith.constant 0 : i32
    %c0_i32_0 = arith.constant 0 : i32
    %c0_i32_1 = arith.constant 0 : i32
    return %c0_i32, %c0_i32_0 : i32, i32
  }
  func.func @transform_9(%arg0: i32, %arg1: i32) -> (i32, i32) {
    %c0_i32 = arith.constant 0 : i32
    %c0_i32_0 = arith.constant 0 : i32
    %c0_i32_1 = arith.constant 0 : i32
    return %c0_i32, %c0_i32_0 : i32, i32
  }
  func.func @transform_10(%arg0: i32, %arg1: i32) -> (i32, i32) {
    %c0_i32 = arith.constant 0 : i32
    %c0_i32_0 = arith.constant 0 : i32
    %c0_i32_1 = arith.constant 0 : i32
    return %c0_i32, %c0_i32_0 : i32, i32
  }
  func.func @transform_11(%arg0: i32, %arg1: i32) -> (i32, i32) {
    %c0_i32 = arith.constant 0 : i32
    %c0_i32_0 = arith.constant 0 : i32
    %c0_i32_1 = arith.constant 0 : i32
    return %c0_i32, %c0_i32_0 : i32, i32
  }
  func.func @transform_12(%arg0: i32, %arg1: i32) -> (i32, i32) {
    %c0_i32 = arith.constant 0 : i32
    %c0_i32_0 = arith.constant 0 : i32
    %c0_i32_1 = arith.constant 0 : i32
    return %c0_i32, %c0_i32_0 : i32, i32
  }
  func.func @transform_13(%arg0: i32, %arg1: i32) -> (i32, i32, i32) {
    %c0_i32 = arith.constant 0 : i32
    %c0_i32_0 = arith.constant 0 : i32
    %c0_i32_1 = arith.constant 0 : i32
    return %arg0, %c0_i32, %c0_i32_0 : i32, i32, i32
  }
}

</mosaic_0001>

<bundles_post_ra>
// kernel: tpu_custom_call.1
= control target key start
LH: loop header
LB: loop body
LE: loop exit
PB: predicated region body
PF: predicated region fallthrough
CT: control target
= control target key end

     0   :  { %18 = vsyncpa [#allocation5], 0  ;;  %s7149_s25 = smov 0   ;;  %s7151_s26 = smov 0   ;;  %s11579_s0 = inlined_call_operand.vmem [shape: f32[2,256,3], index: 0, kind: input, shape index: {}]   ;;  %s11580_s1 = inlined_call_operand.vmem [shape: f32[3,64], index: 1, kind: input, shape index: {}]   ;;  %s11581_s2 = inlined_call_operand.vmem [shape: f32[1,64], index: 2, kind: input, shape index: {}]   ;;  %s11582_s3 = inlined_call_operand.vmem [shape: bf16[64,64], index: 3, kind: input, shape index: {}]   ;;  %s11583_s4 = inlined_call_operand.vmem [shape: f32[1,64], index: 4, kind: input, shape index: {}]   ;;  %s11584_s5 = inlined_call_operand.vmem [shape: bf16[64,128], index: 5, kind: input, shape index: {}]   ;;  %s11585_s6 = inlined_call_operand.vmem [shape: f32[1,128], index: 6, kind: input, shape index: {}]   ;;  %s11586_s7 = inlined_call_operand.vmem [shape: bf16[128,128], index: 7, kind: input, shape index: {}]   ;;  %s11587_s8 = inlined_call_operand.vmem [shape: f32[1,128], index: 8, kind: input, shape index: {}]   ;;  %s11588_s9 = inlined_call_operand.vmem [shape: bf16[128,256], index: 9, kind: input, shape index: {}]   ;;  %s11589_s10 = inlined_call_operand.vmem [shape: f32[1,256], index: 10, kind: input, shape index: {}]   ;;  %s11590_s11 = inlined_call_operand.vmem [shape: bf16[256,256], index: 11, kind: input, shape index: {}]   ;;  %s11591_s12 = inlined_call_operand.vmem [shape: f32[1,256], index: 12, kind: input, shape index: {}]   ;;  %s11592_s13 = inlined_call_operand.hbm [shape: f32[2,1,256], index: 13, kind: output, shape index: {}]  }
   0x1   :  { %s7153_s27 = smov 0   ;;  %s7155_s28 = smov 0  }
   0x2   :  { %s7157_s29 = smov 0  }
   0x3 LB: > { %s6249_s30 = sadd.s32 4294967295, %s7070_s29   ;;  %s33_s14 = sadd.s32 1, %s7066_s28  ;;  %s7070_s29 = sphi %s7157_s29, %s24_s29   ;;  %s7066_s28 = sphi %s7155_s28, %s11745_s28   ;;  %s7062_s27 = sphi %s7153_s27, %s11744_s27   ;;  %s7058_s26 = sphi %s7151_s26, %s11743_s26   ;;  %s7054_s25 = sphi %s7149_s25, %s11742_s25  }
   0x4   : > { %p34_p0 = scmp.ge.s32.totalorder %s33_s14, 4  ;;  %p52_p1 = scmp.ne.s32.totalorder %s7058_s26, %s7054_s25 }
   0x5   : > { %p53_p2 = scmp.eq.s32.totalorder %s7070_s29, 0  ;;  %s45_s16 = sadd.s32 1, %s7058_s26 }
   0x6   : > { %s11747_s14 = smov (%p34_p0, %s33_s14), 0  ;;  %p6251_p5 = scmp.ge.s32.totalorder %s7070_s29, 4 }
   0x7   : > { %p54_p3 = por %p53_p2, %p52_p1  ;;  %s41_s15 = ssub.s32 %s7066_s28, %s11747_s14 }
   0x8   : > { %p43_p4 = scmp.eq.s32.totalorder %s41_s15, 0  ;;  %392 = sbr.rel (%p6251_p5) target bundleno = 33 (0x21), region = 64 }
   0xa   : > { %s7185_s17 = scalar_select %p43_p4, %s7058_s26, %s45_s16  }
   0xd   : > { %395 = sbr.rel (!%p54_p3) target bundleno = 33 (0x21), region = 68  ;;  %s397_s18 = sand.u32 (%p54_p3), 1, %s7058_s26  }
   0xe   : > { %s6631_s19 = sshll.u32 (%p54_p3), %s7066_s28, 6  ;;  %s6252_s20 = sshll.u32 (%p54_p3), %s397_s18, 7 }
   0xf   : > { %s7193_s23 = scalar_lea.vmem (%p54_p3), %s11579_s0, %s6631_s19  ;;  %s399_s24 = scalar_lea.vmem (%p54_p3), [#allocation3], %s6252_s20 }
  0x10   : > { %v464_v0 = vld [vmem:[%s7193_s23] sm:$0xff] (%p54_p3)  ;;  %v466_v1 = vld [vmem:[%s7193_s23 + $0x8] sm:$0xff] (%p54_p3)  ;;  %v468_v2 = vld [vmem:[%s7193_s23 + $0x10] sm:$0xff] (%p54_p3) }
  0x11   : > { %465 = vst [vmem:[%s399_s24] sm:$0xff] (%p54_p3), %v464_v0  ;;  %v470_v3 = vld [vmem:[%s7193_s23 + $0x18] sm:$0xff] (%p54_p3)  ;;  %v472_v4 = vld [vmem:[%s7193_s23 + $0x20] sm:$0xff] (%p54_p3)  ;;  %v474_v5 = vld [vmem:[%s7193_s23 + $0x28] sm:$0xff] (%p54_p3) }
  0x12   : > { %467 = vst [vmem:[%s399_s24 + $0x8] sm:$0xff] %v466_v1  ;;  %v476_v6 = vld [vmem:[%s7193_s23 + $0x30] sm:$0xff]  ;;  %v478_v7 = vld [vmem:[%s7193_s23 + $0x38] sm:$0xff]  ;;  %v480_v8 = vld [vmem:[%s7193_s23 + $0x100] sm:$0xff] }
  0x13   : > { %469 = vst [vmem:[%s399_s24 + $0x10] sm:$0xff] %v468_v2  ;;  %v482_v9 = vld [vmem:[%s7193_s23 + $0x108] sm:$0xff]  ;;  %v484_v10 = vld [vmem:[%s7193_s23 + $0x110] sm:$0xff]  ;;  %v486_v11 = vld [vmem:[%s7193_s23 + $0x118] sm:$0xff] }
  0x14   : > { %471 = vst [vmem:[%s399_s24 + $0x18] sm:$0xff] %v470_v3  ;;  %v488_v12 = vld [vmem:[%s7193_s23 + $0x120] sm:$0xff]  ;;  %v490_v13 = vld [vmem:[%s7193_s23 + $0x128] sm:$0xff]  ;;  %v492_v14 = vld [vmem:[%s7193_s23 + $0x130] sm:$0xff] }
  0x15   : > { %473 = vst [vmem:[%s399_s24 + $0x20] sm:$0xff] %v472_v4  ;;  %v494_v15 = vld [vmem:[%s7193_s23 + $0x138] sm:$0xff] }
  0x16   : > { %475 = vst [vmem:[%s399_s24 + $0x28] sm:$0xff] %v474_v5 }
  0x17   : > { %477 = vst [vmem:[%s399_s24 + $0x30] sm:$0xff] %v476_v6 }
  0x18   : > { %479 = vst [vmem:[%s399_s24 + $0x38] sm:$0xff] %v478_v7 }
  0x19   : > { %481 = vst [vmem:[%s399_s24 + $0x40] sm:$0xff] %v480_v8 }
  0x1a   : > { %483 = vst [vmem:[%s399_s24 + $0x48] sm:$0xff] %v482_v9 }
  0x1b   : > { %485 = vst [vmem:[%s399_s24 + $0x50] sm:$0xff] %v484_v10 }
  0x1c   : > { %487 = vst [vmem:[%s399_s24 + $0x58] sm:$0xff] %v486_v11 }
  0x1d   : > { %489 = vst [vmem:[%s399_s24 + $0x60] sm:$0xff] %v488_v12 }
  0x1e   : > { %491 = vst [vmem:[%s399_s24 + $0x68] sm:$0xff] %v490_v13 }
  0x1f   : > { %493 = vst [vmem:[%s399_s24 + $0x70] sm:$0xff] %v492_v14 }
  0x20   : > { %495 = vst [vmem:[%s399_s24 + $0x78] sm:$0xff] %v494_v15 }
  0x21 PF: > { %p6255_p6 = scmp.ge.s32.totalorder %s7070_s29, 1  ;;  %p500_p7 = scmp.lt.s32.totalorder %s7070_s29, 5 }
  0x23   : > { %p501_p8 = pnand %p6255_p6, %p500_p7 }
  0x25   : > { %504 = sbr.rel (%p501_p8) target bundleno = 1536 (0x600), region = 106 }
  0x2a   : > { %s507_s15 = sand.u32 1, %s7054_s25   ;;  %p6257_p9 = scmp.ne.s32.totalorder %s7062_s27, 0 }
  0x2b   : > { %s6256_s16 = sshll.u32 %s507_s15, 7 }
  0x2c   : > { %s7214_s18 = scalar_lea.vmem [#allocation3], %s6256_s16  ;;  %552 = sbr.rel (%p6257_p9) target bundleno = 51 (0x33), region = 114 }
  0x31   : > { %v7072_v16 = vmov -inf  }
  0x32   : > { %553 = vst [vmem:[#allocation2] sm:$0xf] %v7072_v16 }
  0x33 PF: > { %v554_v17 = vld [vmem:[%s7214_s18] sm:$0xff]  ;;  %v7073_v18 = vmov 2   ;;  %v7074_v19 = vmov 1   ;;  %v7075_v20 = vmov 0   ;;  %v555_v21 = vld [vmem:[%s7214_s18 + $0x8] sm:$0xff]  ;;  %v556_v22 = vld [vmem:[%s7214_s18 + $0x10] sm:$0xff] }
  0x34   : > { %6763 = vset.pattern.permute.xlu2 %v7073_v18  ;;  %6762 = vset.pattern.permute.xlu1 %v7074_v19  ;;  %v557_v23 = vld [vmem:[%s7214_s18 + $0x18] sm:$0xff]  ;;  %v558_v24 = vld [vmem:[%s7214_s18 + $0x20] sm:$0xff]  ;;  %v559_v25 = vld [vmem:[%s7214_s18 + $0x28] sm:$0xff]  ;;  %vm1630_vm8 = vcmask 523264   ;;  %p6626_p10 = scmp.ne.s32.totalorder %s7062_s27, 3 }
  0x35   : > { %6761 = vset.pattern.permute.xlu0 %v7075_v20  ;;  %767 = vperm.xlu2 %6763, %v554_v17   ;;  %v560_v26 = vld [vmem:[%s7214_s18 + $0x30] sm:$0xff]  ;;  %v561_v27 = vld [vmem:[%s7214_s18 + $0x38] sm:$0xff]  ;;  %v563_v28 = vld [vmem:[%s7214_s18 + $0x48] sm:$0xff] }
  0x36   : > { %670 = vperm.xlu1 %6762, %v554_v17   ;;  %574 = vperm.xlu0 %6761, %v554_v17   ;;  %v564_v29 = vld [vmem:[%s7214_s18 + $0x50] sm:$0xff]  ;;  %v562_v30 = vld [vmem:[%s7214_s18 + $0x40] sm:$0xff]  ;;  %v565_v31 = vld [vmem:[%s7214_s18 + $0x58] sm:$0xff] }
  0x37   : > { %v566_v32 = vld [vmem:[%s7214_s18 + $0x60] sm:$0xff]  ;;  %v567_v34 = vld [vmem:[%s7214_s18 + $0x68] sm:$0xff]  ;;  %v7260_v36 = vld [vmem:[%s7214_s18 + $0x70] sm:$0xff] }
  0x38   : > { %v570_v38 = vld [vmem:[%s11580_s1] sm:$0x7]  ;;  %v6635_v14 = vld [vmem:[%s11582_s3 + $0x18] sm:$0xff] }
  0x39   : > { %v7268_v39 = vperm.slane %v570_v38, 2  ;;  %v7270_v40 = vperm.slane %v570_v38, 1  ;;  %v7272_v41 = vperm.slane %v570_v38, 0  ;;  %v7282_v48 = vld [vmem:[%s11581_s2] ss:$0 sm:$0xff]  ;;  %1659 = vmatpush.bf16.msra.mxu0 %v6635_v14  ;;  %6696 = vmatpush.bf16.msra.mxu1 %v6635_v14 }
  0x3a   : > { %v7312_v8 = vld [vmem:[%s7214_s18 + $0x78] sm:$0xff]  ;;  %6697 = vmatpush.bf16.msra.mxu2 %v6635_v14  ;;  %6698 = vmatpush.bf16.msra.mxu3 %v6635_v14 }
  0x3d   : > { %771 = vperm.xlu2 %6763, %v555_v21  }
  0x3e   : > { %674 = vperm.xlu1 %6762, %v555_v21   ;;  %579 = vperm.xlu0 %6761, %v555_v21  }
  0x45   : > { %6765 = vset.pattern.permute.xlu2 %v7074_v19 }
  0x46   : > { %6764 = vset.pattern.permute.xlu1 %v7075_v20  ;;  %584 = vperm.xlu0 %6761, %v556_v22  }
  0x47   : > { %678 = vperm.xlu2 %6765, %v556_v22   ;;  %589 = vperm.xlu1 %6764, %v557_v23  }
  0x4e   : > { %6766 = vset.pattern.permute.xlu0 %v7074_v19 }
  0x4f   : > { %6768 = vset.pattern.permute.xlu2 %v7073_v18  ;;  %6767 = vset.pattern.permute.xlu1 %v7073_v18 }
  0x50   : > { %682 = vperm.xlu0 %6766, %v557_v23   ;;  %779 = vperm.xlu2 %6768, %v557_v23  }
  0x51   : > { %775 = vperm.xlu1 %6767, %v556_v22  }
  0x58   : > { %6770 = vset.pattern.permute.xlu2 %v7075_v20  ;;  %686 = vperm.xlu0 %6766, %v558_v24  }
  0x59   : > { %6769 = vset.pattern.permute.xlu1 %v7075_v20  ;;  %599 = vperm.xlu2 %6770, %v559_v25  }
  0x5a   : > { %594 = vperm.xlu1 %6769, %v558_v24  }
  0x60   : > { %6773 = vset.pattern.permute.xlu0 %v7073_v18 }
  0x61   : > { %6772 = vset.pattern.permute.xlu2 %v7073_v18  ;;  %787 = vperm.xlu0 %6773, %v559_v25  }
  0x62   : > { %6771 = vset.pattern.permute.xlu1 %v7074_v19  ;;  %783 = vperm.xlu2 %6772, %v558_v24  }
  0x63   : > { %690 = vperm.xlu1 %6771, %v559_v25  }
  0x69   : > { %791 = vperm.xlu0 %6773, %v560_v26  }
  0x6a   : > { %6775 = vset.pattern.permute.xlu2 %v7075_v20 }
  0x6b   : > { %6774 = vset.pattern.permute.xlu1 %v7075_v20  ;;  %609 = vperm.xlu2 %6775, %v561_v27  }
  0x6c   : > { %604 = vperm.xlu1 %6774, %v560_v26  }
  0x71   : > { %6780 = vset.pattern.permute.xlu0 %v7075_v20 }
  0x72   : > { %619 = vperm.xlu0 %6780, %v563_v28  }
  0x73   : > { %6777 = vset.pattern.permute.xlu2 %v7074_v19 }
  0x74   : > { %6776 = vset.pattern.permute.xlu1 %v7074_v19  ;;  %698 = vperm.xlu2 %6777, %v561_v27  }
  0x75   : > { %694 = vperm.xlu1 %6776, %v560_v26  }
  0x7a   : > { %624 = vperm.xlu0 %6780, %v564_v29  }
  0x7c   : > { %6779 = vset.pattern.permute.xlu2 %v7075_v20 }
  0x7d   : > { %6778 = vset.pattern.permute.xlu1 %v7073_v18  ;;  %614 = vperm.xlu2 %6779, %v562_v30  }
  0x7e   : > { %795 = vperm.xlu1 %6778, %v561_v27  }
  0x82   : > { %6787 = vset.pattern.permute.xlu0 %v7074_v19 }
  0x83   : > { %714 = vperm.xlu0 %6787, %v565_v31  }
  0x85   : > { %6782 = vset.pattern.permute.xlu2 %v7074_v19 }
  0x86   : > { %6781 = vset.pattern.permute.xlu1 %v7074_v19  ;;  %706 = vperm.xlu2 %6782, %v563_v28  }
  0x87   : > { %702 = vperm.xlu1 %6781, %v562_v30  }
  0x8b   : > { %718 = vperm.xlu0 %6787, %v566_v32  }
  0x8e   : > { %6784 = vset.pattern.permute.xlu2 %v7073_v18 }
  0x8f   : > { %6783 = vset.pattern.permute.xlu1 %v7073_v18  ;;  %803 = vperm.xlu2 %6784, %v563_v28   ;;  %v768_v33 = vpop.permute.xlu2 %767  ;;  %v6634_v28 = vld [vmem:[%s11582_s3 + $0x10] sm:$0xff] }
  0x90   : > { %799 = vperm.xlu1 %6783, %v562_v30   ;;  %v831_v44 = vmul.f32 %v7268_v39, %v768_v33  ;;  %1660 = vmatpush.bf16.msra.mxu0 %v6634_v28 }
  0x91   : > { %6699 = vmatpush.bf16.msra.mxu1 %v6634_v28  ;;  %6700 = vmatpush.bf16.msra.mxu2 %v6634_v28 }
  0x92   : > { %6701 = vmatpush.bf16.msra.mxu3 %v6634_v28 }
  0x93   : > { %6794 = vset.pattern.permute.xlu0 %v7073_v18 }
  0x94   : > { %819 = vperm.xlu0 %6794, %v567_v34  }
  0x97   : > { %v772_v35 = vpop.permute.xlu2 %771  ;;  %6786 = vset.pattern.permute.xlu2 %v7074_v19 }
  0x98   : > { %6785 = vset.pattern.permute.xlu1 %v7075_v20  ;;  %710 = vperm.xlu2 %6786, %v564_v29   ;;  %v832_v57 = vmul.f32 %v7268_v39, %v772_v35 }
  0x99   : > { %629 = vperm.xlu1 %6785, %v565_v31  }
  0x9c   : > { %823 = vperm.xlu0 %6794, %v7260_v36  }
  0xa0   : > { %6789 = vset.pattern.permute.xlu2 %v7073_v18 }
  0xa1   : > { %6788 = vset.pattern.permute.xlu1 %v7073_v18  ;;  %v679_v37 = vpop.permute.xlu2 %678  ;;  %811 = vperm.xlu2 %6789, %v565_v31  }
  0xa2   : > { %807 = vperm.xlu1 %6788, %v564_v29   ;;  %v736_v12 = vmul.f32 %v7270_v40, %v679_v37 }
  0xa8   : > { %v671_v42 = vpop.permute.xlu1 %670  ;;  %v575_v43 = vpop.permute.xlu0 %574 }
  0xa9   : > { %v734_v45 = vmul.f32 %v7270_v40, %v671_v42  ;;  %v653_v46 = vmul.f32 %v7272_v41, %v575_v43  ;;  %6791 = vset.pattern.permute.xlu2 %v7075_v20 }
  0xaa   : > { %6790 = vset.pattern.permute.xlu1 %v7075_v20  ;;  %v780_v47 = vpop.permute.xlu2 %779  ;;  %639 = vperm.xlu2 %6791, %v567_v34  }
  0xab   : > { %v750_v49 = vadd.f32 %v734_v45, %v653_v46  ;;  %634 = vperm.xlu1 %6790, %v566_v32   ;;  %v834_v24 = vmul.f32 %v7268_v39, %v780_v47  ;;  %v6633_v45 = vld [vmem:[%s11582_s3 + $0x8] sm:$0xff] }
  0xac   : > { %1661 = vmatpush.bf16.msra.mxu0 %v6633_v45  ;;  %6702 = vmatpush.bf16.msra.mxu1 %v6633_v45 }
  0xad   : > { %v847_v50 = vadd.f32 %v831_v44, %v750_v49  ;;  %6703 = vmatpush.bf16.msra.mxu2 %v6633_v45  ;;  %6704 = vmatpush.bf16.msra.mxu3 %v6633_v45 }
  0xaf   : > { %v7285_v51 = vadd.f32 %v7282_v48, %v847_v50 }
  0xb0   : > { %v675_v52 = vpop.permute.xlu1 %674  ;;  %v580_v53 = vpop.permute.xlu0 %579 }
  0xb1   : > { %v7288_v54 = vmul.f32 0.70710677, %v7285_v51  ;;  %v735_v55 = vmul.f32 %v7270_v40, %v675_v52  ;;  %v654_v56 = vmul.f32 %v7272_v41, %v580_v53 }
  0xb2   : > { %6793 = vset.pattern.permute.xlu2 %v7073_v18 }
  0xb3   : > { %v914_v58 = vmul.f32 %v7288_v54, %v7288_v54  ;;  %v751_v59 = vadd.f32 %v735_v55, %v654_v56  ;;  %6792 = vset.pattern.permute.xlu1 %v7074_v19  ;;  %v7297_v60 = vpop.permute.xlu2 %599  ;;  %815 = vperm.xlu2 %6793, %v566_v32  }
  0xb4   : > { %722 = vperm.xlu1 %6792, %v567_v34   ;;  %v658_v28 = vmul.f32 %v7272_v41, %v7297_v60 }
  0xb5   : > { %v7299_v61 = vmin.f32 %v914_v58, 16.0  ;;  %v848_v62 = vadd.f32 %v832_v57, %v751_v59  ;;  %v6632_v57 = vld [vmem:[%s11582_s3] sm:$0xff] }
  0xb6   : > { %1662 = vmatpush.bf16.msra.mxu0 %v6632_v57  ;;  %6705 = vmatpush.bf16.msra.mxu1 %v6632_v57 }
  0xb7   : > { %v916_v63 = vmul.f32 2.1237322e-06, %v7299_v61  ;;  %v7303_v0 = vadd.f32 %v7282_v48, %v848_v62  ;;  %v927_v1 = vmul.f32 3.8918573e-05, %v7299_v61  ;;  %6706 = vmatpush.bf16.msra.mxu2 %v6632_v57  ;;  %6707 = vmatpush.bf16.msra.mxu3 %v6632_v57 }
  0xb8   : > { %v585_v2 = vpop.permute.xlu0 %584 }
  0xb9   : > { %v7307_v3 = vmul.f32 0.70710677, %v7303_v0  ;;  %v590_v4 = vpop.permute.xlu1 %589  ;;  %v928_v5 = vadd.f32 0.001143296, %v927_v1  ;;  %v917_v6 = vadd.f32 0.00028619796, %v916_v63  ;;  %v655_v13 = vmul.f32 %v7272_v41, %v585_v2 }
  0xba   : > { %v656_v25 = vmul.f32 %v7272_v41, %v590_v4 }
  0xbb   : > { %v954_v7 = vmul.f32 %v7307_v3, %v7307_v3  ;;  %6796 = vset.pattern.permute.xlu2 %v7075_v20  ;;  %v929_v10 = vmul.f32 %v928_v5, %v7299_v61  ;;  %v918_v16 = vmul.f32 %v917_v6, %v7299_v61  ;;  %v752_v26 = vadd.f32 %v736_v12, %v655_v13 }
  0xbc   : > { %6795 = vset.pattern.permute.xlu1 %v7075_v20  ;;  %v7316_v9 = vpop.permute.xlu2 %783  ;;  %649 = vperm.xlu2 %6796, %v7312_v8  }
  0xbd   : > { %v7320_v11 = vmin.f32 %v954_v7, 16.0  ;;  %644 = vperm.xlu1 %6795, %v7260_v36   ;;  %v930_v15 = vadd.f32 0.014752088, %v929_v10  ;;  %v919_v30 = vadd.f32 0.0036580483, %v918_v16  ;;  %v835_v5 = vmul.f32 %v7268_v39, %v7316_v9 }
  0xbf   : > { %v956_v17 = vmul.f32 2.1237322e-06, %v7320_v11  ;;  %v967_v20 = vmul.f32 3.8918573e-05, %v7320_v11  ;;  %v931_v21 = vmul.f32 %v930_v15, %v7299_v61  ;;  %v920_v47 = vmul.f32 %v919_v30, %v7299_v61 }
  0xc1   : > { %v957_v22 = vadd.f32 0.00028619796, %v956_v17  ;;  %v968_v23 = vadd.f32 0.001143296, %v967_v20  ;;  %v932_v29 = vadd.f32 0.112945676, %v931_v21 }
  0xc2   : > { %v683_v27 = vpop.permute.xlu0 %682  ;;  %v921_v62 = vadd.f32 0.05243302, %v920_v47 }
  0xc3   : > { %v958_v31 = vmul.f32 %v957_v22, %v7320_v11  ;;  %v737_v32 = vmul.f32 %v7270_v40, %v683_v27  ;;  %v776_v33 = vpop.permute.xlu1 %775  ;;  %v969_v34 = vmul.f32 %v968_v23, %v7320_v11  ;;  %v933_v37 = vmul.f32 %v932_v29, %v7299_v61 }
  0xc4   : > { %v833_v35 = vmul.f32 %v7268_v39, %v776_v33  ;;  %6798 = vset.pattern.permute.xlu2 %v7074_v19  ;;  %v922_v12 = vmul.f32 %v921_v62, %v7299_v61 }
  0xc5   : > { %v753_v38 = vadd.f32 %v737_v32, %v656_v25  ;;  %6797 = vset.pattern.permute.xlu1 %v7074_v19  ;;  %v7344_v42 = vpop.permute.xlu2 %609  ;;  %730 = vperm.xlu2 %6798, %v7312_v8   ;;  %v970_v43 = vadd.f32 0.014752088, %v969_v34  ;;  %v934_v46 = vadd.f32 0.4994258, %v933_v37  ;;  %v959_v49 = vadd.f32 0.0036580483, %v958_v31 }
  0xc6   : > { %v849_v44 = vadd.f32 %v833_v35, %v752_v26  ;;  %726 = vperm.xlu1 %6797, %v7260_v36   ;;  %v923_v22 = vadd.f32 0.18741608, %v922_v12 }
  0xc7   : > { %v850_v50 = vadd.f32 %v834_v24, %v753_v38  ;;  %v971_v19 = vmul.f32 %v970_v43, %v7320_v11  ;;  %v935_v53 = vmul.f32 %v934_v46, %v7299_v61  ;;  %v960_v63 = vmul.f32 %v959_v49, %v7320_v11 }
  0xc8   : > { %v7354_v52 = vadd.f32 %v7282_v48, %v849_v44  ;;  %v924_v37 = vmul.f32 %v923_v22, %v7299_v61 }
  0xc9   : > { %v7358_v36 = vadd.f32 %v7282_v48, %v850_v50  ;;  %v7366_v58 = vadd.f32 1.0, %v935_v53  ;;  %v972_v59 = vadd.f32 0.112945676, %v971_v19  ;;  %v961_v13 = vadd.f32 0.05243302, %v960_v63 }
  0xca   : > { %v7361_v55 = vmul.f32 0.70710677, %v7354_v52  ;;  %v687_v56 = vpop.permute.xlu0 %686 }
  0xcb   : > { %v738_v1 = vmul.f32 %v7270_v40, %v687_v56  ;;  %6804 = vrcp.f32 %v7366_v58  ;;  %v7376_v6 = vmul.f32 0.70710677, %v7358_v36  ;;  %v973_v10 = vmul.f32 %v972_v59, %v7320_v11 }
  0xcc   : > { %v994_v2 = vmul.f32 %v7361_v55, %v7361_v55  ;;  %v595_v4 = vpop.permute.xlu1 %594  ;;  %v962_v23 = vmul.f32 %v961_v13, %v7320_v11  ;;  %v948_v53 = vand.u32 2147483648, %v7366_v58  ;;  %v925_v56 = vadd.f32 1.1283791, %v924_v37 }
  0xcd   : > { %v657_v7 = vmul.f32 %v7272_v41, %v595_v4  ;;  %v974_v16 = vadd.f32 0.4994258, %v973_v10  ;;  %v1034_v17 = vmul.f32 %v7376_v6, %v7376_v6  ;;  %vm942_vm1 = vweird.f32 %v7366_v58 }
  0xce   : > { %6799 = vset.pattern.permute.xlu1 %v7073_v18  ;;  %v7383_v15 = vpop.permute.xlu2 %698  ;;  %v7385_v9 = vmin.f32 %v994_v2, 16.0  ;;  %v963_v38 = vadd.f32 0.18741608, %v962_v23  ;;  %v946_v57 = vand.u32 2147483647, %v7366_v58  ;;  %v949_v12 = vor.u32 1.1754944e-38, %v948_v53 }
  0xcf   : > { %v754_v14 = vadd.f32 %v738_v1, %v657_v7  ;;  %827 = vperm.xlu1 %6799, %v7312_v8   ;;  %v975_v21 = vmul.f32 %v974_v16, %v7320_v11  ;;  %v7400_v29 = vmin.f32 %v1034_v17, 16.0  ;;  %v926_v13 = vmul.f32 %v925_v56, %v7288_v54 }
  0xd0   : > { %v1007_v27 = vmul.f32 3.8918573e-05, %v7385_v9  ;;  %v996_v30 = vmul.f32 2.1237322e-06, %v7385_v9  ;;  %v964_v61 = vmul.f32 %v963_v38, %v7320_v11  ;;  %vm947_vm3 = vcmp.eq.f32.partialorder %v946_v57, 8.507059e+37 }
  0xd1   : > { %v851_v18 = vadd.f32 %v835_v5, %v754_v14  ;;  %v6805_v20 = vpop.eup %6804  ;;  %v7395_v26 = vadd.f32 1.0, %v975_v21  ;;  %v1036_v45 = vmul.f32 2.1237322e-06, %v7400_v29  ;;  %v1047_v17 = vmul.f32 3.8918573e-05, %v7400_v29 }
  0xd2   : > { %v938_v25 = vmul.f32 %v6805_v20, %v7366_v58  ;;  %v1008_v44 = vadd.f32 0.001143296, %v1007_v27  ;;  %v997_v46 = vadd.f32 0.00028619796, %v996_v30  ;;  %vm943_vm0 = vweird.f32 %v6805_v20 }
  0xd3   : > { %v7392_v24 = vadd.f32 %v7282_v48, %v851_v18  ;;  %v788_v8 = vpop.permute.xlu0 %787  ;;  %6806 = vrcp.f32 %v7395_v26  ;;  %vm7422_vm2 = vmor %vm942_vm1, %vm943_vm0  ;;  %v1037_v2 = vadd.f32 0.00028619796, %v1036_v45  ;;  %v965_v14 = vadd.f32 1.1283791, %v964_v61 }
  0xd4   : > { %v939_v32 = vsub.f32 1.0, %v938_v25  ;;  %v836_v35 = vmul.f32 %v7268_v39, %v788_v8  ;;  %v1009_v1 = vmul.f32 %v1008_v44, %v7385_v9  ;;  %v998_v4 = vmul.f32 %v997_v46, %v7385_v9 }
  0xd5   : > { %v691_v31 = vpop.permute.xlu1 %690  ;;  %v7404_v33 = vmul.f32 0.70710677, %v7392_v24  ;;  %v1038_v23 = vmul.f32 %v1037_v2, %v7400_v29  ;;  %v986_v25 = vand.u32 2147483647, %v7395_v26  ;;  %v988_v27 = vand.u32 2147483648, %v7395_v26 }
  0xd6   : > { %v739_v34 = vmul.f32 %v7270_v40, %v691_v31  ;;  %v940_v43 = vmul.f32 %v6805_v20, %v939_v32  ;;  %v1010_v22 = vadd.f32 0.014752088, %v1009_v1  ;;  %v999_v8 = vadd.f32 0.0036580483, %v998_v4 }
  0xd7   : > { %v7411_v47 = vpop.permute.xlu2 %614  ;;  %v1074_v50 = vmul.f32 %v7404_v33, %v7404_v33  ;;  %v966_v31 = vmul.f32 %v965_v14, %v7307_v3  ;;  %vm982_vm5 = vweird.f32 %v7395_v26  ;;  %v989_v45 = vor.u32 1.1754944e-38, %v988_v27 }
  0xd8   : > { %v755_v60 = vadd.f32 %v739_v34, %v658_v28  ;;  %v941_v49 = vadd.f32 %v6805_v20, %v940_v43  ;;  %v1011_v30 = vmul.f32 %v1010_v22, %v7385_v9  ;;  %v1000_v44 = vmul.f32 %v999_v8, %v7385_v9 }
  0xd9   : > { %v6807_v59 = vpop.eup %6806  ;;  %v7431_v7 = vmin.f32 %v1074_v50, 16.0  ;;  %vm987_vm7 = vcmp.eq.f32.partialorder %v986_v25, 8.507059e+37 }
  0xda   : > { %v852_v19 = vadd.f32 %v836_v35, %v755_v60  ;;  %v945_v11 = vsel %vm7422_vm2, %v6805_v20, %v941_v49  ;;  %v978_v5 = vmul.f32 %v6807_v59, %v7395_v26  ;;  %vm983_vm4 = vweird.f32 %v6807_v59 }
  0xdb   : > { %v792_v16 = vpop.permute.xlu0 %791  ;;  %v950_v20 = vsel %vm947_vm3, %v949_v12, %v945_v11  ;;  %v1076_v54 = vmul.f32 2.1237322e-06, %v7431_v7  ;;  %v1048_v35 = vadd.f32 0.001143296, %v1047_v17  ;;  %v1012_v43 = vadd.f32 0.112945676, %v1011_v30  ;;  %vm984_vm6 = vmor %vm982_vm5, %vm983_vm4 }
  0xdc   : > { %v7420_v62 = vadd.f32 %v7282_v48, %v852_v19  ;;  %v979_v21 = vsub.f32 1.0, %v978_v5  ;;  %v951_v34 = vmul.f32 %v950_v20, %v926_v13  ;;  %v1039_v60 = vadd.f32 0.0036580483, %v1038_v23 }
  0xdd   : > { %v1049_v46 = vmul.f32 %v1048_v35, %v7400_v29  ;;  %v1077_v49 = vadd.f32 0.00028619796, %v1076_v54  ;;  %v1013_v3 = vmul.f32 %v1012_v43, %v7385_v9  ;;  %v883_v26 = vmul.f32 0.5, %v7303_v0 }
  0xde   : > { %v7434_v58 = vmul.f32 0.70710677, %v7420_v62  ;;  %v605_v10 = vpop.permute.xlu1 %604  ;;  %v980_v28 = vmul.f32 %v6807_v59, %v979_v21  ;;  %v6258_v53 = vclamps-f32 %v951_v34, 1.0  ;;  %v1040_v2 = vmul.f32 %v1039_v60, %v7400_v29 }
  0xdf   : > { %v1050_v61 = vadd.f32 0.014752088, %v1049_v46  ;;  %v1014_v1 = vadd.f32 0.4994258, %v1013_v3  ;;  %v1001_v4 = vadd.f32 0.05243302, %v1000_v44  ;;  %v1078_v12 = vmul.f32 %v1077_v49, %v7431_v7 }
  0xe0   : > { %v1114_v18 = vmul.f32 %v7434_v58, %v7434_v58  ;;  %v707_v32 = vpop.permute.xlu2 %706  ;;  %v981_v38 = vadd.f32 %v6807_v59, %v980_v28  ;;  %v659_v13 = vmul.f32 %v7272_v41, %v605_v10  ;;  %v1041_v27 = vadd.f32 0.05243302, %v1040_v2 }
  0xe1   : > { %v1051_v5 = vmul.f32 %v1050_v61, %v7400_v29  ;;  %v1015_v0 = vmul.f32 %v1014_v1, %v7385_v9  ;;  %v743_v23 = vmul.f32 %v7270_v40, %v707_v32  ;;  %v882_v28 = vmul.f32 0.5, %v7285_v51 }
  0xe2   : > { %v7446_v37 = vmin.f32 %v1114_v18, 16.0  ;;  %v985_v50 = vsel %vm984_vm6, %v6807_v59, %v981_v38  ;;  %v1087_v59 = vmul.f32 3.8918573e-05, %v7431_v7  ;;  %v1554_v18 = vadd.f32 1.0, %v6258_v53 }
  0xe3   : > { %v990_v56 = vsel %vm987_vm7, %v989_v45, %v985_v50  ;;  %v1052_v20 = vadd.f32 0.112945676, %v1051_v5  ;;  %v7464_v10 = vadd.f32 1.0, %v1015_v0  ;;  %v837_v30 = vmul.f32 %v7268_v39, %v792_v16 }
  0xe4   : > { %v1116_v57 = vmul.f32 2.1237322e-06, %v7446_v37  ;;  %v991_v63 = vmul.f32 %v990_v56, %v966_v31  ;;  %v620_v11 = vpop.permute.xlu0 %619  ;;  %v1088_v21 = vadd.f32 0.001143296, %v1087_v59  ;;  %v1002_v38 = vmul.f32 %v1001_v4, %v7385_v9 }
  0xe5   : > { %v662_v8 = vmul.f32 %v7272_v41, %v620_v11  ;;  %v1053_v35 = vmul.f32 %v1052_v20, %v7400_v29  ;;  %v1570_v43 = vmul.f32 %v1554_v18, %v882_v28  ;;  %6808 = vrcp.f32 %v7464_v10 }
  0xe6   : > { %v6259_v17 = vclamps-f32 %v991_v63, 1.0  ;;  %v1117_v22 = vadd.f32 0.00028619796, %v1116_v57  ;;  %v1089_v32 = vmul.f32 %v1088_v21, %v7431_v7  ;;  %v1079_v60 = vadd.f32 0.0036580483, %v1078_v12 }
  0xe7   : > { %v695_v19 = vpop.permute.xlu1 %694  ;;  %v759_v51 = vadd.f32 %v743_v23, %v662_v8  ;;  %v1127_v16 = vmul.f32 3.8918573e-05, %v7446_v37  ;;  %v660_v50 = vmul.f32 %v7272_v41, %v7344_v42  ;;  %v741_v3 = vmul.f32 %v7270_v40, %v7383_v15 }
  0xe8   : > { %v740_v14 = vmul.f32 %v7270_v40, %v695_v19  ;;  %v1555_v25 = vadd.f32 1.0, %v6259_v17  ;;  %v1118_v44 = vmul.f32 %v1117_v22, %v7446_v37  ;;  %v1054_v53 = vadd.f32 0.4994258, %v1053_v35 }
  0xe9   : > { %v804_v54 = vpop.permute.xlu2 %803  ;;  %v1042_v56 = vmul.f32 %v1041_v27, %v7400_v29  ;;  %v1003_v61 = vadd.f32 0.18741608, %v1002_v38  ;;  %v1090_v57 = vadd.f32 0.014752088, %v1089_v32  ;;  %v1128_v11 = vadd.f32 0.001143296, %v1127_v16 }
  0xea   : > { %v756_v31 = vadd.f32 %v740_v14, %v659_v13  ;;  %v1571_v34 = vmul.f32 %v1555_v25, %v883_v26  ;;  %v840_v45 = vmul.f32 %v7268_v39, %v804_v54  ;;  %v1080_v26 = vmul.f32 %v1079_v60, %v7431_v7 }
  0xeb   : > { %v1119_v63 = vadd.f32 0.0036580483, %v1118_v44  ;;  %v1055_v2 = vmul.f32 %v1054_v53, %v7400_v29  ;;  %v6809_v4 = vpop.eup %6808  ;;  %v757_v42 = vadd.f32 %v741_v3, %v660_v50  ;;  %v1043_v12 = vadd.f32 0.18741608, %v1042_v56 }
  0xec   : > { %v1586_v49 = vpack.c.bf16 %v1571_v34, %v1570_v43  ;;  %v853_v19 = vadd.f32 %v837_v30, %v756_v31  ;;  %v856_v1 = vadd.f32 %v840_v45, %v759_v51  ;;  %v1018_v59 = vmul.f32 %v6809_v4, %v7464_v10  ;;  %v7508_v60 = vpop.permute.xlu0 %624 }
  0xed   : > { %v1004_v13 = vmul.f32 %v1003_v61, %v7385_v9  ;;  %v7488_v14 = vadd.f32 1.0, %v1055_v2  ;;  %v1091_v17 = vmul.f32 %v1090_v57, %v7431_v7  ;;  %v1081_v18 = vadd.f32 0.05243302, %v1080_v26 }
  0xee   : > { %6290 = vmatmul.msk.bf16.vlgmr.msra.gmra.mxu0 %vm1630_vm8, %v1586_v49  ;;  %v7483_v5 = vadd.f32 %v7282_v48, %v853_v19  ;;  %v1120_v0 = vmul.f32 %v1119_v63, %v7446_v37  ;;  %v7493_v20 = vadd.f32 %v7282_v48, %v856_v1  ;;  %v1019_v21 = vsub.f32 1.0, %v1018_v59 }
  0xef   : > { %v1026_v23 = vand.u32 2147483647, %v7464_v10  ;;  %v1028_v8 = vand.u32 2147483648, %v7464_v10  ;;  %6810 = vrcp.f32 %v7488_v14  ;;  %v1129_v9 = vmul.f32 %v1128_v11, %v7446_v37 }
  0xf0   : > { %v796_v46 = vpop.permute.xlu1 %795  ;;  %v7500_v25 = vmul.f32 0.70710677, %v7483_v5  ;;  %v1020_v54 = vmul.f32 %v6809_v4, %v1019_v21  ;;  %vm1023_vm9 = vweird.f32 %v6809_v4  ;;  %v1044_v28 = vmul.f32 %v1043_v12, %v7400_v29 }
  0xf1   : > { %v838_v15 = vmul.f32 %v7268_v39, %v796_v46  ;;  %v1005_v30 = vadd.f32 1.1283791, %v1004_v13  ;;  %v1092_v31 = vadd.f32 0.112945676, %v1091_v17  ;;  %v1082_v34 = vmul.f32 %v1081_v18, %v7431_v7 }
  0xf2   : > { %v1121_v35 = vadd.f32 0.05243302, %v1120_v0  ;;  %v1021_v38 = vadd.f32 %v6809_v4, %v1020_v54  ;;  %vm1022_vm10 = vweird.f32 %v7464_v10  ;;  %v7506_v43 = vmul.f32 0.70710677, %v7493_v20  ;;  %v7518_v3 = vpop.permute.xlu2 %710 }
  0xf3   : > { %v854_v27 = vadd.f32 %v838_v15, %v757_v42  ;;  %vm1024_vm11 = vmor %vm1022_vm10, %vm1023_vm9  ;;  %v1029_v32 = vor.u32 1.1754944e-38, %v1028_v8  ;;  %v1093_v44 = vmul.f32 %v1092_v31, %v7431_v7  ;;  %v1130_v51 = vadd.f32 0.014752088, %v1129_v9 }
  0xf4   : > { %v1154_v29 = vmul.f32 %v7500_v25, %v7500_v25  ;;  %v1025_v46 = vsel %vm1024_vm11, %v6809_v4, %v1021_v38  ;;  %vm1027_vm12 = vcmp.eq.f32.partialorder %v1026_v23, 8.507059e+37  ;;  %v1006_v10 = vmul.f32 %v1005_v30, %v7361_v55 }
  0xf5   : > { %v7514_v45 = vadd.f32 %v7282_v48, %v854_v27  ;;  %v6811_v49 = vpop.eup %6810  ;;  %v1030_v50 = vsel %vm1027_vm12, %v1029_v32, %v1025_v46  ;;  %v1094_v19 = vadd.f32 0.4994258, %v1093_v44  ;;  %v884_v53 = vmul.f32 0.5, %v7354_v52  ;;  %v715_v31 = vpop.permute.xlu0 %714 }
  0xf6   : > { %v661_v56 = vmul.f32 %v7272_v41, %v7411_v47  ;;  %v1058_v61 = vmul.f32 %v6811_v49, %v7488_v14  ;;  %v1131_v57 = vmul.f32 %v1130_v51, %v7446_v37  ;;  %v1045_v26 = vadd.f32 1.1283791, %v1044_v28 }
  0xf7   : > { %v1083_v63 = vadd.f32 0.18741608, %v1082_v34  ;;  %v1274_v55 = vmul.f32 %v7506_v43, %v7506_v43  ;;  %v1031_v1 = vmul.f32 %v1030_v50, %v1006_v10  ;;  %v1122_v2 = vmul.f32 %v1121_v35, %v7446_v37 }
  0xf8   : > { %v7528_v4 = vmin.f32 %v1154_v29, 16.0  ;;  %v7531_v11 = vmul.f32 0.70710677, %v7514_v45  ;;  %v1059_v52 = vsub.f32 1.0, %v1058_v61  ;;  %v1068_v15 = vand.u32 2147483648, %v7488_v14 }
  0xf9   : > { %v703_v22 = vpop.permute.xlu1 %702  ;;  %v1095_v12 = vmul.f32 %v1094_v19, %v7431_v7  ;;  %vm1063_vm13 = vweird.f32 %v6811_v49  ;;  %v1066_v17 = vand.u32 2147483647, %v7488_v14  ;;  %v1132_v18 = vadd.f32 0.112945676, %v1131_v57 }
  0xfa   : > { %v742_v16 = vmul.f32 %v7270_v40, %v703_v22  ;;  %v1060_v13 = vmul.f32 %v6811_v49, %v1059_v52  ;;  %v1046_v0 = vmul.f32 %v1045_v26, %v7376_v6  ;;  %v7538_v21 = vmin.f32 %v1274_v55, 16.0 }
  0xfb   : > { %v6260_v22 = vclamps-f32 %v1031_v1, 1.0  ;;  %v1123_v8 = vadd.f32 0.18741608, %v1122_v2  ;;  %v1156_v9 = vmul.f32 2.1237322e-06, %v7528_v4  ;;  %vm1062_vm14 = vweird.f32 %v7488_v14  ;;  %v812_v51 = vpop.permute.xlu2 %811 }
  0xfc   : > { %v758_v47 = vadd.f32 %v742_v16, %v661_v56  ;;  %v1061_v27 = vadd.f32 %v6811_v49, %v1060_v13  ;;  %v1194_v54 = vmul.f32 %v7531_v11, %v7531_v11  ;;  %vm1064_vm15 = vmor %vm1062_vm14, %vm1063_vm13  ;;  %v1069_v28 = vor.u32 1.1754944e-38, %v1068_v15 }
  0xfd   : > { %v7547_v6 = vadd.f32 1.0, %v1095_v12  ;;  %v1084_v34 = vmul.f32 %v1083_v63, %v7431_v7  ;;  %vm1067_vm0 = vcmp.eq.f32.partialorder %v1066_v17, 8.507059e+37  ;;  %v1133_v38 = vmul.f32 %v1132_v18, %v7446_v37 }
  0xfe   : > { %v1065_v35 = vsel %vm1064_vm15, %v6811_v49, %v1061_v27  ;;  %v1276_v32 = vmul.f32 2.1237322e-06, %v7538_v21  ;;  %v1556_v44 = vadd.f32 1.0, %v6260_v22  ;;  %v1167_v29 = vmul.f32 3.8918573e-05, %v7528_v4 }
  0xff   : > { %v1070_v14 = vsel %vm1067_vm0, %v1069_v28, %v1065_v35  ;;  %v745_v16 = vmul.f32 %v7270_v40, %v715_v31  ;;  %6812 = vrcp.f32 %v7547_v6  ;;  %v1124_v7 = vmul.f32 %v1123_v8, %v7446_v37 }
 0x100   : > { %v1071_v46 = vmul.f32 %v1070_v14, %v1046_v0  ;;  %v1157_v49 = vadd.f32 0.00028619796, %v1156_v9  ;;  %v7559_v50 = vmin.f32 %v1194_v54, 16.0  ;;  %v885_v19 = vmul.f32 0.5, %v7358_v36 }
 0x101   : > { %v842_v26 = vmul.f32 %v7268_v39, %v812_v51  ;;  %v1134_v63 = vadd.f32 0.4994258, %v1133_v38  ;;  %v1085_v55 = vadd.f32 1.1283791, %v1084_v34  ;;  %v1277_v1 = vadd.f32 0.00028619796, %v1276_v32 }
 0x102   : > { %v800_v42 = vpop.permute.xlu1 %799  ;;  %v6261_v61 = vclamps-f32 %v1071_v46, 1.0  ;;  %v1572_v2 = vmul.f32 %v1556_v44, %v884_v53  ;;  %v1168_v52 = vadd.f32 0.001143296, %v1167_v29  ;;  %v1125_v12 = vadd.f32 1.1283791, %v1124_v7 }
 0x103   : > { %v839_v59 = vmul.f32 %v7268_v39, %v800_v42  ;;  %v1158_v36 = vmul.f32 %v1157_v49, %v7528_v4  ;;  %v1196_v13 = vmul.f32 2.1237322e-06, %v7559_v50  ;;  %v1278_v8 = vmul.f32 %v1277_v1, %v7538_v21 }
 0x104   : > { %v1557_v42 = vadd.f32 1.0, %v6261_v61  ;;  %v1169_v53 = vmul.f32 %v1168_v52, %v7528_v4  ;;  %v663_v9 = vmul.f32 %v7272_v41, %v7508_v60  ;;  %v744_v28 = vmul.f32 %v7270_v40, %v7518_v3  ;;  %v7590_v14 = vpop.permute.xlu2 %639 }
 0x105   : > { %v855_v23 = vadd.f32 %v839_v59, %v758_v47  ;;  %v1135_v59 = vmul.f32 %v1134_v63, %v7446_v37  ;;  %v6813_v17 = vpop.eup %6812  ;;  %v1159_v31 = vadd.f32 0.0036580483, %v1158_v36  ;;  %v1197_v34 = vadd.f32 0.00028619796, %v1196_v13 }
 0x106   : > { %v1573_v18 = vmul.f32 %v1557_v42, %v885_v19  ;;  %v1098_v37 = vmul.f32 %v6813_v17, %v7547_v6  ;;  %v7586_v38 = vmul.f32 %v1125_v12, %v7434_v58  ;;  %v1108_v60 = vand.u32 2147483648, %v7547_v6 }
 0x107   : > { %v7545_v30 = vadd.f32 %v7282_v48, %v855_v23  ;;  %v7569_v22 = vadd.f32 1.0, %v1135_v59  ;;  %v1086_v23 = vmul.f32 %v1085_v55, %v7404_v33  ;;  %v1170_v44 = vadd.f32 0.014752088, %v1169_v53 }
 0x108   : > { %v1587_v27 = vpack.c.bf16 %v1573_v18, %v1572_v2  ;;  %v1099_v33 = vsub.f32 1.0, %v1098_v37  ;;  %v1207_v3 = vmul.f32 3.8918573e-05, %v7559_v50  ;;  %v1279_v51 = vadd.f32 0.0036580483, %v1278_v8 }
 0x109   : > { %v7554_v10 = vmul.f32 0.70710677, %v7545_v30  ;;  %6814 = vrcp.f32 %v7569_v22  ;;  %vm1103_vm1 = vweird.f32 %v6813_v17  ;;  %v1106_v46 = vand.u32 2147483647, %v7547_v6 }
 0x10a   : > { %6291 = vmatmul.msk.bf16.gmra.mxu0 %vm1630_vm8, %v1587_v27  ;;  %v1100_v29 = vmul.f32 %v6813_v17, %v1099_v33  ;;  %v760_v7 = vadd.f32 %v744_v28, %v663_v9  ;;  %v1171_v49 = vmul.f32 %v1170_v44, %v7528_v4  ;;  %v1198_v19 = vmul.f32 %v1197_v34, %v7559_v50 }
 0x10b   : > { %v630_v56 = vpop.permute.xlu1 %629  ;;  %v1234_v47 = vmul.f32 %v7554_v10, %v7554_v10  ;;  %vm1102_vm2 = vweird.f32 %v7547_v6  ;;  %v1208_v1 = vadd.f32 0.001143296, %v1207_v3  ;;  %v1160_v2 = vmul.f32 %v1159_v31, %v7528_v4 }
 0x10c   : > { %v664_v57 = vmul.f32 %v7272_v41, %v630_v56  ;;  %v1101_v61 = vadd.f32 %v6813_v17, %v1100_v29  ;;  %vm1104_vm3 = vmor %vm1102_vm2, %vm1103_vm1  ;;  %v1172_v55 = vadd.f32 0.112945676, %v1171_v49  ;;  %vm1107_vm4 = vcmp.eq.f32.partialorder %v1106_v46, 8.507059e+37 }
 0x10d   : > { %v7577_v54 = vmin.f32 %v1234_v47, 16.0  ;;  %v719_v47 = vpop.permute.xlu0 %718  ;;  %v1199_v53 = vadd.f32 0.0036580483, %v1198_v19  ;;  %v1209_v9 = vmul.f32 %v1208_v1, %v7559_v50  ;;  %v1146_v27 = vand.u32 2147483647, %v7569_v22  ;;  %v816_v34 = vpop.permute.xlu2 %815 }
 0x10e   : > { %v761_v15 = vadd.f32 %v745_v16, %v664_v57  ;;  %v1105_v52 = vsel %vm1104_vm3, %v6813_v17, %v1101_v61  ;;  %v1173_v6 = vmul.f32 %v1172_v55, %v7528_v4  ;;  %v1280_v17 = vmul.f32 %v1279_v51, %v7538_v21 }
 0x10f   : > { %v1236_v16 = vmul.f32 2.1237322e-06, %v7577_v54  ;;  %v6815_v57 = vpop.eup %6814  ;;  %v746_v8 = vmul.f32 %v7270_v40, %v719_v47  ;;  %vm1142_vm6 = vweird.f32 %v7569_v22  ;;  %v843_v46 = vmul.f32 %v7268_v39, %v816_v34 }
 0x110   : > { %v858_v0 = vadd.f32 %v842_v26, %v761_v15  ;;  %v1109_v26 = vor.u32 1.1754944e-38, %v1108_v60  ;;  %v1138_v42 = vmul.f32 %v6815_v57, %v7569_v22  ;;  %vm1143_vm5 = vweird.f32 %v6815_v57 }
 0x111   : > { %v1237_v15 = vadd.f32 0.00028619796, %v1236_v16  ;;  %v1174_v60 = vadd.f32 0.4994258, %v1173_v6  ;;  %vm1144_vm7 = vmor %vm1142_vm6, %vm1143_vm5  ;;  %vm1147_vm9 = vcmp.eq.f32.partialorder %v1146_v27, 8.507059e+37  ;;  %v1200_v61 = vmul.f32 %v1199_v53, %v7559_v50 }
 0x112   : > { %v7583_v35 = vadd.f32 %v7282_v48, %v858_v0  ;;  %v1110_v59 = vsel %vm1107_vm4, %v1109_v26, %v1105_v52  ;;  %v1139_v18 = vsub.f32 1.0, %v1138_v42  ;;  %v1148_v0 = vand.u32 2147483648, %v7569_v22 }
 0x113   : > { %v1111_v13 = vmul.f32 %v1110_v59, %v1086_v23  ;;  %v1238_v23 = vmul.f32 %v1237_v15, %v7577_v54  ;;  %v1175_v16 = vmul.f32 %v1174_v60, %v7528_v4  ;;  %v1247_v49 = vmul.f32 3.8918573e-05, %v7577_v54 }
 0x114   : > { %v808_v32 = vpop.permute.xlu1 %807  ;;  %v7599_v56 = vmul.f32 0.70710677, %v7583_v35  ;;  %v1140_v37 = vmul.f32 %v6815_v57, %v1139_v18  ;;  %v1149_v51 = vor.u32 1.1754944e-38, %v1148_v0  ;;  %v1161_v19 = vadd.f32 0.05243302, %v1160_v2 }
 0x115   : > { %v841_v58 = vmul.f32 %v7268_v39, %v808_v32  ;;  %v6262_v44 = vclamps-f32 %v1111_v13, 1.0  ;;  %v1239_v26 = vadd.f32 0.0036580483, %v1238_v23  ;;  %v887_v55 = vmul.f32 0.5, %v7420_v62 }
 0x116   : > { %v1354_v36 = vmul.f32 %v7599_v56, %v7599_v56  ;;  %v1141_v3 = vadd.f32 %v6815_v57, %v1140_v37  ;;  %v7632_v42 = vadd.f32 1.0, %v1175_v16  ;;  %v1248_v13 = vadd.f32 0.001143296, %v1247_v49 }
 0x117   : > { %v857_v63 = vadd.f32 %v841_v58, %v760_v7  ;;  %v1210_v7 = vadd.f32 0.014752088, %v1209_v9  ;;  %v1558_v47 = vadd.f32 1.0, %v6262_v44  ;;  %v1162_v62 = vmul.f32 %v1161_v19, %v7528_v4 }
 0x118   : > { %v7621_v32 = vmin.f32 %v1354_v36, 16.0  ;;  %v1145_v58 = vsel %vm1144_vm7, %v6815_v57, %v1141_v3  ;;  %v886_v57 = vmul.f32 0.5, %v7392_v24  ;;  %v820_v36 = vpop.permute.xlu0 %819  ;;  %6816 = vrcp.f32 %v7632_v42 }
 0x119   : > { %v7605_v12 = vadd.f32 %v7282_v48, %v857_v63  ;;  %v1150_v63 = vsel %vm1147_vm9, %v1149_v51, %v1145_v58  ;;  %v1211_v59 = vmul.f32 %v1210_v7, %v7559_v50  ;;  %v1281_v18 = vadd.f32 0.05243302, %v1280_v17 }
 0x11a   : > { %v1356_v1 = vmul.f32 2.1237322e-06, %v7621_v32  ;;  %v1151_v52 = vmul.f32 %v1150_v63, %v7586_v38  ;;  %v1201_v0 = vadd.f32 0.05243302, %v1200_v61  ;;  %v1240_v38 = vmul.f32 %v1239_v26, %v7577_v54 }
 0x11b   : > { %v7616_v28 = vmul.f32 0.70710677, %v7605_v12  ;;  %v666_v9 = vmul.f32 %v7272_v41, %v7590_v14  ;;  %v1574_v27 = vmul.f32 %v1558_v47, %v886_v57  ;;  %v844_v34 = vmul.f32 %v7268_v39, %v820_v36 }
 0x11c   : > { %v6263_v6 = vclamps-f32 %v1151_v52, 1.0  ;;  %v1212_v23 = vadd.f32 0.112945676, %v1211_v59  ;;  %v1249_v44 = vmul.f32 %v1248_v13, %v7577_v54  ;;  %v1282_v3 = vmul.f32 %v1281_v18, %v7538_v21 }
 0x11d   : > { %v635_v31 = vpop.permute.xlu1 %634  ;;  %v1314_v22 = vmul.f32 %v7616_v28, %v7616_v28  ;;  %v1202_v51 = vmul.f32 %v1201_v0, %v7559_v50  ;;  %v1241_v14 = vadd.f32 0.05243302, %v1240_v38  ;;  %v1163_v16 = vadd.f32 0.18741608, %v1162_v62  ;;  %v7669_v62 = vld [vmem:[%s11581_s2] ss:$0 sm:$0xff] }
 0x11e   : > { %v665_v33 = vmul.f32 %v7272_v41, %v635_v31  ;;  %v1559_v24 = vadd.f32 1.0, %v6263_v6  ;;  %v1250_v7 = vadd.f32 0.014752088, %v1249_v44  ;;  %v1287_v58 = vmul.f32 3.8918573e-05, %v7538_v21 }
 0x11f   : > { %v7636_v2 = vmin.f32 %v1314_v22, 16.0  ;;  %v1242_v52 = vmul.f32 %v1241_v14, %v7577_v54  ;;  %v1164_v47 = vmul.f32 %v1163_v16, %v7528_v4  ;;  %vm1182_vm11 = vweird.f32 %v7632_v42 }
 0x120   : > { %v762_v29 = vadd.f32 %v746_v8, %v665_v33  ;;  %v1357_v8 = vadd.f32 0.00028619796, %v1356_v1  ;;  %v1575_v33 = vmul.f32 %v1559_v24, %v887_v55  ;;  %v1251_v55 = vmul.f32 %v1250_v7, %v7577_v54 }
 0x121   : > { %v1316_v17 = vmul.f32 2.1237322e-06, %v7636_v2  ;;  %v1203_v1 = vadd.f32 0.18741608, %v1202_v51  ;;  %v1288_v6 = vadd.f32 0.001143296, %v1287_v58 }
 0x122   : > { %v859_v15 = vadd.f32 %v843_v46, %v762_v29  ;;  %v1213_v29 = vmul.f32 %v1212_v23, %v7559_v50  ;;  %v6817_v46 = vpop.eup %6816  ;;  %v1358_v22 = vmul.f32 %v1357_v8, %v7621_v32  ;;  %v1252_v8 = vadd.f32 0.112945676, %v1251_v55 }
 0x123   : > { %v1178_v61 = vmul.f32 %v6817_v46, %v7632_v42  ;;  %v1317_v26 = vadd.f32 0.00028619796, %v1316_v17  ;;  %vm1183_vm10 = vweird.f32 %v6817_v46  ;;  %v1204_v24 = vmul.f32 %v1203_v1, %v7559_v50 }
 0x124   : > { %v7645_v31 = vadd.f32 %v7282_v48, %v859_v15  ;;  %v1588_v48 = vpack.c.bf16 %v1575_v33, %v1574_v27  ;;  %v1214_v63 = vadd.f32 0.4994258, %v1213_v29  ;;  %v1283_v15 = vadd.f32 0.18741608, %v1282_v3  ;;  %vm7689_vm12 = vmor %vm1182_vm11, %vm1183_vm10 }
 0x125   : > { %v1179_v57 = vsub.f32 1.0, %v1178_v61  ;;  %v1359_v36 = vadd.f32 0.0036580483, %v1358_v22  ;;  %v1318_v4 = vmul.f32 %v1317_v26, %v7636_v2  ;;  %v1188_v27 = vand.u32 2147483648, %v7632_v42 }
 0x126   : > { %v723_v53 = vpop.permute.xlu1 %722  ;;  %v7656_v49 = vmul.f32 0.70710677, %v7645_v31  ;;  %6292 = vmatmul.msk.bf16.vlgmr.msra.gmra.mxu1 %vm1630_vm8, %v1588_v48  ;;  %v1215_v59 = vmul.f32 %v1214_v63, %v7559_v50  ;;  %v1289_v23 = vmul.f32 %v1288_v6, %v7538_v21  ;;  %v1165_v44 = vadd.f32 1.1283791, %v1164_v47 }
 0x127   : > { %v747_v37 = vmul.f32 %v7270_v40, %v723_v53  ;;  %v1180_v0 = vmul.f32 %v6817_v46, %v1179_v57  ;;  %v1360_v33 = vmul.f32 %v1359_v36, %v7621_v32  ;;  %v1319_v3 = vadd.f32 0.0036580483, %v1318_v4 }
 0x128   : > { %v1394_v13 = vmul.f32 %v7656_v49, %v7656_v49  ;;  %v7675_v53 = vadd.f32 1.0, %v1215_v59  ;;  %v1253_v51 = vmul.f32 %v1252_v8, %v7577_v54  ;;  %v1284_v14 = vmul.f32 %v1283_v15, %v7538_v21  ;;  %v650_v59 = vpop.permute.xlu2 %649 }
 0x129   : > { %v763_v60 = vadd.f32 %v747_v37, %v666_v9  ;;  %v1243_v9 = vadd.f32 0.18741608, %v1242_v52  ;;  %v1181_v37 = vadd.f32 %v6817_v46, %v1180_v0  ;;  %v1205_v29 = vadd.f32 1.1283791, %v1204_v24 }
 0x12a   : > { %6818 = vrcp.f32 %v7675_v53  ;;  %v7684_v17 = vmin.f32 %v1394_v13, 16.0  ;;  %v7698_v16 = vmul.f32 0.5, %v7483_v5  ;;  %v1189_v48 = vor.u32 1.1754944e-38, %v1188_v27 }
 0x12b   : > { %v860_v19 = vadd.f32 %v844_v34, %v763_v60  ;;  %v1186_v34 = vand.u32 2147483647, %v7632_v42  ;;  %v1185_v42 = vsel %vm7689_vm12, %v6817_v46, %v1181_v37  ;;  %v1244_v7 = vmul.f32 %v1243_v9, %v7577_v54 }
 0x12c   : > { %v1254_v58 = vadd.f32 0.4994258, %v1253_v51  ;;  %v1290_v22 = vadd.f32 0.014752088, %v1289_v23  ;;  %v1396_v61 = vmul.f32 2.1237322e-06, %v7684_v17  ;;  %v1166_v55 = vmul.f32 %v1165_v44, %v7500_v25 }
 0x12d   : > { %v7672_v18 = vadd.f32 %v7669_v62, %v860_v19  ;;  %vm1187_vm13 = vcmp.eq.f32.partialorder %v1186_v34, 8.507059e+37  ;;  %v1361_v19 = vadd.f32 0.05243302, %v1360_v33  ;;  %v7706_v1 = vmul.f32 0.5, %v7514_v45 }
 0x12e   : > { %v1190_v26 = vsel %vm1187_vm13, %v1189_v48, %v1185_v42  ;;  %v1320_v5 = vmul.f32 %v1319_v3, %v7636_v2  ;;  %v1255_v52 = vmul.f32 %v1254_v58, %v7577_v54  ;;  %v7710_v57 = vadd.f32 1.1283791, %v1284_v14 }
 0x12f   : > { %v645_v38 = vpop.permute.xlu1 %644  ;;  %v7687_v60 = vmul.f32 0.70710677, %v7672_v18  ;;  %v1206_v47 = vmul.f32 %v1205_v29, %v7531_v11  ;;  %v1367_v36 = vmul.f32 3.8918573e-05, %v7621_v32  ;;  %v7715_v13 = vadd.f32 1.1283791, %v1244_v7  ;;  %v824_v29 = vpop.permute.xlu0 %823 }
 0x130   : > { %v6819_v63 = vpop.eup %6818  ;;  %v1191_v25 = vmul.f32 %v1190_v26, %v1166_v55  ;;  %v7717_v0 = vadd.f32 1.0, %v1255_v52  ;;  %v1291_v45 = vmul.f32 %v1290_v22, %v7538_v21  ;;  %v7721_v4 = vmul.f32 %v1361_v19, %v7621_v32 }
 0x131   : > { %v1434_v46 = vmul.f32 %v7687_v60, %v7687_v60  ;;  %v1218_v15 = vmul.f32 %v6819_v63, %v7675_v53  ;;  %v1397_v54 = vadd.f32 0.00028619796, %v1396_v61  ;;  %v1321_v24 = vadd.f32 0.05243302, %v1320_v5 }
 0x132   : > { %v1228_v9 = vand.u32 2147483648, %v7675_v53  ;;  %6820 = vrcp.f32 %v7717_v0  ;;  %vm1223_vm14 = vweird.f32 %v6819_v63  ;;  %v1226_v34 = vand.u32 2147483647, %v7675_v53 }
 0x133   : > { %v7723_v8 = vmin.f32 %v1434_v46, 16.0  ;;  %v1219_v11 = vsub.f32 1.0, %v1218_v15  ;;  %v1368_v23 = vadd.f32 0.001143296, %v1367_v36  ;;  %v6264_v33 = vclamps-f32 %v1191_v25, 1.0 }
 0x134   : > { %v667_v50 = vmul.f32 %v7272_v41, %v645_v38  ;;  %v1292_v44 = vadd.f32 0.112945676, %v1291_v45  ;;  %v1327_v3 = vmul.f32 3.8918573e-05, %v7636_v2  ;;  %v1398_v42 = vmul.f32 %v1397_v54, %v7684_v17 }
 0x135   : > { %v1220_v27 = vmul.f32 %v6819_v63, %v1219_v11  ;;  %v1436_v51 = vmul.f32 2.1237322e-06, %v7723_v8  ;;  %vm1222_vm15 = vweird.f32 %v7675_v53  ;;  %v1229_v48 = vor.u32 1.1754944e-38, %v1228_v9 }
 0x136   : > { %vm1224_vm0 = vmor %vm1222_vm15, %vm1223_vm14  ;;  %v1293_v58 = vmul.f32 %v1292_v44, %v7538_v21  ;;  %v1328_v22 = vadd.f32 0.001143296, %v1327_v3  ;;  %v1322_v19 = vmul.f32 %v1321_v24, %v7636_v2  ;;  %vm1227_vm1 = vcmp.eq.f32.partialorder %v1226_v34, 8.507059e+37 }
 0x137   : > { %v1221_v14 = vadd.f32 %v6819_v63, %v1220_v27  ;;  %v1369_v61 = vmul.f32 %v1368_v23, %v7621_v32  ;;  %v1560_v55 = vadd.f32 1.0, %v6264_v33  ;;  %v845_v5 = vmul.f32 %v7268_v39, %v824_v29 }
 0x138   : > { %v727_v6 = vpop.permute.xlu1 %726  ;;  %v6821_v46 = vpop.eup %6820  ;;  %v1294_v52 = vadd.f32 0.4994258, %v1293_v58  ;;  %v668_v15 = vmul.f32 %v7272_v41, %v650_v59  ;;  %v1329_v25 = vmul.f32 %v1328_v22, %v7636_v2  ;;  %v1399_v45 = vadd.f32 0.0036580483, %v1398_v42 }
 0x139   : > { %v748_v37 = vmul.f32 %v7270_v40, %v727_v6  ;;  %v1225_v38 = vsel %vm1224_vm0, %v6819_v63, %v1221_v14  ;;  %v731_v6 = vpop.permute.xlu2 %730  ;;  %v1258_v36 = vmul.f32 %v6821_v46, %v7717_v0  ;;  %v1437_v54 = vadd.f32 0.00028619796, %v1436_v51 }
 0x13a   : > { %v1230_v26 = vsel %vm1227_vm1, %v1229_v48, %v1225_v38  ;;  %v1295_v11 = vmul.f32 %v1294_v52, %v7538_v21  ;;  %v1330_v27 = vadd.f32 0.014752088, %v1329_v25  ;;  %v1370_v34 = vadd.f32 0.014752088, %v1369_v61 }
 0x13b   : > { %v764_v7 = vadd.f32 %v748_v37, %v667_v50  ;;  %v1231_v53 = vmul.f32 %v1230_v26, %v1206_v47  ;;  %v1259_v9 = vsub.f32 1.0, %v1258_v36  ;;  %v1576_v23 = vmul.f32 %v1560_v55, %v7698_v16 }
 0x13c   : > { %v749_v47 = vmul.f32 %v7270_v40, %v731_v6  ;;  %vm1263_vm2 = vweird.f32 %v6821_v46  ;;  %v7744_v41 = vadd.f32 1.0, %v1295_v11  ;;  %v1331_v50 = vmul.f32 %v1330_v27, %v7636_v2 }
 0x13d   : > { %v861_v63 = vadd.f32 %v845_v5, %v764_v7  ;;  %v6265_v24 = vclamps-f32 %v1231_v53, 1.0  ;;  %v1260_v33 = vmul.f32 %v6821_v46, %v1259_v9  ;;  %v1371_v44 = vmul.f32 %v1370_v34, %v7621_v32 }
 0x13e   : > { %v1268_v3 = vand.u32 2147483648, %v7717_v0  ;;  %6822 = vrcp.f32 %v7744_v41  ;;  %vm1262_vm3 = vweird.f32 %v7717_v0  ;;  %v1266_v51 = vand.u32 2147483647, %v7717_v0 }
 0x13f   : > { %v1561_v59 = vadd.f32 1.0, %v6265_v24  ;;  %v7749_v21 = vadd.f32 %v7669_v62, %v861_v63  ;;  %v1261_v42 = vadd.f32 %v6821_v46, %v1260_v33  ;;  %v1438_v14 = vmul.f32 %v1437_v54, %v7723_v8  ;;  %vm7759_vm4 = vmor %vm1262_vm3, %vm1263_vm2 }
 0x140   : > { %v765_v29 = vadd.f32 %v749_v47, %v668_v15  ;;  %v1332_v7 = vadd.f32 0.112945676, %v1331_v50  ;;  %v1372_v58 = vadd.f32 0.112945676, %v1371_v44  ;;  %v1363_v22 = vadd.f32 0.18741608, %v7721_v4 }
 0x141   : > { %v828_v37 = vpop.permute.xlu1 %827  ;;  %v1577_v40 = vmul.f32 %v1561_v59, %v7706_v1  ;;  %v1265_v1 = vsel %vm7759_vm4, %v6821_v46, %v1261_v42  ;;  %v1400_v61 = vmul.f32 %v1399_v45, %v7684_v17  ;;  %v7768_v0 = vmul.f32 0.70710677, %v7749_v21 }
 0x142   : > { %v846_v16 = vmul.f32 %v7268_v39, %v828_v37  ;;  %v1323_v39 = vadd.f32 0.18741608, %v1322_v19  ;;  %v1269_v26 = vor.u32 1.1754944e-38, %v1268_v3  ;;  %vm1267_vm5 = vcmp.eq.f32.partialorder %v1266_v51, 8.507059e+37 }
 0x143   : > { %v1589_v38 = vpack.c.bf16 %v1577_v40, %v1576_v23  ;;  %v1333_v5 = vmul.f32 %v1332_v7, %v7636_v2  ;;  %v1373_v52 = vmul.f32 %v1372_v58, %v7621_v32  ;;  %v1407_v4 = vmul.f32 3.8918573e-05, %v7684_v17 }
 0x144   : > { %v862_v55 = vadd.f32 %v846_v16, %v765_v29  ;;  %v6823_v19 = vpop.eup %6822  ;;  %v1286_v46 = vmul.f32 %v7710_v57, %v7506_v43  ;;  %v1246_v53 = vmul.f32 %v7715_v13, %v7554_v10  ;;  %v1439_v15 = vadd.f32 0.0036580483, %v1438_v14 }
 0x145   : > { %6293 = vmatmul.msk.bf16.gmra.mxu1 %vm1630_vm8, %v1589_v38  ;;  %v1270_v6 = vsel %vm1267_vm5, %v1269_v26, %v1265_v1  ;;  %v1364_v36 = vmul.f32 %v1363_v22, %v7621_v32  ;;  %v1324_v25 = vmul.f32 %v1323_v39, %v7636_v2  ;;  %v1298_v45 = vmul.f32 %v6823_v19, %v7744_v41 }
 0x146   : > { %v1334_v54 = vadd.f32 0.4994258, %v1333_v5  ;;  %v1401_v63 = vadd.f32 0.05243302, %v1400_v61  ;;  %v1474_v11 = vmul.f32 %v7768_v0, %v7768_v0  ;;  %v7784_v24 = vadd.f32 %v7669_v62, %v862_v55 }
 0x147   : > { %v1374_v43 = vadd.f32 0.4994258, %v1373_v52  ;;  %v1271_v57 = vmul.f32 %v1270_v6, %v1246_v53  ;;  %v1299_v9 = vsub.f32 1.0, %v1298_v45  ;;  %v1408_v13 = vadd.f32 0.001143296, %v1407_v4 }
 0x148   : > { %v1335_v10 = vmul.f32 %v1334_v54, %v7636_v2  ;;  %v1440_v37 = vmul.f32 %v1439_v15, %v7723_v8  ;;  %vm1302_vm6 = vweird.f32 %v7744_v41  ;;  %v1308_v27 = vand.u32 2147483648, %v7744_v41 }
 0x149   : > { %v1375_v34 = vmul.f32 %v1374_v43, %v7621_v32  ;;  %v1300_v23 = vmul.f32 %v6823_v19, %v1299_v9  ;;  %vm1303_vm7 = vweird.f32 %v6823_v19  ;;  %v1306_v47 = vand.u32 2147483647, %v7744_v41 }
 0x14a   : > { %v7792_v62 = vadd.f32 1.0, %v1335_v10  ;;  %v1365_v59 = vadd.f32 1.1283791, %v1364_v36  ;;  %v7794_v33 = vmin.f32 %v1474_v11, 16.0  ;;  %v7797_v2 = vmul.f32 0.70710677, %v7784_v24  ;;  %vm1304_vm9 = vmor %vm1302_vm6, %vm1303_vm7 }
 0x14b   : > { %v7799_v50 = vadd.f32 1.0, %v1375_v34  ;;  %v6266_v44 = vclamps-f32 %v1271_v57, 1.0  ;;  %v1301_v3 = vadd.f32 %v6823_v19, %v1300_v23  ;;  %v1409_v32 = vmul.f32 %v1408_v13, %v7684_v17 }
 0x14c   : > { %6824 = vrcp.f32 %v7792_v62  ;;  %v1325_v16 = vadd.f32 1.1283791, %v1324_v25  ;;  %v1309_v40 = vor.u32 1.1754944e-38, %v1308_v27  ;;  %v1447_v42 = vmul.f32 3.8918573e-05, %v7723_v8 }
 0x14d   : > { %6826 = vrcp.f32 %v7799_v50  ;;  %v1402_v51 = vmul.f32 %v1401_v63, %v7684_v17  ;;  %v1441_v14 = vadd.f32 0.05243302, %v1440_v37  ;;  %v1305_v29 = vsel %vm1304_vm9, %v6823_v19, %v1301_v3 }
 0x14e   : > { %vm1307_vm10 = vcmp.eq.f32.partialorder %v1306_v47, 8.507059e+37  ;;  %v1476_v48 = vmul.f32 2.1237322e-06, %v7794_v33  ;;  %v1514_v58 = vmul.f32 %v7797_v2, %v7797_v2  ;;  %v891_v22 = vmul.f32 0.5, %v7493_v20 }
 0x14f   : > { %v1310_v7 = vsel %vm1307_vm10, %v1309_v40, %v1305_v29  ;;  %v1562_v39 = vadd.f32 1.0, %v6266_v44  ;;  %v1410_v38 = vadd.f32 0.014752088, %v1409_v32  ;;  %v890_v1 = vmul.f32 0.5, %v7545_v30 }
 0x150   : > { %v1311_v41 = vmul.f32 %v1310_v7, %v1286_v46  ;;  %v1366_v61 = vmul.f32 %v1365_v59, %v7599_v56  ;;  %v1326_v26 = vmul.f32 %v1325_v16, %v7616_v28  ;;  %v1448_v55 = vadd.f32 0.001143296, %v1447_v42 }
 0x151   : > { %v1403_v52 = vadd.f32 0.18741608, %v1402_v51  ;;  %v1442_v4 = vmul.f32 %v1441_v14, %v7723_v8  ;;  %v1411_v53 = vmul.f32 %v1410_v38, %v7684_v17  ;;  %v1477_v6 = vadd.f32 0.00028619796, %v1476_v48 }
 0x152   : > { %v6825_v5 = vpop.eup %6824  ;;  %v6267_v19 = vclamps-f32 %v1311_v41, 1.0  ;;  %v7817_v20 = vmin.f32 %v1514_v58, 16.0  ;;  %v1449_v30 = vmul.f32 %v1448_v55, %v7723_v8  ;;  %v1578_v56 = vmul.f32 %v1562_v39, %v890_v1 }
 0x153   : > { %v6827_v15 = vpop.eup %6826  ;;  %v1338_v46 = vmul.f32 %v6825_v5, %v7792_v62  ;;  %v1412_v25 = vadd.f32 0.112945676, %v1411_v53  ;;  %v1346_v54 = vand.u32 2147483647, %v7792_v62  ;;  %v1348_v63 = vand.u32 2147483648, %v7792_v62 }
 0x154   : > { %v1563_v36 = vadd.f32 1.0, %v6267_v19  ;;  %v1378_v28 = vmul.f32 %v6827_v15, %v7799_v50  ;;  %v1450_v11 = vadd.f32 0.014752088, %v1449_v30  ;;  %v1386_v9 = vand.u32 2147483647, %v7799_v50 }
 0x155   : > { %v1339_v45 = vsub.f32 1.0, %v1338_v46  ;;  %v1413_v10 = vmul.f32 %v1412_v25, %v7684_v17  ;;  %vm1343_vm11 = vweird.f32 %v6825_v5  ;;  %v1388_v37 = vand.u32 2147483648, %v7799_v50 }
 0x156   : > { %v1579_v43 = vmul.f32 %v1563_v36, %v891_v22  ;;  %v1379_v57 = vsub.f32 1.0, %v1378_v28  ;;  %v1451_v27 = vmul.f32 %v1450_v11, %v7723_v8  ;;  %vm1383_vm12 = vweird.f32 %v6827_v15 }
 0x157   : > { %v1340_v13 = vmul.f32 %v6825_v5, %v1339_v45  ;;  %v1414_v47 = vadd.f32 0.4994258, %v1413_v10  ;;  %vm1342_vm13 = vweird.f32 %v7792_v62  ;;  %vm1347_vm14 = vcmp.eq.f32.partialorder %v1346_v54, 8.507059e+37 }
 0x158   : > { %v1590_v34 = vpack.c.bf16 %v1579_v43, %v1578_v56  ;;  %v1380_v23 = vmul.f32 %v6827_v15, %v1379_v57  ;;  %v1452_v44 = vadd.f32 0.112945676, %v1451_v27  ;;  %vm1344_vm15 = vmor %vm1342_vm13, %vm1343_vm11  ;;  %v1349_v3 = vor.u32 1.1754944e-38, %v1348_v63 }
 0x159   : > { %v1341_v59 = vadd.f32 %v6825_v5, %v1340_v13  ;;  %vm1382_vm0 = vweird.f32 %v7799_v50  ;;  %v1415_v16 = vmul.f32 %v1414_v47, %v7684_v17  ;;  %v1389_v42 = vor.u32 1.1754944e-38, %v1388_v37 }
 0x15a   : > { %6294 = vmatmul.msk.bf16.gmra.mxu1 %vm1630_vm8, %v1590_v34  ;;  %v1381_v32 = vadd.f32 %v6827_v15, %v1380_v23  ;;  %vm1384_vm1 = vmor %vm1382_vm0, %vm1383_vm12  ;;  %v1453_v51 = vmul.f32 %v1452_v44, %v7723_v8  ;;  %v1487_v14 = vmul.f32 3.8918573e-05, %v7794_v33  ;;  %vm1387_vm2 = vcmp.eq.f32.partialorder %v1386_v9, 8.507059e+37 }
 0x15b   : > { %v1345_v40 = vsel %vm1344_vm15, %v6825_v5, %v1341_v59  ;;  %v1416_v48 = vadd.f32 1.0, %v1415_v16  ;;  %v1516_v7 = vmul.f32 2.1237322e-06, %v7817_v20  ;;  %v1404_v50 = vmul.f32 %v1403_v52, %v7684_v17 }
 0x15c   : > { %v1350_v29 = vsel %vm1347_vm14, %v1349_v3, %v1345_v40  ;;  %v1385_v62 = vsel %vm1384_vm1, %v6827_v15, %v1381_v32  ;;  %v1454_v41 = vadd.f32 0.4994258, %v1453_v51  ;;  %v1443_v38 = vadd.f32 0.18741608, %v1442_v4 }
 0x15d   : > { %v1351_v58 = vmul.f32 %v1350_v29, %v1326_v26  ;;  %v1390_v22 = vsel %vm1387_vm2, %v1389_v42, %v1385_v62  ;;  %6828 = vrcp.f32 %v1416_v48  ;;  %v1488_v5 = vadd.f32 0.001143296, %v1487_v14 }
 0x15e   : > { %v1391_v39 = vmul.f32 %v1390_v22, %v1366_v61  ;;  %v1455_v55 = vmul.f32 %v1454_v41, %v7723_v8  ;;  %v892_v19 = vmul.f32 0.5, %v7605_v12  ;;  %v1478_v53 = vmul.f32 %v1477_v6, %v7794_v33  ;;  %v7849_v12 = vld [vmem:[%s11583_s4] ss:$0 sm:$0xff] }
 0x15f   : > { %v6268_v1 = vclamps-f32 %v1351_v58, 1.0  ;;  %v1517_v46 = vadd.f32 0.00028619796, %v1516_v7  ;;  %v1489_v26 = vmul.f32 %v1488_v5, %v7794_v33  ;;  %v893_v17 = vmul.f32 0.5, %v7583_v35 }
 0x160   : > { %v6269_v15 = vclamps-f32 %v1391_v39, 1.0  ;;  %v7839_v36 = vadd.f32 1.0, %v1455_v55  ;;  %v1405_v61 = vadd.f32 1.1283791, %v1404_v50  ;;  %v1527_v4 = vmul.f32 3.8918573e-05, %v7817_v20 }
 0x161   : > { %v1564_v30 = vadd.f32 1.0, %v6268_v1  ;;  %v1444_v56 = vmul.f32 %v1443_v38, %v7723_v8  ;;  %v1479_v25 = vadd.f32 0.0036580483, %v1478_v53  ;;  %v1490_v54 = vadd.f32 0.014752088, %v1489_v26 }
 0x162   : > { %v1565_v52 = vadd.f32 1.0, %v6269_v15  ;;  %6830 = vrcp.f32 %v7839_v36  ;;  %v1528_v63 = vadd.f32 0.001143296, %v1527_v4  ;;  %v1518_v35 = vmul.f32 %v1517_v46, %v7817_v20 }
 0x163   : > { %v1580_v28 = vmul.f32 %v1564_v30, %v892_v19  ;;  %v6829_v6 = vpop.eup %6828  ;;  %v1406_v43 = vmul.f32 %v1405_v61, %v7656_v49  ;;  %v1491_v9 = vmul.f32 %v1490_v54, %v7794_v33  ;;  %v1445_v13 = vadd.f32 1.1283791, %v1444_v56 }
 0x164   : > { %v1581_v45 = vmul.f32 %v1565_v52, %v893_v17  ;;  %v1418_v11 = vmul.f32 %v6829_v6, %v1416_v48  ;;  %v1529_v10 = vmul.f32 %v1528_v63, %v7817_v20  ;;  %v1426_v27 = vand.u32 2147483647, %v1416_v48 }
 0x165   : > { %v1480_v23 = vmul.f32 %v1479_v25, %v7794_v33  ;;  %v1428_v47 = vand.u32 2147483648, %v1416_v48  ;;  %v1492_v59 = vadd.f32 0.112945676, %v1491_v9  ;;  %v1519_v3 = vadd.f32 0.0036580483, %v1518_v35 }
 0x166   : > { %v1591_v57 = vpack.c.bf16 %v1581_v45, %v1580_v28  ;;  %v1419_v37 = vsub.f32 1.0, %v1418_v11  ;;  %v1530_v44 = vadd.f32 0.014752088, %v1529_v10  ;;  %vm1423_vm3 = vweird.f32 %v6829_v6 }
 0x167   : > { %vm1422_vm4 = vweird.f32 %v1416_v48  ;;  %v1493_v42 = vmul.f32 %v1492_v59, %v7794_v33  ;;  %vm1427_vm5 = vcmp.eq.f32.partialorder %v1426_v27, 8.507059e+37  ;;  %v1466_v29 = vand.u32 2147483647, %v7839_v36 }
 0x168   : > { %6295 = vmatmul.msk.bf16.vlgmr.msra.gmra.mxu2 %vm1630_vm8, %v1591_v57  ;;  %v6831_v49 = vpop.eup %6830  ;;  %v1420_v32 = vmul.f32 %v6829_v6, %v1419_v37  ;;  %v1531_v51 = vmul.f32 %v1530_v44, %v7817_v20  ;;  %vm1424_vm6 = vmor %vm1422_vm4, %vm1423_vm3  ;;  %v1429_v7 = vor.u32 1.1754944e-38, %v1428_v47  ;;  %v1468_v48 = vand.u32 2147483648, %v7839_v36 }
 0x169   : > { %v1458_v40 = vmul.f32 %v6831_v49, %v7839_v36  ;;  %v1494_v22 = vadd.f32 0.4994258, %v1493_v42  ;;  %vm1463_vm7 = vweird.f32 %v6831_v49  ;;  %v1481_v19 = vadd.f32 0.05243302, %v1480_v23 }
 0x16a   : > { %v1421_v14 = vadd.f32 %v6829_v6, %v1420_v32  ;;  %v1532_v41 = vadd.f32 0.112945676, %v1531_v51  ;;  %vm1462_vm9 = vweird.f32 %v7839_v36  ;;  %v1446_v17 = vmul.f32 %v1445_v13, %v7687_v60 }
 0x16b   : > { %v1664_v8 = vpop.f32.mrf.mxu0  ;;  %v1459_v58 = vsub.f32 1.0, %v1458_v40  ;;  %v1495_v55 = vmul.f32 %v1494_v22, %v7794_v33  ;;  %v1520_v61 = vmul.f32 %v1519_v3, %v7817_v20  ;;  %vm1464_vm10 = vmor %vm1462_vm9, %vm1463_vm7  ;;  %v1469_v52 = vor.u32 1.1754944e-38, %v1468_v48 }
 0x16c   : > { %v7856_v34 = vadd.f32 %v7849_v12, %v1664_v8  ;;  %v1425_v50 = vsel %vm1424_vm6, %v6829_v6, %v1421_v14  ;;  %v1533_v5 = vmul.f32 %v1532_v41, %v7817_v20  ;;  %vm1467_vm11 = vcmp.eq.f32.partialorder %v1466_v29, 8.507059e+37 }
 0x16d   : > { %v1430_v38 = vsel %vm1427_vm5, %v1429_v7, %v1425_v50  ;;  %v1460_v1 = vmul.f32 %v6831_v49, %v1459_v58  ;;  %v1496_v30 = vadd.f32 1.0, %v1495_v55  ;;  %v1482_v45 = vmul.f32 %v1481_v19, %v7794_v33 }
 0x16e   : > { %v7861_v16 = vmul.f32 0.70710677, %v7856_v34  ;;  %v1431_v53 = vmul.f32 %v1430_v38, %v1406_v43  ;;  %v1534_v26 = vadd.f32 0.4994258, %v1533_v5  ;;  %v1521_v60 = vadd.f32 0.05243302, %v1520_v61 }
 0x16f   : > { %v1461_v46 = vadd.f32 %v6831_v49, %v1460_v1  ;;  %6832 = vrcp.f32 %v1496_v30  ;;  %v894_v57 = vmul.f32 0.5, %v7645_v31  ;;  %v895_v10 = vmul.f32 0.5, %v7672_v18 }
 0x170   : > { %v1736_v62 = vmul.f32 %v7861_v16, %v7861_v16  ;;  %v6270_v56 = vclamps-f32 %v1431_v53, 1.0  ;;  %v1535_v54 = vmul.f32 %v1534_v26, %v7817_v20  ;;  %v1483_v13 = vadd.f32 0.18741608, %v1482_v45 }
 0x171   : > { %v1465_v28 = vsel %vm1464_vm10, %v6831_v49, %v1461_v46  ;;  %v1522_v23 = vmul.f32 %v1521_v60, %v7817_v20  ;;  %vm1502_vm13 = vweird.f32 %v1496_v30  ;;  %v1506_v22 = vand.u32 2147483647, %v1496_v30 }
 0x172   : > { %v7870_v39 = vmin.f32 %v1736_v62, 16.0  ;;  %v1470_v6 = vsel %vm1467_vm11, %v1469_v52, %v1465_v28  ;;  %v1566_v11 = vadd.f32 1.0, %v6270_v56  ;;  %v7882_v43 = vadd.f32 1.0, %v1535_v54 }
 0x173   : > { %v1471_v36 = vmul.f32 %v1470_v6, %v1446_v17  ;;  %v1666_v44 = vpop.f32.mrf.mxu0  ;;  %v1484_v32 = vmul.f32 %v1483_v13, %v7794_v33  ;;  %v1523_v14 = vadd.f32 0.18741608, %v1522_v23  ;;  %v1508_v62 = vand.u32 2147483648, %v1496_v30 }
 0x174   : > { %v1749_v15 = vmul.f32 3.8918573e-05, %v7870_v39  ;;  %6834 = vrcp.f32 %v7882_v43  ;;  %v1582_v47 = vmul.f32 %v1566_v11, %v894_v57  ;;  %v7890_v3 = vadd.f32 %v7849_v12, %v1666_v44 }
 0x175   : > { %v6271_v35 = vclamps-f32 %v1471_v36, 1.0  ;;  %v6833_v9 = vpop.eup %6832  ;;  %v1738_v18 = vmul.f32 2.1237322e-06, %v7870_v39  ;;  %v1485_v41 = vadd.f32 1.1283791, %v1484_v32  ;;  %v1524_v55 = vmul.f32 %v1523_v14, %v7817_v20 }
 0x176   : > { %v1750_v4 = vadd.f32 0.001143296, %v1749_v15  ;;  %v1498_v27 = vmul.f32 %v6833_v9, %v1496_v30  ;;  %vm1503_vm12 = vweird.f32 %v6833_v9  ;;  %v7896_v29 = vmul.f32 0.70710677, %v7890_v3 }
 0x177   : > { %v1567_v37 = vadd.f32 1.0, %v6271_v35  ;;  %v1739_v50 = vadd.f32 0.00028619796, %v1738_v18  ;;  %vm1504_vm14 = vmor %vm1502_vm13, %vm1503_vm12  ;;  %v1509_v19 = vor.u32 1.1754944e-38, %v1508_v62  ;;  %vm1507_vm15 = vcmp.eq.f32.partialorder %v1506_v22, 8.507059e+37 }
 0x178   : > { %v1751_v25 = vmul.f32 %v1750_v4, %v7870_v39  ;;  %v1499_v31 = vsub.f32 1.0, %v1498_v27  ;;  %v1776_v48 = vmul.f32 %v7896_v29, %v7896_v29  ;;  %v1486_v15 = vmul.f32 %v1485_v41, %v7768_v0 }
 0x179   : > { %v1583_v59 = vmul.f32 %v1567_v37, %v895_v10  ;;  %v1740_v46 = vmul.f32 %v1739_v50, %v7870_v39  ;;  %v1548_v52 = vand.u32 2147483648, %v7882_v43  ;;  %v1525_v4 = vadd.f32 1.1283791, %v1524_v55 }
 0x17a   : > { %v1752_v63 = vadd.f32 0.014752088, %v1751_v25  ;;  %v1500_v42 = vmul.f32 %v6833_v9, %v1499_v31  ;;  %v6835_v51 = vpop.eup %6834  ;;  %v7903_v5 = vmin.f32 %v1776_v48, 16.0  ;;  %v1546_v56 = vand.u32 2147483647, %v7882_v43 }
 0x17b   : > { %v1592_v40 = vpack.c.bf16 %v1583_v59, %v1582_v47  ;;  %v1538_v33 = vmul.f32 %v6835_v51, %v7882_v43  ;;  %vm1543_vm0 = vweird.f32 %v6835_v51  ;;  %vm1542_vm1 = vweird.f32 %v7882_v43 }
 0x17c   : > { %v1753_v8 = vmul.f32 %v1752_v63, %v7870_v39  ;;  %v1501_v58 = vadd.f32 %v6833_v9, %v1500_v42  ;;  %v1789_v30 = vmul.f32 3.8918573e-05, %v7903_v5  ;;  %v1778_v17 = vmul.f32 2.1237322e-06, %v7903_v5  ;;  %vm1544_vm2 = vmor %vm1542_vm1, %vm1543_vm0 }
 0x17d   : > { %6296 = vmatmul.msk.bf16.gmra.mxu2 %vm1630_vm8, %v1592_v40  ;;  %v1539_v1 = vsub.f32 1.0, %v1538_v33  ;;  %v1741_v0 = vadd.f32 0.0036580483, %v1740_v46  ;;  %v1549_v63 = vor.u32 1.1754944e-38, %v1548_v52  ;;  %v1526_v60 = vmul.f32 %v1525_v4, %v7797_v2 }
 0x17e   : > { %v1754_v49 = vadd.f32 0.112945676, %v1753_v8  ;;  %v1505_v38 = vsel %vm1504_vm14, %v6833_v9, %v1501_v58  ;;  %v1790_v20 = vadd.f32 0.001143296, %v1789_v30  ;;  %v1779_v36 = vadd.f32 0.00028619796, %v1778_v17 }
 0x17f   : > { %v1510_v26 = vsel %vm1507_vm15, %v1509_v19, %v1505_v38  ;;  %v1540_v61 = vmul.f32 %v6835_v51, %v1539_v1  ;;  %vm1547_vm3 = vcmp.eq.f32.partialorder %v1546_v56, 8.507059e+37  ;;  %v1742_v9 = vmul.f32 %v1741_v0, %v7870_v39 }
 0x180   : > { %v1755_v7 = vmul.f32 %v1754_v49, %v7870_v39  ;;  %v1511_v6 = vmul.f32 %v1510_v26, %v1486_v15  ;;  %v1791_v45 = vmul.f32 %v1790_v20, %v7903_v5  ;;  %v1780_v13 = vmul.f32 %v1779_v36, %v7903_v5 }
 0x181   : > { %v1541_v25 = vadd.f32 %v6835_v51, %v1540_v61  ;;  %v1743_v2 = vadd.f32 0.05243302, %v1742_v9  ;;  %v897_v49 = vmul.f32 0.5, %v7784_v24  ;;  %v896_v32 = vmul.f32 0.5, %v7749_v21 }
 0x182   : > { %v1756_v53 = vadd.f32 0.4994258, %v1755_v7  ;;  %v1792_v35 = vadd.f32 0.014752088, %v1791_v45  ;;  %v6272_v57 = vclamps-f32 %v1511_v6, 1.0 }
 0x183   : > { %v1545_v54 = vsel %vm1544_vm2, %v6835_v51, %v1541_v25  ;;  %v1781_v31 = vadd.f32 0.0036580483, %v1780_v13  ;;  %v1744_v62 = vmul.f32 %v1743_v2, %v7870_v39 }
 0x184   : > { %v1757_v28 = vmul.f32 %v1756_v53, %v7870_v39  ;;  %v1550_v8 = vsel %vm1547_vm3, %v1549_v63, %v1545_v54  ;;  %v1793_v10 = vmul.f32 %v1792_v35, %v7903_v5  ;;  %v1568_v47 = vadd.f32 1.0, %v6272_v57 }
 0x185   : > { %v1551_v43 = vmul.f32 %v1550_v8, %v1526_v60  ;;  %v1782_v22 = vmul.f32 %v1781_v31, %v7903_v5  ;;  %v1745_v50 = vadd.f32 0.18741608, %v1744_v62 }
 0x186   : > { %v7915_v11 = vadd.f32 1.0, %v1757_v28  ;;  %v1794_v37 = vadd.f32 0.112945676, %v1793_v10  ;;  %v1584_v51 = vmul.f32 %v1568_v47, %v896_v32 }
 0x187   : > { %v6273_v27 = vclamps-f32 %v1551_v43, 1.0  ;;  %v1669_v23 = vpop.f32.mrf.mxu0  ;;  %v1783_v38 = vadd.f32 0.05243302, %v1782_v22  ;;  %v1746_v46 = vmul.f32 %v1745_v50, %v7870_v39 }
 0x188   : > { %6836 = vrcp.f32 %v7915_v11  ;;  %v1795_v59 = vmul.f32 %v1794_v37, %v7903_v5  ;;  %v7923_v44 = vadd.f32 %v7849_v12, %v1669_v23  ;;  %vm1764_vm4 = vweird.f32 %v7915_v11 }
 0x189   : > { %v1569_v40 = vadd.f32 1.0, %v6273_v27  ;;  %v1784_v61 = vmul.f32 %v1783_v38, %v7903_v5  ;;  %v1747_v6 = vadd.f32 1.1283791, %v1746_v46  ;;  %v1768_v57 = vand.u32 2147483647, %v7915_v11 }
 0x18a   : > { %v1796_v18 = vadd.f32 0.4994258, %v1795_v59  ;;  %v7928_v42 = vmul.f32 0.70710677, %v7923_v44  ;;  %v1770_v8 = vand.u32 2147483648, %v7915_v11 }
 0x18b   : > { %v1585_v14 = vmul.f32 %v1569_v40, %v897_v49  ;;  %v1785_v45 = vadd.f32 0.18741608, %v1784_v61  ;;  %vm1769_vm11 = vcmp.eq.f32.partialorder %v1768_v57, 8.507059e+37 }
 0x18c   : > { %v1797_v7 = vmul.f32 %v1796_v18, %v7903_v5  ;;  %v1816_v24 = vmul.f32 %v7928_v42, %v7928_v42  ;;  %v1771_v40 = vor.u32 1.1754944e-38, %v1770_v8 }
 0x18d   : > { %v1593_v33 = vpack.c.bf16 %v1585_v14, %v1584_v51  ;;  %v1786_v23 = vmul.f32 %v1785_v45, %v7903_v5  ;;  %v1705_v14 = vmul.f32 0.5, %v7890_v3 }
 0x18e   : > { %v7932_v58 = vpop.eup %6836  ;;  %v7937_v21 = vadd.f32 1.0, %v1797_v7  ;;  %v7939_v41 = vmin.f32 %v1816_v24, 16.0 }
 0x18f   : > { %6297 = vmatmul.msk.bf16.vlgmr.msra.gmra.mxu3 %vm1630_vm8, %v1593_v33  ;;  %v1760_v48 = vmul.f32 %v7932_v58, %v7915_v11  ;;  %v1671_v55 = vpop.f32.mrf.mxu0  ;;  %vm1765_vm5 = vweird.f32 %v7932_v58  ;;  %v1787_v33 = vadd.f32 1.1283791, %v1786_v23 }
 0x190   : > { %6838 = vrcp.f32 %v7937_v21  ;;  %v1818_v1 = vmul.f32 2.1237322e-06, %v7939_v41  ;;  %v1829_v19 = vmul.f32 3.8918573e-05, %v7939_v41  ;;  %v7948_v53 = vadd.f32 %v7849_v12, %v1671_v55  ;;  %vm7988_vm7 = vmor %vm1764_vm4, %vm1765_vm5 }
 0x191   : > { %v1761_v30 = vsub.f32 1.0, %v1760_v48  ;;  %v1808_v18 = vand.u32 2147483647, %v7937_v21  ;;  %v1810_v51 = vand.u32 2147483648, %v7937_v21  ;;  %vm1804_vm9 = vweird.f32 %v7937_v21 }
 0x192   : > { %v1819_v15 = vadd.f32 0.00028619796, %v1818_v1  ;;  %v1830_v26 = vadd.f32 0.001143296, %v1829_v19  ;;  %v7952_v17 = vmul.f32 0.70710677, %v7948_v53 }
 0x193   : > { %v1762_v39 = vmul.f32 %v7932_v58, %v1761_v30  ;;  %vm1809_vm12 = vcmp.eq.f32.partialorder %v1808_v18, 8.507059e+37 }
 0x194   : > { %v1820_v52 = vmul.f32 %v1819_v15, %v7939_v41  ;;  %v1831_v20 = vmul.f32 %v1830_v26, %v7939_v41  ;;  %v1856_v56 = vmul.f32 %v7952_v17, %v7952_v17  ;;  %v1748_v26 = vmul.f32 %v1747_v6, %v7861_v16  ;;  %v6639_v16 = vld [vmem:[%s11584_s5 + $0x18] sm:$0xff] }
 0x195   : > { %v1763_v10 = vadd.f32 %v7932_v58, %v1762_v39  ;;  %2480 = vmatpush.bf16.msrb.mxu1 %v6639_v16 }
 0x196   : > { %v6839_v4 = vpop.eup %6838  ;;  %v1832_v25 = vadd.f32 0.014752088, %v1831_v20  ;;  %v7961_v0 = vmin.f32 %v1856_v56, 16.0  ;;  %v1821_v54 = vadd.f32 0.0036580483, %v1820_v52  ;;  %v1788_v56 = vmul.f32 %v1787_v33, %v7896_v29 }
 0x197   : > { %v1800_v28 = vmul.f32 %v6839_v4, %v7937_v21  ;;  %vm1805_vm6 = vweird.f32 %v6839_v4  ;;  %v1767_v24 = vsel %vm7988_vm7, %v7932_v58, %v1763_v10  ;;  %v1811_v58 = vor.u32 1.1754944e-38, %v1810_v51 }
 0x198   : > { %v1833_v63 = vmul.f32 %v1832_v25, %v7939_v41  ;;  %v1858_v60 = vmul.f32 2.1237322e-06, %v7961_v0  ;;  %v1869_v35 = vmul.f32 3.8918573e-05, %v7961_v0  ;;  %v1822_v47 = vmul.f32 %v1821_v54, %v7939_v41  ;;  %vm7997_vm10 = vmor %vm1804_vm9, %vm1805_vm6 }
 0x199   : > { %v1801_v36 = vsub.f32 1.0, %v1800_v28  ;;  %v1772_v15 = vsel %vm1769_vm11, %v1771_v40, %v1767_v24 }
 0x19a   : > { %v1834_v43 = vadd.f32 0.112945676, %v1833_v63  ;;  %v1859_v13 = vadd.f32 0.00028619796, %v1858_v60  ;;  %v1870_v37 = vadd.f32 0.001143296, %v1869_v35  ;;  %v1773_v25 = vmul.f32 %v1772_v15, %v1748_v26 }
 0x19b   : > { %v1802_v9 = vmul.f32 %v6839_v4, %v1801_v36  ;;  %v1823_v11 = vadd.f32 0.05243302, %v1822_v47  ;;  %v1704_v26 = vmul.f32 0.5, %v7856_v34 }
 0x19c   : > { %v1835_v49 = vmul.f32 %v1834_v43, %v7939_v41  ;;  %v1860_v31 = vmul.f32 %v1859_v13, %v7961_v0  ;;  %v1871_v32 = vmul.f32 %v1870_v37, %v7961_v0  ;;  %v6638_v43 = vld [vmem:[%s11584_s5 + $0x10] sm:$0xff] }
 0x19d   : > { %v1803_v59 = vadd.f32 %v6839_v4, %v1802_v9  ;;  %v1824_v28 = vmul.f32 %v1823_v11, %v7939_v41  ;;  %v6298_v9 = vclamps-f32 %v1773_v25, 1.0  ;;  %2481 = vmatpush.bf16.msrb.mxu1 %v6638_v43 }
 0x19e   : > { %v1836_v62 = vadd.f32 0.4994258, %v1835_v49  ;;  %v1861_v7 = vadd.f32 0.0036580483, %v1860_v31  ;;  %v1872_v22 = vadd.f32 0.014752088, %v1871_v32 }
 0x19f   : > { %v1807_v21 = vsel %vm7997_vm10, %v6839_v4, %v1803_v59  ;;  %v1825_v29 = vadd.f32 0.18741608, %v1824_v28  ;;  %v2376_v51 = vadd.f32 1.0, %v6298_v9 }
 0x1a0   : > { %v1837_v38 = vmul.f32 %v1836_v62, %v7939_v41  ;;  %v1862_v1 = vmul.f32 %v1861_v7, %v7961_v0  ;;  %v1873_v55 = vmul.f32 %v1872_v22, %v7961_v0  ;;  %v1812_v61 = vsel %vm1809_vm12, %v1811_v58, %v1807_v21  ;;  %v6637_v7 = vld [vmem:[%s11584_s5 + $0x8] sm:$0xff] }
 0x1a1   : > { %v1813_v6 = vmul.f32 %v1812_v61, %v1788_v56  ;;  %v1826_v31 = vmul.f32 %v1825_v29, %v7939_v41  ;;  %2482 = vmatpush.bf16.msrb.mxu1 %v6637_v7 }
 0x1a2   : > { %v8010_v46 = vadd.f32 1.0, %v1837_v38  ;;  %v1874_v30 = vadd.f32 0.112945676, %v1873_v55  ;;  %v1863_v39 = vadd.f32 0.05243302, %v1862_v1 }
 0x1a3   : > { %v1674_v27 = vpop.f32.mrf.mxu1  ;;  %v6299_v37 = vclamps-f32 %v1813_v6, 1.0  ;;  %v1827_v3 = vadd.f32 1.1283791, %v1826_v31 }
 0x1a4   : > { %v7974_v2 = vadd.f32 %v7849_v12, %v1674_v27  ;;  %6840 = vrcp.f32 %v8010_v46  ;;  %v1875_v45 = vmul.f32 %v1874_v30, %v7961_v0  ;;  %v1864_v35 = vmul.f32 %v1863_v39, %v7961_v0  ;;  %v6636_v30 = vld [vmem:[%s11584_s5] sm:$0xff] }
 0x1a5   : > { %v2377_v22 = vadd.f32 1.0, %v6299_v37  ;;  %v1850_v24 = vand.u32 2147483648, %v8010_v46  ;;  %vm1844_vm14 = vweird.f32 %v8010_v46  ;;  %v1848_v21 = vand.u32 2147483647, %v8010_v46  ;;  %2483 = vmatpush.bf16.msrb.mxu1 %v6636_v30 }
 0x1a6   : > { %v7982_v5 = vmul.f32 0.70710677, %v7974_v2  ;;  %v1876_v60 = vadd.f32 0.4994258, %v1875_v45  ;;  %v1865_v32 = vadd.f32 0.18741608, %v1864_v35  ;;  %v2392_v39 = vmul.f32 %v2376_v51, %v1704_v26 }
 0x1a7   : > { %v2393_v61 = vmul.f32 %v2377_v22, %v1705_v14  ;;  %v1828_v25 = vmul.f32 %v1827_v3, %v7928_v42  ;;  %vm1849_vm0 = vcmp.eq.f32.partialorder %v1848_v21, 8.507059e+37  ;;  %v1707_v30 = vmul.f32 0.5, %v7948_v53 }
 0x1a8   : > { %v1896_v48 = vmul.f32 %v7982_v5, %v7982_v5  ;;  %v1877_v10 = vmul.f32 %v1876_v60, %v7961_v0  ;;  %v1866_v38 = vmul.f32 %v1865_v32, %v7961_v0 }
 0x1a9   : > { %v2408_v35 = vpack.c.bf16 %v2393_v61, %v2392_v39 }
 0x1aa   : > { %v8008_v19 = vmin.f32 %v1896_v48, 16.0  ;;  %v6841_v13 = vpop.eup %6840  ;;  %v8038_v49 = vadd.f32 1.0, %v1877_v10  ;;  %v1867_v16 = vadd.f32 1.1283791, %v1866_v38 }
 0x1ab   : > { %v1676_v20 = vpop.f32.mrf.mxu1  ;;  %v1840_v59 = vmul.f32 %v6841_v13, %v8010_v46  ;;  %vm1845_vm13 = vweird.f32 %v6841_v13  ;;  %6330 = vmatmul.msk.bf16.vlgmr.msrb.gmra.mxu1 %vm1630_vm8, %v2408_v35 }
 0x1ac   : > { %v1898_v52 = vmul.f32 2.1237322e-06, %v8008_v19  ;;  %v1909_v4 = vmul.f32 3.8918573e-05, %v8008_v19  ;;  %v8023_v63 = vadd.f32 %v7849_v12, %v1676_v20  ;;  %6842 = vrcp.f32 %v8038_v49  ;;  %vm1846_vm15 = vmor %vm1844_vm14, %vm1845_vm13 }
 0x1ad   : > { %v1841_v62 = vsub.f32 1.0, %v1840_v59  ;;  %v1888_v60 = vand.u32 2147483647, %v8038_v49  ;;  %vm1884_vm2 = vweird.f32 %v8038_v49  ;;  %v1868_v31 = vmul.f32 %v1867_v16, %v7952_v17 }
 0x1ae   : > { %v1899_v36 = vadd.f32 0.00028619796, %v1898_v52  ;;  %v1910_v54 = vadd.f32 0.001143296, %v1909_v4  ;;  %v8028_v8 = vmul.f32 0.70710677, %v8023_v63 }
 0x1af   : > { %v1842_v33 = vmul.f32 %v6841_v13, %v1841_v62  ;;  %v1851_v52 = vor.u32 1.1754944e-38, %v1850_v24  ;;  %vm1889_vm4 = vcmp.eq.f32.partialorder %v1888_v60, 8.507059e+37 }
 0x1b0   : > { %v1911_v57 = vmul.f32 %v1910_v54, %v8008_v19  ;;  %v1900_v27 = vmul.f32 %v1899_v36, %v8008_v19  ;;  %v1936_v47 = vmul.f32 %v8028_v8, %v8028_v8 }
 0x1b1   : > { %v1843_v1 = vadd.f32 %v6841_v13, %v1842_v33 }
 0x1b2   : > { %v1912_v23 = vadd.f32 0.014752088, %v1911_v57  ;;  %v8042_v18 = vmin.f32 %v1936_v47, 16.0  ;;  %v1901_v41 = vadd.f32 0.0036580483, %v1900_v27  ;;  %v6843_v46 = vpop.eup %6842  ;;  %v1890_v57 = vand.u32 2147483648, %v8038_v49 }
 0x1b3   : > { %v1847_v20 = vsel %vm1846_vm15, %v6841_v13, %v1843_v1  ;;  %v1880_v34 = vmul.f32 %v6843_v46, %v8038_v49  ;;  %vm1885_vm1 = vweird.f32 %v6843_v46 }
 0x1b4   : > { %v1913_v40 = vmul.f32 %v1912_v23, %v8008_v19  ;;  %v1938_v11 = vmul.f32 2.1237322e-06, %v8042_v18  ;;  %v1949_v48 = vmul.f32 3.8918573e-05, %v8042_v18  ;;  %v1902_v4 = vmul.f32 %v1901_v41, %v8008_v19  ;;  %vm1886_vm3 = vmor %vm1884_vm2, %vm1885_vm1 }
 0x1b5   : > { %v1852_v45 = vsel %vm1849_vm0, %v1851_v52, %v1847_v20  ;;  %v1881_v54 = vsub.f32 1.0, %v1880_v34  ;;  %v1891_v32 = vor.u32 1.1754944e-38, %v1890_v57 }
 0x1b6   : > { %v1914_v50 = vadd.f32 0.112945676, %v1913_v40  ;;  %v1939_v58 = vadd.f32 0.00028619796, %v1938_v11  ;;  %v1950_v15 = vadd.f32 0.001143296, %v1949_v48  ;;  %v1853_v13 = vmul.f32 %v1852_v45, %v1828_v25 }
 0x1b7   : > { %v1903_v9 = vadd.f32 0.05243302, %v1902_v4  ;;  %v1882_v37 = vmul.f32 %v6843_v46, %v1881_v54  ;;  %v1706_v4 = vmul.f32 0.5, %v7923_v44 }
 0x1b8   : > { %v1915_v55 = vmul.f32 %v1914_v50, %v8008_v19  ;;  %v1940_v56 = vmul.f32 %v1939_v58, %v8042_v18  ;;  %v1951_v28 = vmul.f32 %v1950_v15, %v8042_v18  ;;  %v6300_v51 = vclamps-f32 %v1853_v13, 1.0 }
 0x1b9   : > { %v1883_v23 = vadd.f32 %v6843_v46, %v1882_v37  ;;  %v1904_v62 = vmul.f32 %v1903_v9, %v8008_v19 }
 0x1ba   : > { %v1916_v0 = vadd.f32 0.4994258, %v1915_v55  ;;  %v1952_v36 = vadd.f32 0.014752088, %v1951_v28  ;;  %v1941_v29 = vadd.f32 0.0036580483, %v1940_v56 }
 0x1bb   : > { %v1887_v14 = vsel %vm1886_vm3, %v6843_v46, %v1883_v23  ;;  %v2378_v48 = vadd.f32 1.0, %v6300_v51  ;;  %v1905_v21 = vadd.f32 0.18741608, %v1904_v62 }
 0x1bc   : > { %v1917_v6 = vmul.f32 %v1916_v0, %v8008_v19  ;;  %v1953_v42 = vmul.f32 %v1952_v36, %v8042_v18  ;;  %v1942_v47 = vmul.f32 %v1941_v29, %v8042_v18  ;;  %v1892_v22 = vsel %vm1889_vm4, %v1891_v32, %v1887_v14 }
 0x1bd   : > { %v1893_v24 = vmul.f32 %v1892_v22, %v1868_v31  ;;  %v2394_v25 = vmul.f32 %v2378_v48, %v1706_v4  ;;  %v1906_v34 = vmul.f32 %v1905_v21, %v8008_v19 }
 0x1be   : > { %v8069_v10 = vadd.f32 1.0, %v1917_v6  ;;  %v1954_v59 = vadd.f32 0.112945676, %v1953_v42  ;;  %v1943_v41 = vadd.f32 0.05243302, %v1942_v47 }
 0x1bf   : > { %v6301_v3 = vclamps-f32 %v1893_v24, 1.0  ;;  %v1907_v19 = vadd.f32 1.1283791, %v1906_v34 }
 0x1c0   : > { %6844 = vrcp.f32 %v8069_v10  ;;  %v1955_v7 = vmul.f32 %v1954_v59, %v8042_v18  ;;  %v1944_v52 = vmul.f32 %v1943_v41, %v8042_v18  ;;  %v1928_v6 = vand.u32 2147483647, %v8069_v10 }
 0x1c1   : > { %v2379_v26 = vadd.f32 1.0, %v6301_v3  ;;  %v1930_v54 = vand.u32 2147483648, %v8069_v10  ;;  %vm1924_vm6 = vweird.f32 %v8069_v10  ;;  %v1908_v31 = vmul.f32 %v1907_v19, %v7982_v5 }
 0x1c2   : > { %v1679_v43 = vpop.f32.mrf.mxu1  ;;  %v1956_v33 = vadd.f32 0.4994258, %v1955_v7  ;;  %v1945_v53 = vadd.f32 0.18741608, %v1944_v52  ;;  %vm1929_vm9 = vcmp.eq.f32.partialorder %v1928_v6, 8.507059e+37 }
 0x1c3   : > { %v8073_v27 = vadd.f32 %v7849_v12, %v1679_v43  ;;  %v2395_v0 = vmul.f32 %v2379_v26, %v1707_v30 }
 0x1c4   : > { %v1957_v1 = vmul.f32 %v1956_v33, %v8042_v18  ;;  %v1946_v9 = vmul.f32 %v1945_v53, %v8042_v18 }
 0x1c5   : > { %v8081_v40 = vmul.f32 0.70710677, %v8073_v27  ;;  %v2409_v36 = vpack.c.bf16 %v2395_v0, %v2394_v25 }
 0x1c6   : > { %v6845_v17 = vpop.eup %6844  ;;  %v8099_v46 = vadd.f32 1.0, %v1957_v1  ;;  %v1947_v7 = vadd.f32 1.1283791, %v1946_v9  ;;  %v1709_v9 = vmul.f32 0.5, %v8023_v63 }
 0x1c7   : > { %v1976_v49 = vmul.f32 %v8081_v40, %v8081_v40  ;;  %v1920_v38 = vmul.f32 %v6845_v17, %v8069_v10  ;;  %vm1925_vm5 = vweird.f32 %v6845_v17  ;;  %6331 = vmatmul.msk.bf16.gmra.mxu1 %vm1630_vm8, %v2409_v36  ;;  %v1931_v10 = vor.u32 1.1754944e-38, %v1930_v54 }
 0x1c8   : > { %6846 = vrcp.f32 %v8099_v46  ;;  %vm8116_vm7 = vmor %vm1924_vm6, %vm1925_vm5  ;;  %v1970_v24 = vand.u32 2147483648, %v8099_v46  ;;  %v1968_v5 = vand.u32 2147483647, %v8099_v46  ;;  %vm1964_vm11 = vweird.f32 %v8099_v46 }
 0x1c9   : > { %v8087_v50 = vmin.f32 %v1976_v49, 16.0  ;;  %v1921_v61 = vsub.f32 1.0, %v1920_v38 }
 0x1ca   : > { %v1681_v11 = vpop.f32.mrf.mxu1  ;;  %v1971_v26 = vor.u32 1.1754944e-38, %v1970_v24  ;;  %vm1969_vm13 = vcmp.eq.f32.partialorder %v1968_v5, 8.507059e+37 }
 0x1cb   : > { %v1978_v55 = vmul.f32 2.1237322e-06, %v8087_v50  ;;  %v1989_v58 = vmul.f32 3.8918573e-05, %v8087_v50  ;;  %v8094_v15 = vadd.f32 %v7849_v12, %v1681_v11  ;;  %v1922_v56 = vmul.f32 %v6845_v17, %v1921_v61 }
 0x1cd   : > { %v1990_v20 = vadd.f32 0.001143296, %v1989_v58  ;;  %v1979_v28 = vadd.f32 0.00028619796, %v1978_v55  ;;  %v8102_v39 = vmul.f32 0.70710677, %v8094_v15  ;;  %v1923_v16 = vadd.f32 %v6845_v17, %v1922_v56 }
 0x1ce   : > { %v6847_v13 = vpop.eup %6846  ;;  %v1948_v55 = vmul.f32 %v1947_v7, %v8028_v8 }
 0x1cf   : > { %v1991_v45 = vmul.f32 %v1990_v20, %v8087_v50  ;;  %v2016_v44 = vmul.f32 %v8102_v39, %v8102_v39  ;;  %v1980_v60 = vmul.f32 %v1979_v28, %v8087_v50  ;;  %v1927_v37 = vsel %vm8116_vm7, %v6845_v17, %v1923_v16 }
 0x1d0   : > { %v1960_v47 = vmul.f32 %v6847_v13, %v8099_v46  ;;  %v1932_v62 = vsel %vm1929_vm9, %v1931_v10, %v1927_v37  ;;  %vm1965_vm10 = vweird.f32 %v6847_v13 }
 0x1d1   : > { %v1992_v29 = vadd.f32 0.014752088, %v1991_v45  ;;  %v8112_v35 = vmin.f32 %v2016_v44, 16.0  ;;  %v1981_v59 = vadd.f32 0.0036580483, %v1980_v60  ;;  %v1933_v3 = vmul.f32 %v1932_v62, %v1908_v31  ;;  %vm1966_vm12 = vmor %vm1964_vm11, %vm1965_vm10 }
 0x1d2   : > { %v1961_v22 = vsub.f32 1.0, %v1960_v47 }
 0x1d3   : > { %v1993_v42 = vmul.f32 %v1992_v29, %v8087_v50  ;;  %v2018_v43 = vmul.f32 2.1237322e-06, %v8112_v35  ;;  %v2029_v23 = vmul.f32 3.8918573e-05, %v8112_v35  ;;  %v1982_v48 = vmul.f32 %v1981_v59, %v8087_v50 }
 0x1d4   : > { %v1962_v11 = vmul.f32 %v6847_v13, %v1961_v22  ;;  %v6302_v56 = vclamps-f32 %v1933_v3, 1.0  ;;  %v1708_v29 = vmul.f32 0.5, %v7974_v2 }
 0x1d5   : > { %v1994_v32 = vadd.f32 0.112945676, %v1993_v42  ;;  %v2019_v51 = vadd.f32 0.00028619796, %v2018_v43  ;;  %v2030_v18 = vadd.f32 0.001143296, %v2029_v23 }
 0x1d6   : > { %v1963_v58 = vadd.f32 %v6847_v13, %v1962_v11  ;;  %v1983_v0 = vadd.f32 0.05243302, %v1982_v48  ;;  %v2380_v19 = vadd.f32 1.0, %v6302_v56 }
 0x1d7   : > { %v1684_v14 = vpop.f32.mrf.mxu1  ;;  %v1995_v41 = vmul.f32 %v1994_v32, %v8087_v50  ;;  %v2020_v33 = vmul.f32 %v2019_v51, %v8112_v35  ;;  %v2031_v17 = vmul.f32 %v2030_v18, %v8112_v35 }
 0x1d8   : > { %v8129_v49 = vadd.f32 %v7849_v12, %v1684_v14  ;;  %v1967_v20 = vsel %vm1966_vm12, %v6847_v13, %v1963_v58  ;;  %v1984_v36 = vmul.f32 %v1983_v0, %v8087_v50  ;;  %v2396_v2 = vmul.f32 %v2380_v19, %v1708_v29 }
 0x1d9   : > { %v1996_v21 = vadd.f32 0.4994258, %v1995_v41  ;;  %v2021_v38 = vadd.f32 0.0036580483, %v2020_v33  ;;  %v2032_v1 = vadd.f32 0.014752088, %v2031_v17  ;;  %v1972_v28 = vsel %vm1969_vm13, %v1971_v26, %v1967_v20 }
 0x1da   : > { %v8140_v30 = vmul.f32 0.70710677, %v8129_v49  ;;  %v1973_v53 = vmul.f32 %v1972_v28, %v1948_v55  ;;  %v1985_v59 = vadd.f32 0.18741608, %v1984_v36 }
 0x1db   : > { %v1997_v61 = vmul.f32 %v1996_v21, %v8087_v50  ;;  %v2022_v52 = vmul.f32 %v2021_v38, %v8112_v35  ;;  %v2033_v4 = vmul.f32 %v2032_v1, %v8112_v35 }
 0x1dc   : > { %v2056_v8 = vmul.f32 %v8140_v30, %v8140_v30  ;;  %v6303_v6 = vclamps-f32 %v1973_v53, 1.0  ;;  %v1986_v17 = vmul.f32 %v1985_v59, %v8087_v50 }
 0x1dd   : > { %v8147_v46 = vadd.f32 1.0, %v1997_v61  ;;  %v2034_v25 = vadd.f32 0.112945676, %v2033_v4  ;;  %v2023_v45 = vadd.f32 0.05243302, %v2022_v52 }
 0x1de   : > { %v8149_v44 = vmin.f32 %v2056_v8, 16.0  ;;  %v2381_v42 = vadd.f32 1.0, %v6303_v6  ;;  %v1987_v0 = vadd.f32 1.1283791, %v1986_v17 }
 0x1df   : > { %v1686_v34 = vpop.f32.mrf.mxu1  ;;  %6848 = vrcp.f32 %v8147_v46  ;;  %v2035_v54 = vmul.f32 %v2034_v25, %v8112_v35  ;;  %v2024_v43 = vmul.f32 %v2023_v45, %v8112_v35  ;;  %v2010_v5 = vand.u32 2147483648, %v8147_v46 }
 0x1e0   : > { %v8153_v16 = vadd.f32 %v7849_v12, %v1686_v34  ;;  %v2058_v60 = vmul.f32 2.1237322e-06, %v8149_v44  ;;  %v2069_v57 = vmul.f32 3.8918573e-05, %v8149_v44  ;;  %v2397_v47 = vmul.f32 %v2381_v42, %v1709_v9 }
 0x1e1   : > { %v2036_v13 = vadd.f32 0.4994258, %v2035_v54  ;;  %v2025_v62 = vadd.f32 0.18741608, %v2024_v43  ;;  %v2008_v58 = vand.u32 2147483647, %v8147_v46  ;;  %vm2004_vm15 = vweird.f32 %v8147_v46 }
 0x1e2   : > { %v2059_v37 = vadd.f32 0.00028619796, %v2058_v60  ;;  %v2070_v23 = vadd.f32 0.001143296, %v2069_v57  ;;  %v8163_v10 = vmul.f32 0.70710677, %v8153_v16  ;;  %v2410_v33 = vpack.c.bf16 %v2397_v47, %v2396_v2 }
 0x1e3   : > { %v2037_v31 = vmul.f32 %v2036_v13, %v8112_v35  ;;  %v2026_v26 = vmul.f32 %v2025_v62, %v8112_v35  ;;  %v2011_v8 = vor.u32 1.1754944e-38, %v2010_v5  ;;  %vm2009_vm1 = vcmp.eq.f32.partialorder %v2008_v58, 8.507059e+37 }
 0x1e4   : > { %v2060_v51 = vmul.f32 %v2059_v37, %v8149_v44  ;;  %v2071_v18 = vmul.f32 %v2070_v23, %v8149_v44  ;;  %v2096_v63 = vmul.f32 %v8163_v10, %v8163_v10  ;;  %6332 = vmatmul.msk.bf16.gmra.mxu1 %vm1630_vm8, %v2410_v33  ;;  %v1988_v29 = vmul.f32 %v1987_v0, %v8081_v40 }
 0x1e5   : > { %v6849_v32 = vpop.eup %6848  ;;  %v8171_v7 = vadd.f32 1.0, %v2037_v31 }
 0x1e6   : > { %v2000_v14 = vmul.f32 %v6849_v32, %v8147_v46  ;;  %v2061_v22 = vadd.f32 0.0036580483, %v2060_v51  ;;  %v2072_v24 = vadd.f32 0.014752088, %v2071_v18  ;;  %v8173_v41 = vmin.f32 %v2096_v63, 16.0 }
 0x1e7   : > { %6850 = vrcp.f32 %v8171_v7  ;;  %vm2005_vm14 = vweird.f32 %v6849_v32  ;;  %v2027_v46 = vadd.f32 1.1283791, %v2026_v26  ;;  %v2048_v57 = vand.u32 2147483647, %v8171_v7 }
 0x1e8   : > { %v2001_v11 = vsub.f32 1.0, %v2000_v14  ;;  %v2062_v48 = vmul.f32 %v2061_v22, %v8149_v44  ;;  %v2073_v3 = vmul.f32 %v2072_v24, %v8149_v44  ;;  %v2098_v1 = vmul.f32 2.1237322e-06, %v8173_v41  ;;  %vm2006_vm0 = vmor %vm2004_vm15, %vm2005_vm14 }
 0x1e9   : > { %v2109_v55 = vmul.f32 3.8918573e-05, %v8173_v41  ;;  %v2050_v42 = vand.u32 2147483648, %v8171_v7  ;;  %v2028_v31 = vmul.f32 %v2027_v46, %v8102_v39  ;;  %vm2044_vm3 = vweird.f32 %v8171_v7  ;;  %v8217_v39 = vld [vmem:[%s11583_s4] ss:$0 sm:$0xff] }
 0x1ea   : > { %v2002_v38 = vmul.f32 %v6849_v32, %v2001_v11  ;;  %v2074_v61 = vadd.f32 0.112945676, %v2073_v3  ;;  %v2099_v4 = vadd.f32 0.00028619796, %v2098_v1  ;;  %v2063_v34 = vadd.f32 0.05243302, %v2062_v48 }
 0x1eb   : > { %v1689_v21 = vpop.f32.mrf.mxu2  ;;  %v2110_v20 = vadd.f32 0.001143296, %v2109_v55  ;;  %vm2049_vm4 = vcmp.eq.f32.partialorder %v2048_v57, 8.507059e+37  ;;  %v2051_v14 = vor.u32 1.1754944e-38, %v2050_v42 }
 0x1ec   : > { %v8184_v50 = vadd.f32 %v7849_v12, %v1689_v21  ;;  %v2003_v52 = vadd.f32 %v6849_v32, %v2002_v38  ;;  %v2075_v56 = vmul.f32 %v2074_v61, %v8149_v44  ;;  %v2100_v35 = vmul.f32 %v2099_v4, %v8173_v41 }
 0x1ed   : > { %v6851_v12 = vpop.eup %6850  ;;  %v2111_v53 = vmul.f32 %v2110_v20, %v8173_v41  ;;  %v2064_v43 = vmul.f32 %v2063_v34, %v8149_v44 }
 0x1ee   : > { %v8192_v28 = vmul.f32 0.70710677, %v8184_v50  ;;  %v2007_v25 = vsel %vm2006_vm0, %v6849_v32, %v2003_v52  ;;  %v2040_v45 = vmul.f32 %v6851_v12, %v8171_v7  ;;  %v2076_v36 = vadd.f32 0.4994258, %v2075_v56 }
 0x1ef   : > { %v2012_v6 = vsel %vm2009_vm1, %v2011_v8, %v2007_v25  ;;  %v2101_v54 = vadd.f32 0.0036580483, %v2100_v35  ;;  %v2112_v60 = vadd.f32 0.014752088, %v2111_v53  ;;  %vm2045_vm2 = vweird.f32 %v6851_v12 }
 0x1f0   : > { %v2041_v19 = vsub.f32 1.0, %v2040_v45  ;;  %v2136_v9 = vmul.f32 %v8192_v28, %v8192_v28  ;;  %v2077_v13 = vmul.f32 %v2076_v36, %v8149_v44  ;;  %v2013_v23 = vmul.f32 %v2012_v6, %v1988_v29  ;;  %vm2046_vm5 = vmor %vm2044_vm3, %vm2045_vm2 }
 0x1f1   : > { %v2113_v37 = vmul.f32 %v2112_v60, %v8173_v41  ;;  %v2102_v2 = vmul.f32 %v2101_v54, %v8173_v41  ;;  %v2065_v62 = vadd.f32 0.18741608, %v2064_v43  ;;  %v1710_v56 = vmul.f32 0.5, %v8073_v27 }
 0x1f2   : > { %v2042_v47 = vmul.f32 %v6851_v12, %v2041_v19  ;;  %v8205_v59 = vmin.f32 %v2136_v9, 16.0  ;;  %v8208_v32 = vadd.f32 1.0, %v2077_v13  ;;  %v6304_v24 = vclamps-f32 %v2013_v23, 1.0 }
 0x1f3   : > { %v1691_v40 = vpop.f32.mrf.mxu2  ;;  %v2114_v51 = vadd.f32 0.112945676, %v2113_v37  ;;  %v2103_v5 = vadd.f32 0.05243302, %v2102_v2  ;;  %v2066_v38 = vmul.f32 %v2065_v62, %v8149_v44  ;;  %v1711_v25 = vmul.f32 0.5, %v8094_v15 }
 0x1f4   : > { %v2043_v18 = vadd.f32 %v6851_v12, %v2042_v47  ;;  %v2149_v63 = vmul.f32 3.8918573e-05, %v8205_v59  ;;  %6852 = vrcp.f32 %v8208_v32  ;;  %v8220_v22 = vadd.f32 %v8217_v39, %v1691_v40 }
 0x1f5   : > { %v2115_v7 = vmul.f32 %v2114_v51, %v8173_v41  ;;  %v2138_v17 = vmul.f32 2.1237322e-06, %v8205_v59  ;;  %v2382_v58 = vadd.f32 1.0, %v6304_v24  ;;  %v2104_v20 = vmul.f32 %v2103_v5, %v8173_v41 }
 0x1f6   : > { %v2047_v33 = vsel %vm2046_vm5, %v6851_v12, %v2043_v18  ;;  %v2150_v48 = vadd.f32 0.001143296, %v2149_v63  ;;  %v8227_v55 = vmul.f32 0.70710677, %v8220_v22  ;;  %v2067_v45 = vadd.f32 1.1283791, %v2066_v38 }
 0x1f7   : > { %v2052_v11 = vsel %vm2049_vm4, %v2051_v14, %v2047_v33  ;;  %v2116_v21 = vadd.f32 0.4994258, %v2115_v7  ;;  %v2139_v52 = vadd.f32 0.00028619796, %v2138_v17  ;;  %v2398_v46 = vmul.f32 %v2382_v58, %v1710_v56 }
 0x1f8   : > { %v2053_v3 = vmul.f32 %v2052_v11, %v2028_v31  ;;  %v2151_v1 = vmul.f32 %v2150_v48, %v8205_v59  ;;  %v2176_v8 = vmul.f32 %v8227_v55, %v8227_v55  ;;  %vm2084_vm6 = vweird.f32 %v8208_v32 }
 0x1f9   : > { %v2117_v61 = vmul.f32 %v2116_v21, %v8173_v41  ;;  %v2140_v36 = vmul.f32 %v2139_v52, %v8205_v59  ;;  %v2105_v27 = vadd.f32 0.18741608, %v2104_v20  ;;  %v2088_v15 = vand.u32 2147483647, %v8208_v32 }
 0x1fa   : > { %v6305_v26 = vclamps-f32 %v2053_v3, 1.0  ;;  %v6853_v4 = vpop.eup %6852  ;;  %v2152_v0 = vadd.f32 0.014752088, %v2151_v1  ;;  %v8239_v53 = vmin.f32 %v2176_v8, 16.0  ;;  %v2090_v9 = vand.u32 2147483648, %v8208_v32 }
 0x1fb   : > { %v2080_v12 = vmul.f32 %v6853_v4, %v8208_v32  ;;  %v8236_v34 = vadd.f32 1.0, %v2117_v61  ;;  %vm2085_vm7 = vweird.f32 %v6853_v4  ;;  %v2141_v37 = vadd.f32 0.0036580483, %v2140_v36 }
 0x1fc   : > { %v2383_v44 = vadd.f32 1.0, %v6305_v26  ;;  %v2153_v35 = vmul.f32 %v2152_v0, %v8205_v59  ;;  %v2178_v57 = vmul.f32 2.1237322e-06, %v8239_v53  ;;  %v2189_v42 = vmul.f32 3.8918573e-05, %v8239_v53  ;;  %vm8258_vm9 = vmor %vm2084_vm6, %vm2085_vm7 }
 0x1fd   : > { %v2081_v6 = vsub.f32 1.0, %v2080_v12  ;;  %6854 = vrcp.f32 %v8236_v34  ;;  %v2106_v40 = vmul.f32 %v2105_v27, %v8173_v41  ;;  %v2068_v24 = vmul.f32 %v2067_v45, %v8140_v30 }
 0x1fe   : > { %v2399_v60 = vmul.f32 %v2383_v44, %v1711_v25  ;;  %v2154_v19 = vadd.f32 0.112945676, %v2153_v35  ;;  %v2179_v47 = vadd.f32 0.00028619796, %v2178_v57  ;;  %v2190_v31 = vadd.f32 0.001143296, %v2189_v42 }
 0x1ff   : > { %v2082_v29 = vmul.f32 %v6853_v4, %v2081_v6  ;;  %vm2089_vm10 = vcmp.eq.f32.partialorder %v2088_v15, 8.507059e+37  ;;  %v2091_v32 = vor.u32 1.1754944e-38, %v2090_v9  ;;  %v2142_v11 = vmul.f32 %v2141_v37, %v8205_v59 }
 0x200   : > { %v1694_v54 = vpop.f32.mrf.mxu2  ;;  %v2155_v23 = vmul.f32 %v2154_v19, %v8205_v59  ;;  %v2411_v51 = vpack.c.bf16 %v2399_v60, %v2398_v46  ;;  %v2180_v14 = vmul.f32 %v2179_v47, %v8239_v53  ;;  %v2191_v33 = vmul.f32 %v2190_v31, %v8239_v53 }
 0x201   : > { %v8249_v43 = vadd.f32 %v8217_v39, %v1694_v54  ;;  %v2083_v13 = vadd.f32 %v6853_v4, %v2082_v29  ;;  %v2107_v5 = vadd.f32 1.1283791, %v2106_v40  ;;  %v2128_v1 = vand.u32 2147483647, %v8236_v34 }
 0x202   : > { %v2156_v63 = vadd.f32 0.4994258, %v2155_v23  ;;  %6333 = vmatmul.msk.bf16.gmra.mxu1 %vm1630_vm8, %v2411_v51  ;;  %v2192_v30 = vadd.f32 0.014752088, %v2191_v33  ;;  %v2181_v58 = vadd.f32 0.0036580483, %v2180_v14  ;;  %vm2124_vm12 = vweird.f32 %v8236_v34 }
 0x203   : > { %v8254_v2 = vmul.f32 0.70710677, %v8249_v43  ;;  %v6855_v62 = vpop.eup %6854  ;;  %v2087_v41 = vsel %vm8258_vm9, %v6853_v4, %v2083_v13  ;;  %v2130_v61 = vand.u32 2147483648, %v8236_v34  ;;  %v2143_v8 = vadd.f32 0.05243302, %v2142_v11 }
 0x204   : > { %v2120_v17 = vmul.f32 %v6855_v62, %v8236_v34  ;;  %v2157_v48 = vmul.f32 %v2156_v63, %v8205_v59  ;;  %v2092_v21 = vsel %vm2089_vm10, %v2091_v32, %v2087_v41  ;;  %v2193_v4 = vmul.f32 %v2192_v30, %v8239_v53 }
 0x205   : > { %v2216_v7 = vmul.f32 %v8254_v2, %v8254_v2  ;;  %vm2125_vm11 = vweird.f32 %v6855_v62  ;;  %v2093_v44 = vmul.f32 %v2092_v21, %v2068_v24  ;;  %v2182_v35 = vmul.f32 %v2181_v58, %v8239_v53 }
 0x206   : > { %v2121_v38 = vsub.f32 1.0, %v2120_v17  ;;  %v8277_v52 = vadd.f32 1.0, %v2157_v48  ;;  %v2194_v46 = vadd.f32 0.112945676, %v2193_v4  ;;  %v2108_v45 = vmul.f32 %v2107_v5, %v8163_v10  ;;  %vm2126_vm13 = vmor %vm2124_vm12, %vm2125_vm11 }
 0x207   : > { %v8273_v3 = vmin.f32 %v2216_v7, 16.0  ;;  %v2131_v6 = vor.u32 1.1754944e-38, %v2130_v61  ;;  %vm2129_vm14 = vcmp.eq.f32.partialorder %v2128_v1, 8.507059e+37  ;;  %v2144_v27 = vmul.f32 %v2143_v8, %v8205_v59 }
 0x208   : > { %v1696_v26 = vpop.f32.mrf.mxu2  ;;  %v2122_v0 = vmul.f32 %v6855_v62, %v2121_v38  ;;  %6856 = vrcp.f32 %v8277_v52  ;;  %v2195_v29 = vmul.f32 %v2194_v46, %v8239_v53  ;;  %v6306_v15 = vclamps-f32 %v2093_v44, 1.0 }
 0x209   : > { %v2218_v20 = vmul.f32 2.1237322e-06, %v8273_v3  ;;  %v2229_v56 = vmul.f32 3.8918573e-05, %v8273_v3  ;;  %v8284_v12 = vadd.f32 %v8217_v39, %v1696_v26  ;;  %v2183_v42 = vadd.f32 0.05243302, %v2182_v35 }
 0x20a   : > { %v2123_v25 = vadd.f32 %v6855_v62, %v2122_v0  ;;  %v2196_v10 = vadd.f32 0.4994258, %v2195_v29  ;;  %v2145_v31 = vadd.f32 0.18741608, %v2144_v27  ;;  %v2384_v18 = vadd.f32 1.0, %v6306_v15 }
 0x20b   : > { %v2219_v36 = vadd.f32 0.00028619796, %v2218_v20  ;;  %v2230_v54 = vadd.f32 0.001143296, %v2229_v56  ;;  %v8293_v34 = vmul.f32 0.70710677, %v8284_v12  ;;  %v2184_v7 = vmul.f32 %v2183_v42, %v8239_v53 }
 0x20c   : > { %v2127_v60 = vsel %vm2126_vm13, %v6855_v62, %v2123_v25  ;;  %v2197_v63 = vmul.f32 %v2196_v10, %v8239_v53  ;;  %v1713_v24 = vmul.f32 0.5, %v8153_v16  ;;  %v1712_v32 = vmul.f32 0.5, %v8129_v49 }
 0x20d   : > { %v2132_v19 = vsel %vm2129_vm14, %v2131_v6, %v2127_v60  ;;  %v2231_v57 = vmul.f32 %v2230_v54, %v8273_v3  ;;  %v2220_v37 = vmul.f32 %v2219_v36, %v8273_v3  ;;  %v2256_v47 = vmul.f32 %v8293_v34, %v8293_v34 }
 0x20e   : > { %v2133_v9 = vmul.f32 %v2132_v19, %v2108_v45  ;;  %v6857_v13 = vpop.eup %6856  ;;  %v8306_v17 = vadd.f32 1.0, %v2197_v63  ;;  %v2400_v38 = vmul.f32 %v2384_v18, %v1712_v32  ;;  %v2146_v1 = vmul.f32 %v2145_v31, %v8205_v59 }
 0x20f   : > { %v2232_v23 = vadd.f32 0.014752088, %v2231_v57  ;;  %v2160_v51 = vmul.f32 %v6857_v13, %v8277_v52  ;;  %v8301_v62 = vmin.f32 %v2256_v47, 16.0  ;;  %v2221_v11 = vadd.f32 0.0036580483, %v2220_v37 }
 0x210   : > { %v6307_v40 = vclamps-f32 %v2133_v9, 1.0  ;;  %6858 = vrcp.f32 %v8306_v17  ;;  %vm2165_vm15 = vweird.f32 %v6857_v13  ;;  %v2168_v58 = vand.u32 2147483647, %v8277_v52 }
 0x211   : > { %v2233_v14 = vmul.f32 %v2232_v23, %v8273_v3  ;;  %v2161_v33 = vsub.f32 1.0, %v2160_v51  ;;  %v2258_v21 = vmul.f32 2.1237322e-06, %v8301_v62  ;;  %v2185_v26 = vadd.f32 0.18741608, %v2184_v7 }
 0x212   : > { %v2385_v41 = vadd.f32 1.0, %v6307_v40  ;;  %v1699_v16 = vpop.f32.mrf.mxu3  ;;  %v2222_v4 = vmul.f32 %v2221_v11, %v8273_v3  ;;  %v2269_v20 = vmul.f32 3.8918573e-05, %v8301_v62  ;;  %v2170_v8 = vand.u32 2147483648, %v8277_v52 }
 0x213   : > { %v2234_v5 = vadd.f32 0.112945676, %v2233_v14  ;;  %v2162_v30 = vmul.f32 %v6857_v13, %v2161_v33  ;;  %v2259_v44 = vadd.f32 0.00028619796, %v2258_v21  ;;  %vm2164_vm0 = vweird.f32 %v8277_v52 }
 0x214   : > { %v2401_v48 = vmul.f32 %v2385_v41, %v1713_v24  ;;  %v2270_v59 = vadd.f32 0.001143296, %v2269_v20  ;;  %v8319_v25 = vadd.f32 %v8217_v39, %v1699_v16  ;;  %v2147_v35 = vadd.f32 1.1283791, %v2146_v1  ;;  %vm8322_vm1 = vmor %vm2164_vm0, %vm2165_vm15 }
 0x215   : > { %v2235_v49 = vmul.f32 %v2234_v5, %v8273_v3  ;;  %v2163_v61 = vadd.f32 %v6857_v13, %v2162_v30  ;;  %v2186_v45 = vmul.f32 %v2185_v26, %v8239_v53  ;;  %v2223_v54 = vadd.f32 0.05243302, %v2222_v4 }
 0x216   : > { %v2412_v0 = vpack.c.bf16 %v2401_v48, %v2400_v38  ;;  %v6859_v36 = vpop.eup %6858  ;;  %v2271_v60 = vmul.f32 %v2270_v59, %v8301_v62  ;;  %v8332_v27 = vmul.f32 0.70710677, %v8319_v25  ;;  %vm2169_vm2 = vcmp.eq.f32.partialorder %v2168_v58, 8.507059e+37 }
 0x217   : > { %v2236_v56 = vadd.f32 0.4994258, %v2235_v49  ;;  %v2167_v52 = vsel %vm8322_vm1, %v6857_v13, %v2163_v61  ;;  %v2171_v29 = vor.u32 1.1754944e-38, %v2170_v8  ;;  %v2200_v15 = vmul.f32 %v6859_v36, %v8306_v17 }
 0x218   : > { %6334 = vmatmul.msk.bf16.gmra.mxu1 %vm1630_vm8, %v2412_v0  ;;  %v2260_v19 = vmul.f32 %v2259_v44, %v8301_v62  ;;  %v2208_v53 = vand.u32 2147483647, %v8306_v17  ;;  %v2272_v9 = vadd.f32 0.014752088, %v2271_v60  ;;  %v2296_v42 = vmul.f32 %v8332_v27, %v8332_v27 }
 0x219   : > { %v2237_v6 = vmul.f32 %v2236_v56, %v8273_v3  ;;  %v2172_v13 = vsel %vm2169_vm2, %v2171_v29, %v2167_v52  ;;  %v2201_v37 = vsub.f32 1.0, %v2200_v15  ;;  %v2210_v23 = vand.u32 2147483648, %v8306_v17 }
 0x21a   : > { %v1701_v10 = vpop.f32.mrf.mxu3  ;;  %v2148_v40 = vmul.f32 %v2147_v35, %v8192_v28  ;;  %v2187_v31 = vadd.f32 1.1283791, %v2186_v45  ;;  %v2224_v51 = vmul.f32 %v2223_v54, %v8273_v3  ;;  %vm2205_vm3 = vweird.f32 %v6859_v36 }
 0x21b   : > { %v8337_v57 = vadd.f32 1.0, %v2237_v6  ;;  %v8343_v47 = vadd.f32 %v8217_v39, %v1701_v10  ;;  %v2202_v18 = vmul.f32 %v6859_v36, %v2201_v37  ;;  %v2261_v63 = vadd.f32 0.0036580483, %v2260_v19 }
 0x21c   : > { %v2273_v14 = vmul.f32 %v2272_v9, %v8301_v62  ;;  %v2173_v24 = vmul.f32 %v2172_v13, %v2148_v40  ;;  %vm2204_vm4 = vweird.f32 %v8306_v17  ;;  %vm8350_vm5 = vcmp.eq.f32.partialorder %v2208_v53, 8.507059e+37 }
 0x21d   : > { %6860 = vrcp.f32 %v8337_v57  ;;  %v8354_v39 = vmin.f32 %v2296_v42, 16.0  ;;  %v2203_v28 = vadd.f32 %v6859_v36, %v2202_v18  ;;  %v2211_v33 = vor.u32 1.1754944e-38, %v2210_v23  ;;  %vm2206_vm6 = vmor %vm2204_vm4, %vm2205_vm3 }
 0x21e   : > { %v2274_v7 = vadd.f32 0.112945676, %v2273_v14  ;;  %v8357_v32 = vmul.f32 0.70710677, %v8343_v47  ;;  %v2188_v11 = vmul.f32 %v2187_v31, %v8227_v55  ;;  %v2225_v5 = vadd.f32 0.18741608, %v2224_v51 }
 0x21f   : > { %v2298_v48 = vmul.f32 2.1237322e-06, %v8354_v39  ;;  %v2309_v17 = vmul.f32 3.8918573e-05, %v8354_v39  ;;  %v2207_v30 = vsel %vm2206_vm6, %v6859_v36, %v2203_v28  ;;  %v2262_v21 = vmul.f32 %v2261_v63, %v8301_v62 }
 0x220   : > { %v2275_v38 = vmul.f32 %v2274_v7, %v8301_v62  ;;  %v2336_v1 = vmul.f32 %v8357_v32, %v8357_v32  ;;  %v6308_v58 = vclamps-f32 %v2173_v24, 1.0  ;;  %v2212_v26 = vsel %vm8350_vm5, %v2211_v33, %v2207_v30 }
 0x221   : > { %v2299_v55 = vadd.f32 0.00028619796, %v2298_v48  ;;  %v2310_v49 = vadd.f32 0.001143296, %v2309_v17  ;;  %v1714_v61 = vmul.f32 0.5, %v8184_v50  ;;  %v1715_v4 = vmul.f32 0.5, %v8220_v22 }
 0x222   : > { %v2213_v20 = vmul.f32 %v2212_v26, %v2188_v11  ;;  %v2276_v8 = vadd.f32 0.4994258, %v2275_v38  ;;  %v8373_v59 = vmin.f32 %v2336_v1, 16.0  ;;  %v2226_v46 = vmul.f32 %v2225_v5, %v8273_v3 }
 0x223   : > { %v6861_v16 = vpop.eup %6860  ;;  %v2300_v56 = vmul.f32 %v2299_v55, %v8354_v39  ;;  %v2311_v44 = vmul.f32 %v2310_v49, %v8354_v39  ;;  %v2263_v6 = vadd.f32 0.05243302, %v2262_v21  ;;  %v2386_v36 = vadd.f32 1.0, %v6308_v58 }
 0x224   : > { %v2240_v0 = vmul.f32 %v6861_v16, %v8337_v57  ;;  %v6309_v35 = vclamps-f32 %v2213_v20, 1.0  ;;  %v2277_v50 = vmul.f32 %v2276_v8, %v8301_v62  ;;  %v2338_v22 = vmul.f32 2.1237322e-06, %v8373_v59 }
 0x225   : > { %v2312_v52 = vadd.f32 0.014752088, %v2311_v44  ;;  %v2301_v29 = vadd.f32 0.0036580483, %v2300_v56  ;;  %v2349_v15 = vmul.f32 3.8918573e-05, %v8373_v59  ;;  %vm2245_vm7 = vweird.f32 %v6861_v16 }
 0x226   : > { %v2241_v45 = vsub.f32 1.0, %v2240_v0  ;;  %v2387_v54 = vadd.f32 1.0, %v6309_v35  ;;  %v8379_v19 = vadd.f32 1.0, %v2277_v50  ;;  %v2339_v9 = vadd.f32 0.00028619796, %v2338_v22 }
 0x227   : > { %v2313_v53 = vmul.f32 %v2312_v52, %v8354_v39  ;;  %v2250_v42 = vand.u32 2147483648, %v8337_v57  ;;  %v2264_v10 = vmul.f32 %v2263_v6, %v8301_v62  ;;  %v2350_v13 = vadd.f32 0.001143296, %v2349_v15 }
 0x228   : > { %v2242_v60 = vmul.f32 %v6861_v16, %v2241_v45  ;;  %v2403_v37 = vmul.f32 %v2387_v54, %v1715_v4  ;;  %vm2244_vm9 = vweird.f32 %v8337_v57  ;;  %v2248_v23 = vand.u32 2147483647, %v8337_v57  ;;  %v2485_v52 = vpop.f32.mrf.mxu1 }
 0x229   : > { %6862 = vrcp.f32 %v8379_v19  ;;  %vm8387_vm10 = vmor %vm2244_vm9, %vm2245_vm7  ;;  %v2302_v31 = vmul.f32 %v2301_v29, %v8354_v39  ;;  %v2314_v51 = vadd.f32 0.112945676, %v2313_v53  ;;  %v2340_v18 = vmul.f32 %v2339_v9, %v8373_v59 }
 0x22a   : > { %v2243_v3 = vadd.f32 %v6861_v16, %v2242_v60  ;;  %v2402_v63 = vmul.f32 %v2386_v36, %v1714_v61  ;;  %v2227_v14 = vadd.f32 1.1283791, %v2226_v46  ;;  %v2351_v41 = vmul.f32 %v2350_v13, %v8373_v59 }
 0x22b   : > { %v2251_v28 = vor.u32 1.1754944e-38, %v2250_v42  ;;  %v2265_v57 = vadd.f32 0.18741608, %v2264_v10  ;;  %v2315_v33 = vmul.f32 %v2314_v51, %v8354_v39  ;;  %vm2249_vm11 = vcmp.eq.f32.partialorder %v2248_v23, 8.507059e+37 }
 0x22c   : > { %v2247_v24 = vsel %vm8387_vm10, %v6861_v16, %v2243_v3  ;;  %v2341_v7 = vadd.f32 0.0036580483, %v2340_v18  ;;  %v2352_v11 = vadd.f32 0.014752088, %v2351_v41  ;;  %v2413_v5 = vpack.c.bf16 %v2403_v37, %v2402_v63 }
 0x22d   : > { %v2252_v48 = vsel %vm2249_vm11, %v2251_v28, %v2247_v24  ;;  %v2303_v17 = vadd.f32 0.05243302, %v2302_v31  ;;  %v2316_v30 = vadd.f32 0.4994258, %v2315_v33  ;;  %v2228_v38 = vmul.f32 %v2227_v14, %v8254_v2 }
 0x22e   : > { %v2353_v1 = vmul.f32 %v2352_v11, %v8373_v59  ;;  %6335 = vmatmul.msk.bf16.gmra.mxu1 %vm1630_vm8, %v2413_v5  ;;  %v2266_v16 = vmul.f32 %v2265_v57, %v8301_v62  ;;  %v2342_v49 = vmul.f32 %v2341_v7, %v8373_v59  ;;  %v2290_v0 = vand.u32 2147483648, %v8379_v19  ;;  %v8412_v62 = vld [vmem:[%s11585_s6] ss:$0 sm:$0xff] }
 0x22f   : > { %v6863_v21 = vpop.eup %6862  ;;  %v2253_v26 = vmul.f32 %v2252_v48, %v2228_v38  ;;  %v2317_v55 = vmul.f32 %v2316_v30, %v8354_v39  ;;  %v2304_v20 = vmul.f32 %v2303_v17, %v8354_v39  ;;  %v2288_v35 = vand.u32 2147483647, %v8379_v19 }
 0x230   : > { %v2280_v58 = vmul.f32 %v6863_v21, %v8379_v19  ;;  %v2354_v61 = vadd.f32 0.112945676, %v2353_v1  ;;  %v2267_v56 = vadd.f32 1.1283791, %v2266_v16  ;;  %vm2285_vm12 = vweird.f32 %v6863_v21  ;;  %v2487_v28 = vpop.f32.mrf.mxu1 }
 0x231   : > { %v8406_v2 = vadd.f32 1.0, %v2317_v55  ;;  %v6310_v46 = vclamps-f32 %v2253_v26, 1.0  ;;  %v2343_v45 = vadd.f32 0.05243302, %v2342_v49  ;;  %vm2284_vm13 = vweird.f32 %v8379_v19 }
 0x232   : > { %v2281_v4 = vsub.f32 1.0, %v2280_v58  ;;  %v2355_v8 = vmul.f32 %v2354_v61, %v8373_v59  ;;  %v2305_v36 = vadd.f32 0.18741608, %v2304_v20  ;;  %vm2286_vm14 = vmor %vm2284_vm13, %vm2285_vm12  ;;  %v2291_v22 = vor.u32 1.1754944e-38, %v2290_v0 }
 0x233   : > { %6864 = vrcp.f32 %v8406_v2  ;;  %v8418_v54 = vadd.f32 %v8412_v62, %v2485_v52  ;;  %v2268_v60 = vmul.f32 %v2267_v56, %v8293_v34  ;;  %vm2289_vm15 = vcmp.eq.f32.partialorder %v2288_v35, 8.507059e+37 }
 0x234   : > { %v2282_v44 = vmul.f32 %v6863_v21, %v2281_v4  ;;  %v2356_v50 = vadd.f32 0.4994258, %v2355_v8  ;;  %v2388_v53 = vadd.f32 1.0, %v6310_v46  ;;  %v2344_v3 = vmul.f32 %v2343_v45, %v8373_v59 }
 0x235   : > { %v8424_v19 = vmul.f32 0.70710677, %v8418_v54  ;;  %v2306_v10 = vmul.f32 %v2305_v36, %v8354_v39  ;;  %v1716_v23 = vmul.f32 0.5, %v8249_v43  ;;  %v1717_v18 = vmul.f32 0.5, %v8284_v12 }
 0x236   : > { %v2283_v6 = vadd.f32 %v6863_v21, %v2282_v44  ;;  %v2357_v15 = vmul.f32 %v2356_v50, %v8373_v59  ;;  %v2345_v63 = vadd.f32 0.18741608, %v2344_v3  ;;  %v2328_v43 = vand.u32 2147483647, %v8406_v2 }
 0x237   : > { %v2557_v34 = vmul.f32 %v8424_v19, %v8424_v19  ;;  %v2404_v51 = vmul.f32 %v2388_v53, %v1716_v23  ;;  %v2307_v24 = vadd.f32 1.1283791, %v2306_v10  ;;  %v2330_v57 = vand.u32 2147483648, %v8406_v2 }
 0x238   : > { %v2287_v29 = vsel %vm2286_vm14, %v6863_v21, %v2283_v6  ;;  %v8427_v13 = vadd.f32 1.0, %v2357_v15  ;;  %v8440_v33 = vadd.f32 %v8412_v62, %v2487_v28  ;;  %vm2324_vm1 = vweird.f32 %v8406_v2 }
 0x239   : > { %v2292_v9 = vsel %vm2289_vm15, %v2291_v22, %v2287_v29  ;;  %v6865_v37 = vpop.eup %6864  ;;  %v8435_v41 = vmin.f32 %v2557_v34, 16.0  ;;  %v2346_v48 = vmul.f32 %v2345_v63, %v8373_v59  ;;  %v2308_v58 = vmul.f32 %v2307_v24, %v8332_v27 }
 0x23a   : > { %v2293_v42 = vmul.f32 %v2292_v9, %v2268_v60  ;;  %v2320_v31 = vmul.f32 %v6865_v37, %v8406_v2  ;;  %6866 = vrcp.f32 %v8427_v13  ;;  %vm2325_vm0 = vweird.f32 %v6865_v37 }
 0x23b   : > { %v2559_v12 = vmul.f32 2.1237322e-06, %v8435_v41  ;;  %v2570_v5 = vmul.f32 3.8918573e-05, %v8435_v41  ;;  %v8447_v17 = vmul.f32 0.70710677, %v8440_v33  ;;  %vm2326_vm2 = vmor %vm2324_vm1, %vm2325_vm0  ;;  %vm2364_vm5 = vweird.f32 %v8427_v13 }
 0x23c   : > { %v6311_v40 = vclamps-f32 %v2293_v42, 1.0  ;;  %v2321_v39 = vsub.f32 1.0, %v2320_v31  ;;  %v2331_v26 = vor.u32 1.1754944e-38, %v2330_v57  ;;  %vm2329_vm3 = vcmp.eq.f32.partialorder %v2328_v43, 8.507059e+37 }
 0x23d   : > { %v2560_v38 = vadd.f32 0.00028619796, %v2559_v12  ;;  %v2571_v1 = vadd.f32 0.001143296, %v2570_v5  ;;  %v2597_v55 = vmul.f32 %v8447_v17, %v8447_v17  ;;  %v2347_v20 = vadd.f32 1.1283791, %v2346_v48 }
 0x23e   : > { %v2389_v14 = vadd.f32 1.0, %v6311_v40  ;;  %v2322_v11 = vmul.f32 %v6865_v37, %v2321_v39  ;;  %v2368_v8 = vand.u32 2147483647, %v8427_v13  ;;  %v2370_v56 = vand.u32 2147483648, %v8427_v13 }
 0x23f   : > { %v2561_v61 = vmul.f32 %v2560_v38, %v8435_v41  ;;  %v2572_v0 = vmul.f32 %v2571_v1, %v8435_v41  ;;  %v8457_v2 = vmin.f32 %v2597_v55, 16.0  ;;  %v2348_v53 = vmul.f32 %v2347_v20, %v8357_v32 }
 0x240   : > { %v2405_v7 = vmul.f32 %v2389_v14, %v1717_v18  ;;  %v2323_v30 = vadd.f32 %v6865_v37, %v2322_v11  ;;  %v6867_v16 = vpop.eup %6866  ;;  %v2371_v3 = vor.u32 1.1754944e-38, %v2370_v56  ;;  %vm2369_vm7 = vcmp.eq.f32.partialorder %v2368_v8, 8.507059e+37 }
 0x241   : > { %v2360_v59 = vmul.f32 %v6867_v16, %v8427_v13  ;;  %v2562_v44 = vadd.f32 0.0036580483, %v2561_v61  ;;  %vm2365_vm4 = vweird.f32 %v6867_v16  ;;  %v2573_v35 = vadd.f32 0.014752088, %v2572_v0 }
 0x242   : > { %v2414_v21 = vpack.c.bf16 %v2405_v7, %v2404_v51  ;;  %v2327_v49 = vsel %vm2326_vm2, %v6865_v37, %v2323_v30  ;;  %v2599_v46 = vmul.f32 2.1237322e-06, %v8457_v2  ;;  %v2610_v45 = vmul.f32 3.8918573e-05, %v8457_v2  ;;  %vm2366_vm6 = vmor %vm2364_vm5, %vm2365_vm4 }
 0x243   : > { %v2332_v4 = vsel %vm2329_vm3, %v2331_v26, %v2327_v49  ;;  %v2361_v27 = vsub.f32 1.0, %v2360_v59  ;;  %v2563_v52 = vmul.f32 %v2562_v44, %v8435_v41  ;;  %v2574_v60 = vmul.f32 %v2573_v35, %v8435_v41  ;;  %v6647_v59 = vld [vmem:[%s11586_s7 + $0x38] sm:$0xff]  ;;  %v6646_v44 = vld [vmem:[%s11586_s7 + $0x30] sm:$0xff] }
 0x244   : > { %6336 = vmatmul.msk.bf16.gmra.mxu1 %vm1630_vm8, %v2414_v21  ;;  %v2490_v6 = vpop.f32.mrf.mxu1  ;;  %v2333_v36 = vmul.f32 %v2332_v4, %v2308_v58  ;;  %v2600_v29 = vadd.f32 0.00028619796, %v2599_v46  ;;  %v2611_v15 = vadd.f32 0.001143296, %v2610_v45  ;;  %v1718_v38 = vmul.f32 0.5, %v8319_v25  ;;  %3305 = vmatpush.bf16.msrb.mxu2 %v6647_v59 }
 0x245   : > { %v2362_v50 = vmul.f32 %v6867_v16, %v2361_v27  ;;  %v8465_v22 = vadd.f32 %v8412_v62, %v2490_v6  ;;  %v2575_v42 = vadd.f32 0.112945676, %v2574_v60  ;;  %v2564_v31 = vadd.f32 0.05243302, %v2563_v52 }
 0x246   : > { %v2601_v10 = vmul.f32 %v2600_v29, %v8457_v2  ;;  %v2612_v37 = vmul.f32 %v2611_v15, %v8457_v2  ;;  %v6312_v34 = vclamps-f32 %v2333_v36, 1.0  ;;  %v1719_v1 = vmul.f32 0.5, %v8343_v47 }
 0x247   : > { %v2363_v9 = vadd.f32 %v6867_v16, %v2362_v50  ;;  %v8474_v23 = vmul.f32 0.70710677, %v8465_v22  ;;  %v2576_v32 = vmul.f32 %v2575_v42, %v8435_v41  ;;  %v2565_v5 = vmul.f32 %v2564_v31, %v8435_v41 }
 0x248   : > { %v2602_v18 = vadd.f32 0.0036580483, %v2601_v10  ;;  %v2613_v13 = vadd.f32 0.014752088, %v2612_v37  ;;  %v2390_v57 = vadd.f32 1.0, %v6312_v34  ;;  %3306 = vmatpush.bf16.msrb.mxu2 %v6646_v44 }
 0x249   : > { %v2367_v40 = vsel %vm2366_vm6, %v6867_v16, %v2363_v9  ;;  %v2637_v14 = vmul.f32 %v8474_v23, %v8474_v23  ;;  %v2577_v24 = vadd.f32 0.4994258, %v2576_v32  ;;  %v2566_v25 = vadd.f32 0.18741608, %v2565_v5 }
 0x24a   : > { %v2372_v51 = vsel %vm2369_vm7, %v2371_v3, %v2367_v40  ;;  %v2603_v39 = vmul.f32 %v2602_v18, %v8457_v2  ;;  %v2614_v28 = vmul.f32 %v2613_v13, %v8457_v2  ;;  %v2406_v61 = vmul.f32 %v2390_v57, %v1718_v38  ;;  %v6644_v13 = vld [vmem:[%s11586_s7 + $0x20] sm:$0xff] }
 0x24b   : > { %v2373_v63 = vmul.f32 %v2372_v51, %v2348_v53  ;;  %v8481_v11 = vmin.f32 %v2637_v14, 16.0  ;;  %v2578_v48 = vmul.f32 %v2577_v24, %v8435_v41  ;;  %v2567_v45 = vmul.f32 %v2566_v25, %v8435_v41  ;;  %v6645_v53 = vld [vmem:[%s11586_s7 + $0x28] sm:$0xff] }
 0x24c   : > { %v2492_v43 = vpop.f32.mrf.mxu1  ;;  %v2604_v30 = vadd.f32 0.05243302, %v2603_v39  ;;  %v2615_v21 = vadd.f32 0.112945676, %v2614_v28  ;;  %3307 = vmatpush.bf16.msrb.mxu2 %v6645_v53 }
 0x24d   : > { %v6313_v7 = vclamps-f32 %v2373_v63, 1.0  ;;  %v8484_v12 = vadd.f32 %v8412_v62, %v2492_v43  ;;  %v2579_v58 = vadd.f32 1.0, %v2578_v48  ;;  %v2639_v55 = vmul.f32 2.1237322e-06, %v8481_v11 }
 0x24e   : > { %v2616_v26 = vmul.f32 %v2615_v21, %v8457_v2  ;;  %v2650_v20 = vmul.f32 3.8918573e-05, %v8481_v11  ;;  %v2605_v47 = vmul.f32 %v2604_v30, %v8457_v2  ;;  %v2568_v41 = vadd.f32 1.1283791, %v2567_v45 }
 0x24f   : > { %v2391_v16 = vadd.f32 1.0, %v6313_v7  ;;  %v8493_v49 = vmul.f32 0.70710677, %v8484_v12  ;;  %6868 = vrcp.f32 %v2579_v58  ;;  %v2640_v8 = vadd.f32 0.00028619796, %v2639_v55 }
 0x250   : > { %v2617_v0 = vadd.f32 0.4994258, %v2616_v26  ;;  %v2651_v35 = vadd.f32 0.001143296, %v2650_v20  ;;  %v2606_v6 = vadd.f32 0.18741608, %v2605_v47  ;;  %v2569_v24 = vmul.f32 %v2568_v41, %v8424_v19  ;;  %3308 = vmatpush.bf16.msrb.mxu2 %v6644_v13 }
 0x251   : > { %v2407_v4 = vmul.f32 %v2391_v16, %v1719_v1  ;;  %v2677_v56 = vmul.f32 %v8493_v49, %v8493_v49  ;;  %v2641_v29 = vmul.f32 %v2640_v8, %v8481_v11  ;;  %v2589_v42 = vand.u32 2147483647, %v2579_v58  ;;  %v6643_v19 = vld [vmem:[%s11586_s7 + $0x18] sm:$0xff]  ;;  %v6642_v20 = vld [vmem:[%s11586_s7 + $0x10] sm:$0xff] }
 0x252   : > { %v2618_v46 = vmul.f32 %v2617_v0, %v8457_v2  ;;  %v2652_v50 = vmul.f32 %v2651_v35, %v8481_v11  ;;  %v2607_v10 = vmul.f32 %v2606_v6, %v8457_v2  ;;  %v2591_v51 = vand.u32 2147483648, %v2579_v58 }
 0x253   : > { %v2415_v27 = vpack.c.bf16 %v2407_v4, %v2406_v61  ;;  %v8508_v36 = vmin.f32 %v2677_v56, 16.0  ;;  %v2642_v32 = vadd.f32 0.0036580483, %v2641_v29  ;;  %vm2585_vm9 = vweird.f32 %v2579_v58 }
 0x254   : > { %v8511_v52 = vadd.f32 1.0, %v2618_v46  ;;  %v2653_v9 = vadd.f32 0.014752088, %v2652_v50  ;;  %v2608_v39 = vadd.f32 1.1283791, %v2607_v10  ;;  %vm2590_vm10 = vcmp.eq.f32.partialorder %v2589_v42, 8.507059e+37  ;;  %3309 = vmatpush.bf16.msrb.mxu2 %v6643_v19 }
 0x255   : > { %6337 = vmatmul.msk.bf16.gmra.mxu1 %vm1630_vm8, %v2415_v27  ;;  %v6869_v60 = vpop.eup %6868  ;;  %v2679_v15 = vmul.f32 2.1237322e-06, %v8508_v36  ;;  %v2690_v31 = vmul.f32 3.8918573e-05, %v8508_v36  ;;  %v2592_v48 = vor.u32 1.1754944e-38, %v2591_v51  ;;  %v2643_v21 = vmul.f32 %v2642_v32, %v8481_v11 }
 0x256   : > { %v2581_v3 = vmul.f32 %v6869_v60, %v2579_v58  ;;  %6870 = vrcp.f32 %v8511_v52  ;;  %v2654_v40 = vmul.f32 %v2653_v9, %v8481_v11  ;;  %vm2586_vm8 = vweird.f32 %v6869_v60 }
 0x257   : > { %v2680_v34 = vadd.f32 0.00028619796, %v2679_v15  ;;  %v2691_v28 = vadd.f32 0.001143296, %v2690_v31  ;;  %vm2587_vm11 = vmor %vm2585_vm9, %vm2586_vm8  ;;  %v2629_v16 = vand.u32 2147483647, %v8511_v52  ;;  %v2609_v59 = vmul.f32 %v2608_v39, %v8447_v17 }
 0x258   : > { %v2582_v37 = vsub.f32 1.0, %v2581_v3  ;;  %v2655_v2 = vadd.f32 0.112945676, %v2654_v40  ;;  %v2631_v4 = vand.u32 2147483648, %v8511_v52  ;;  %vm2625_vm12 = vweird.f32 %v8511_v52  ;;  %3310 = vmatpush.bf16.msrb.mxu2 %v6642_v20  ;;  %v6640_v39 = vld [vmem:[%s11586_s7] sm:$0xff] }
 0x259   : > { %v2681_v7 = vmul.f32 %v2680_v34, %v8508_v36  ;;  %v2692_v26 = vmul.f32 %v2691_v28, %v8508_v36  ;;  %vm8551_vm14 = vcmp.eq.f32.partialorder %v2629_v16, 8.507059e+37  ;;  %v2644_v35 = vadd.f32 0.05243302, %v2643_v21 }
 0x25a   : > { %v2583_v63 = vmul.f32 %v6869_v60, %v2582_v37  ;;  %v2656_v38 = vmul.f32 %v2655_v2, %v8481_v11  ;;  %v2632_v50 = vor.u32 1.1754944e-38, %v2631_v4 }
 0x25b   : > { %v2682_v47 = vadd.f32 0.0036580483, %v2681_v7  ;;  %v2693_v44 = vadd.f32 0.014752088, %v2692_v26  ;;  %v2645_v51 = vmul.f32 %v2644_v35, %v8481_v11 }
 0x25c   : > { %v6871_v43 = vpop.eup %6870  ;;  %v2584_v57 = vadd.f32 %v6869_v60, %v2583_v63  ;;  %v2657_v27 = vadd.f32 0.4994258, %v2656_v38 }
 0x25d   : > { %v2621_v30 = vmul.f32 %v6871_v43, %v8511_v52  ;;  %vm2626_vm13 = vweird.f32 %v6871_v43  ;;  %v2694_v15 = vmul.f32 %v2693_v44, %v8508_v36  ;;  %v2683_v9 = vmul.f32 %v2682_v47, %v8508_v36 }
 0x25e   : > { %v2588_v1 = vsel %vm2587_vm11, %v6869_v60, %v2584_v57  ;;  %v6641_v60 = vld [vmem:[%s11586_s7 + $0x8] sm:$0xff]  ;;  %v2658_v29 = vmul.f32 %v2657_v27, %v8481_v11  ;;  %vm2627_vm15 = vmor %vm2625_vm12, %vm2626_vm13  ;;  %v2526_v57 = vmul.f32 0.5, %v8440_v33 }
 0x25f   : > { %v2593_v55 = vsel %vm2590_vm10, %v2592_v48, %v2588_v1  ;;  %v2622_v61 = vsub.f32 1.0, %v2621_v30  ;;  %v2695_v34 = vadd.f32 0.112945676, %v2694_v15  ;;  %3311 = vmatpush.bf16.msrb.mxu2 %v6641_v60  ;;  %v2646_v30 = vadd.f32 0.18741608, %v2645_v51 }
 0x260   : > { %v2594_v25 = vmul.f32 %v2593_v55, %v2569_v24  ;;  %v8571_v37 = vadd.f32 1.0, %v2658_v29 }
 0x261   : > { %v2495_v18 = vpop.f32.mrf.mxu1  ;;  %v2623_v8 = vmul.f32 %v6871_v43, %v2622_v61  ;;  %v2696_v13 = vmul.f32 %v2695_v34, %v8508_v36  ;;  %v2647_v20 = vmul.f32 %v2646_v30, %v8481_v11 }
 0x262   : > { %v8526_v14 = vadd.f32 %v8412_v62, %v2495_v18  ;;  %v6338_v53 = vclamps-f32 %v2594_v25, 1.0  ;;  %6872 = vrcp.f32 %v8571_v37  ;;  %v2684_v18 = vadd.f32 0.05243302, %v2683_v9 }
 0x263   : > { %v2624_v6 = vadd.f32 %v6871_v43, %v2623_v8  ;;  %v2697_v7 = vadd.f32 0.4994258, %v2696_v13  ;;  %3312 = vmatpush.bf16.msrb.mxu2 %v6640_v39  ;;  %v2671_v35 = vand.u32 2147483648, %v8571_v37  ;;  %v2669_v11 = vand.u32 2147483647, %v8571_v37 }
 0x264   : > { %v8531_v5 = vmul.f32 0.70710677, %v8526_v14  ;;  %v3197_v32 = vadd.f32 1.0, %v6338_v53  ;;  %v2685_v1 = vmul.f32 %v2684_v18, %v8508_v36  ;;  %v2648_v60 = vadd.f32 1.1283791, %v2647_v20 }
 0x265   : > { %v2628_v42 = vsel %vm2627_vm15, %v6871_v43, %v2624_v6  ;;  %v2525_v43 = vmul.f32 0.5, %v8418_v54  ;;  %v2698_v16 = vmul.f32 %v2697_v7, %v8508_v36  ;;  %vm2665_vm1 = vweird.f32 %v8571_v37 }
 0x266   : > { %v2717_v58 = vmul.f32 %v8531_v5, %v8531_v5  ;;  %v2633_v40 = vsel %vm8551_vm14, %v2632_v50, %v2628_v42  ;;  %v2686_v44 = vadd.f32 0.18741608, %v2685_v1  ;;  %v2672_v42 = vor.u32 1.1754944e-38, %v2671_v35 }
 0x267   : > { %v2634_v31 = vmul.f32 %v2633_v40, %v2609_v59  ;;  %v3213_v38 = vmul.f32 %v3197_v32, %v2525_v43  ;;  %v8594_v4 = vadd.f32 1.0, %v2698_v16  ;;  %vm2670_vm3 = vcmp.eq.f32.partialorder %v2669_v11, 8.507059e+37 }
 0x268   : > { %v8548_v0 = vmin.f32 %v2717_v58, 16.0  ;;  %v6873_v26 = vpop.eup %6872  ;;  %v2649_v13 = vmul.f32 %v2648_v60, %v8474_v23 }
 0x269   : > { %v2497_v56 = vpop.f32.mrf.mxu1  ;;  %v6339_v63 = vclamps-f32 %v2634_v31, 1.0  ;;  %v2661_v61 = vmul.f32 %v6873_v26, %v8571_v37  ;;  %6874 = vrcp.f32 %v8594_v4  ;;  %vm2666_vm0 = vweird.f32 %v6873_v26 }
 0x26a   : > { %v2719_v46 = vmul.f32 2.1237322e-06, %v8548_v0  ;;  %v8557_v45 = vadd.f32 %v8412_v62, %v2497_v56  ;;  %v2730_v41 = vmul.f32 3.8918573e-05, %v8548_v0  ;;  %vm2667_vm2 = vmor %vm2665_vm1, %vm2666_vm0  ;;  %vm2705_vm5 = vweird.f32 %v8594_v4 }
 0x26b   : > { %v3198_v48 = vadd.f32 1.0, %v6339_v63  ;;  %v2662_v56 = vsub.f32 1.0, %v2661_v61 }
 0x26c   : > { %v2720_v3 = vadd.f32 0.00028619796, %v2719_v46  ;;  %v8569_v10 = vmul.f32 0.70710677, %v8557_v45  ;;  %v2731_v28 = vadd.f32 0.001143296, %v2730_v41 }
 0x26d   : > { %v3214_v55 = vmul.f32 %v3198_v48, %v2526_v57  ;;  %v2663_v6 = vmul.f32 %v6873_v26, %v2662_v56  ;;  %v2711_v48 = vand.u32 2147483648, %v8594_v4 }
 0x26e   : > { %v2757_v52 = vmul.f32 %v8569_v10, %v8569_v10  ;;  %v2721_v2 = vmul.f32 %v2720_v3, %v8548_v0  ;;  %v2732_v19 = vmul.f32 %v2731_v28, %v8548_v0  ;;  %v2687_v3 = vmul.f32 %v2686_v44, %v8508_v36 }
 0x26f   : > { %v3229_v25 = vpack.c.bf16 %v3214_v55, %v3213_v38  ;;  %v2664_v53 = vadd.f32 %v6873_v26, %v2663_v6  ;;  %v6875_v40 = vpop.eup %6874  ;;  %v2709_v38 = vand.u32 2147483647, %v8594_v4 }
 0x270   : > { %v8581_v24 = vmin.f32 %v2757_v52, 16.0  ;;  %v2722_v54 = vadd.f32 0.0036580483, %v2721_v2  ;;  %v2733_v33 = vadd.f32 0.014752088, %v2732_v19  ;;  %v2701_v37 = vmul.f32 %v6875_v40, %v8594_v4 }
 0x271   : > { %3313 = vmatmul.bf16.vlgmr.msrb.gmra.mxu2 %v3229_v25  ;;  %v2668_v51 = vsel %vm2667_vm2, %v6873_v26, %v2664_v53  ;;  %v2688_v39 = vadd.f32 1.1283791, %v2687_v3  ;;  %vm2706_vm4 = vweird.f32 %v6875_v40  ;;  %vm2710_vm7 = vcmp.eq.f32.partialorder %v2709_v38, 8.507059e+37 }
 0x272   : > { %v2759_v21 = vmul.f32 2.1237322e-06, %v8581_v24  ;;  %v2770_v58 = vmul.f32 3.8918573e-05, %v8581_v24  ;;  %v2734_v47 = vmul.f32 %v2733_v33, %v8548_v0  ;;  %v2723_v17 = vmul.f32 %v2722_v54, %v8548_v0  ;;  %vm2707_vm6 = vmor %vm2705_vm5, %vm2706_vm4 }
 0x273   : > { %v2673_v18 = vsel %vm2670_vm3, %v2672_v42, %v2668_v51  ;;  %v2702_v57 = vsub.f32 1.0, %v2701_v37  ;;  %v2689_v55 = vmul.f32 %v2688_v39, %v8493_v49  ;;  %v2712_v33 = vor.u32 1.1754944e-38, %v2711_v48 }
 0x274   : > { %v2760_v59 = vadd.f32 0.00028619796, %v2759_v21  ;;  %v2771_v27 = vadd.f32 0.001143296, %v2770_v58  ;;  %v2735_v50 = vadd.f32 0.112945676, %v2734_v47  ;;  %v2674_v7 = vmul.f32 %v2673_v18, %v2649_v13 }
 0x275   : > { %v2724_v41 = vadd.f32 0.05243302, %v2723_v17  ;;  %v2703_v19 = vmul.f32 %v6875_v40, %v2702_v57  ;;  %v2527_v53 = vmul.f32 0.5, %v8465_v22  ;;  %v2530_v48 = vmul.f32 0.5, %v8557_v45 }
 0x276   : > { %v2761_v8 = vmul.f32 %v2760_v59, %v8581_v24  ;;  %v2772_v46 = vmul.f32 %v2771_v27, %v8581_v24  ;;  %v2736_v9 = vmul.f32 %v2735_v50, %v8548_v0  ;;  %v6340_v59 = vclamps-f32 %v2674_v7, 1.0 }
 0x277   : > { %v2725_v28 = vmul.f32 %v2724_v41, %v8548_v0  ;;  %v2704_v26 = vadd.f32 %v6875_v40, %v2703_v19 }
 0x278   : > { %v2773_v29 = vadd.f32 0.014752088, %v2772_v46  ;;  %v2762_v15 = vadd.f32 0.0036580483, %v2761_v8  ;;  %v2737_v52 = vadd.f32 0.4994258, %v2736_v9 }
 0x279   : > { %v2726_v16 = vadd.f32 0.18741608, %v2725_v28  ;;  %v2708_v47 = vsel %vm2707_vm6, %v6875_v40, %v2704_v26  ;;  %v3199_v6 = vadd.f32 1.0, %v6340_v59 }
 0x27a   : > { %v2774_v34 = vmul.f32 %v2773_v29, %v8581_v24  ;;  %v2763_v36 = vmul.f32 %v2762_v15, %v8581_v24  ;;  %v2738_v63 = vmul.f32 %v2737_v52, %v8548_v0  ;;  %v2713_v8 = vsel %vm2710_vm7, %v2712_v33, %v2708_v47 }
 0x27b   : > { %v2727_v49 = vmul.f32 %v2726_v16, %v8548_v0  ;;  %v2714_v17 = vmul.f32 %v2713_v8, %v2689_v55  ;;  %v2528_v0 = vmul.f32 0.5, %v8484_v12 }
 0x27c   : > { %v2775_v2 = vadd.f32 0.112945676, %v2774_v34  ;;  %v8620_v30 = vadd.f32 1.0, %v2738_v63  ;;  %v2764_v1 = vadd.f32 0.05243302, %v2763_v36 }
 0x27d   : > { %v6341_v29 = vclamps-f32 %v2714_v17, 1.0  ;;  %v2728_v3 = vadd.f32 1.1283791, %v2727_v49 }
 0x27e   : > { %v2776_v21 = vmul.f32 %v2775_v2, %v8581_v24  ;;  %6876 = vrcp.f32 %v8620_v30  ;;  %v2765_v27 = vmul.f32 %v2764_v1, %v8581_v24  ;;  %v2751_v51 = vand.u32 2147483648, %v8620_v30 }
 0x27f   : > { %v2500_v31 = vpop.f32.mrf.mxu1  ;;  %v3200_v42 = vadd.f32 1.0, %v6341_v29  ;;  %v2749_v13 = vand.u32 2147483647, %v8620_v30  ;;  %vm2745_vm9 = vweird.f32 %v8620_v30 }
 0x280   : > { %v8609_v32 = vadd.f32 %v8412_v62, %v2500_v31  ;;  %v2777_v61 = vadd.f32 0.4994258, %v2776_v21  ;;  %v2766_v9 = vadd.f32 0.18741608, %v2765_v27  ;;  %v3215_v31 = vmul.f32 %v3199_v6, %v2527_v53 }
 0x281   : > { %v3216_v22 = vmul.f32 %v3200_v42, %v2528_v0  ;;  %v2752_v38 = vor.u32 1.1754944e-38, %v2751_v51  ;;  %vm2750_vm11 = vcmp.eq.f32.partialorder %v2749_v13, 8.507059e+37 }
 0x282   : > { %v8617_v43 = vmul.f32 0.70710677, %v8609_v32  ;;  %v2778_v56 = vmul.f32 %v2777_v61, %v8581_v24  ;;  %v2767_v12 = vmul.f32 %v2766_v9, %v8581_v24 }
 0x283   : > { %v3230_v39 = vpack.c.bf16 %v3216_v22, %v3215_v31 }
 0x284   : > { %v2797_v23 = vmul.f32 %v8617_v43, %v8617_v43  ;;  %v6877_v35 = vpop.eup %6876  ;;  %v8642_v11 = vadd.f32 1.0, %v2778_v56 }
 0x285   : > { %v2741_v15 = vmul.f32 %v6877_v35, %v8620_v30  ;;  %vm2746_vm8 = vweird.f32 %v6877_v35  ;;  %3318 = vmatmul.bf16.gmra.mxu2 %v3230_v39  ;;  %v2729_v30 = vmul.f32 %v2728_v3, %v8531_v5  ;;  %v2529_v39 = vmul.f32 0.5, %v8526_v14 }
 0x286   : > { %v8627_v58 = vmin.f32 %v2797_v23, 16.0  ;;  %6878 = vrcp.f32 %v8642_v11  ;;  %vm8660_vm10 = vmor %vm2745_vm9, %vm2746_vm8  ;;  %v2789_v61 = vand.u32 2147483647, %v8642_v11  ;;  %vm2785_vm13 = vweird.f32 %v8642_v11 }
 0x287   : > { %v2502_v54 = vpop.f32.mrf.mxu1  ;;  %v2742_v34 = vsub.f32 1.0, %v2741_v15 }
 0x288   : > { %v2799_v20 = vmul.f32 2.1237322e-06, %v8627_v58  ;;  %v8633_v25 = vadd.f32 %v8412_v62, %v2502_v54  ;;  %v2810_v4 = vmul.f32 3.8918573e-05, %v8627_v58  ;;  %v2768_v54 = vadd.f32 1.1283791, %v2767_v12 }
 0x289   : > { %v2743_v37 = vmul.f32 %v6877_v35, %v2742_v34  ;;  %vm2790_vm15 = vcmp.eq.f32.partialorder %v2789_v61, 8.507059e+37 }
 0x28a   : > { %v8640_v44 = vmul.f32 0.70710677, %v8633_v25  ;;  %v2800_v46 = vadd.f32 0.00028619796, %v2799_v20  ;;  %v2811_v50 = vadd.f32 0.001143296, %v2810_v4  ;;  %v2769_v6 = vmul.f32 %v2768_v54, %v8569_v10 }
 0x28b   : > { %v2744_v28 = vadd.f32 %v6877_v35, %v2743_v37  ;;  %v2791_v4 = vand.u32 2147483648, %v8642_v11 }
 0x28c   : > { %v2837_v60 = vmul.f32 %v8640_v44, %v8640_v44  ;;  %v2801_v40 = vmul.f32 %v2800_v46, %v8627_v58  ;;  %v2812_v52 = vmul.f32 %v2811_v50, %v8627_v58  ;;  %v6879_v57 = vpop.eup %6878 }
 0x28d   : > { %v2748_v19 = vsel %vm8660_vm10, %v6877_v35, %v2744_v28  ;;  %v2781_v1 = vmul.f32 %v6879_v57, %v8642_v11  ;;  %vm2786_vm12 = vweird.f32 %v6879_v57  ;;  %v2792_v3 = vor.u32 1.1754944e-38, %v2791_v4 }
 0x28e   : > { %v8650_v41 = vmin.f32 %v2837_v60, 16.0  ;;  %v2813_v36 = vadd.f32 0.014752088, %v2812_v52  ;;  %v2802_v7 = vadd.f32 0.0036580483, %v2801_v40  ;;  %v2753_v33 = vsel %vm2750_vm11, %v2752_v38, %v2748_v19  ;;  %vm2787_vm14 = vmor %vm2785_vm13, %vm2786_vm12 }
 0x28f   : > { %v2782_v47 = vsub.f32 1.0, %v2781_v1  ;;  %v2754_v49 = vmul.f32 %v2753_v33, %v2729_v30 }
 0x290   : > { %v2839_v18 = vmul.f32 2.1237322e-06, %v8650_v41  ;;  %v2850_v63 = vmul.f32 3.8918573e-05, %v8650_v41  ;;  %v2814_v21 = vmul.f32 %v2813_v36, %v8627_v58  ;;  %v2803_v20 = vmul.f32 %v2802_v7, %v8627_v58 }
 0x291   : > { %v2783_v17 = vmul.f32 %v6879_v57, %v2782_v47  ;;  %v6342_v10 = vclamps-f32 %v2754_v49, 1.0 }
 0x292   : > { %v2840_v2 = vadd.f32 0.00028619796, %v2839_v18  ;;  %v2851_v23 = vadd.f32 0.001143296, %v2850_v63  ;;  %v2815_v26 = vadd.f32 0.112945676, %v2814_v21 }
 0x293   : > { %v2804_v60 = vadd.f32 0.05243302, %v2803_v20  ;;  %v2784_v29 = vadd.f32 %v6879_v57, %v2783_v17  ;;  %v3201_v63 = vadd.f32 1.0, %v6342_v10 }
 0x294   : > { %v2841_v24 = vmul.f32 %v2840_v2, %v8650_v41  ;;  %v2852_v55 = vmul.f32 %v2851_v23, %v8650_v41  ;;  %v2816_v27 = vmul.f32 %v2815_v26, %v8627_v58 }
 0x295   : > { %v2505_v16 = vpop.f32.mrf.mxu1  ;;  %v2788_v34 = vsel %vm2787_vm14, %v6879_v57, %v2784_v29  ;;  %v2805_v18 = vmul.f32 %v2804_v60, %v8627_v58  ;;  %v3217_v30 = vmul.f32 %v3201_v63, %v2529_v39 }
 0x296   : > { %v8672_v59 = vadd.f32 %v8412_v62, %v2505_v16  ;;  %v2853_v8 = vadd.f32 0.014752088, %v2852_v55  ;;  %v2842_v56 = vadd.f32 0.0036580483, %v2841_v24  ;;  %v2817_v35 = vadd.f32 0.4994258, %v2816_v27 }
 0x297   : > { %v2793_v52 = vsel %vm2790_vm15, %v2792_v3, %v2788_v34  ;;  %v2806_v21 = vadd.f32 0.18741608, %v2805_v18 }
 0x298   : > { %v8678_v5 = vmul.f32 0.70710677, %v8672_v59  ;;  %v2854_v46 = vmul.f32 %v2853_v8, %v8650_v41  ;;  %v2818_v15 = vmul.f32 %v2817_v35, %v8627_v58  ;;  %v2843_v0 = vmul.f32 %v2842_v56, %v8650_v41 }
 0x299   : > { %v2794_v22 = vmul.f32 %v2793_v52, %v2769_v6  ;;  %v2807_v45 = vmul.f32 %v2806_v21, %v8627_v58 }
 0x29a   : > { %v2877_v50 = vmul.f32 %v8678_v5, %v8678_v5  ;;  %v2855_v53 = vadd.f32 0.112945676, %v2854_v46  ;;  %v2819_v40 = vadd.f32 1.0, %v2818_v15  ;;  %v2844_v37 = vadd.f32 0.05243302, %v2843_v0 }
 0x29b   : > { %v6343_v36 = vclamps-f32 %v2794_v22, 1.0  ;;  %v2808_v58 = vadd.f32 1.1283791, %v2807_v45 }
 0x29c   : > { %v8688_v9 = vmin.f32 %v2877_v50, 16.0  ;;  %v2856_v31 = vmul.f32 %v2855_v53, %v8650_v41  ;;  %6880 = vrcp.f32 %v2819_v40  ;;  %v2845_v19 = vmul.f32 %v2844_v37, %v8650_v41 }
 0x29d   : > { %v2507_v42 = vpop.f32.mrf.mxu1  ;;  %v3202_v23 = vadd.f32 1.0, %v6343_v36  ;;  %v2829_v8 = vand.u32 2147483647, %v2819_v40  ;;  %v2831_v56 = vand.u32 2147483648, %v2819_v40  ;;  %vm2825_vm1 = vweird.f32 %v2819_v40 }
 0x29e   : > { %v2879_v11 = vmul.f32 2.1237322e-06, %v8688_v9  ;;  %v8694_v51 = vadd.f32 %v8412_v62, %v2507_v42  ;;  %v2857_v2 = vadd.f32 0.4994258, %v2856_v31  ;;  %v2890_v7 = vmul.f32 3.8918573e-05, %v8688_v9 }
 0x29f   : > { %v3218_v14 = vmul.f32 %v3202_v23, %v2530_v48  ;;  %v2846_v20 = vadd.f32 0.18741608, %v2845_v19  ;;  %v2832_v0 = vor.u32 1.1754944e-38, %v2831_v56  ;;  %vm2830_vm3 = vcmp.eq.f32.partialorder %v2829_v8, 8.507059e+37 }
 0x2a0   : > { %v2880_v12 = vadd.f32 0.00028619796, %v2879_v11  ;;  %v8698_v13 = vmul.f32 0.70710677, %v8694_v51  ;;  %v2858_v24 = vmul.f32 %v2857_v2, %v8650_v41  ;;  %v2891_v26 = vadd.f32 0.001143296, %v2890_v7 }
 0x2a1   : > { %v3231_v61 = vpack.c.bf16 %v3218_v14, %v3217_v30  ;;  %v2847_v60 = vmul.f32 %v2846_v20, %v8650_v41  ;;  %v2809_v41 = vmul.f32 %v2808_v58, %v8617_v43 }
 0x2a2   : > { %v2881_v28 = vmul.f32 %v2880_v12, %v8688_v9  ;;  %v2917_v57 = vmul.f32 %v8698_v13, %v8698_v13  ;;  %v6881_v1 = vpop.eup %6880  ;;  %v8710_v16 = vadd.f32 1.0, %v2858_v24  ;;  %v2892_v4 = vmul.f32 %v2891_v26, %v8688_v9 }
 0x2a3   : > { %v2821_v33 = vmul.f32 %v6881_v1, %v2819_v40  ;;  %3323 = vmatmul.bf16.gmra.mxu2 %v3231_v61  ;;  %vm2826_vm0 = vweird.f32 %v6881_v1  ;;  %v2848_v37 = vadd.f32 1.1283791, %v2847_v60  ;;  %v2531_v60 = vmul.f32 0.5, %v8609_v32 }
 0x2a4   : > { %v8708_v38 = vmin.f32 %v2917_v57, 16.0  ;;  %v2882_v55 = vadd.f32 0.0036580483, %v2881_v28  ;;  %6882 = vrcp.f32 %v8710_v16  ;;  %v2893_v6 = vadd.f32 0.014752088, %v2892_v4  ;;  %vm2827_vm2 = vmor %vm2825_vm1, %vm2826_vm0 }
 0x2a5   : > { %v2822_v27 = vsub.f32 1.0, %v2821_v33  ;;  %v2869_v63 = vand.u32 2147483647, %v8710_v16  ;;  %v2871_v43 = vand.u32 2147483648, %v8710_v16  ;;  %v2849_v24 = vmul.f32 %v2848_v37, %v8640_v44 }
 0x2a6   : > { %v2919_v54 = vmul.f32 2.1237322e-06, %v8708_v38  ;;  %v2930_v49 = vmul.f32 3.8918573e-05, %v8708_v38  ;;  %v2883_v17 = vmul.f32 %v2882_v55, %v8688_v9  ;;  %v2894_v3 = vmul.f32 %v2893_v6, %v8688_v9 }
 0x2a7   : > { %v2823_v46 = vmul.f32 %v6881_v1, %v2822_v27  ;;  %vm2865_vm5 = vweird.f32 %v8710_v16  ;;  %vm2870_vm7 = vcmp.eq.f32.partialorder %v2869_v63, 8.507059e+37  ;;  %v2872_v33 = vor.u32 1.1754944e-38, %v2871_v43 }
 0x2a8   : > { %v2920_v47 = vadd.f32 0.00028619796, %v2919_v54  ;;  %v2931_v50 = vadd.f32 0.001143296, %v2930_v49  ;;  %v2884_v10 = vadd.f32 0.05243302, %v2883_v17 }
 0x2a9   : > { %v2824_v15 = vadd.f32 %v6881_v1, %v2823_v46  ;;  %v2895_v18 = vadd.f32 0.112945676, %v2894_v3 }
 0x2aa   : > { %v2921_v35 = vmul.f32 %v2920_v47, %v8708_v38  ;;  %v6883_v53 = vpop.eup %6882  ;;  %v2932_v42 = vmul.f32 %v2931_v50, %v8708_v38  ;;  %v2885_v28 = vmul.f32 %v2884_v10, %v8688_v9 }
 0x2ab   : > { %v2828_v34 = vsel %vm2827_vm2, %v6881_v1, %v2824_v15  ;;  %v2861_v31 = vmul.f32 %v6883_v53, %v8710_v16  ;;  %v2510_v11 = vpop.f32.mrf.mxu1  ;;  %v2896_v2 = vmul.f32 %v2895_v18, %v8688_v9  ;;  %vm2866_vm4 = vweird.f32 %v6883_v53 }
 0x2ac   : > { %v2922_v29 = vadd.f32 0.0036580483, %v2921_v35  ;;  %v2833_v52 = vsel %vm2830_vm3, %v2832_v0, %v2828_v34  ;;  %v2933_v22 = vadd.f32 0.014752088, %v2932_v42  ;;  %v8726_v12 = vadd.f32 %v8412_v62, %v2510_v11  ;;  %vm2867_vm6 = vmor %vm2865_vm5, %vm2866_vm4 }
 0x2ad   : > { %v2862_v36 = vsub.f32 1.0, %v2861_v31  ;;  %v2834_v7 = vmul.f32 %v2833_v52, %v2809_v41  ;;  %v2897_v21 = vadd.f32 0.4994258, %v2896_v2  ;;  %v2886_v55 = vadd.f32 0.18741608, %v2885_v28 }
 0x2ae   : > { %v2923_v40 = vmul.f32 %v2922_v29, %v8708_v38  ;;  %v2934_v39 = vmul.f32 %v2933_v22, %v8708_v38  ;;  %v8733_v57 = vmul.f32 0.70710677, %v8726_v12  ;;  %v2532_v29 = vmul.f32 0.5, %v8633_v25 }
 0x2af   : > { %v2863_v48 = vmul.f32 %v6883_v53, %v2862_v36  ;;  %v2898_v14 = vmul.f32 %v2897_v21, %v8688_v9  ;;  %v6344_v54 = vclamps-f32 %v2834_v7, 1.0  ;;  %v2887_v4 = vmul.f32 %v2886_v55, %v8688_v9 }
 0x2b0   : > { %v2935_v23 = vadd.f32 0.112945676, %v2934_v39  ;;  %v2924_v19 = vadd.f32 0.05243302, %v2923_v40  ;;  %v2957_v1 = vmul.f32 %v8733_v57, %v8733_v57 }
 0x2b1   : > { %v2864_v30 = vadd.f32 %v6883_v53, %v2863_v48  ;;  %v2899_v20 = vadd.f32 1.0, %v2898_v14  ;;  %v3203_v46 = vadd.f32 1.0, %v6344_v54  ;;  %v8773_v48 = vld [vmem:[%s11585_s6] ss:$0 sm:$0xff] }
 0x2b2   : > { %v2936_v26 = vmul.f32 %v2935_v23, %v8708_v38  ;;  %v8742_v45 = vmin.f32 %v2957_v1, 16.0  ;;  %v2925_v27 = vmul.f32 %v2924_v19, %v8708_v38 }
 0x2b3   : > { %v2512_v61 = vpop.f32.mrf.mxu1  ;;  %v2868_v44 = vsel %vm2867_vm6, %v6883_v53, %v2864_v30  ;;  %6884 = vrcp.f32 %v2899_v20  ;;  %v2888_v53 = vadd.f32 1.1283791, %v2887_v4  ;;  %v3219_v34 = vmul.f32 %v3203_v46, %v2531_v60 }
 0x2b4   : > { %v2937_v47 = vadd.f32 0.4994258, %v2936_v26  ;;  %v8746_v8 = vadd.f32 %v8412_v62, %v2512_v61  ;;  %v2873_v16 = vsel %vm2870_vm7, %v2872_v33, %v2868_v44  ;;  %v2959_v17 = vmul.f32 2.1237322e-06, %v8742_v45 }
 0x2b5   : > { %v2874_v56 = vmul.f32 %v2873_v16, %v2849_v24  ;;  %v2926_v6 = vadd.f32 0.18741608, %v2925_v27  ;;  %v2970_v62 = vmul.f32 3.8918573e-05, %v8742_v45  ;;  %v2909_v41 = vand.u32 2147483647, %v2899_v20 }
 0x2b6   : > { %v8750_v49 = vmul.f32 0.70710677, %v8746_v8  ;;  %v2938_v58 = vmul.f32 %v2937_v47, %v8708_v38  ;;  %v2960_v10 = vadd.f32 0.00028619796, %v2959_v17  ;;  %v2911_v37 = vand.u32 2147483648, %v2899_v20 }
 0x2b7   : > { %v6345_v35 = vclamps-f32 %v2874_v56, 1.0  ;;  %v2971_v3 = vadd.f32 0.001143296, %v2970_v62  ;;  %v2927_v11 = vmul.f32 %v2926_v6, %v8708_v38  ;;  %v2889_v40 = vmul.f32 %v2888_v53, %v8678_v5 }
 0x2b8   : > { %v2997_v50 = vmul.f32 %v8750_v49, %v8750_v49  ;;  %v8759_v15 = vadd.f32 1.0, %v2938_v58  ;;  %v2961_v36 = vmul.f32 %v2960_v10, %v8742_v45  ;;  %vm2905_vm9 = vweird.f32 %v2899_v20 }
 0x2b9   : > { %v3204_v9 = vadd.f32 1.0, %v6345_v35  ;;  %v6885_v42 = vpop.eup %6884  ;;  %v2972_v25 = vmul.f32 %v2971_v3, %v8742_v45  ;;  %v2928_v39 = vadd.f32 1.1283791, %v2927_v11  ;;  %vm2910_vm10 = vcmp.eq.f32.partialorder %v2909_v41, 8.507059e+37 }
 0x2ba   : > { %v8761_v0 = vmin.f32 %v2997_v50, 16.0  ;;  %6886 = vrcp.f32 %v8759_v15  ;;  %v2901_v32 = vmul.f32 %v6885_v42, %v2899_v20  ;;  %vm2906_vm8 = vweird.f32 %v6885_v42 }
 0x2bb   : > { %v3220_v31 = vmul.f32 %v3204_v9, %v2532_v29  ;;  %v2973_v63 = vadd.f32 0.014752088, %v2972_v25  ;;  %v2912_v19 = vor.u32 1.1754944e-38, %v2911_v37  ;;  %v2962_v30 = vadd.f32 0.0036580483, %v2961_v36  ;;  %vm2907_vm11 = vmor %vm2905_vm9, %vm2906_vm8 }
 0x2bc   : > { %v2999_v52 = vmul.f32 2.1237322e-06, %v8761_v0  ;;  %v2902_v22 = vsub.f32 1.0, %v2901_v32  ;;  %v3010_v2 = vmul.f32 3.8918573e-05, %v8761_v0  ;;  %vm2945_vm12 = vweird.f32 %v8759_v15 }
 0x2bd   : > { %v3232_v18 = vpack.c.bf16 %v3220_v31, %v3219_v34  ;;  %v2974_v5 = vmul.f32 %v2973_v63, %v8742_v45  ;;  %v2951_v61 = vand.u32 2147483648, %v8759_v15  ;;  %v2949_v4 = vand.u32 2147483647, %v8759_v15 }
 0x2be   : > { %v3000_v28 = vadd.f32 0.00028619796, %v2999_v52  ;;  %v2903_v7 = vmul.f32 %v6885_v42, %v2902_v22  ;;  %v3011_v23 = vadd.f32 0.001143296, %v3010_v2  ;;  %v2963_v17 = vmul.f32 %v2962_v30, %v8742_v45 }
 0x2bf   : > { %3328 = vmatmul.bf16.gmra.mxu2 %v3232_v18  ;;  %v2975_v26 = vadd.f32 0.112945676, %v2974_v5  ;;  %v2952_v29 = vor.u32 1.1754944e-38, %v2951_v61  ;;  %v2929_v10 = vmul.f32 %v2928_v39, %v8698_v13  ;;  %vm2950_vm15 = vcmp.eq.f32.partialorder %v2949_v4, 8.507059e+37 }
 0x2c0   : > { %v6887_v43 = vpop.eup %6886  ;;  %v2904_v24 = vadd.f32 %v6885_v42, %v2903_v7  ;;  %v3001_v55 = vmul.f32 %v3000_v28, %v8761_v0  ;;  %v3012_v27 = vmul.f32 %v3011_v23, %v8761_v0  ;;  %v2964_v11 = vadd.f32 0.05243302, %v2963_v17 }
 0x2c1   : > { %v2515_v38 = vpop.f32.mrf.mxu1  ;;  %v2941_v1 = vmul.f32 %v6887_v43, %v8759_v15  ;;  %v2976_v47 = vmul.f32 %v2975_v26, %v8742_v45  ;;  %vm2946_vm13 = vweird.f32 %v6887_v43  ;;  %v2533_v63 = vmul.f32 0.5, %v8672_v59 }
 0x2c2   : > { %v8776_v21 = vadd.f32 %v8773_v48, %v2515_v38  ;;  %v2908_v54 = vsel %vm2907_vm11, %v6885_v42, %v2904_v24  ;;  %v3013_v58 = vadd.f32 0.014752088, %v3012_v27  ;;  %v3002_v6 = vadd.f32 0.0036580483, %v3001_v55  ;;  %vm2947_vm14 = vmor %vm2945_vm12, %vm2946_vm13 }
 0x2c3   : > { %v2942_v33 = vsub.f32 1.0, %v2941_v1  ;;  %v2913_v20 = vsel %vm2910_vm10, %v2912_v19, %v2908_v54  ;;  %v2977_v46 = vadd.f32 0.4994258, %v2976_v47  ;;  %v2965_v2 = vmul.f32 %v2964_v11, %v8742_v45 }
 0x2c4   : > { %v8781_v14 = vmul.f32 0.70710677, %v8776_v21  ;;  %v2914_v16 = vmul.f32 %v2913_v20, %v2889_v40  ;;  %v3014_v42 = vmul.f32 %v3013_v58, %v8761_v0  ;;  %v3003_v25 = vmul.f32 %v3002_v6, %v8761_v0 }
 0x2c5   : > { %v2943_v56 = vmul.f32 %v6887_v43, %v2942_v33  ;;  %v2978_v3 = vmul.f32 %v2977_v46, %v8742_v45  ;;  %v2534_v38 = vmul.f32 0.5, %v8694_v51  ;;  %v2966_v55 = vadd.f32 0.18741608, %v2965_v2 }
 0x2c6   : > { %v3037_v44 = vmul.f32 %v8781_v14, %v8781_v14  ;;  %v6346_v62 = vclamps-f32 %v2914_v16, 1.0  ;;  %v3015_v13 = vadd.f32 0.112945676, %v3014_v42  ;;  %v3004_v23 = vadd.f32 0.05243302, %v3003_v25 }
 0x2c7   : > { %v2944_v60 = vadd.f32 %v6887_v43, %v2943_v56  ;;  %v8808_v22 = vadd.f32 1.0, %v2978_v3 }
 0x2c8   : > { %v8792_v35 = vmin.f32 %v3037_v44, 16.0  ;;  %v3205_v37 = vadd.f32 1.0, %v6346_v62  ;;  %v3005_v16 = vmul.f32 %v3004_v23, %v8761_v0 }
 0x2c9   : > { %v2517_v50 = vpop.f32.mrf.mxu1  ;;  %v2948_v34 = vsel %vm2947_vm14, %v6887_v43, %v2944_v60  ;;  %6888 = vrcp.f32 %v8808_v22  ;;  %v3016_v43 = vmul.f32 %v3015_v13, %v8761_v0  ;;  %v2967_v60 = vmul.f32 %v2966_v55, %v8742_v45 }
 0x2ca   : > { %v3039_v9 = vmul.f32 2.1237322e-06, %v8792_v35  ;;  %v8796_v53 = vadd.f32 %v8773_v48, %v2517_v50  ;;  %v3050_v31 = vmul.f32 3.8918573e-05, %v8792_v35  ;;  %v2953_v18 = vsel %vm2950_vm15, %v2952_v29, %v2948_v34 }
 0x2cb   : > { %v2954_v15 = vmul.f32 %v2953_v18, %v2929_v10  ;;  %v3221_v19 = vmul.f32 %v3205_v37, %v2533_v63  ;;  %v3017_v30 = vadd.f32 0.4994258, %v3016_v43  ;;  %v2991_v34 = vand.u32 2147483648, %v8808_v22 }
 0x2cc   : > { %v3040_v52 = vadd.f32 0.00028619796, %v3039_v9  ;;  %v8805_v32 = vmul.f32 0.70710677, %v8796_v53  ;;  %v3051_v40 = vadd.f32 0.001143296, %v3050_v31  ;;  %vm2985_vm1 = vweird.f32 %v8808_v22 }
 0x2cd   : > { %v6347_v36 = vclamps-f32 %v2954_v15, 1.0  ;;  %v3018_v20 = vmul.f32 %v3017_v30, %v8761_v0  ;;  %v3006_v9 = vadd.f32 0.18741608, %v3005_v16  ;;  %v2989_v45 = vand.u32 2147483647, %v8808_v22 }
 0x2ce   : > { %v3077_v41 = vmul.f32 %v8805_v32, %v8805_v32  ;;  %v3041_v39 = vmul.f32 %v3040_v52, %v8792_v35  ;;  %v3052_v5 = vmul.f32 %v3051_v40, %v8792_v35  ;;  %v2968_v25 = vadd.f32 1.1283791, %v2967_v60 }
 0x2cf   : > { %v3206_v7 = vadd.f32 1.0, %v6347_v36  ;;  %v6889_v61 = vpop.eup %6888  ;;  %v8831_v46 = vadd.f32 1.0, %v3018_v20  ;;  %v3007_v36 = vmul.f32 %v3006_v9, %v8761_v0  ;;  %vm2990_vm3 = vcmp.eq.f32.partialorder %v2989_v45, 8.507059e+37 }
 0x2d0   : > { %v8816_v28 = vmin.f32 %v3077_v41, 16.0  ;;  %v3053_v59 = vadd.f32 0.014752088, %v3052_v5  ;;  %v3042_v54 = vadd.f32 0.0036580483, %v3041_v39  ;;  %v2981_v17 = vmul.f32 %v6889_v61, %v8808_v22 }
 0x2d1   : > { %v3222_v1 = vmul.f32 %v3206_v7, %v2534_v38  ;;  %6890 = vrcp.f32 %v8831_v46  ;;  %vm2986_vm0 = vweird.f32 %v6889_v61  ;;  %v2992_v7 = vor.u32 1.1754944e-38, %v2991_v34 }
 0x2d2   : > { %v3079_v24 = vmul.f32 2.1237322e-06, %v8816_v28  ;;  %v3090_v26 = vmul.f32 3.8918573e-05, %v8816_v28  ;;  %v2520_v51 = vpop.f32.mrf.mxu1  ;;  %v3054_v47 = vmul.f32 %v3053_v59, %v8792_v35  ;;  %v3043_v50 = vmul.f32 %v3042_v54, %v8792_v35  ;;  %vm8848_vm2 = vmor %vm2985_vm1, %vm2986_vm0 }
 0x2d3   : > { %v3233_v44 = vpack.c.bf16 %v3222_v1, %v3221_v19  ;;  %v8828_v4 = vadd.f32 %v8773_v48, %v2520_v51  ;;  %v2982_v62 = vsub.f32 1.0, %v2981_v17  ;;  %v2969_v0 = vmul.f32 %v2968_v25, %v8733_v57 }
 0x2d4   : > { %v3080_v33 = vadd.f32 0.00028619796, %v3079_v24  ;;  %v3091_v27 = vadd.f32 0.001143296, %v3090_v26  ;;  %v3055_v58 = vadd.f32 0.112945676, %v3054_v47  ;;  %vm3025_vm5 = vweird.f32 %v8831_v46 }
 0x2d5   : > { %3333 = vmatmul.bf16.gmra.mxu2 %v3233_v44  ;;  %v8837_v29 = vmul.f32 0.70710677, %v8828_v4  ;;  %v2983_v42 = vmul.f32 %v6889_v61, %v2982_v62  ;;  %v3044_v52 = vadd.f32 0.05243302, %v3043_v50  ;;  %v3008_v30 = vadd.f32 1.1283791, %v3007_v36 }
 0x2d6   : > { %v3081_v56 = vmul.f32 %v3080_v33, %v8816_v28  ;;  %v3092_v6 = vmul.f32 %v3091_v27, %v8816_v28  ;;  %v3056_v31 = vmul.f32 %v3055_v58, %v8792_v35  ;;  %v3031_v51 = vand.u32 2147483648, %v8831_v46 }
 0x2d7   : > { %v3117_v10 = vmul.f32 %v8837_v29, %v8837_v29  ;;  %v2984_v18 = vadd.f32 %v6889_v61, %v2983_v42  ;;  %v6891_v39 = vpop.eup %6890  ;;  %v3045_v23 = vmul.f32 %v3044_v52, %v8792_v35  ;;  %v3029_v47 = vand.u32 2147483647, %v8831_v46 }
 0x2d8   : > { %v3082_v3 = vadd.f32 0.0036580483, %v3081_v56  ;;  %v3093_v11 = vadd.f32 0.014752088, %v3092_v6  ;;  %v3057_v13 = vadd.f32 0.4994258, %v3056_v31  ;;  %v3021_v19 = vmul.f32 %v6891_v39, %v8831_v46 }
 0x2d9   : > { %v8846_v15 = vmin.f32 %v3117_v10, 16.0  ;;  %v2988_v22 = vsel %vm8848_vm2, %v6889_v61, %v2984_v18  ;;  %v3046_v61 = vadd.f32 0.18741608, %v3045_v23  ;;  %vm3026_vm4 = vweird.f32 %v6891_v39 }
 0x2da   : > { %v2522_v41 = vpop.f32.mrf.mxu1  ;;  %v3094_v40 = vmul.f32 %v3093_v11, %v8816_v28  ;;  %v3083_v63 = vmul.f32 %v3082_v3, %v8816_v28  ;;  %v3058_v43 = vmul.f32 %v3057_v13, %v8792_v35  ;;  %v3022_v33 = vsub.f32 1.0, %v3021_v19  ;;  %vm3027_vm6 = vmor %vm3025_vm5, %vm3026_vm4 }
 0x2db   : > { %v8856_v2 = vadd.f32 %v8773_v48, %v2522_v41  ;;  %v3119_v38 = vmul.f32 2.1237322e-06, %v8846_v15  ;;  %v2993_v48 = vsel %vm2990_vm3, %v2992_v7, %v2988_v22  ;;  %v2535_v16 = vmul.f32 0.5, %v8726_v12 }
 0x2dc   : > { %v3095_v5 = vadd.f32 0.112945676, %v3094_v40  ;;  %v8868_v1 = vadd.f32 1.0, %v3058_v43  ;;  %v3084_v59 = vadd.f32 0.05243302, %v3083_v63  ;;  %v2994_v57 = vmul.f32 %v2993_v48, %v2969_v0 }
 0x2dd   : > { %v8864_v24 = vmul.f32 0.70710677, %v8856_v2  ;;  %v3120_v54 = vadd.f32 0.00028619796, %v3119_v38  ;;  %v3023_v20 = vmul.f32 %v6891_v39, %v3022_v33  ;;  %v3009_v56 = vmul.f32 %v3008_v30, %v8750_v49 }
 0x2de   : > { %v3096_v55 = vmul.f32 %v3095_v5, %v8816_v28  ;;  %6892 = vrcp.f32 %v8868_v1  ;;  %v3085_v17 = vmul.f32 %v3084_v59, %v8816_v28  ;;  %v3047_v60 = vmul.f32 %v3046_v61, %v8792_v35 }
 0x2df   : > { %v3157_v26 = vmul.f32 %v8864_v24, %v8864_v24  ;;  %v3121_v6 = vmul.f32 %v3120_v54, %v8846_v15  ;;  %v3024_v50 = vadd.f32 %v6891_v39, %v3023_v20  ;;  %v6348_v3 = vclamps-f32 %v2994_v57, 1.0 }
 0x2e0   : > { %v3097_v27 = vadd.f32 0.4994258, %v3096_v55  ;;  %v3032_v42 = vor.u32 1.1754944e-38, %v3031_v51  ;;  %vm3030_vm7 = vcmp.eq.f32.partialorder %v3029_v47, 8.507059e+37  ;;  %v3130_v34 = vmul.f32 3.8918573e-05, %v8846_v15 }
 0x2e1   : > { %v8874_v44 = vmin.f32 %v3157_v26, 16.0  ;;  %v3028_v10 = vsel %vm3027_vm6, %v6891_v39, %v3024_v50  ;;  %v3086_v31 = vadd.f32 0.18741608, %v3085_v17  ;;  %v3122_v18 = vadd.f32 0.0036580483, %v3121_v6 }
 0x2e2   : > { %v3098_v62 = vmul.f32 %v3097_v27, %v8816_v28  ;;  %v3033_v52 = vsel %vm3030_vm7, %v3032_v42, %v3028_v10  ;;  %v2536_v25 = vmul.f32 0.5, %v8746_v8  ;;  %v3207_v37 = vadd.f32 1.0, %v6348_v3 }
 0x2e3   : > { %v3159_v58 = vmul.f32 2.1237322e-06, %v8874_v44  ;;  %v3034_v45 = vmul.f32 %v3033_v52, %v3009_v56  ;;  %v3170_v35 = vmul.f32 3.8918573e-05, %v8874_v44  ;;  %v3048_v40 = vadd.f32 1.1283791, %v3047_v60 }
 0x2e4   : > { %v6893_v12 = vpop.eup %6892  ;;  %v8886_v49 = vadd.f32 1.0, %v3098_v62  ;;  %v3071_v63 = vand.u32 2147483648, %v8868_v1  ;;  %v3131_v22 = vadd.f32 0.001143296, %v3130_v34  ;;  %v3087_v39 = vmul.f32 %v3086_v31, %v8816_v28 }
 0x2e5   : > { %v3160_v9 = vadd.f32 0.00028619796, %v3159_v58  ;;  %v3061_v46 = vmul.f32 %v6893_v12, %v8868_v1  ;;  %v6349_v36 = vclamps-f32 %v3034_v45, 1.0  ;;  %vm3066_vm8 = vweird.f32 %v6893_v12 }
 0x2e6   : > { %6894 = vrcp.f32 %v8886_v49  ;;  %v3069_v7 = vand.u32 2147483647, %v8868_v1  ;;  %v3123_v43 = vmul.f32 %v3122_v18, %v8846_v15  ;;  %v3132_v23 = vmul.f32 %v3131_v22, %v8846_v15 }
 0x2e7   : > { %v3161_v11 = vmul.f32 %v3160_v9, %v8874_v44  ;;  %v3062_v13 = vsub.f32 1.0, %v3061_v46  ;;  %v3208_v5 = vadd.f32 1.0, %v6349_v36  ;;  %v3171_v8 = vadd.f32 0.001143296, %v3170_v35 }
 0x2e8   : > { %v3223_v48 = vmul.f32 %v3207_v37, %v2535_v16  ;;  %vm3065_vm9 = vweird.f32 %v8868_v1  ;;  %v3072_v28 = vor.u32 1.1754944e-38, %v3071_v63  ;;  %v3133_v26 = vadd.f32 0.014752088, %v3132_v23 }
 0x2e9   : > { %v3162_v41 = vadd.f32 0.0036580483, %v3161_v11  ;;  %v3063_v38 = vmul.f32 %v6893_v12, %v3062_v13  ;;  %v3224_v59 = vmul.f32 %v3208_v5, %v2536_v25  ;;  %vm3067_vm10 = vmor %vm3065_vm9, %vm3066_vm8  ;;  %v3172_v55 = vmul.f32 %v3171_v8, %v8874_v44 }
 0x2ea   : > { %v3088_v54 = vadd.f32 1.1283791, %v3087_v39  ;;  %vm3070_vm11 = vcmp.eq.f32.partialorder %v3069_v7, 8.507059e+37  ;;  %v3124_v57 = vadd.f32 0.05243302, %v3123_v43  ;;  %v3134_v47 = vmul.f32 %v3133_v26, %v8846_v15 }
 0x2eb   : > { %v3163_v0 = vmul.f32 %v3162_v41, %v8874_v44  ;;  %v3064_v19 = vadd.f32 %v6893_v12, %v3063_v38  ;;  %v3234_v51 = vpack.c.bf16 %v3224_v59, %v3223_v48  ;;  %v3049_v27 = vmul.f32 %v3048_v40, %v8781_v14  ;;  %v8912_v14 = vld [vmem:[%s11587_s8] ss:$0 sm:$0xff] }
 0x2ec   : > { %v6895_v30 = vpop.eup %6894  ;;  %v3173_v56 = vadd.f32 0.014752088, %v3172_v55  ;;  %v3109_v17 = vand.u32 2147483647, %v8886_v49  ;;  %v3111_v58 = vand.u32 2147483648, %v8886_v49  ;;  %v3125_v9 = vmul.f32 %v3124_v57, %v8846_v15 }
 0x2ed   : > { %v3068_v33 = vsel %vm3067_vm10, %v6893_v12, %v3064_v19  ;;  %v3101_v61 = vmul.f32 %v6895_v30, %v8886_v49  ;;  %v3164_v1 = vadd.f32 0.05243302, %v3163_v0  ;;  %3338 = vmatmul.bf16.gmra.mxu2 %v3234_v51  ;;  %v3135_v6 = vadd.f32 0.112945676, %v3134_v47 }
 0x2ee   : > { %v3073_v20 = vsel %vm3070_vm11, %v3072_v28, %v3068_v33  ;;  %vm3106_vm12 = vweird.f32 %v6895_v30  ;;  %v3174_v60 = vmul.f32 %v3173_v56, %v8874_v44  ;;  %vm3105_vm13 = vweird.f32 %v8886_v49 }
 0x2ef   : > { %v3102_v16 = vsub.f32 1.0, %v3101_v61  ;;  %v3074_v50 = vmul.f32 %v3073_v20, %v3049_v27  ;;  %v3136_v3 = vmul.f32 %v3135_v6, %v8846_v15  ;;  %v3165_v42 = vmul.f32 %v3164_v1, %v8874_v44  ;;  %vm3107_vm14 = vmor %vm3105_vm13, %vm3106_vm12 }
 0x2f0   : > { %v3175_v10 = vadd.f32 0.112945676, %v3174_v60  ;;  %v3089_v34 = vmul.f32 %v3088_v54, %v8805_v32  ;;  %v3112_v31 = vor.u32 1.1754944e-38, %v3111_v58  ;;  %vm3110_vm15 = vcmp.eq.f32.partialorder %v3109_v17, 8.507059e+37 }
 0x2f1   : > { %v3103_v62 = vmul.f32 %v6895_v30, %v3102_v16  ;;  %v3137_v11 = vadd.f32 0.4994258, %v3136_v3  ;;  %v6350_v52 = vclamps-f32 %v3074_v50, 1.0  ;;  %v3126_v35 = vadd.f32 0.18741608, %v3125_v9 }
 0x2f2   : > { %v3176_v45 = vmul.f32 %v3175_v10, %v8874_v44  ;;  %v3166_v49 = vadd.f32 0.18741608, %v3165_v42  ;;  %v2537_v38 = vmul.f32 0.5, %v8776_v21  ;;  %v2538_v5 = vmul.f32 0.5, %v8796_v53 }
 0x2f3   : > { %v3104_v12 = vadd.f32 %v6895_v30, %v3103_v62  ;;  %v3138_v37 = vmul.f32 %v3137_v11, %v8846_v15  ;;  %v3209_v22 = vadd.f32 1.0, %v6350_v52  ;;  %v3127_v7 = vmul.f32 %v3126_v35, %v8846_v15 }
 0x2f4   : > { %v3314_v18 = vpop.f32.mrf.mxu2  ;;  %v3177_v40 = vadd.f32 0.4994258, %v3176_v45  ;;  %v3167_v23 = vmul.f32 %v3166_v49, %v8874_v44 }
 0x2f5   : > { %v3108_v46 = vsel %vm3107_vm14, %v6895_v30, %v3104_v12  ;;  %v8920_v41 = vadd.f32 %v8912_v14, %v3314_v18  ;;  %v8926_v36 = vadd.f32 1.0, %v3138_v37  ;;  %v3225_v19 = vmul.f32 %v3209_v22, %v2537_v38 }
 0x2f6   : > { %v3113_v25 = vsel %vm3110_vm15, %v3112_v31, %v3108_v46  ;;  %v3178_v39 = vmul.f32 %v3177_v40, %v8874_v44  ;;  %v3128_v21 = vadd.f32 1.1283791, %v3127_v7  ;;  %v3168_v53 = vadd.f32 1.1283791, %v3167_v23 }
 0x2f7   : > { %v3114_v13 = vmul.f32 %v3113_v25, %v3089_v34  ;;  %v8924_v32 = vmul.f32 0.70710677, %v8920_v41  ;;  %6896 = vrcp.f32 %v8926_v36  ;;  %v3151_v51 = vand.u32 2147483648, %v8926_v36 }
 0x2f8   : > { %v8936_v0 = vadd.f32 1.0, %v3178_v39  ;;  %v3129_v20 = vmul.f32 %v3128_v21, %v8837_v29  ;;  %v3169_v16 = vmul.f32 %v3168_v53, %v8864_v24  ;;  %vm3145_vm0 = vweird.f32 %v8926_v36 }
 0x2f9   : > { %v6351_v63 = vclamps-f32 %v3114_v13, 1.0  ;;  %v3386_v43 = vmul.f32 %v8924_v32, %v8924_v32  ;;  %v3149_v50 = vand.u32 2147483647, %v8926_v36  ;;  %v3152_v9 = vor.u32 1.1754944e-38, %v3151_v51  ;;  %v6662_v51 = vld [vmem:[%s11588_s9 + $0x74] sm:$0xf] }
 0x2fa   : > { %6898 = vrcp.f32 %v8936_v0  ;;  %v3189_v12 = vand.u32 2147483647, %v8936_v0  ;;  %v3191_v11 = vand.u32 2147483648, %v8936_v0  ;;  %vm3185_vm5 = vweird.f32 %v8936_v0 }
 0x2fb   : > { %v3210_v8 = vadd.f32 1.0, %v6351_v63  ;;  %v8938_v48 = vmin.f32 %v3386_v43, 16.0  ;;  %vm3150_vm4 = vcmp.eq.f32.partialorder %v3149_v50, 8.507059e+37 }
 0x2fc   : > { %v3316_v59 = vpop.f32.mrf.mxu2  ;;  %vm3190_vm7 = vcmp.eq.f32.partialorder %v3189_v12, 8.507059e+37 }
 0x2fd   : > { %v3226_v30 = vmul.f32 %v3210_v8, %v2538_v5  ;;  %v3388_v15 = vmul.f32 2.1237322e-06, %v8938_v48  ;;  %v3399_v28 = vmul.f32 3.8918573e-05, %v8938_v48  ;;  %v8944_v26 = vadd.f32 %v8912_v14, %v3316_v59  ;;  %v6897_v55 = vpop.eup %6896 }
 0x2fe   : > { %v3141_v57 = vmul.f32 %v6897_v55, %v8926_v36  ;;  %vm3146_vm1 = vweird.f32 %v6897_v55  ;;  %v3192_v36 = vor.u32 1.1754944e-38, %v3191_v11 }
 0x2ff   : > { %v3235_v44 = vpack.c.bf16 %v3226_v30, %v3225_v19  ;;  %v3389_v54 = vadd.f32 0.00028619796, %v3388_v15  ;;  %v3400_v33 = vadd.f32 0.001143296, %v3399_v28  ;;  %v8947_v61 = vmul.f32 0.70710677, %v8944_v26  ;;  %vm3147_vm2 = vmor %vm3145_vm0, %vm3146_vm1 }
 0x300   : > { %v6899_v1 = vpop.eup %6898  ;;  %v3142_v17 = vsub.f32 1.0, %v3141_v57 }
 0x301   : > { %3343 = vmatmul.bf16.gmra.mxu2 %v3235_v44  ;;  %v3390_v47 = vmul.f32 %v3389_v54, %v8938_v48  ;;  %v3401_v27 = vmul.f32 %v3400_v33, %v8938_v48  ;;  %v3426_v56 = vmul.f32 %v8947_v61, %v8947_v61  ;;  %v3181_v62 = vmul.f32 %v6899_v1, %v8936_v0  ;;  %v6460_v54 = vld [vmem:[%s11588_s9 + $0x70] sm:$0xf]  ;;  %v6663_v33 = vld [vmem:[%s11588_s9 + $0x74] sm:$0xf0] }
 0x302   : > { %v3143_v60 = vmul.f32 %v6897_v55, %v3142_v17  ;;  %vm3186_vm3 = vweird.f32 %v6899_v1 }
 0x303   : > { %v3391_v58 = vadd.f32 0.0036580483, %v3390_v47  ;;  %v3402_v6 = vadd.f32 0.014752088, %v3401_v27  ;;  %v8960_v29 = vmin.f32 %v3426_v56, 16.0  ;;  %v3182_v42 = vsub.f32 1.0, %v3181_v62  ;;  %vm3187_vm6 = vmor %vm3185_vm5, %vm3186_vm3 }
 0x304   : > { %v3144_v31 = vadd.f32 %v6897_v55, %v3143_v60  ;;  %v2539_v47 = vmul.f32 0.5, %v8828_v4 }
 0x305   : > { %v3392_v3 = vmul.f32 %v3391_v58, %v8938_v48  ;;  %v3403_v24 = vmul.f32 %v3402_v6, %v8938_v48  ;;  %v3428_v10 = vmul.f32 2.1237322e-06, %v8960_v29  ;;  %v3439_v34 = vmul.f32 3.8918573e-05, %v8960_v29  ;;  %v6452_v6 = vld [vmem:[%s11588_s9 + $0x60] sm:$0xf] }
 0x306   : > { %v3183_v18 = vmul.f32 %v6899_v1, %v3182_v42  ;;  %v3148_v25 = vsel %vm3147_vm2, %v6897_v55, %v3144_v31  ;;  %v6461_v58 = vor.u32 %v6663_v33, %v6460_v54  ;;  %v6454_v42 = vld [vmem:[%s11588_s9 + $0x68] sm:$0xf0] }
 0x307   : > { %v3393_v52 = vadd.f32 0.05243302, %v3392_v3  ;;  %v3404_v46 = vadd.f32 0.112945676, %v3403_v24  ;;  %v3429_v45 = vadd.f32 0.00028619796, %v3428_v10  ;;  %v3153_v49 = vsel %vm3150_vm4, %v3152_v9, %v3148_v25 }
 0x308   : > { %v3440_v35 = vadd.f32 0.001143296, %v3439_v34  ;;  %v3184_v13 = vadd.f32 %v6899_v1, %v3183_v18  ;;  %v3154_v22 = vmul.f32 %v3153_v49, %v3129_v20  ;;  %v3319_v21 = vpop.f32.mrf.mxu2  ;;  %v6462_v20 = vld [vmem:[%s11588_s9 + $0x78] sm:$0xf0]  ;;  %4168 = vmatpush.bf16.msrb.mxu3 %v6461_v58  ;;  %v6660_v24 = vld [vmem:[%s11588_s9 + $0x64] sm:$0xf] }
 0x309   : > { %v3405_v37 = vmul.f32 %v3404_v46, %v8938_v48  ;;  %v3430_v40 = vmul.f32 %v3429_v45, %v8960_v29  ;;  %v3394_v39 = vmul.f32 %v3393_v52, %v8938_v48  ;;  %v8981_v53 = vadd.f32 %v8912_v14, %v3319_v21  ;;  %v6444_v45 = vld [vmem:[%s11588_s9 + $0x50] sm:$0xf]  ;;  %v6438_v21 = vld [vmem:[%s11588_s9 + $0x48] sm:$0xf0] }
 0x30a   : > { %v3441_v63 = vmul.f32 %v3440_v35, %v8960_v29  ;;  %v3188_v7 = vsel %vm3187_vm6, %v6899_v1, %v3184_v13  ;;  %v6352_v19 = vclamps-f32 %v3154_v22, 1.0  ;;  %v6465_v62 = vor.u32 %v6662_v51, %v6462_v20  ;;  %v6659_v35 = vld [vmem:[%s11588_s9 + $0x54] sm:$0xf0] }
 0x30b   : > { %v3406_v38 = vadd.f32 0.4994258, %v3405_v37  ;;  %v3431_v43 = vadd.f32 0.0036580483, %v3430_v40  ;;  %v3193_v23 = vsel %vm3190_vm7, %v3192_v36, %v3188_v7  ;;  %v3395_v15 = vadd.f32 0.18741608, %v3394_v39 }
 0x30c   : > { %v3442_v5 = vadd.f32 0.014752088, %v3441_v63  ;;  %v3194_v30 = vmul.f32 %v3193_v23, %v3169_v16  ;;  %v3211_v57 = vadd.f32 1.0, %v6352_v19  ;;  %v2540_v16 = vmul.f32 0.5, %v8856_v2  ;;  %v6661_v2 = vld [vmem:[%s11588_s9 + $0x64] sm:$0xf0]  ;;  %4217 = vmatpush.bf16.msrb.mxu0 %v6465_v62 }
 0x30d   : > { %v3407_v8 = vmul.f32 %v3406_v38, %v8938_v48  ;;  %v3432_v0 = vmul.f32 %v3431_v43, %v8960_v29  ;;  %v9000_v56 = vmul.f32 0.70710677, %v8981_v53  ;;  %v3396_v60 = vmul.f32 %v3395_v15, %v8938_v48  ;;  %v6658_v63 = vld [vmem:[%s11588_s9 + $0x54] sm:$0xf]  ;;  %v6446_v39 = vld [vmem:[%s11588_s9 + $0x58] sm:$0xf0] }
 0x30e   : > { %v3443_v59 = vmul.f32 %v3442_v5, %v8960_v29  ;;  %v6353_v44 = vclamps-f32 %v3194_v30, 1.0  ;;  %v3227_v9 = vmul.f32 %v3211_v57, %v2539_v47  ;;  %v6453_v10 = vor.u32 %v6661_v2, %v6452_v6  ;;  %v6436_v19 = vld [vmem:[%s11588_s9 + $0x40] sm:$0xf]  ;;  %v6657_v30 = vld [vmem:[%s11588_s9 + $0x44] sm:$0xf0] }
 0x30f   : > { %v8978_v28 = vadd.f32 1.0, %v3407_v8  ;;  %v3433_v27 = vadd.f32 0.05243302, %v3432_v0  ;;  %v3466_v4 = vmul.f32 %v9000_v56, %v9000_v56  ;;  %v6457_v34 = vor.u32 %v6660_v24, %v6454_v42  ;;  %v6656_v0 = vld [vmem:[%s11588_s9 + $0x44] sm:$0xf] }
 0x310   : > { %v3444_v55 = vadd.f32 0.112945676, %v3443_v59  ;;  %v3212_v17 = vadd.f32 1.0, %v6353_v44  ;;  %v3321_v12 = vpop.f32.mrf.mxu2  ;;  %v3397_v49 = vadd.f32 1.1283791, %v3396_v60  ;;  %4169 = vmatpush.bf16.msrb.mxu3 %v6453_v10  ;;  %v6445_v40 = vor.u32 %v6659_v35, %v6444_v45 }
 0x311   : > { %6900 = vrcp.f32 %v8978_v28  ;;  %v3434_v11 = vmul.f32 %v3433_v27, %v8960_v29  ;;  %v9019_v52 = vmin.f32 %v3466_v4, 16.0  ;;  %v9022_v18 = vadd.f32 %v8912_v14, %v3321_v12  ;;  %4218 = vmatpush.bf16.msrb.mxu0 %v6457_v34  ;;  %v6428_v57 = vld [vmem:[%s11588_s9 + $0x30] sm:$0xf]  ;;  %v6420_v2 = vld [vmem:[%s11588_s9 + $0x20] sm:$0xf] }
 0x312   : > { %v3445_v1 = vmul.f32 %v3444_v55, %v8960_v29  ;;  %v3228_v3 = vmul.f32 %v3212_v17, %v2540_v16  ;;  %v3418_v36 = vand.u32 2147483647, %v8978_v28  ;;  %v3420_v38 = vand.u32 2147483648, %v8978_v28  ;;  %v6430_v16 = vld [vmem:[%s11588_s9 + $0x38] sm:$0xf0] }
 0x313   : > { %v9034_v13 = vmul.f32 0.70710677, %v9022_v18  ;;  %v3435_v7 = vadd.f32 0.18741608, %v3434_v11  ;;  %v3468_v43 = vmul.f32 2.1237322e-06, %v9019_v52  ;;  %v6449_v8 = vor.u32 %v6658_v63, %v6446_v39 }
 0x314   : > { %v3446_v50 = vadd.f32 0.4994258, %v3445_v1  ;;  %v3236_v46 = vpack.c.bf16 %v3228_v3, %v3227_v9  ;;  %4170 = vmatpush.bf16.msrb.mxu3 %v6445_v40  ;;  %vm3414_vm9 = vweird.f32 %v8978_v28  ;;  %v6437_v44 = vor.u32 %v6657_v30, %v6436_v19  ;;  %v6654_v1 = vld [vmem:[%s11588_s9 + $0x34] sm:$0xf]  ;;  %v6653_v12 = vld [vmem:[%s11588_s9 + $0x24] sm:$0xf0] }
 0x315   : > { %v3506_v5 = vmul.f32 %v9034_v13, %v9034_v13  ;;  %4219 = vmatpush.bf16.msrb.mxu0 %v6449_v8  ;;  %v6441_v55 = vor.u32 %v6656_v0, %v6438_v21  ;;  %vm3419_vm11 = vcmp.eq.f32.partialorder %v3418_v36, 8.507059e+37  ;;  %v3421_v54 = vor.u32 1.1754944e-38, %v3420_v38  ;;  %v6652_v10 = vld [vmem:[%s11588_s9 + $0x24] sm:$0xf]  ;;  %v6412_v36 = vld [vmem:[%s11588_s9 + $0x10] sm:$0xf] }
 0x316   : > { %v3447_v48 = vmul.f32 %v3446_v50, %v8960_v29  ;;  %3348 = vmatmul.bf16.gmra.mxu2 %v3236_v46  ;;  %v3469_v33 = vadd.f32 0.00028619796, %v3468_v43  ;;  %v3398_v20 = vmul.f32 %v3397_v49, %v8924_v32  ;;  %v3436_v27 = vmul.f32 %v3435_v7, %v8960_v29  ;;  %v6422_v46 = vld [vmem:[%s11588_s9 + $0x28] sm:$0xf0]  ;;  %v6651_v39 = vld [vmem:[%s11588_s9 + $0x14] sm:$0xf0] }
 0x317   : > { %v6901_v31 = vpop.eup %6900  ;;  %v9057_v59 = vmin.f32 %v3506_v5, 16.0  ;;  %v3479_v29 = vmul.f32 3.8918573e-05, %v9019_v52  ;;  %v6433_v60 = vor.u32 %v6654_v1, %v6430_v16  ;;  %v6421_v11 = vor.u32 %v6653_v12, %v6420_v2  ;;  %v6650_v5 = vld [vmem:[%s11588_s9 + $0x14] sm:$0xf] }
 0x318   : > { %v3410_v25 = vmul.f32 %v6901_v31, %v8978_v28  ;;  %v9031_v37 = vadd.f32 1.0, %v3447_v48  ;;  %vm3415_vm8 = vweird.f32 %v6901_v31  ;;  %v6655_v28 = vld [vmem:[%s11588_s9 + $0x34] sm:$0xf0]  ;;  %4171 = vmatpush.bf16.msrb.mxu3 %v6437_v44  ;;  %v3437_v24 = vadd.f32 1.1283791, %v3436_v27 }
 0x319   : > { %vm3416_vm10 = vmor %vm3414_vm9, %vm3415_vm8  ;;  %v3508_v32 = vmul.f32 2.1237322e-06, %v9057_v59  ;;  %4220 = vmatpush.bf16.msrb.mxu0 %v6441_v55  ;;  %v6429_v62 = vor.u32 %v6655_v28, %v6428_v57  ;;  %v3470_v42 = vmul.f32 %v3469_v33, %v9019_v52  ;;  %v3480_v45 = vadd.f32 0.001143296, %v3479_v29  ;;  %v6404_v33 = vld [vmem:[%s11588_s9] sm:$0xf] }
 0x31a   : > { %v3411_v22 = vsub.f32 1.0, %v3410_v25  ;;  %6902 = vrcp.f32 %v9031_v37  ;;  %v3458_v50 = vand.u32 2147483647, %v9031_v37  ;;  %v3460_v9 = vand.u32 2147483648, %v9031_v37  ;;  %v6649_v57 = vld [vmem:[%s11588_s9 + $0x4] sm:$0xf0] }
 0x31b   : > { %vm3454_vm13 = vweird.f32 %v9031_v37  ;;  %v3438_v38 = vmul.f32 %v3437_v24, %v8947_v61  ;;  %v3471_v7 = vadd.f32 0.0036580483, %v3470_v42  ;;  %v6413_v30 = vor.u32 %v6651_v39, %v6412_v36  ;;  %v6648_v28 = vld [vmem:[%s11588_s9 + $0x4] sm:$0xf]  ;;  %v6406_v1 = vld [vmem:[%s11588_s9 + $0x8] sm:$0xf0] }
 0x31c   : > { %v3412_v23 = vmul.f32 %v6901_v31, %v3411_v22  ;;  %4172 = vmatpush.bf16.msrb.mxu3 %v6429_v62  ;;  %vm9099_vm14 = vcmp.eq.f32.partialorder %v3458_v50, 8.507059e+37  ;;  %v3461_v63 = vor.u32 1.1754944e-38, %v3460_v9  ;;  %v6425_v22 = vor.u32 %v6652_v10, %v6422_v46 }
 0x31d   : > { %4221 = vmatpush.bf16.msrb.mxu0 %v6433_v60  ;;  %v3354_v16 = vmul.f32 0.5, %v8920_v41  ;;  %v3355_v29 = vmul.f32 0.5, %v8944_v26  ;;  %v6409_v62 = vor.u32 %v6648_v28, %v6406_v1  ;;  %v3472_v41 = vmul.f32 %v3471_v7, %v9019_v52 }
 0x31e   : > { %v3413_v15 = vadd.f32 %v6901_v31, %v3412_v23  ;;  %v6414_v23 = vld [vmem:[%s11588_s9 + $0x18] sm:$0xf0] }
 0x31f   : > { %v6417_v44 = vor.u32 %v6650_v5, %v6414_v23 }
 0x320   : > { %v6903_v51 = vpop.eup %6902  ;;  %v3417_v47 = vsel %vm3416_vm10, %v6901_v31, %v3413_v15  ;;  %v3509_v31 = vadd.f32 0.00028619796, %v3508_v32  ;;  %4173 = vmatpush.bf16.msrb.mxu3 %v6421_v11 }
 0x321   : > { %v3422_v17 = vsel %vm3419_vm11, %v3421_v54, %v3417_v47  ;;  %v3450_v58 = vmul.f32 %v6903_v51, %v9031_v37  ;;  %vm3455_vm12 = vweird.f32 %v6903_v51  ;;  %v3481_v37 = vmul.f32 %v3480_v45, %v9019_v52  ;;  %4222 = vmatpush.bf16.msrb.mxu0 %v6425_v22 }
 0x322   : > { %v3423_v6 = vmul.f32 %v3422_v17, %v3398_v20  ;;  %vm3456_vm15 = vmor %vm3454_vm13, %vm3455_vm12  ;;  %v3510_v19 = vmul.f32 %v3509_v31, %v9057_v59  ;;  %v3519_v20 = vmul.f32 3.8918573e-05, %v9057_v59 }
 0x323   : > { %v3451_v4 = vsub.f32 1.0, %v3450_v58  ;;  %v3482_v61 = vadd.f32 0.014752088, %v3481_v37  ;;  %v6405_v58 = vor.u32 %v6649_v57, %v6404_v33 }
 0x324   : > { %v6386_v35 = vclamps-f32 %v3423_v6, 1.0  ;;  %4174 = vmatpush.bf16.msrb.mxu3 %v6413_v30  ;;  %v3511_v6 = vadd.f32 0.0036580483, %v3510_v19 }
 0x325   : > { %v3452_v34 = vmul.f32 %v6903_v51, %v3451_v4  ;;  %4223 = vmatpush.bf16.msrb.mxu0 %v6417_v44 }
 0x326   : > { %v3324_v3 = vpop.f32.mrf.mxu2  ;;  %v4026_v0 = vadd.f32 1.0, %v6386_v35  ;;  %v3512_v31 = vmul.f32 %v3511_v6, %v9057_v59 }
 0x327   : > { %v9087_v48 = vadd.f32 %v8912_v14, %v3324_v3  ;;  %v3453_v40 = vadd.f32 %v6903_v51, %v3452_v34  ;;  %v3520_v3 = vadd.f32 0.001143296, %v3519_v20 }
 0x328   : > { %v4042_v2 = vmul.f32 %v4026_v0, %v3354_v16  ;;  %4175 = vmatpush.bf16.msrb.mxu3 %v6405_v58 }
 0x329   : > { %v9104_v49 = vmul.f32 0.70710677, %v9087_v48  ;;  %v3457_v8 = vsel %vm3456_vm15, %v6903_v51, %v3453_v40  ;;  %v3483_v51 = vmul.f32 %v3482_v61, %v9019_v52  ;;  %v3521_v34 = vmul.f32 %v3520_v3, %v9057_v59  ;;  %4224 = vmatpush.bf16.msrb.mxu0 %v6409_v62 }
 0x32a   : > { %v3462_v21 = vsel %vm9099_vm14, %v3461_v63, %v3457_v8  ;;  %v3473_v63 = vadd.f32 0.05243302, %v3472_v41 }
 0x32b   : > { %v3546_v43 = vmul.f32 %v9104_v49, %v9104_v49  ;;  %v3463_v55 = vmul.f32 %v3462_v21, %v3438_v38  ;;  %v3484_v32 = vadd.f32 0.112945676, %v3483_v51  ;;  %v3522_v40 = vadd.f32 0.014752088, %v3521_v34 }
 0x32c   : > { %v3474_v8 = vmul.f32 %v3473_v63, %v9019_v52 }
 0x32d   : > { %v9126_v15 = vmin.f32 %v3546_v43, 16.0  ;;  %v6387_v17 = vclamps-f32 %v3463_v55, 1.0  ;;  %v3485_v9 = vmul.f32 %v3484_v32, %v9019_v52  ;;  %v3523_v38 = vmul.f32 %v3522_v40, %v9057_v59 }
 0x32e   : > { %v3326_v54 = vpop.f32.mrf.mxu2  ;;  %v3513_v43 = vadd.f32 0.05243302, %v3512_v31  ;;  %v3475_v51 = vadd.f32 0.18741608, %v3474_v8 }
 0x32f   : > { %v3548_v47 = vmul.f32 2.1237322e-06, %v9126_v15  ;;  %v9138_v27 = vadd.f32 %v8912_v14, %v3326_v54  ;;  %v4027_v60 = vadd.f32 1.0, %v6387_v17  ;;  %v3559_v42 = vmul.f32 3.8918573e-05, %v9126_v15 }
 0x330   : > { %v3486_v10 = vadd.f32 0.4994258, %v3485_v9  ;;  %v3524_v19 = vadd.f32 0.112945676, %v3523_v38  ;;  %v3514_v44 = vmul.f32 %v3513_v43, %v9057_v59  ;;  %v3476_v9 = vmul.f32 %v3475_v51, %v9019_v52 }
 0x331   : > { %v3549_v50 = vadd.f32 0.00028619796, %v3548_v47  ;;  %v9149_v4 = vmul.f32 0.70710677, %v9138_v27  ;;  %v4043_v12 = vmul.f32 %v4027_v60, %v3355_v29  ;;  %v3560_v46 = vadd.f32 0.001143296, %v3559_v42 }
 0x332   : > { %v3487_v25 = vmul.f32 %v3486_v10, %v9019_v52  ;;  %v3525_v55 = vmul.f32 %v3524_v19, %v9057_v59  ;;  %v3515_v32 = vadd.f32 0.18741608, %v3514_v44  ;;  %v9221_v19 = vmul.f32 0.5, %v8981_v53 }
 0x333   : > { %v3550_v24 = vmul.f32 %v3549_v50, %v9126_v15  ;;  %v3586_v26 = vmul.f32 %v9149_v4, %v9149_v4  ;;  %v4058_v35 = vpack.c.bf16 %v4043_v12, %v4042_v2  ;;  %v3561_v36 = vmul.f32 %v3560_v46, %v9126_v15 }
 0x334   : > { %v9165_v37 = vadd.f32 1.0, %v3487_v25  ;;  %v3526_v20 = vadd.f32 0.4994258, %v3525_v55  ;;  %v3516_v10 = vmul.f32 %v3515_v32, %v9057_v59 }
 0x335   : > { %v3551_v11 = vadd.f32 0.0036580483, %v3550_v24  ;;  %v9159_v45 = vmin.f32 %v3586_v26, 16.0  ;;  %4176 = vmatmul.bf16.vlgmr.msrb.gmra.mxu3 %v4058_v35  ;;  %4225 = vmatmul.bf16.vlgmr.msrb.gmra.mxu0 %v4058_v35  ;;  %v3562_v5 = vadd.f32 0.014752088, %v3561_v36 }
 0x336   : > { %6904 = vrcp.f32 %v9165_v37  ;;  %v3527_v50 = vmul.f32 %v3526_v20, %v9057_v59  ;;  %vm3494_vm1 = vweird.f32 %v9165_v37  ;;  %v3498_v52 = vand.u32 2147483647, %v9165_v37 }
 0x337   : > { %v3552_v22 = vmul.f32 %v3551_v11, %v9126_v15  ;;  %v3588_v39 = vmul.f32 2.1237322e-06, %v9159_v45  ;;  %v3599_v7 = vmul.f32 3.8918573e-05, %v9159_v45  ;;  %v3563_v30 = vmul.f32 %v3562_v5, %v9126_v15 }
 0x338   : > { %v9189_v42 = vadd.f32 1.0, %v3527_v50  ;;  %v3500_v11 = vand.u32 2147483648, %v9165_v37  ;;  %v3517_v43 = vadd.f32 1.1283791, %v3516_v10  ;;  %vm3499_vm3 = vcmp.eq.f32.partialorder %v3498_v52, 8.507059e+37 }
 0x339   : > { %v3589_v23 = vadd.f32 0.00028619796, %v3588_v39  ;;  %v3553_v61 = vadd.f32 0.05243302, %v3552_v22  ;;  %v3600_v21 = vadd.f32 0.001143296, %v3599_v7 }
 0x33a   : > { %v3564_v54 = vadd.f32 0.112945676, %v3563_v30  ;;  %6906 = vrcp.f32 %v9189_v42  ;;  %v3477_v39 = vadd.f32 1.1283791, %v3476_v9  ;;  %v3501_v5 = vor.u32 1.1754944e-38, %v3500_v11 }
 0x33b   : > { %v3590_v0 = vmul.f32 %v3589_v23, %v9159_v45  ;;  %v3601_v57 = vmul.f32 %v3600_v21, %v9159_v45  ;;  %v3554_v1 = vmul.f32 %v3553_v61, %v9126_v15  ;;  %v3538_v51 = vand.u32 2147483647, %v9189_v42 }
 0x33c   : > { %v3565_v47 = vmul.f32 %v3564_v54, %v9126_v15  ;;  %v6905_v28 = vpop.eup %6904  ;;  %v3478_v21 = vmul.f32 %v3477_v39, %v9000_v56  ;;  %vm3534_vm5 = vweird.f32 %v9189_v42 }
 0x33d   : > { %v3591_v33 = vadd.f32 0.0036580483, %v3590_v0  ;;  %v3602_v58 = vadd.f32 0.014752088, %v3601_v57  ;;  %v3490_v6 = vmul.f32 %v6905_v28, %v9165_v37  ;;  %v3555_v24 = vadd.f32 0.18741608, %v3554_v1 }
 0x33e   : > { %v3566_v62 = vadd.f32 0.4994258, %v3565_v47  ;;  %vm3495_vm0 = vweird.f32 %v6905_v28  ;;  %v3518_v57 = vmul.f32 %v3517_v43, %v9034_v13  ;;  %vm9246_vm6 = vcmp.eq.f32.partialorder %v3538_v51, 8.507059e+37 }
 0x33f   : > { %v3592_v16 = vmul.f32 %v3591_v33, %v9159_v45  ;;  %v3603_v60 = vmul.f32 %v3602_v58, %v9159_v45  ;;  %v3491_v41 = vsub.f32 1.0, %v3490_v6  ;;  %v3556_v59 = vmul.f32 %v3555_v24, %v9126_v15  ;;  %vm9205_vm2 = vmor %vm3494_vm1, %vm3495_vm0 }
 0x340   : > { %v3567_v12 = vmul.f32 %v3566_v62, %v9126_v15  ;;  %v6907_v8 = vpop.eup %6906  ;;  %v9228_v33 = vmul.f32 0.5, %v9022_v18 }
 0x341   : > { %v3593_v3 = vadd.f32 0.05243302, %v3592_v16  ;;  %v3604_v26 = vadd.f32 0.112945676, %v3603_v60  ;;  %v3492_v31 = vmul.f32 %v6905_v28, %v3491_v41  ;;  %v3557_v30 = vadd.f32 1.1283791, %v3556_v59 }
 0x342   : > { %v3329_v17 = vpop.f32.mrf.mxu2  ;;  %v9202_v40 = vadd.f32 1.0, %v3567_v12  ;;  %v3530_v54 = vmul.f32 %v6907_v8, %v9189_v42  ;;  %vm3535_vm4 = vweird.f32 %v6907_v8 }
 0x343   : > { %v9180_v29 = vadd.f32 %v8912_v14, %v3329_v17  ;;  %v3594_v46 = vmul.f32 %v3593_v3, %v9159_v45  ;;  %v3493_v25 = vadd.f32 %v6905_v28, %v3492_v31  ;;  %v3605_v36 = vmul.f32 %v3604_v26, %v9159_v45  ;;  %vm3536_vm7 = vmor %vm3534_vm5, %vm3535_vm4 }
 0x344   : > { %6908 = vrcp.f32 %v9202_v40  ;;  %v9237_v16 = vmul.f32 %v3557_v30, %v9104_v49  ;;  %v3540_v17 = vand.u32 2147483648, %v9189_v42  ;;  %v3578_v24 = vand.u32 2147483647, %v9202_v40 }
 0x345   : > { %v9187_v2 = vmul.f32 0.70710677, %v9180_v29  ;;  %v3497_v7 = vsel %vm9205_vm2, %v6905_v28, %v3493_v25  ;;  %v3595_v15 = vadd.f32 0.18741608, %v3594_v46  ;;  %v3606_v0 = vadd.f32 0.4994258, %v3605_v36 }
 0x346   : > { %v3502_v61 = vsel %vm3499_vm3, %v3501_v5, %v3497_v7  ;;  %v3531_v28 = vsub.f32 1.0, %v3530_v54  ;;  %v3541_v3 = vor.u32 1.1754944e-38, %v3540_v17  ;;  %v3580_v10 = vand.u32 2147483648, %v9202_v40 }
 0x347   : > { %v3626_v34 = vmul.f32 %v9187_v2, %v9187_v2  ;;  %v3607_v53 = vmul.f32 %v3606_v0, %v9159_v45  ;;  %v3596_v20 = vmul.f32 %v3595_v15, %v9159_v45  ;;  %v3503_v56 = vmul.f32 %v3502_v61, %v3478_v21 }
 0x348   : > { %v3532_v6 = vmul.f32 %v6907_v8, %v3531_v28  ;;  %vm3574_vm9 = vweird.f32 %v9202_v40  ;;  %vm3579_vm11 = vcmp.eq.f32.partialorder %v3578_v24, 8.507059e+37  ;;  %v3581_v61 = vor.u32 1.1754944e-38, %v3580_v10 }
 0x349   : > { %v9200_v35 = vmin.f32 %v3626_v34, 16.0  ;;  %v9240_v18 = vadd.f32 1.0, %v3607_v53  ;;  %v3597_v50 = vadd.f32 1.1283791, %v3596_v20  ;;  %v6388_v60 = vclamps-f32 %v3503_v56, 1.0 }
 0x34a   : > { %v3331_v63 = vpop.f32.mrf.mxu2  ;;  %v6909_v1 = vpop.eup %6908  ;;  %v3533_v9 = vadd.f32 %v6907_v8, %v3532_v6 }
 0x34b   : > { %v3628_v37 = vmul.f32 2.1237322e-06, %v9200_v35  ;;  %v9212_v38 = vadd.f32 %v8912_v14, %v3331_v63  ;;  %v3639_v13 = vmul.f32 3.8918573e-05, %v9200_v35  ;;  %v3570_v49 = vmul.f32 %v6909_v1, %v9202_v40 }
 0x34c   : > { %6910 = vrcp.f32 %v9240_v18  ;;  %v3537_v42 = vsel %vm3536_vm7, %v6907_v8, %v3533_v9  ;;  %vm3575_vm8 = vweird.f32 %v6909_v1  ;;  %v4028_v63 = vadd.f32 1.0, %v6388_v60 }
 0x34d   : > { %v9218_v23 = vmul.f32 0.70710677, %v9212_v38  ;;  %v3629_v44 = vadd.f32 0.00028619796, %v3628_v37  ;;  %v3571_v41 = vsub.f32 1.0, %v3570_v49  ;;  %v3542_v31 = vsel %vm9246_vm6, %v3541_v3, %v3537_v42  ;;  %vm3576_vm10 = vmor %vm3574_vm9, %vm3575_vm8 }
 0x34e   : > { %v3640_v12 = vadd.f32 0.001143296, %v3639_v13  ;;  %v3543_v59 = vmul.f32 %v3542_v31, %v3518_v57  ;;  %v3598_v36 = vmul.f32 %v3597_v50, %v9149_v4  ;;  %v4044_v21 = vmul.f32 %v4028_v63, %v9221_v19 }
 0x34f   : > { %v3666_v55 = vmul.f32 %v9218_v23, %v9218_v23  ;;  %v3630_v58 = vmul.f32 %v3629_v44, %v9200_v35  ;;  %v3572_v52 = vmul.f32 %v6909_v1, %v3571_v41  ;;  %vm3614_vm12 = vweird.f32 %v9240_v18 }
 0x350   : > { %v3641_v11 = vmul.f32 %v3640_v12, %v9200_v35  ;;  %v6389_v43 = vclamps-f32 %v3543_v59, 1.0  ;;  %v3618_v53 = vand.u32 2147483647, %v9240_v18  ;;  %v3620_v20 = vand.u32 2147483648, %v9240_v18 }
 0x351   : > { %v9234_v47 = vmin.f32 %v3666_v55, 16.0  ;;  %v3631_v26 = vadd.f32 0.0036580483, %v3630_v58  ;;  %v3573_v37 = vadd.f32 %v6909_v1, %v3572_v52  ;;  %v3359_v52 = vmul.f32 0.5, %v9138_v27 }
 0x352   : > { %v6911_v22 = vpop.eup %6910  ;;  %v3642_v7 = vadd.f32 0.014752088, %v3641_v11  ;;  %v4029_v4 = vadd.f32 1.0, %v6389_v43  ;;  %vm3619_vm15 = vcmp.eq.f32.partialorder %v3618_v53, 8.507059e+37 }
 0x353   : > { %v3668_v32 = vmul.f32 2.1237322e-06, %v9234_v47  ;;  %v3679_v34 = vmul.f32 3.8918573e-05, %v9234_v47  ;;  %v3610_v5 = vmul.f32 %v6911_v22, %v9240_v18  ;;  %v3632_v8 = vmul.f32 %v3631_v26, %v9200_v35 }
 0x354   : > { %v3577_v40 = vsel %vm3576_vm10, %v6909_v1, %v3573_v37  ;;  %v3643_v57 = vmul.f32 %v3642_v7, %v9200_v35  ;;  %v4045_v51 = vmul.f32 %v4029_v4, %v9228_v33  ;;  %vm3615_vm13 = vweird.f32 %v6911_v22 }
 0x355   : > { %v3669_v62 = vadd.f32 0.00028619796, %v3668_v32  ;;  %v3680_v15 = vadd.f32 0.001143296, %v3679_v34  ;;  %v3582_v55 = vsel %vm3579_vm11, %v3581_v61, %v3577_v40  ;;  %v3611_v54 = vsub.f32 1.0, %v3610_v5  ;;  %vm3616_vm14 = vmor %vm3614_vm12, %vm3615_vm13 }
 0x356   : > { %v3644_v1 = vadd.f32 0.112945676, %v3643_v57  ;;  %v3633_v17 = vadd.f32 0.05243302, %v3632_v8  ;;  %v4059_v13 = vpack.c.bf16 %v4045_v51, %v4044_v21  ;;  %v3583_v32 = vmul.f32 %v3582_v55, %v9237_v16 }
 0x357   : > { %v3670_v46 = vmul.f32 %v3669_v62, %v9234_v47  ;;  %v3681_v56 = vmul.f32 %v3680_v15, %v9234_v47  ;;  %v3612_v19 = vmul.f32 %v6911_v22, %v3611_v54  ;;  %v3621_v62 = vor.u32 1.1754944e-38, %v3620_v20 }
 0x358   : > { %v3334_v25 = vpop.f32.mrf.mxu2  ;;  %4181 = vmatmul.bf16.gmra.mxu3 %v4059_v13  ;;  %4230 = vmatmul.bf16.gmra.mxu0 %v4059_v13  ;;  %v3645_v60 = vmul.f32 %v3644_v1, %v9200_v35  ;;  %v6390_v12 = vclamps-f32 %v3583_v32, 1.0  ;;  %v3358_v40 = vmul.f32 0.5, %v9087_v48 }
 0x359   : > { %v9262_v39 = vadd.f32 %v8912_v14, %v3334_v25  ;;  %v3671_v0 = vadd.f32 0.0036580483, %v3670_v46  ;;  %v3682_v6 = vadd.f32 0.014752088, %v3681_v56  ;;  %v3613_v50 = vadd.f32 %v6911_v22, %v3612_v19 }
 0x35a   : > { %v3646_v42 = vadd.f32 0.4994258, %v3645_v60  ;;  %v4030_v7 = vadd.f32 1.0, %v6390_v12 }
 0x35b   : > { %v9267_v30 = vmul.f32 0.70710677, %v9262_v39  ;;  %v3672_v45 = vmul.f32 %v3671_v0, %v9234_v47  ;;  %v3683_v9 = vmul.f32 %v3682_v6, %v9234_v47  ;;  %v3617_v24 = vsel %vm3616_vm14, %v6911_v22, %v3613_v50 }
 0x35c   : > { %v3622_v26 = vsel %vm3619_vm15, %v3621_v62, %v3617_v24  ;;  %v3647_v11 = vmul.f32 %v3646_v42, %v9200_v35  ;;  %v4046_v55 = vmul.f32 %v4030_v7, %v3358_v40 }
 0x35d   : > { %v3706_v44 = vmul.f32 %v9267_v30, %v9267_v30  ;;  %v3673_v18 = vadd.f32 0.05243302, %v3672_v45  ;;  %v3623_v34 = vmul.f32 %v3622_v26, %v3598_v36  ;;  %v3684_v31 = vadd.f32 0.112945676, %v3683_v9 }
 0x35e   : > { %v3648_v43 = vadd.f32 1.0, %v3647_v11 }
 0x35f   : > { %v9278_v28 = vmin.f32 %v3706_v44, 16.0  ;;  %v6391_v63 = vclamps-f32 %v3623_v34, 1.0  ;;  %v3685_v22 = vmul.f32 %v3684_v31, %v9234_v47  ;;  %v3674_v36 = vmul.f32 %v3673_v18, %v9234_v47 }
 0x360   : > { %v3336_v58 = vpop.f32.mrf.mxu2  ;;  %6912 = vrcp.f32 %v3648_v43  ;;  %v3660_v24 = vand.u32 2147483648, %v3648_v43  ;;  %vm3654_vm0 = vweird.f32 %v3648_v43 }
 0x361   : > { %v3708_v33 = vmul.f32 2.1237322e-06, %v9278_v28  ;;  %v9284_v49 = vadd.f32 %v8912_v14, %v3336_v58  ;;  %v3719_v16 = vmul.f32 3.8918573e-05, %v9278_v28  ;;  %v3634_v14 = vmul.f32 %v3633_v17, %v9200_v35 }
 0x362   : > { %v4031_v27 = vadd.f32 1.0, %v6391_v63  ;;  %v3686_v8 = vadd.f32 0.4994258, %v3685_v22  ;;  %v3675_v51 = vadd.f32 0.18741608, %v3674_v36  ;;  %v3661_v22 = vor.u32 1.1754944e-38, %v3660_v24 }
 0x363   : > { %v3709_v3 = vadd.f32 0.00028619796, %v3708_v33  ;;  %v9292_v41 = vmul.f32 0.70710677, %v9284_v49  ;;  %v3720_v46 = vadd.f32 0.001143296, %v3719_v16 }
 0x364   : > { %v3635_v37 = vadd.f32 0.18741608, %v3634_v14  ;;  %v4047_v4 = vmul.f32 %v4031_v27, %v3359_v52  ;;  %v3687_v21 = vmul.f32 %v3686_v8, %v9234_v47  ;;  %v3676_v6 = vmul.f32 %v3675_v51, %v9234_v47 }
 0x365   : > { %v3746_v10 = vmul.f32 %v9292_v41, %v9292_v41  ;;  %v3710_v25 = vmul.f32 %v3709_v3, %v9278_v28  ;;  %v3721_v5 = vmul.f32 %v3720_v46, %v9278_v28  ;;  %v3658_v33 = vand.u32 2147483647, %v3648_v43  ;;  %v9332_v46 = vld [vmem:[%s11587_s8] ss:$0 sm:$0xff] }
 0x366   : > { %v3636_v44 = vmul.f32 %v3635_v37, %v9200_v35  ;;  %v9311_v20 = vadd.f32 1.0, %v3687_v21  ;;  %v4060_v56 = vpack.c.bf16 %v4047_v4, %v4046_v55  ;;  %v6913_v13 = vpop.eup %6912  ;;  %v3677_v42 = vadd.f32 1.1283791, %v3676_v6 }
 0x367   : > { %v9300_v59 = vmin.f32 %v3746_v10, 16.0  ;;  %v3711_v61 = vadd.f32 0.0036580483, %v3710_v25  ;;  %v3722_v54 = vadd.f32 0.014752088, %v3721_v5  ;;  %v3650_v45 = vmul.f32 %v6913_v13, %v3648_v43 }
 0x368   : > { %6914 = vrcp.f32 %v9311_v20  ;;  %v3637_v35 = vadd.f32 1.1283791, %v3636_v44  ;;  %4186 = vmatmul.bf16.gmra.mxu3 %v4060_v56  ;;  %4235 = vmatmul.bf16.gmra.mxu0 %v4060_v56  ;;  %vm3655_vm1 = vweird.f32 %v6913_v13  ;;  %vm9322_vm2 = vcmp.eq.f32.partialorder %v3658_v33, 8.507059e+37 }
 0x369   : > { %v3748_v15 = vmul.f32 2.1237322e-06, %v9300_v59  ;;  %v3759_v57 = vmul.f32 3.8918573e-05, %v9300_v59  ;;  %v3723_v48 = vmul.f32 %v3722_v54, %v9278_v28  ;;  %v3712_v1 = vmul.f32 %v3711_v61, %v9278_v28  ;;  %vm3656_vm3 = vmor %vm3654_vm0, %vm3655_vm1 }
 0x36a   : > { %v3651_v16 = vsub.f32 1.0, %v3650_v45  ;;  %v3638_v3 = vmul.f32 %v3637_v35, %v9187_v2  ;;  %v3700_v27 = vand.u32 2147483648, %v9311_v20  ;;  %vm3694_vm5 = vweird.f32 %v9311_v20 }
 0x36b   : > { %v3749_v0 = vadd.f32 0.00028619796, %v3748_v15  ;;  %v3760_v19 = vadd.f32 0.001143296, %v3759_v57  ;;  %v3724_v58 = vadd.f32 0.112945676, %v3723_v48 }
 0x36c   : > { %v3713_v60 = vadd.f32 0.05243302, %v3712_v1  ;;  %v3652_v47 = vmul.f32 %v6913_v13, %v3651_v16  ;;  %v3698_v15 = vand.u32 2147483647, %v9311_v20  ;;  %v3701_v51 = vor.u32 1.1754944e-38, %v3700_v27 }
 0x36d   : > { %v3750_v53 = vmul.f32 %v3749_v0, %v9300_v59  ;;  %v3761_v32 = vmul.f32 %v3760_v19, %v9300_v59  ;;  %v3725_v50 = vmul.f32 %v3724_v58, %v9278_v28 }
 0x36e   : > { %v6915_v26 = vpop.eup %6914  ;;  %v3714_v2 = vmul.f32 %v3713_v60, %v9278_v28  ;;  %v3653_v63 = vadd.f32 %v6913_v13, %v3652_v47  ;;  %vm3699_vm7 = vcmp.eq.f32.partialorder %v3698_v15, 8.507059e+37  ;;  %v3361_v60 = vmul.f32 0.5, %v9212_v38 }
 0x36f   : > { %v3751_v17 = vadd.f32 0.0036580483, %v3750_v53  ;;  %v3762_v62 = vadd.f32 0.014752088, %v3761_v32  ;;  %v3726_v14 = vadd.f32 0.4994258, %v3725_v50  ;;  %v3690_v34 = vmul.f32 %v6915_v26, %v9311_v20 }
 0x370   : > { %v3339_v18 = vpop.f32.mrf.mxu2  ;;  %v3657_v36 = vsel %vm3656_vm3, %v6913_v13, %v3653_v63  ;;  %vm3695_vm4 = vweird.f32 %v6915_v26  ;;  %v3715_v61 = vadd.f32 0.18741608, %v3714_v2  ;;  %v3678_v53 = vmul.f32 %v3677_v42, %v9218_v23 }
 0x371   : > { %v3752_v9 = vmul.f32 %v3751_v17, %v9300_v59  ;;  %v3763_v12 = vmul.f32 %v3762_v62, %v9300_v59  ;;  %v3727_v31 = vmul.f32 %v3726_v14, %v9278_v28  ;;  %v9335_v25 = vadd.f32 %v9332_v46, %v3339_v18  ;;  %vm3696_vm6 = vmor %vm3694_vm5, %vm3695_vm4 }
 0x372   : > { %v3691_v37 = vsub.f32 1.0, %v3690_v34  ;;  %v3662_v8 = vsel %vm9322_vm2, %v3661_v22, %v3657_v36  ;;  %v3716_v1 = vmul.f32 %v3715_v61, %v9278_v28  ;;  %v3360_v50 = vmul.f32 0.5, %v9180_v29 }
 0x373   : > { %v3764_v52 = vadd.f32 0.112945676, %v3763_v12  ;;  %v3753_v11 = vadd.f32 0.05243302, %v3752_v9  ;;  %v9337_v7 = vadd.f32 1.0, %v3727_v31  ;;  %v3663_v21 = vmul.f32 %v3662_v8, %v3638_v3 }
 0x374   : > { %v9341_v5 = vmul.f32 0.70710677, %v9335_v25  ;;  %v3692_v40 = vmul.f32 %v6915_v26, %v3691_v37  ;;  %v3717_v9 = vadd.f32 1.1283791, %v3716_v1 }
 0x375   : > { %v3765_v43 = vmul.f32 %v3764_v52, %v9300_v59  ;;  %6916 = vrcp.f32 %v9337_v7  ;;  %v3754_v0 = vmul.f32 %v3753_v11, %v9300_v59  ;;  %v6392_v57 = vclamps-f32 %v3663_v21, 1.0 }
 0x376   : > { %v3786_v4 = vmul.f32 %v9341_v5, %v9341_v5  ;;  %v3693_v44 = vadd.f32 %v6915_v26, %v3692_v40  ;;  %v3738_v12 = vand.u32 2147483647, %v9337_v7  ;;  %v3740_v18 = vand.u32 2147483648, %v9337_v7 }
 0x377   : > { %v3766_v55 = vadd.f32 0.4994258, %v3765_v43  ;;  %v3755_v17 = vadd.f32 0.18741608, %v3754_v0  ;;  %v4032_v33 = vadd.f32 1.0, %v6392_v57  ;;  %vm3734_vm9 = vweird.f32 %v9337_v7 }
 0x378   : > { %v9352_v54 = vmin.f32 %v3786_v4, 16.0  ;;  %v3341_v56 = vpop.f32.mrf.mxu2  ;;  %v3697_v48 = vsel %vm3696_vm6, %v6915_v26, %v3693_v44  ;;  %vm3739_vm11 = vcmp.eq.f32.partialorder %v3738_v12, 8.507059e+37  ;;  %v3741_v15 = vor.u32 1.1754944e-38, %v3740_v18 }
 0x379   : > { %v3767_v19 = vmul.f32 %v3766_v55, %v9300_v59  ;;  %v9358_v13 = vadd.f32 %v9332_v46, %v3341_v56  ;;  %v3702_v20 = vsel %vm3699_vm7, %v3701_v51, %v3697_v48  ;;  %v3756_v16 = vmul.f32 %v3755_v17, %v9300_v59 }
 0x37a   : > { %v3703_v58 = vmul.f32 %v3702_v20, %v3678_v53  ;;  %v3799_v6 = vmul.f32 3.8918573e-05, %v9352_v54  ;;  %v3788_v23 = vmul.f32 2.1237322e-06, %v9352_v54  ;;  %v4048_v47 = vmul.f32 %v4032_v33, %v3360_v50 }
 0x37b   : > { %v6917_v35 = vpop.eup %6916  ;;  %v9360_v32 = vadd.f32 1.0, %v3767_v19  ;;  %v9365_v45 = vmul.f32 0.70710677, %v9358_v13  ;;  %v3718_v59 = vmul.f32 %v3717_v9, %v9267_v30  ;;  %v3757_v36 = vadd.f32 1.1283791, %v3756_v16 }
 0x37c   : > { %v6393_v28 = vclamps-f32 %v3703_v58, 1.0  ;;  %v3730_v62 = vmul.f32 %v6917_v35, %v9337_v7  ;;  %v3800_v26 = vadd.f32 0.001143296, %v3799_v6  ;;  %v3789_v42 = vadd.f32 0.00028619796, %v3788_v23 }
 0x37d   : > { %6918 = vrcp.f32 %v9360_v32  ;;  %v3826_v3 = vmul.f32 %v9365_v45, %v9365_v45  ;;  %vm3735_vm8 = vweird.f32 %v6917_v35  ;;  %v3778_v21 = vand.u32 2147483647, %v9360_v32 }
 0x37e   : > { %v4033_v24 = vadd.f32 1.0, %v6393_v28  ;;  %v3731_v14 = vsub.f32 1.0, %v3730_v62  ;;  %v3801_v38 = vmul.f32 %v3800_v26, %v9352_v54  ;;  %vm3736_vm10 = vmor %vm3734_vm9, %vm3735_vm8  ;;  %v3790_v27 = vmul.f32 %v3789_v42, %v9352_v54 }
 0x37f   : > { %v9375_v29 = vmin.f32 %v3826_v3, 16.0  ;;  %v3780_v44 = vand.u32 2147483648, %v9360_v32  ;;  %v3758_v17 = vmul.f32 %v3757_v36, %v9292_v41  ;;  %vm3774_vm13 = vweird.f32 %v9360_v32 }
 0x380   : > { %v4049_v10 = vmul.f32 %v4033_v24, %v3361_v60  ;;  %v3732_v34 = vmul.f32 %v6917_v35, %v3731_v14  ;;  %v3802_v43 = vadd.f32 0.014752088, %v3801_v38  ;;  %v3791_v48 = vadd.f32 0.0036580483, %v3790_v27 }
 0x381   : > { %v3828_v31 = vmul.f32 2.1237322e-06, %v9375_v29  ;;  %v3839_v2 = vmul.f32 3.8918573e-05, %v9375_v29  ;;  %vm3779_vm15 = vcmp.eq.f32.partialorder %v3778_v21, 8.507059e+37  ;;  %v3781_v23 = vor.u32 1.1754944e-38, %v3780_v44 }
 0x382   : > { %v4061_v22 = vpack.c.bf16 %v4049_v10, %v4048_v47  ;;  %v3733_v37 = vadd.f32 %v6917_v35, %v3732_v34  ;;  %v3803_v40 = vmul.f32 %v3802_v43, %v9352_v54  ;;  %v3792_v41 = vmul.f32 %v3791_v48, %v9352_v54 }
 0x383   : > { %v6919_v11 = vpop.eup %6918  ;;  %v3829_v61 = vadd.f32 0.00028619796, %v3828_v31  ;;  %v3840_v57 = vadd.f32 0.001143296, %v3839_v2  ;;  %v3362_v47 = vmul.f32 0.5, %v9262_v39  ;;  %v3363_v38 = vmul.f32 0.5, %v9284_v49 }
 0x384   : > { %v3344_v52 = vpop.f32.mrf.mxu2  ;;  %v3770_v30 = vmul.f32 %v6919_v11, %v9360_v32  ;;  %4191 = vmatmul.bf16.gmra.mxu3 %v4061_v22  ;;  %4240 = vmatmul.bf16.gmra.mxu0 %v4061_v22  ;;  %v3737_v7 = vsel %vm3736_vm10, %v6917_v35, %v3733_v37  ;;  %v3804_v55 = vadd.f32 0.112945676, %v3803_v40  ;;  %vm3775_vm12 = vweird.f32 %v6919_v11 }
 0x385   : > { %v9384_v63 = vadd.f32 %v9332_v46, %v3344_v52  ;;  %v3742_v0 = vsel %vm3739_vm11, %v3741_v15, %v3737_v7  ;;  %v3841_v1 = vmul.f32 %v3840_v57, %v9375_v29  ;;  %v3830_v20 = vmul.f32 %v3829_v61, %v9375_v29  ;;  %vm3776_vm14 = vmor %vm3774_vm13, %vm3775_vm12 }
 0x386   : > { %v3771_v4 = vsub.f32 1.0, %v3770_v30  ;;  %v3743_v53 = vmul.f32 %v3742_v0, %v3718_v59  ;;  %v3805_v19 = vmul.f32 %v3804_v55, %v9352_v54  ;;  %v3793_v18 = vadd.f32 0.05243302, %v3792_v41 }
 0x387   : > { %v9389_v8 = vmul.f32 0.70710677, %v9384_v63  ;;  %v3842_v60 = vadd.f32 0.014752088, %v3841_v1  ;;  %v3831_v16 = vadd.f32 0.0036580483, %v3830_v20 }
 0x388   : > { %v3772_v56 = vmul.f32 %v6919_v11, %v3771_v4  ;;  %v3806_v33 = vadd.f32 0.4994258, %v3805_v19  ;;  %v6394_v28 = vclamps-f32 %v3743_v53, 1.0  ;;  %v3794_v37 = vmul.f32 %v3793_v18, %v9352_v54 }
 0x389   : > { %v3866_v51 = vmul.f32 %v9389_v8, %v9389_v8  ;;  %v3843_v14 = vmul.f32 %v3842_v60, %v9375_v29  ;;  %v3832_v59 = vmul.f32 %v3831_v16, %v9375_v29 }
 0x38a   : > { %v3773_v58 = vadd.f32 %v6919_v11, %v3772_v56  ;;  %v3807_v32 = vmul.f32 %v3806_v33, %v9352_v54  ;;  %v4034_v26 = vadd.f32 1.0, %v6394_v28  ;;  %v3795_v61 = vadd.f32 0.18741608, %v3794_v37  ;;  %v6558_v28 = vld [vmem:[%s11590_s11 + $0x78] sm:$0xf0] }
 0x38b   : > { %v9404_v50 = vmin.f32 %v3866_v51, 16.0  ;;  %v3844_v34 = vadd.f32 0.112945676, %v3843_v14  ;;  %v3833_v49 = vadd.f32 0.05243302, %v3832_v59 }
 0x38c   : > { %v3346_v35 = vpop.f32.mrf.mxu2  ;;  %v3777_v62 = vsel %vm3776_vm14, %v6919_v11, %v3773_v58  ;;  %v9414_v10 = vadd.f32 1.0, %v3807_v32  ;;  %v4050_v11 = vmul.f32 %v4034_v26, %v3362_v47  ;;  %v3796_v48 = vmul.f32 %v3795_v61, %v9352_v54  ;;  %v6678_v54 = vld [vmem:[%s11590_s11 + $0x74] sm:$0xf]  ;;  %v6556_v26 = vld [vmem:[%s11590_s11 + $0x70] sm:$0xf] }
 0x38d   : > { %v9402_v6 = vadd.f32 %v9332_v46, %v3346_v35  ;;  %v3782_v9 = vsel %vm3779_vm15, %v3781_v23, %v3777_v62  ;;  %v3879_v42 = vmul.f32 3.8918573e-05, %v9404_v50  ;;  %v3868_v39 = vmul.f32 2.1237322e-06, %v9404_v50 }
 0x38e   : > { %v3783_v3 = vmul.f32 %v3782_v9, %v3758_v17  ;;  %6920 = vrcp.f32 %v9414_v10  ;;  %v3845_v43 = vmul.f32 %v3844_v34, %v9375_v29  ;;  %v3834_v21 = vmul.f32 %v3833_v49, %v9375_v29  ;;  %v6694_v34 = vld [vmem:[%s11590_s11 + $0xf4] sm:$0xf] }
 0x38f   : > { %v9408_v24 = vmul.f32 0.70710677, %v9402_v6  ;;  %v3880_v52 = vadd.f32 0.001143296, %v3879_v42  ;;  %v3869_v0 = vadd.f32 0.00028619796, %v3868_v39  ;;  %vm3814_vm1 = vweird.f32 %v9414_v10 }
 0x390   : > { %v6395_v12 = vclamps-f32 %v3783_v3, 1.0  ;;  %v3846_v27 = vadd.f32 0.4994258, %v3845_v43  ;;  %v3835_v1 = vadd.f32 0.18741608, %v3834_v21  ;;  %v3820_v20 = vand.u32 2147483648, %v9414_v10 }
 0x391   : > { %v3906_v2 = vmul.f32 %v9408_v24, %v9408_v24  ;;  %v3881_v36 = vmul.f32 %v3880_v52, %v9404_v50  ;;  %v3870_v19 = vmul.f32 %v3869_v0, %v9404_v50  ;;  %v3818_v58 = vand.u32 2147483647, %v9414_v10  ;;  %v6620_v3 = vld [vmem:[%s11590_s11 + $0xf0] sm:$0xf] }
 0x392   : > { %v4035_v31 = vadd.f32 1.0, %v6395_v12  ;;  %v3847_v4 = vmul.f32 %v3846_v27, %v9375_v29  ;;  %v3797_v60 = vadd.f32 1.1283791, %v3796_v48  ;;  %v6561_v16 = vor.u32 %v6678_v54, %v6558_v28  ;;  %v6695_v12 = vld [vmem:[%s11590_s11 + $0xf4] sm:$0xf0] }
 0x393   : > { %v9425_v30 = vmin.f32 %v3906_v2, 16.0  ;;  %v3882_v7 = vadd.f32 0.014752088, %v3881_v36  ;;  %v3871_v41 = vadd.f32 0.0036580483, %v3870_v19  ;;  %v3821_v14 = vor.u32 1.1754944e-38, %v3820_v20 }
 0x394   : > { %v4051_v22 = vmul.f32 %v4035_v31, %v3363_v38  ;;  %v6921_v40 = vpop.eup %6920  ;;  %v9431_v57 = vadd.f32 1.0, %v3847_v4  ;;  %5986 = vmatpush.bf16.msra.mxu3 %v6561_v16  ;;  %v6621_v18 = vor.u32 %v6695_v12, %v6620_v3  ;;  %v6622_v38 = vld [vmem:[%s11590_s11 + $0xf8] sm:$0xf0]  ;;  %v3836_v31 = vmul.f32 %v3835_v1, %v9375_v29  ;;  %v6676_v2 = vld [vmem:[%s11590_s11 + $0x64] sm:$0xf] }
 0x395   : > { %v3810_v44 = vmul.f32 %v6921_v40, %v9414_v10  ;;  %v3908_v55 = vmul.f32 2.1237322e-06, %v9425_v30  ;;  %v3883_v51 = vmul.f32 %v3882_v7, %v9404_v50  ;;  %v3919_v56 = vmul.f32 3.8918573e-05, %v9425_v30  ;;  %v6679_v10 = vld [vmem:[%s11590_s11 + $0x74] sm:$0xf0] }
 0x396   : > { %v4062_v15 = vpack.c.bf16 %v4051_v22, %v4050_v11  ;;  %6922 = vrcp.f32 %v9431_v57  ;;  %vm3815_vm0 = vweird.f32 %v6921_v40  ;;  %vm3819_vm3 = vcmp.eq.f32.partialorder %v3818_v58, 8.507059e+37  ;;  %v6550_v11 = vld [vmem:[%s11590_s11 + $0x68] sm:$0xf0]  ;;  %5937 = vmatpush.bf16.msra.mxu2 %v6621_v18  ;;  %v6612_v3 = vld [vmem:[%s11590_s11 + $0xe0] sm:$0xf] }
 0x397   : > { %v3811_v53 = vsub.f32 1.0, %v3810_v44  ;;  %v3909_v35 = vadd.f32 0.00028619796, %v3908_v55  ;;  %v3884_v23 = vadd.f32 0.112945676, %v3883_v51  ;;  %vm9447_vm2 = vmor %vm3814_vm1, %vm3815_vm0  ;;  %v6557_v39 = vor.u32 %v6679_v10, %v6556_v26 }
 0x398   : > { %4196 = vmatmul.bf16.gmra.mxu3 %v4062_v15  ;;  %4245 = vmatmul.bf16.gmra.mxu0 %v4062_v15  ;;  %v3920_v62 = vadd.f32 0.001143296, %v3919_v56  ;;  %v6625_v43 = vor.u32 %v6694_v34, %v6622_v38  ;;  %v3798_v36 = vmul.f32 %v3797_v60, %v9341_v5  ;;  %v3872_v29 = vmul.f32 %v3871_v41, %v9404_v50 }
 0x399   : > { %v3812_v17 = vmul.f32 %v6921_v40, %v3811_v53  ;;  %v3910_v47 = vmul.f32 %v3909_v35, %v9425_v30  ;;  %v3885_v59 = vmul.f32 %v3884_v23, %v9404_v50  ;;  %5888 = vmatpush.bf16.msra.mxu1 %v6557_v39  ;;  %v6553_v27 = vor.u32 %v6676_v2, %v6550_v11  ;;  %v3349_v54 = vpop.f32.mrf.mxu2 }
 0x39a   : > { %v3921_v22 = vmul.f32 %v3920_v62, %v9425_v30  ;;  %6035 = vmatpush.bf16.msra.mxu0 %v6625_v43  ;;  %v3860_v0 = vand.u32 2147483648, %v9431_v57  ;;  %v3858_v44 = vand.u32 2147483647, %v9431_v57  ;;  %v3873_v55 = vadd.f32 0.05243302, %v3872_v29 }
 0x39b   : > { %v3813_v33 = vadd.f32 %v6921_v40, %v3812_v17  ;;  %v3911_v49 = vadd.f32 0.0036580483, %v3910_v47  ;;  %v3886_v7 = vadd.f32 0.4994258, %v3885_v59  ;;  %5987 = vmatpush.bf16.msra.mxu3 %v6553_v27  ;;  %vm3854_vm5 = vweird.f32 %v9431_v57 }
 0x39c   : > { %v6923_v42 = vpop.eup %6922  ;;  %v3922_v4 = vadd.f32 0.014752088, %v3921_v22  ;;  %v3861_v1 = vor.u32 1.1754944e-38, %v3860_v0  ;;  %vm3859_vm7 = vcmp.eq.f32.partialorder %v3858_v44, 8.507059e+37  ;;  %v3874_v58 = vmul.f32 %v3873_v55, %v9404_v50 }
 0x39d   : > { %v3817_v32 = vsel %vm9447_vm2, %v6921_v40, %v3813_v33  ;;  %v3850_v52 = vmul.f32 %v6923_v42, %v9431_v57  ;;  %v3837_v40 = vadd.f32 1.1283791, %v3836_v31  ;;  %vm3855_vm4 = vweird.f32 %v6923_v42 }
 0x39e   : > { %v3822_v37 = vsel %vm3819_vm3, %v3821_v14, %v3817_v32  ;;  %v3887_v5 = vmul.f32 %v3886_v7, %v9404_v50  ;;  %v3923_v51 = vmul.f32 %v3922_v4, %v9425_v30  ;;  %v3912_v53 = vmul.f32 %v3911_v49, %v9425_v30  ;;  %vm3856_vm6 = vmor %vm3854_vm5, %vm3855_vm4 }
 0x39f   : > { %v3851_v15 = vsub.f32 1.0, %v3850_v52  ;;  %v3823_v61 = vmul.f32 %v3822_v37, %v3798_v36  ;;  %v3838_v20 = vmul.f32 %v3837_v40, %v9365_v45  ;;  %v3364_v9 = vmul.f32 0.5, %v9335_v25  ;;  %v6693_v25 = vld [vmem:[%s11590_s11 + $0xe4] sm:$0xf0] }
 0x3a0   : > { %v9490_v48 = vadd.f32 1.0, %v3887_v5  ;;  %v3924_v17 = vadd.f32 0.112945676, %v3923_v51  ;;  %v3913_v33 = vadd.f32 0.05243302, %v3912_v53  ;;  %v3365_v16 = vmul.f32 0.5, %v9358_v13 }
 0x3a1   : > { %v3852_v21 = vmul.f32 %v6923_v42, %v3851_v15  ;;  %v6396_v19 = vclamps-f32 %v3823_v61, 1.0  ;;  %v3875_v45 = vadd.f32 0.18741608, %v3874_v58  ;;  %v9503_v12 = vadd.f32 %v9332_v46, %v3349_v54  ;;  %v4082_v13 = vld [vmem:[%s11589_s10] sm:$0x3]  ;;  %v3351_v36 = vpop.f32.mrf.mxu2 }
 0x3a2   : > { %6924 = vrcp.f32 %v9490_v48  ;;  %v3925_v57 = vmul.f32 %v3924_v17, %v9425_v30  ;;  %v3914_v14 = vmul.f32 %v3913_v33, %v9425_v30  ;;  %v6613_v59 = vor.u32 %v6693_v25, %v6612_v3 }
 0x3a3   : > { %v3853_v56 = vadd.f32 %v6923_v42, %v3852_v21  ;;  %v4036_v62 = vadd.f32 1.0, %v6396_v19  ;;  %v9515_v31 = vperm.slane %v4082_v13, 1  ;;  %v3876_v52 = vmul.f32 %v3875_v45, %v9404_v50 }
 0x3a4   : > { %v3926_v41 = vadd.f32 0.4994258, %v3925_v57  ;;  %v3915_v11 = vadd.f32 0.18741608, %v3914_v14  ;;  %v9519_v22 = vmul.f32 0.70710677, %v9503_v12  ;;  %5938 = vmatpush.bf16.msra.mxu2 %v6613_v59  ;;  %vm3894_vm9 = vweird.f32 %v9490_v48 }
 0x3a5   : > { %v3857_v35 = vsel %vm3856_vm6, %v6923_v42, %v3853_v56  ;;  %v4052_v18 = vmul.f32 %v4036_v62, %v3364_v9  ;;  %v3900_v43 = vand.u32 2147483648, %v9490_v48  ;;  %v3898_v29 = vand.u32 2147483647, %v9490_v48 }
 0x3a6   : > { %v3862_v23 = vsel %vm3859_vm7, %v3861_v1, %v3857_v35  ;;  %v3927_v42 = vmul.f32 %v3926_v41, %v9425_v30  ;;  %v9528_v15 = vperm.slane %v4082_v13, 0  ;;  %v3877_v27 = vadd.f32 1.1283791, %v3876_v52 }
 0x3a7   : > { %v3863_v28 = vmul.f32 %v3862_v23, %v3838_v20  ;;  %v3916_v7 = vmul.f32 %v3915_v11, %v9425_v30  ;;  %v3946_v40 = vmul.f32 %v9519_v22, %v9519_v22  ;;  %v9537_v4 = vadd.f32 %v9332_v46, %v3351_v36 }
 0x3a8   : > { %v6925_v32 = vpop.eup %6924  ;;  %v9513_v38 = vadd.f32 1.0, %v3927_v42  ;;  %v3901_v44 = vor.u32 1.1754944e-38, %v3900_v43  ;;  %vm3899_vm11 = vcmp.eq.f32.partialorder %v3898_v29, 8.507059e+37  ;;  %v3366_v11 = vmul.f32 0.5, %v9384_v63  ;;  %v6548_v29 = vld [vmem:[%s11590_s11 + $0x60] sm:$0xf] }
 0x3a9   : > { %v6397_v60 = vclamps-f32 %v3863_v28, 1.0  ;;  %v3890_v10 = vmul.f32 %v6925_v32, %v9490_v48  ;;  %vm3895_vm8 = vweird.f32 %v6925_v32  ;;  %v3878_v48 = vmul.f32 %v3877_v27, %v9389_v8 }
 0x3aa   : > { %6926 = vrcp.f32 %v9513_v38  ;;  %vm3896_vm10 = vmor %vm3894_vm9, %vm3895_vm8  ;;  %v9546_v19 = vmin.f32 %v3946_v40, 16.0  ;;  %v3917_v17 = vadd.f32 1.1283791, %v3916_v7  ;;  %v9555_v20 = vmul.f32 0.70710677, %v9537_v4 }
 0x3ab   : > { %v4037_v26 = vadd.f32 1.0, %v6397_v60  ;;  %v3891_v2 = vsub.f32 1.0, %v3890_v10  ;;  %v3938_v23 = vand.u32 2147483647, %v9513_v38  ;;  %v3940_v33 = vand.u32 2147483648, %v9513_v38 }
 0x3ac   : > { %v3948_v62 = vmul.f32 2.1237322e-06, %v9546_v19  ;;  %v3918_v60 = vmul.f32 %v3917_v17, %v9408_v24  ;;  %vm3934_vm13 = vweird.f32 %v9513_v38  ;;  %v3959_v9 = vmul.f32 3.8918573e-05, %v9546_v19 }
 0x3ad   : > { %v4053_v34 = vmul.f32 %v4037_v26, %v3365_v16  ;;  %v3892_v39 = vmul.f32 %v6925_v32, %v3891_v2  ;;  %v3986_v16 = vmul.f32 %v9555_v20, %v9555_v20  ;;  %v3941_v3 = vor.u32 1.1754944e-38, %v3940_v33 }
 0x3ae   : > { %vm3939_vm15 = vcmp.eq.f32.partialorder %v3938_v23, 8.507059e+37  ;;  %v3949_v25 = vadd.f32 0.00028619796, %v3948_v62 }
 0x3af   : > { %v4063_v37 = vpack.c.bf16 %v4053_v34, %v4052_v18  ;;  %v3893_v49 = vadd.f32 %v6925_v32, %v3892_v39  ;;  %v3960_v18 = vadd.f32 0.001143296, %v3959_v9  ;;  %v9577_v10 = vmin.f32 %v3986_v16, 16.0 }
 0x3b0   : > { %v6927_v55 = vpop.eup %6926  ;;  %v3367_v39 = vmul.f32 0.5, %v9402_v6  ;;  %v3950_v43 = vmul.f32 %v3949_v25, %v9546_v19  ;;  %v6692_v6 = vld [vmem:[%s11590_s11 + $0xe4] sm:$0xf] }
 0x3b1   : > { %4201 = vmatmul.bf16.gmra.mxu3 %v4063_v37  ;;  %4250 = vmatmul.bf16.gmra.mxu0 %v4063_v37  ;;  %v3897_v21 = vsel %vm3896_vm10, %v6925_v32, %v3893_v49  ;;  %v3930_v56 = vmul.f32 %v6927_v55, %v9513_v38  ;;  %vm3935_vm12 = vweird.f32 %v6927_v55  ;;  %v6677_v49 = vld [vmem:[%s11590_s11 + $0x64] sm:$0xf0]  ;;  %v3961_v27 = vmul.f32 %v3960_v18, %v9546_v19 }
 0x3b2   : > { %v4226_v47 = vpop.f32.mrf.mxu0  ;;  %v3902_v53 = vsel %vm3899_vm11, %v3901_v44, %v3897_v21  ;;  %vm3936_vm14 = vmor %vm3934_vm13, %vm3935_vm12  ;;  %v3988_v63 = vmul.f32 2.1237322e-06, %v9577_v10  ;;  %v6614_v21 = vld [vmem:[%s11590_s11 + $0xe8] sm:$0xf0] }
 0x3b3   : > { %v9525_v50 = vadd.f32 %v4226_v47, %v9515_v31  ;;  %v3931_v35 = vsub.f32 1.0, %v3930_v56  ;;  %v3903_v58 = vmul.f32 %v3902_v53, %v3878_v48  ;;  %v3962_v17 = vadd.f32 0.014752088, %v3961_v27 }
 0x3b4   : > { %v3989_v23 = vadd.f32 0.00028619796, %v3988_v63 }
 0x3b5   : > { %v9534_v61 = vmul.f32 0.70710677, %v9525_v50  ;;  %v3932_v8 = vmul.f32 %v6927_v55, %v3931_v35  ;;  %v6398_v45 = vclamps-f32 %v3903_v58, 1.0  ;;  %v3951_v58 = vadd.f32 0.0036580483, %v3950_v43 }
 0x3b7   : > { %v4370_v30 = vmul.f32 %v9534_v61, %v9534_v61  ;;  %v3933_v41 = vadd.f32 %v6927_v55, %v3932_v8  ;;  %v4038_v34 = vadd.f32 1.0, %v6398_v45  ;;  %v3952_v16 = vmul.f32 %v3951_v58, %v9546_v19 }
 0x3b8   : > { %v4177_v0 = vpop.f32.mrf.mxu3  ;;  %v3990_v45 = vmul.f32 %v3989_v23, %v9577_v10 }
 0x3b9   : > { %v9540_v5 = vadd.f32 %v4177_v0, %v9528_v15  ;;  %v9559_v54 = vmin.f32 %v4370_v30, 16.0  ;;  %v3937_v14 = vsel %vm3936_vm14, %v6927_v55, %v3933_v41  ;;  %v4054_v7 = vmul.f32 %v4038_v34, %v3366_v11 }
 0x3ba   : > { %v4228_v51 = vpop.f32.mrf.mxu0  ;;  %v3942_v42 = vsel %vm3939_vm15, %v3941_v3, %v3937_v14  ;;  %v6549_v0 = vor.u32 %v6677_v49, %v6548_v29  ;;  %v6617_v55 = vor.u32 %v6692_v6, %v6614_v21  ;;  %v6674_v14 = vld [vmem:[%s11590_s11 + $0x54] sm:$0xf]  ;;  %v6691_v29 = vld [vmem:[%s11590_s11 + $0xd4] sm:$0xf0] }
 0x3bb   : > { %v9549_v46 = vmul.f32 0.70710677, %v9540_v5  ;;  %v9552_v1 = vadd.f32 %v4228_v51, %v9515_v31  ;;  %v4383_v32 = vmul.f32 3.8918573e-05, %v9559_v54  ;;  %v3943_v13 = vmul.f32 %v3942_v42, %v3918_v60 }
 0x3bc   : > { %5889 = vmatpush.bf16.msra.mxu1 %v6549_v0  ;;  %v4372_v48 = vmul.f32 2.1237322e-06, %v9559_v54  ;;  %6036 = vmatpush.bf16.msra.mxu0 %v6617_v55  ;;  %v3963_v60 = vmul.f32 %v3962_v17, %v9546_v19  ;;  %v6606_v55 = vld [vmem:[%s11590_s11 + $0xd8] sm:$0xf0] }
 0x3bd   : > { %v4330_v28 = vmul.f32 %v9549_v46, %v9549_v46  ;;  %v9564_v57 = vmul.f32 0.70710677, %v9552_v1  ;;  %v4384_v38 = vadd.f32 0.001143296, %v4383_v32  ;;  %v6399_v59 = vclamps-f32 %v3943_v13, 1.0 }
 0x3be   : > { %v4373_v62 = vadd.f32 0.00028619796, %v4372_v48  ;;  %v3964_v13 = vadd.f32 0.112945676, %v3963_v60 }
 0x3bf   : > { %v9573_v26 = vmin.f32 %v4330_v28, 16.0  ;;  %v4450_v24 = vmul.f32 %v9564_v57, %v9564_v57  ;;  %v4039_v36 = vadd.f32 1.0, %v6399_v59  ;;  %v4385_v40 = vmul.f32 %v4384_v38, %v9559_v54 }
 0x3c0   : > { %v4179_v47 = vpop.f32.mrf.mxu3  ;;  %v4374_v25 = vmul.f32 %v4373_v62, %v9559_v54  ;;  %v3953_v59 = vadd.f32 0.05243302, %v3952_v16  ;;  %v3965_v27 = vmul.f32 %v3964_v13, %v9546_v19 }
 0x3c1   : > { %v4343_v52 = vmul.f32 3.8918573e-05, %v9573_v26  ;;  %v9580_v2 = vmin.f32 %v4450_v24, 16.0  ;;  %v9584_v37 = vadd.f32 %v4179_v47, %v9528_v15  ;;  %v4055_v44 = vmul.f32 %v4039_v36, %v3367_v39  ;;  %v6542_v24 = vld [vmem:[%s11590_s11 + $0x58] sm:$0xf0] }
 0x3c2   : > { %v4386_v35 = vadd.f32 0.014752088, %v4385_v40  ;;  %v4332_v9 = vmul.f32 2.1237322e-06, %v9573_v26  ;;  %v6545_v38 = vor.u32 %v6674_v14, %v6542_v24  ;;  %v6604_v36 = vld [vmem:[%s11590_s11 + $0xd0] sm:$0xf] }
 0x3c3   : > { %v4344_v30 = vadd.f32 0.001143296, %v4343_v52  ;;  %v4463_v51 = vmul.f32 3.8918573e-05, %v9580_v2  ;;  %v9605_v53 = vmul.f32 0.70710677, %v9584_v37  ;;  %v4064_v56 = vpack.c.bf16 %v4055_v44, %v4054_v7 }
 0x3c4   : > { %v4387_v41 = vmul.f32 %v4386_v35, %v9559_v54  ;;  %v4333_v18 = vadd.f32 0.00028619796, %v4332_v9  ;;  %v4452_v34 = vmul.f32 2.1237322e-06, %v9580_v2  ;;  %v3991_v52 = vadd.f32 0.0036580483, %v3990_v45  ;;  %5988 = vmatpush.bf16.msra.mxu3 %v6545_v38 }
 0x3c5   : > { %4206 = vmatmul.bf16.gmra.mxu3 %v4064_v56  ;;  %4255 = vmatmul.bf16.gmra.mxu0 %v4064_v56  ;;  %v4345_v33 = vmul.f32 %v4344_v30, %v9573_v26  ;;  %v4464_v8 = vadd.f32 0.001143296, %v4463_v51  ;;  %v4410_v28 = vmul.f32 %v9605_v53, %v9605_v53  ;;  %v4375_v49 = vadd.f32 0.0036580483, %v4374_v25  ;;  %v6690_v44 = vld [vmem:[%s11590_s11 + $0xd4] sm:$0xf] }
 0x3c6   : > { %v4388_v47 = vadd.f32 0.112945676, %v4387_v41  ;;  %v4334_v7 = vmul.f32 %v4333_v18, %v9573_v26  ;;  %v4453_v40 = vadd.f32 0.00028619796, %v4452_v34  ;;  %v6605_v21 = vor.u32 %v6691_v29, %v6604_v36  ;;  %v6675_v41 = vld [vmem:[%s11590_s11 + $0x54] sm:$0xf0] }
 0x3c7   : > { %v4346_v3 = vadd.f32 0.014752088, %v4345_v33  ;;  %v4465_v32 = vmul.f32 %v4464_v8, %v9580_v2  ;;  %v9623_v42 = vmin.f32 %v4410_v28, 16.0  ;;  %v3954_v30 = vmul.f32 %v3953_v59, %v9546_v19  ;;  %v6540_v33 = vld [vmem:[%s11590_s11 + $0x50] sm:$0xf] }
 0x3c8   : > { %v4389_v63 = vmul.f32 %v4388_v47, %v9559_v54  ;;  %v3992_v51 = vmul.f32 %v3991_v52, %v9577_v10  ;;  %v4376_v48 = vmul.f32 %v4375_v49, %v9559_v54  ;;  %5939 = vmatpush.bf16.msra.mxu2 %v6605_v21  ;;  %v3966_v17 = vadd.f32 0.4994258, %v3965_v27 }
 0x3c9   : > { %v4347_v11 = vmul.f32 %v4346_v3, %v9573_v26  ;;  %v4466_v39 = vadd.f32 0.014752088, %v4465_v32  ;;  %v4423_v43 = vmul.f32 3.8918573e-05, %v9623_v42  ;;  %v4335_v58 = vadd.f32 0.0036580483, %v4334_v7 }
 0x3ca   : > { %v4390_v35 = vadd.f32 0.4994258, %v4389_v63  ;;  %v4454_v23 = vmul.f32 %v4453_v40, %v9580_v2  ;;  %v6609_v8 = vor.u32 %v6690_v44, %v6606_v55  ;;  %v3955_v9 = vadd.f32 0.18741608, %v3954_v30 }
 0x3cb   : > { %v4348_v0 = vadd.f32 0.112945676, %v4347_v11  ;;  %v4467_v6 = vmul.f32 %v4466_v39, %v9580_v2  ;;  %v4424_v56 = vadd.f32 0.001143296, %v4423_v43  ;;  %v3993_v16 = vadd.f32 0.05243302, %v3992_v51 }
 0x3cc   : > { %6037 = vmatpush.bf16.msra.mxu0 %v6609_v8  ;;  %v4377_v32 = vadd.f32 0.05243302, %v4376_v48  ;;  %v6541_v14 = vor.u32 %v6675_v41, %v6540_v33  ;;  %v3967_v25 = vmul.f32 %v3966_v17, %v9546_v19  ;;  %v4391_v13 = vmul.f32 %v4390_v35, %v9559_v54 }
 0x3cd   : > { %v4349_v62 = vmul.f32 %v4348_v0, %v9573_v26  ;;  %v4468_v60 = vadd.f32 0.112945676, %v4467_v6  ;;  %v4425_v45 = vmul.f32 %v4424_v56, %v9623_v42  ;;  %v4336_v47 = vmul.f32 %v4335_v58, %v9573_v26 }
 0x3ce   : > { %v4455_v18 = vadd.f32 0.0036580483, %v4454_v23  ;;  %v4412_v34 = vmul.f32 2.1237322e-06, %v9623_v42  ;;  %5890 = vmatpush.bf16.msra.mxu1 %v6541_v14  ;;  %v3994_v11 = vmul.f32 %v3993_v16, %v9577_v10  ;;  %v3956_v43 = vmul.f32 %v3955_v9, %v9546_v19 }
 0x3cf   : > { %v4350_v38 = vadd.f32 0.4994258, %v4349_v62  ;;  %v4469_v59 = vmul.f32 %v4468_v60, %v9580_v2  ;;  %v4426_v39 = vadd.f32 0.014752088, %v4425_v45  ;;  %v4378_v36 = vmul.f32 %v4377_v32, %v9559_v54 }
 0x3d0   : > { %v9674_v49 = vadd.f32 1.0, %v3967_v25  ;;  %v9676_v27 = vadd.f32 1.0, %v4391_v13  ;;  %v4337_v63 = vadd.f32 0.05243302, %v4336_v47  ;;  %v4456_v7 = vmul.f32 %v4455_v18, %v9580_v2 }
 0x3d1   : > { %v4413_v40 = vadd.f32 0.00028619796, %v4412_v34  ;;  %v4351_v0 = vmul.f32 %v4350_v38, %v9573_v26  ;;  %v4470_v6 = vadd.f32 0.4994258, %v4469_v59  ;;  %v3995_v44 = vadd.f32 0.18741608, %v3994_v11 }
 0x3d2   : > { %v4427_v55 = vmul.f32 %v4426_v39, %v9623_v42  ;;  %v4379_v30 = vadd.f32 0.18741608, %v4378_v36  ;;  %6928 = vrcp.f32 %v9674_v49  ;;  %v3957_v56 = vadd.f32 1.1283791, %v3956_v43 }
 0x3d3   : > { %6930 = vrcp.f32 %v9676_v27  ;;  %v4338_v48 = vmul.f32 %v4337_v63, %v9573_v26  ;;  %v4457_v17 = vadd.f32 0.05243302, %v4456_v7  ;;  %v9691_v35 = vadd.f32 1.0, %v4351_v0 }
 0x3d4   : > { %v4471_v58 = vmul.f32 %v4470_v6, %v9580_v2  ;;  %v4414_v23 = vmul.f32 %v4413_v40, %v9623_v42  ;;  %v3996_v8 = vmul.f32 %v3995_v44, %v9577_v10  ;;  %v9700_v60 = vmul.f32 0.5, %v9503_v12 }
 0x3d5   : > { %v4231_v3 = vpop.f32.mrf.mxu0  ;;  %v9703_v41 = vmul.f32 0.5, %v9537_v4  ;;  %v4380_v9 = vmul.f32 %v4379_v30, %v9559_v54  ;;  %v9707_v16 = vmul.f32 %v3957_v56, %v9519_v22  ;;  %v4339_v45 = vadd.f32 0.18741608, %v4338_v48 }
 0x3d6   : > { %v9666_v52 = vadd.f32 %v4231_v3, %v9515_v31  ;;  %v4458_v3 = vmul.f32 %v4457_v17, %v9580_v2  ;;  %6932 = vrcp.f32 %v9691_v35  ;;  %v9713_v25 = vadd.f32 1.0, %v4471_v58 }
 0x3d7   : > { %v4415_v12 = vadd.f32 0.0036580483, %v4414_v23  ;;  %v3997_v47 = vadd.f32 1.1283791, %v3996_v8  ;;  %v3999_v18 = vmul.f32 3.8918573e-05, %v9577_v10  ;;  %v4340_v39 = vmul.f32 %v4339_v45, %v9573_v26 }
 0x3d8   : > { %v9681_v21 = vmul.f32 0.70710677, %v9666_v52  ;;  %v9710_v14 = vpop.eup %6928  ;;  %v9723_v34 = vmul.f32 0.5, %v9525_v50  ;;  %v4381_v38 = vadd.f32 1.1283791, %v4380_v9  ;;  %v9726_v59 = vmul.f32 0.5, %v9540_v5 }
 0x3d9   : > { %v9717_v4 = vpop.eup %6930  ;;  %v4459_v43 = vadd.f32 0.18741608, %v4458_v3  ;;  %v3970_v63 = vmul.f32 %v9710_v14, %v9674_v49  ;;  %6934 = vrcp.f32 %v9713_v25  ;;  %v4416_v7 = vmul.f32 %v4415_v12, %v9623_v42 }
 0x3da   : > { %11633 = vst [vmem:[#allocation7_spill] sm:$0xff] %v9681_v21  ;;  %v4530_v33 = vmul.f32 %v9681_v21, %v9681_v21  ;;  %v4000_v40 = vadd.f32 0.001143296, %v3999_v18  ;;  %v9736_v0 = vmul.f32 %v3997_v47, %v9555_v20  ;;  %v4394_v5 = vmul.f32 %v9717_v4, %v9676_v27 }
 0x3db   : > { %v4182_v28 = vpop.f32.mrf.mxu3  ;;  %11634 = vst [vmem:[#allocation8_spill] sm:$0xff] %v9723_v34  ;;  %v4404_v44 = vand.u32 2147483648, %v9676_v27  ;;  %v4341_v48 = vadd.f32 1.1283791, %v4340_v39  ;;  %v4460_v20 = vmul.f32 %v4459_v43, %v9580_v2  ;;  %v3971_v58 = vsub.f32 1.0, %v3970_v63 }
 0x3dc   : > { %v9658_v24 = vadd.f32 %v4182_v28, %v9528_v15  ;;  %v4428_v28 = vadd.f32 0.112945676, %v4427_v55  ;;  %v9715_v13 = vmin.f32 %v4530_v33, 16.0  ;;  %11635 = vst [vmem:[#allocation9_spill] sm:$0xff] %v9726_v59  ;;  %v9745_v55 = vmul.f32 0.5, %v9552_v1 }
 0x3dd   : > { %v4001_v56 = vmul.f32 %v4000_v40, %v9577_v10  ;;  %v9750_v23 = vmul.f32 %v4381_v38, %v9534_v61  ;;  %v4417_v33 = vadd.f32 0.05243302, %v4416_v7  ;;  %v4402_v2 = vand.u32 2147483647, %v9676_v27 }
 0x3de   : > { %v9672_v29 = vmul.f32 0.70710677, %v9658_v24  ;;  %v4429_v54 = vmul.f32 %v4428_v28, %v9623_v42  ;;  %v4532_v50 = vmul.f32 2.1237322e-06, %v9715_v13  ;;  %11636 = vst [vmem:[#allocation10_spill] sm:$0xff] %v9745_v55  ;;  %v9764_v47 = vmul.f32 %v4341_v48, %v9549_v46 }
 0x3df   : > { %v4002_v28 = vadd.f32 0.014752088, %v4001_v56  ;;  %vm4398_vm0 = vweird.f32 %v9676_v27  ;;  %v4418_v38 = vmul.f32 %v4417_v33, %v9623_v42  ;;  %v3972_v39 = vmul.f32 %v9710_v14, %v3971_v58 }
 0x3e0   : > { %v4490_v19 = vmul.f32 %v9672_v29, %v9672_v29  ;;  %v4430_v6 = vadd.f32 0.4994258, %v4429_v54  ;;  %v4533_v8 = vadd.f32 0.00028619796, %v4532_v50  ;;  %v4364_v54 = vand.u32 2147483648, %v9691_v35 }
 0x3e1   : > { %v4003_v12 = vmul.f32 %v4002_v28, %v9577_v10  ;;  %vm4399_vm1 = vweird.f32 %v9717_v4  ;;  %v4362_v50 = vand.u32 2147483647, %v9691_v35  ;;  %vm3974_vm2 = vweird.f32 %v9674_v49 }
 0x3e2   : > { %v9686_v51 = vmin.f32 %v4490_v19, 16.0  ;;  %v9741_v19 = vpop.eup %6932  ;;  %v4431_v1 = vmul.f32 %v4430_v6, %v9623_v42  ;;  %v9780_v6 = vor.u32 1.1754944e-38, %v4364_v54  ;;  %v4419_v48 = vadd.f32 0.18741608, %v4418_v38  ;;  %v6596_v54 = vld [vmem:[%s11590_s11 + $0xc0] sm:$0xf]  ;;  %vm9831_vm7 = vmor %vm4398_vm0, %vm4399_vm1 }
 0x3e3   : > { %v4354_v9 = vmul.f32 %v9741_v19, %v9691_v35  ;;  %v9756_v3 = vpop.eup %6934  ;;  %v4004_v43 = vadd.f32 0.112945676, %v4003_v12  ;;  %vm9789_vm3 = vcmp.eq.f32.partialorder %v4402_v2, 8.507059e+37  ;;  %vm4358_vm4 = vweird.f32 %v9691_v35 }
 0x3e4   : > { %v4503_v62 = vmul.f32 3.8918573e-05, %v9686_v51  ;;  %v4492_v11 = vmul.f32 2.1237322e-06, %v9686_v51  ;;  %v4474_v46 = vmul.f32 %v9756_v3, %v9713_v25  ;;  %v9774_v7 = vadd.f32 1.0, %v4431_v1  ;;  %v4184_v1 = vpop.f32.mrf.mxu3 }
 0x3e5   : > { %v4355_v63 = vsub.f32 1.0, %v4354_v9  ;;  %v6534_v9 = vld [vmem:[%s11590_s11 + $0x48] sm:$0xf0]  ;;  %v3973_v2 = vadd.f32 %v9710_v14, %v3972_v39  ;;  %vm4478_vm5 = vweird.f32 %v9713_v25  ;;  %v9818_v39 = vadd.f32 %v4184_v1, %v9528_v15 }
 0x3e6   : > { %v4504_v32 = vadd.f32 0.001143296, %v4503_v62  ;;  %v4493_v30 = vadd.f32 0.00028619796, %v4492_v11  ;;  %v4395_v62 = vsub.f32 1.0, %v4394_v5  ;;  %v4534_v11 = vmul.f32 %v4533_v8, %v9715_v13 }
 0x3e7   : > { %v4005_v5 = vmul.f32 %v4004_v43, %v9577_v10  ;;  %v4356_v8 = vmul.f32 %v9741_v19, %v4355_v63  ;;  %v4475_v28 = vsub.f32 1.0, %v4474_v46  ;;  %6936 = vrcp.f32 %v9774_v7 }
 0x3e8   : > { %v4505_v22 = vmul.f32 %v4504_v32, %v9686_v51  ;;  %v9759_v32 = vor.u32 1.1754944e-38, %v4404_v44  ;;  %v4494_v61 = vmul.f32 %v4493_v30, %v9686_v51  ;;  %v4484_v44 = vand.u32 2147483648, %v9713_v25 }
 0x3e9   : > { %vm3975_vm6 = vweird.f32 %v9710_v14  ;;  %vm4359_vm8 = vweird.f32 %v9741_v19  ;;  %v4476_v46 = vmul.f32 %v9756_v3, %v4475_v28  ;;  %v4420_v27 = vmul.f32 %v4419_v48, %v9623_v42 }
 0x3ea   : > { %v4506_v36 = vadd.f32 0.014752088, %v4505_v22  ;;  %v4461_v22 = vadd.f32 1.1283791, %v4460_v20  ;;  %v4495_v40 = vadd.f32 0.0036580483, %v4494_v61  ;;  %vm9854_vm9 = vmor %vm3974_vm2, %vm3975_vm6  ;;  %v9863_v48 = vadd.f32 %v9741_v19, %v4356_v8 }
 0x3eb   : > { %v4535_v20 = vadd.f32 0.0036580483, %v4534_v11  ;;  %vm4479_vm10 = vweird.f32 %v9756_v3  ;;  %vm9889_vm12 = vmor %vm4358_vm4, %vm4359_vm8  ;;  %v4442_v63 = vand.u32 2147483647, %v9774_v7  ;;  %vm4438_vm15 = vweird.f32 %v9774_v7 }
 0x3ec   : > { %v4507_v26 = vmul.f32 %v4506_v36, %v9686_v51  ;;  %v4396_v36 = vmul.f32 %v9717_v4, %v4395_v62  ;;  %v9786_v56 = vmul.f32 %v4461_v22, %v9564_v57  ;;  %v4233_v62 = vpop.f32.mrf.mxu0  ;;  %v6672_v57 = vld [vmem:[%s11590_s11 + $0x44] sm:$0xf]  ;;  %v6689_v22 = vld [vmem:[%s11590_s11 + $0xc4] sm:$0xf0]  ;;  %vm9904_vm13 = vmor %vm4478_vm5, %vm4479_vm10  ;;  %vm9935_vm0 = vcmp.eq.f32.partialorder %v4362_v50, 8.507059e+37 }
 0x3ed   : > { %v9806_v12 = vadd.f32 %v4233_v62, %v9515_v31  ;;  %v6537_v38 = vor.u32 %v6672_v57, %v6534_v9  ;;  %v6597_v11 = vor.u32 %v6689_v22, %v6596_v54  ;;  %v9870_v57 = vadd.f32 %v9756_v3, %v4476_v46 }
 0x3ee   : > { %v4508_v17 = vadd.f32 0.112945676, %v4507_v26  ;;  %v4397_v58 = vadd.f32 %v9717_v4, %v4396_v36  ;;  %vm9975_vm6 = vcmp.eq.f32.partialorder %v4442_v63, 8.507059e+37 }
 0x3ef   : > { %v9825_v36 = vmul.f32 0.70710677, %v9806_v12  ;;  %5989 = vmatpush.bf16.msra.mxu3 %v6537_v38  ;;  %5940 = vmatpush.bf16.msra.mxu2 %v6597_v11 }
 0x3f0   : > { %v4509_v45 = vmul.f32 %v4508_v17, %v9686_v51  ;;  %v4006_v17 = vadd.f32 0.4994258, %v4005_v5  ;;  %v9839_v5 = vmul.f32 0.70710677, %v9818_v39 }
 0x3f1   : > { %11639 = vst [vmem:[#allocation11_spill] sm:$0xff] %v9825_v36  ;;  %v4610_v42 = vmul.f32 %v9825_v36, %v9825_v36 }
 0x3f2   : > { %v4510_v18 = vadd.f32 0.4994258, %v4509_v45  ;;  %v4496_v45 = vmul.f32 %v4495_v40, %v9686_v51  ;;  %v4007_v61 = vmul.f32 %v4006_v17, %v9577_v10  ;;  %v4536_v10 = vmul.f32 %v4535_v20, %v9715_v13  ;;  %11642 = vst [vmem:[#allocation12_spill] sm:$0xff] %v9839_v5  ;;  %v9847_v17 = vpop.eup %6936 }
 0x3f3   : > { %v3980_v40 = vand.u32 2147483648, %v9674_v49  ;;  %v3978_v20 = vand.u32 2147483647, %v9674_v49  ;;  %v3977_v49 = vsel %vm9854_vm9, %v9710_v14, %v3973_v2  ;;  %v9872_v1 = vmin.f32 %v4610_v42, 16.0 }
 0x3f4   : > { %v4511_v30 = vmul.f32 %v4510_v18, %v9686_v51  ;;  %v9822_v43 = vadd.f32 1.0, %v4007_v61  ;;  %v4497_v28 = vadd.f32 0.05243302, %v4496_v45  ;;  %v9881_v61 = vor.u32 1.1754944e-38, %v4484_v44 }
 0x3f5   : > { %v3981_v9 = vor.u32 1.1754944e-38, %v3980_v40  ;;  %v4434_v54 = vmul.f32 %v9847_v17, %v9774_v7  ;;  %vm3979_vm11 = vcmp.eq.f32.partialorder %v3978_v20, 8.507059e+37  ;;  %v4444_v20 = vand.u32 2147483648, %v9774_v7 }
 0x3f6   : > { %v9815_v18 = vadd.f32 1.0, %v4511_v30  ;;  %v4401_v30 = vsel %vm9831_vm7, %v9717_v4, %v4397_v58  ;;  %6938 = vrcp.f32 %v9822_v43  ;;  %v4570_v4 = vmul.f32 %v9839_v5, %v9839_v5 }
 0x3f7   : > { %v4537_v58 = vadd.f32 0.05243302, %v4536_v10  ;;  %v9879_v8 = vsel %vm9789_vm3, %v9759_v32, %v4401_v30  ;;  %v4498_v2 = vmul.f32 %v4497_v28, %v9686_v51  ;;  %v3982_v22 = vsel %vm3979_vm11, %v3981_v9, %v3977_v49  ;;  %v4236_v49 = vpop.f32.mrf.mxu0 }
 0x3f8   : > { %6940 = vrcp.f32 %v9815_v18  ;;  %v9874_v45 = vmin.f32 %v4570_v4, 16.0  ;;  %v4612_v32 = vmul.f32 2.1237322e-06, %v9872_v1  ;;  %v9908_v10 = vadd.f32 1.1283791, %v4420_v27 }
 0x3f9   : > { %v4538_v46 = vmul.f32 %v4537_v58, %v9715_v13  ;;  %v4435_v42 = vsub.f32 1.0, %v4434_v54  ;;  %vm4439_vm14 = vweird.f32 %v9847_v17  ;;  %v3983_v27 = vmul.f32 %v3982_v22, %v9707_v16 }
 0x3fa   : > { %v4583_v44 = vmul.f32 3.8918573e-05, %v9874_v45  ;;  %v4613_v62 = vadd.f32 0.00028619796, %v4612_v32  ;;  %v4499_v58 = vadd.f32 0.18741608, %v4498_v2  ;;  %v9924_v26 = vadd.f32 %v4236_v49, %v9515_v31  ;;  %vm9987_vm7 = vmor %vm4438_vm15, %vm4439_vm14 }
 0x3fb   : > { %v4018_v38 = vand.u32 2147483647, %v9822_v43  ;;  %v9927_v30 = vadd.f32 0.18741608, %v4538_v46  ;;  %v4020_v32 = vand.u32 2147483648, %v9822_v43  ;;  %v6400_v36 = vclamps-f32 %v3983_v27, 1.0 }
 0x3fc   : > { %v6939_v33 = vpop.eup %6938  ;;  %v4584_v4 = vadd.f32 0.001143296, %v4583_v44  ;;  %11649 = vst [vmem:[#allocation13_spill] sm:$0xff] %v9924_v26  ;;  %v11652_v22 = vand.u32 2147483647, %v9713_v25  ;;  %v4500_v5 = vmul.f32 %v4499_v58, %v9686_v51  ;;  %vm4014_vm3 = vweird.f32 %v9822_v43  ;;  %v4187_v58 = vpop.f32.mrf.mxu3 }
 0x3fd   : > { %v4010_v28 = vmul.f32 %v6939_v33, %v9822_v43  ;;  %vm4015_vm2 = vweird.f32 %v6939_v33  ;;  %v4572_v49 = vmul.f32 2.1237322e-06, %v9874_v45  ;;  %v9949_v50 = vmul.f32 0.70710677, %v9924_v26  ;;  %v6598_v27 = vld [vmem:[%s11590_s11 + $0xc8] sm:$0xf0] }
 0x3fe   : > { %v9912_v40 = vpop.eup %6940  ;;  %v4585_v16 = vmul.f32 %v4584_v4, %v9874_v45  ;;  %vm9941_vm1 = vcmp.eq.f32.partialorder %v11652_v22, 8.507059e+37  ;;  %v4436_v4 = vmul.f32 %v9847_v17, %v4435_v42  ;;  %vm4019_vm4 = vcmp.eq.f32.partialorder %v4018_v38, 8.507059e+37  ;;  %vm4016_vm5 = vmor %vm4014_vm3, %vm4015_vm2  ;;  %v6688_v42 = vld [vmem:[%s11590_s11 + $0xc4] sm:$0xf]  ;;  %v6532_v26 = vld [vmem:[%s11590_s11 + $0x40] sm:$0xf] }
 0x3ff   : > { %v4011_v9 = vsub.f32 1.0, %v4010_v28  ;;  %v4514_v54 = vmul.f32 %v9912_v40, %v9815_v18  ;;  %v4614_v28 = vmul.f32 %v4613_v62, %v9872_v1  ;;  %v4690_v51 = vmul.f32 %v9949_v50, %v9949_v50  ;;  %v4238_v2 = vpop.f32.mrf.mxu0 }
 0x400   : > { %v4586_v35 = vadd.f32 0.014752088, %v4585_v16  ;;  %v4573_v38 = vadd.f32 0.00028619796, %v4572_v49  ;;  %v4445_v55 = vor.u32 1.1754944e-38, %v4444_v20  ;;  %v4040_v34 = vadd.f32 1.0, %v6400_v36 }
 0x401   : > { %v4012_v46 = vmul.f32 %v6939_v33, %v4011_v9  ;;  %v4515_v22 = vsub.f32 1.0, %v4514_v54  ;;  %v4021_v9 = vor.u32 1.1754944e-38, %v4020_v32  ;;  %v4615_v43 = vadd.f32 0.0036580483, %v4614_v28 }
 0x402   : > { %v4587_v62 = vmul.f32 %v4586_v35, %v9874_v45  ;;  %v6601_v54 = vor.u32 %v6688_v42, %v6598_v27  ;;  %v4437_v32 = vadd.f32 %v9847_v17, %v4436_v4  ;;  %v9963_v21 = vmin.f32 %v4690_v51, 16.0 }
 0x403   : > { %v4013_v25 = vadd.f32 %v6939_v33, %v4012_v46  ;;  %v9973_v28 = vadd.f32 %v4187_v58, %v9528_v15  ;;  %v9979_v20 = vadd.f32 1.1283791, %v4500_v5  ;;  %v4522_v63 = vand.u32 2147483647, %v9815_v18 }
 0x404   : > { %v4588_v35 = vadd.f32 0.112945676, %v4587_v62  ;;  %6038 = vmatpush.bf16.msra.mxu0 %v6601_v54  ;;  %v4616_v62 = vmul.f32 %v4615_v43, %v9872_v1  ;;  %v4574_v5 = vmul.f32 %v4573_v38, %v9874_v45  ;;  %v4441_v14 = vsel %vm9987_vm7, %v9847_v17, %v4437_v32 }
 0x405   : > { %v4017_v16 = vsel %vm4016_vm5, %v6939_v33, %v4013_v25  ;;  %v6673_v33 = vld [vmem:[%s11590_s11 + $0x44] sm:$0xf0]  ;;  %vm4519_vm8 = vweird.f32 %v9912_v40  ;;  %v4524_v44 = vand.u32 2147483648, %v9815_v18  ;;  %v10033_v43 = vadd.f32 %v4238_v2, %v9515_v31  ;;  %v6686_v25 = vld [vmem:[%s11590_s11 + $0xb4] sm:$0xf] }
 0x406   : > { %v4022_v46 = vsel %vm4019_vm4, %v4021_v9, %v4017_v16  ;;  %v4589_v36 = vmul.f32 %v4588_v35, %v9874_v45  ;;  %v6533_v4 = vor.u32 %v6673_v33, %v6532_v26  ;;  %v11659_v26 = vsel %vm9889_vm12, %v9741_v19, %v9863_v48  ;;  %v6687_v48 = vld [vmem:[%s11590_s11 + $0xb4] sm:$0xf0]  ;;  %v6670_v35 = vld [vmem:[%s11590_s11 + $0x34] sm:$0xf]  ;;  %v6526_v33 = vld [vmem:[%s11590_s11 + $0x38] sm:$0xf0] }
 0x407   : > { %v4023_v59 = vmul.f32 %v4022_v46, %v9736_v0  ;;  %v4516_v0 = vmul.f32 %v9912_v40, %v4515_v22  ;;  %v4366_v7 = vsel %vm9935_vm0, %v9780_v6, %v11659_v26  ;;  %v11660_v22 = vsel %vm9904_vm13, %v9756_v3, %v9870_v57  ;;  %v6588_v6 = vld [vmem:[%s11590_s11 + $0xb0] sm:$0xf]  ;;  %v6580_v26 = vld [vmem:[%s11590_s11 + $0xa0] sm:$0xf] }
 0x408   : > { %5891 = vmatpush.bf16.msra.mxu1 %v6533_v4  ;;  %v4703_v19 = vmul.f32 3.8918573e-05, %v9963_v21  ;;  %v4056_v57 = vmul.f32 %v4040_v34, %v9700_v60  ;;  %v4590_v11 = vadd.f32 0.4994258, %v4589_v36  ;;  %v4617_v51 = vadd.f32 0.05243302, %v4616_v62 }
 0x409   : > { %v6401_v9 = vclamps-f32 %v4023_v59, 1.0  ;;  %v4486_v59 = vsel %vm9941_vm1, %v9881_v61, %v11660_v22  ;;  %v10022_v61 = vmul.f32 0.70710677, %v9973_v28  ;;  %v4517_v17 = vadd.f32 %v9912_v40, %v4516_v0 }
 0x40a   : > { %v4704_v42 = vadd.f32 0.001143296, %v4703_v19  ;;  %v4575_v58 = vadd.f32 0.0036580483, %v4574_v5  ;;  %v4692_v60 = vmul.f32 2.1237322e-06, %v9963_v21  ;;  %v6589_v38 = vor.u32 %v6687_v48, %v6588_v6 }
 0x40b   : > { %v4041_v3 = vadd.f32 1.0, %v6401_v9  ;;  %v4650_v16 = vmul.f32 %v10022_v61, %v10022_v61  ;;  %vm10035_vm9 = vcmp.eq.f32.partialorder %v4522_v63, 8.507059e+37  ;;  %v10050_v0 = vmul.f32 %v9879_v8, %v9750_v23  ;;  %v6590_v63 = vld [vmem:[%s11590_s11 + $0xb8] sm:$0xf0]  ;;  %v6524_v23 = vld [vmem:[%s11590_s11 + $0x30] sm:$0xf]  ;;  %v4189_v9 = vpop.f32.mrf.mxu3 }
 0x40c   : > { %v4705_v34 = vmul.f32 %v4704_v42, %v9963_v21  ;;  %v10053_v36 = vmul.f32 %v4366_v7, %v9764_v47  ;;  %v4422_v4 = vmul.f32 %v9908_v10, %v9605_v53  ;;  %vm4518_vm10 = vweird.f32 %v9815_v18  ;;  %5941 = vmatpush.bf16.msra.mxu2 %v6589_v38  ;;  %v6685_v19 = vld [vmem:[%s11590_s11 + $0xa4] sm:$0xf0] }
 0x40d   : > { %v4057_v27 = vmul.f32 %v4041_v3, %v9703_v41  ;;  %v4591_v41 = vmul.f32 %v4590_v11, %v9874_v45  ;;  %v10040_v46 = vmin.f32 %v4650_v16, 16.0  ;;  %v10068_v47 = vmul.f32 %v4486_v59, %v9786_v56  ;;  %vm10074_vm11 = vmor %vm4518_vm10, %vm4519_vm8  ;;  %v6671_v56 = vld [vmem:[%s11590_s11 + $0x34] sm:$0xf0] }
 0x40e   : > { %v4446_v53 = vsel %vm9975_vm6, %v4445_v55, %v4441_v14  ;;  %v4706_v8 = vadd.f32 0.014752088, %v4705_v34  ;;  %v4521_v55 = vsel %vm10074_vm11, %v9912_v40, %v4517_v17  ;;  %v4693_v49 = vadd.f32 0.00028619796, %v4692_v60 }
 0x40f   : > { %v4065_v32 = vpack.c.bf16 %v4057_v27, %v4056_v57  ;;  %v4663_v10 = vmul.f32 3.8918573e-05, %v10040_v46  ;;  %v6529_v62 = vor.u32 %v6670_v35, %v6526_v33  ;;  %v10086_v5 = vmul.f32 0.70710677, %v10033_v43 }
 0x410   : > { %v4525_v7 = vor.u32 1.1754944e-38, %v4524_v44  ;;  %v10091_v22 = vadd.f32 1.0, %v4591_v41  ;;  %v4707_v59 = vmul.f32 %v4706_v8, %v9963_v21  ;;  %v6593_v6 = vor.u32 %v6686_v25, %v6590_v63 }
 0x411   : > { %4211 = vmatmul.bf16.gmra.mxu3 %v4065_v32  ;;  %4260 = vmatmul.bf16.gmra.mxu0 %v4065_v32  ;;  %v4664_v14 = vadd.f32 0.001143296, %v4663_v10  ;;  %v4770_v40 = vmul.f32 %v10086_v5, %v10086_v5  ;;  %v10100_v48 = vadd.f32 %v4189_v9, %v9528_v15  ;;  %v6525_v3 = vor.u32 %v6671_v56, %v6524_v23 }
 0x412   : > { %5990 = vmatpush.bf16.msra.mxu3 %v6529_v62  ;;  %v4447_v57 = vmul.f32 %v4446_v53, %v4422_v4  ;;  %v4526_v11 = vsel %vm10035_vm9, %v4525_v7, %v4521_v55  ;;  %v4576_v2 = vmul.f32 %v4575_v58, %v9874_v45  ;;  %v4618_v44 = vmul.f32 %v4617_v51, %v9872_v1 }
 0x413   : > { %v4665_v17 = vmul.f32 %v4664_v14, %v10040_v46  ;;  %v4708_v42 = vadd.f32 0.112945676, %v4707_v59  ;;  %v10107_v27 = vmin.f32 %v4770_v40, 16.0  ;;  %6039 = vmatpush.bf16.msra.mxu0 %v6593_v6  ;;  %5892 = vmatpush.bf16.msra.mxu1 %v6525_v3  ;;  %v6581_v16 = vor.u32 %v6685_v19, %v6580_v26 }
 0x414   : > { %v4502_v60 = vmul.f32 %v9979_v20, %v9672_v29  ;;  %6942 = vrcp.f32 %v10091_v22  ;;  %v4694_v34 = vmul.f32 %v4693_v49, %v9963_v21  ;;  %v10114_v38 = vmul.f32 0.70710677, %v10100_v48 }
 0x415   : > { %v6467_v58 = vclamps-f32 %v10050_v0, 1.0  ;;  %v6466_v51 = vclamps-f32 %v10053_v36, 1.0  ;;  %v10119_v54 = vmul.f32 0.5, %v9584_v37  ;;  %v4666_v32 = vadd.f32 0.014752088, %v4665_v17  ;;  %5942 = vmatpush.bf16.msra.mxu2 %v6581_v16 }
 0x416   : > { %v6469_v41 = vclamps-f32 %v10068_v47, 1.0  ;;  %v4527_v35 = vmul.f32 %v4526_v11, %v4502_v60  ;;  %v4652_v29 = vmul.f32 2.1237322e-06, %v10040_v46  ;;  %v4783_v20 = vmul.f32 3.8918573e-05, %v10107_v27  ;;  %v11665_v11 = vld [vmem:[#allocation13_spill] sm:$0xff] }
 0x417   : > { %v4619_v33 = vadd.f32 0.18741608, %v4618_v44  ;;  %v4577_v4 = vadd.f32 0.05243302, %v4576_v2  ;;  %v4709_v25 = vmul.f32 %v4708_v42, %v9963_v21  ;;  %v4667_v0 = vmul.f32 %v4666_v32, %v10040_v46 }
 0x418   : > { %v6468_v63 = vclamps-f32 %v4447_v57, 1.0  ;;  %v4540_v37 = vmul.f32 %v9927_v30, %v9715_v13  ;;  %v4695_v36 = vadd.f32 0.0036580483, %v4694_v34  ;;  %v4730_v23 = vmul.f32 %v10114_v38, %v10114_v38 }
 0x419   : > { %v5611_v47 = vadd.f32 1.0, %v6467_v58  ;;  %v10131_v53 = vmul.f32 0.5, %v9666_v52  ;;  %v10134_v18 = vmul.f32 0.5, %v9658_v24  ;;  %v4784_v8 = vadd.f32 0.001143296, %v4783_v20 }
 0x41a   : > { %v10136_v10 = vpop.eup %6942  ;;  %v10138_v9 = vadd.f32 1.0, %v6466_v51  ;;  %v6470_v56 = vclamps-f32 %v4527_v35, 1.0  ;;  %v4653_v55 = vadd.f32 0.00028619796, %v4652_v29  ;;  %v4668_v49 = vadd.f32 0.112945676, %v4667_v0 }
 0x41b   : > { %v10140_v30 = vadd.f32 1.0, %v6469_v41  ;;  %v4620_v62 = vmul.f32 %v4619_v33, %v9872_v1  ;;  %v4578_v26 = vmul.f32 %v4577_v4, %v9874_v45  ;;  %v4710_v7 = vadd.f32 0.4994258, %v4709_v25  ;;  %v6572_v33 = vld [vmem:[%s11590_s11 + $0x90] sm:$0xf] }
 0x41c   : > { %v10144_v52 = vadd.f32 1.0, %v6468_v63  ;;  %v10146_v59 = vadd.f32 1.1283791, %v4540_v37  ;;  %v4696_v24 = vmul.f32 %v4695_v36, %v9963_v21  ;;  %v10149_v14 = vmin.f32 %v4730_v23, 16.0  ;;  %v6682_v23 = vld [vmem:[%s11590_s11 + $0x94] sm:$0xf] }
 0x41d   : > { %v10152_v19 = vmul.f32 0.5, %v9806_v12  ;;  %v10155_v40 = vmul.f32 0.5, %v9818_v39  ;;  %v4594_v6 = vmul.f32 %v10136_v10, %v10091_v22  ;;  %v4785_v3 = vmul.f32 %v4784_v8, %v10107_v27  ;;  %v6684_v12 = vld [vmem:[%s11590_s11 + $0xa4] sm:$0xf]  ;;  %v6582_v39 = vld [vmem:[%s11590_s11 + $0xa8] sm:$0xf0] }
 0x41e   : > { %v10160_v57 = vadd.f32 1.0, %v6470_v56  ;;  %v10163_v2 = vmul.f32 0.5, %v11665_v11  ;;  %v4654_v17 = vmul.f32 %v4653_v55, %v10040_v46  ;;  %v4669_v44 = vmul.f32 %v4668_v49, %v10040_v46  ;;  %v6574_v8 = vld [vmem:[%s11590_s11 + $0x98] sm:$0xf0]  ;;  %v6668_v56 = vld [vmem:[%s11590_s11 + $0x24] sm:$0xf] }
 0x41f   : > { %v10173_v42 = vadd.f32 1.1283791, %v4620_v62  ;;  %v4579_v16 = vadd.f32 0.18741608, %v4578_v26  ;;  %v4711_v60 = vmul.f32 %v4710_v7, %v9963_v21  ;;  %v4772_v34 = vmul.f32 2.1237322e-06, %v10107_v27 }
 0x420   : > { %v4602_v58 = vand.u32 2147483647, %v10091_v22  ;;  %v4697_v51 = vadd.f32 0.05243302, %v4696_v24  ;;  %v4743_v32 = vmul.f32 3.8918573e-05, %v10149_v14  ;;  %v6585_v20 = vor.u32 %v6684_v12, %v6582_v39 }
 0x421   : > { %v4595_v41 = vsub.f32 1.0, %v4594_v6  ;;  %v10180_v35 = vmul.f32 0.5, %v9973_v28  ;;  %v4786_v29 = vadd.f32 0.014752088, %v4785_v3  ;;  %v4655_v4 = vadd.f32 0.0036580483, %v4654_v17 }
 0x422   : > { %v4670_v25 = vadd.f32 0.4994258, %v4669_v44  ;;  %v4744_v0 = vadd.f32 0.001143296, %v4743_v32  ;;  %v10185_v63 = vadd.f32 1.0, %v4711_v60  ;;  %v10188_v37 = vmul.f32 0.5, %v10033_v43  ;;  %6040 = vmatpush.bf16.msra.mxu0 %v6585_v20  ;;  %v4241_v32 = vpop.f32.mrf.mxu0 }
 0x423   : > { %v4773_v36 = vadd.f32 0.00028619796, %v4772_v34  ;;  %v6683_v28 = vld [vmem:[%s11590_s11 + $0x94] sm:$0xf0]  ;;  %v11666_v43 = vld [vmem:[#allocation8_spill] sm:$0xff]  ;;  %v4580_v49 = vmul.f32 %v4579_v16, %v9874_v45  ;;  %v4596_v62 = vmul.f32 %v10136_v10, %v4595_v41  ;;  %v4787_v26 = vmul.f32 %v4786_v29, %v10107_v27 }
 0x424   : > { %v10203_v55 = vmul.f32 %v5611_v47, %v11666_v43  ;;  %v6518_v7 = vld [vmem:[%s11590_s11 + $0x28] sm:$0xf0]  ;;  %v6516_v24 = vld [vmem:[%s11590_s11 + $0x20] sm:$0xf]  ;;  %v6669_v6 = vld [vmem:[%s11590_s11 + $0x24] sm:$0xf0]  ;;  %v4656_v47 = vmul.f32 %v4655_v4, %v10040_v46  ;;  %v4671_v45 = vmul.f32 %v4670_v25, %v10040_v46  ;;  %v4745_v3 = vmul.f32 %v4744_v0, %v10149_v14 }
 0x425   : > { %v6573_v11 = vor.u32 %v6683_v28, %v6572_v33  ;;  %v4698_v17 = vmul.f32 %v4697_v51, %v9963_v21  ;;  %6944 = vrcp.f32 %v10185_v63  ;;  %v4774_v44 = vmul.f32 %v4773_v36, %v10107_v27  ;;  %v11670_v43 = vld [vmem:[#allocation10_spill] sm:$0xff] }
 0x426   : > { %v4732_v12 = vmul.f32 2.1237322e-06, %v10149_v14  ;;  %v4746_v39 = vadd.f32 0.014752088, %v4745_v3  ;;  %v6577_v16 = vor.u32 %v6682_v23, %v6574_v8  ;;  %v6521_v60 = vor.u32 %v6668_v56, %v6518_v7  ;;  %v6564_v23 = vld [vmem:[%s11590_s11 + $0x80] sm:$0xf] }
 0x427   : > { %5943 = vmatpush.bf16.msra.mxu2 %v6573_v11  ;;  %v6517_v34 = vor.u32 %v6669_v6, %v6516_v24  ;;  %v4597_v41 = vadd.f32 %v10136_v10, %v4596_v62  ;;  %vm4599_vm12 = vweird.f32 %v10136_v10  ;;  %v4604_v29 = vand.u32 2147483648, %v10091_v22  ;;  %v11669_v8 = vld [vmem:[#allocation9_spill] sm:$0xff]  ;;  %v11673_v3 = vld [vmem:[#allocation7_spill] sm:$0xff] }
 0x428   : > { %v4788_v20 = vadd.f32 0.112945676, %v4787_v26  ;;  %v4581_v51 = vadd.f32 1.1283791, %v4580_v49  ;;  %v4657_v33 = vadd.f32 0.05243302, %v4656_v47  ;;  %v4747_v25 = vmul.f32 %v4746_v39, %v10149_v14  ;;  %6041 = vmatpush.bf16.msra.mxu0 %v6577_v16  ;;  %5991 = vmatpush.bf16.msra.mxu3 %v6521_v60 }
 0x429   : > { %v10227_v4 = vadd.f32 1.0, %v4671_v45  ;;  %vm4598_vm13 = vweird.f32 %v10091_v22  ;;  %vm10231_vm14 = vcmp.eq.f32.partialorder %v4602_v58, 8.507059e+37  ;;  %v4699_v36 = vadd.f32 0.18741608, %v4698_v17  ;;  %5893 = vmatpush.bf16.msra.mxu1 %v6517_v34  ;;  %v6681_v26 = vld [vmem:[%s11590_s11 + $0x84] sm:$0xf0] }
 0x42a   : > { %v10236_v28 = vadd.f32 %v4241_v32, %v9515_v31  ;;  %v10243_v56 = vmul.f32 %v10138_v9, %v11669_v8  ;;  %v5645_v22 = vmul.f32 %v10140_v30, %v11670_v43  ;;  %vm10249_vm15 = vmor %vm4598_vm13, %vm4599_vm12  ;;  %v4775_v49 = vadd.f32 0.0036580483, %v4774_v44  ;;  %v6680_v47 = vld [vmem:[%s11590_s11 + $0x84] sm:$0xf]  ;;  %v6566_v45 = vld [vmem:[%s11590_s11 + $0x88] sm:$0xf0] }
 0x42b   : > { %v4733_v62 = vadd.f32 0.00028619796, %v4732_v12  ;;  %v10256_v7 = vpop.eup %6944  ;;  %v4601_v9 = vsel %vm10249_vm15, %v10136_v10, %v4597_v41  ;;  %v4605_v24 = vor.u32 1.1754944e-38, %v4604_v29  ;;  %v4789_v30 = vmul.f32 %v4788_v20, %v10107_v27  ;;  %v6667_v44 = vld [vmem:[%s11590_s11 + $0x14] sm:$0xf0] }
 0x42c   : > { %v10263_v6 = vmul.f32 0.5, %v10100_v48  ;;  %v10273_v11 = vmul.f32 %v10146_v59, %v11673_v3  ;;  %v4658_v10 = vmul.f32 %v4657_v33, %v10040_v46  ;;  %6946 = vrcp.f32 %v10227_v4  ;;  %v6508_v48 = vld [vmem:[%s11590_s11 + $0x10] sm:$0xf]  ;;  %v6666_v60 = vld [vmem:[%s11590_s11 + $0x14] sm:$0xf] }
 0x42d   : > { %v4748_v17 = vadd.f32 0.112945676, %v4747_v25  ;;  %v10285_v12 = vmul.f32 %v10144_v52, %v10119_v54  ;;  %v4700_v59 = vmul.f32 %v4699_v36, %v9963_v21  ;;  %v10289_v39 = vmul.f32 0.70710677, %v10236_v28  ;;  %v6510_v34 = vld [vmem:[%s11590_s11 + $0x18] sm:$0xf0]  ;;  %v4192_v25 = vpop.f32.mrf.mxu3 }
 0x42e   : > { %v6565_v16 = vor.u32 %v6681_v26, %v6564_v23  ;;  %v4606_v32 = vsel %vm10231_vm14, %v4605_v24, %v4601_v9  ;;  %v4714_v54 = vmul.f32 %v10256_v7, %v10185_v63  ;;  %v4776_v21 = vmul.f32 %v4775_v49, %v10107_v27  ;;  %v11674_v36 = vld [vmem:[#allocation12_spill] sm:$0xff]  ;;  %v6500_v58 = vld [vmem:[%s11590_s11] sm:$0xf]  ;;  %v6665_v49 = vld [vmem:[%s11590_s11 + $0x4] sm:$0xf0] }
 0x42f   : > { %v4734_v52 = vmul.f32 %v4733_v62, %v10149_v14  ;;  %v4790_v41 = vadd.f32 0.4994258, %v4789_v30  ;;  %v4850_v29 = vmul.f32 %v10289_v39, %v10289_v39  ;;  %v6569_v20 = vor.u32 %v6680_v47, %v6566_v45 }
 0x430   : > { %5944 = vmatpush.bf16.msra.mxu2 %v6565_v16  ;;  %v6509_v33 = vor.u32 %v6667_v44, %v6508_v48  ;;  %v4582_v23 = vmul.f32 %v4581_v51, %v11674_v36  ;;  %v4659_v8 = vadd.f32 0.18741608, %v4658_v10  ;;  %v4749_v0 = vmul.f32 %v4748_v17, %v10149_v14 }
 0x431   : > { %v6513_v43 = vor.u32 %v6666_v60, %v6510_v34  ;;  %v4701_v62 = vadd.f32 1.1283791, %v4700_v59  ;;  %v4724_v26 = vand.u32 2147483648, %v10185_v63  ;;  %v10314_v9 = vmin.f32 %v4850_v29, 16.0  ;;  %6042 = vmatpush.bf16.msra.mxu0 %v6569_v20  ;;  %v6664_v34 = vld [vmem:[%s11590_s11 + $0x4] sm:$0xf]  ;;  %v4243_v29 = vpop.f32.mrf.mxu0 }
 0x432   : > { %5894 = vmatpush.bf16.msra.mxu1 %v6509_v33  ;;  %v5675_v51 = vpack.c.bf16 %v5645_v22, %v10203_v55  ;;  %v10317_v24 = vpop.eup %6946  ;;  %v4607_v30 = vmul.f32 %v4606_v32, %v4582_v23  ;;  %v4715_v47 = vsub.f32 1.0, %v4714_v54  ;;  %v4777_v45 = vadd.f32 0.05243302, %v4776_v21  ;;  %v11675_v55 = vld [vmem:[#allocation11_spill] sm:$0xff] }
 0x433   : > { %v4735_v3 = vadd.f32 0.0036580483, %v4734_v52  ;;  %5992 = vmatpush.bf16.msra.mxu3 %v6513_v43  ;;  %v4791_v10 = vmul.f32 %v4790_v41, %v10107_v27  ;;  %v4863_v17 = vmul.f32 3.8918573e-05, %v10314_v9  ;;  %v10322_v48 = vadd.f32 %v4192_v25, %v9528_v15  ;;  %v6502_v32 = vld [vmem:[%s11590_s11 + $0x8] sm:$0xf0] }
 0x434   : > { %5945 = vmatmul.bf16.vlgmr.msra.gmra.mxu2 %v5675_v51  ;;  %v6501_v44 = vor.u32 %v6665_v49, %v6500_v58  ;;  %v10326_v59 = vmul.f32 %v10160_v57, %v10134_v18  ;;  %v10330_v22 = vmul.f32 %v10173_v42, %v11675_v55  ;;  %v4660_v16 = vmul.f32 %v4659_v8, %v10040_v46 }
 0x435   : > { %v4750_v60 = vadd.f32 0.4994258, %v4749_v0  ;;  %6043 = vmatmul.bf16.vlgmr.msra.gmra.mxu0 %v5675_v51  ;;  %v10340_v54 = vmul.f32 %v4701_v62, %v9949_v50  ;;  %v4722_v18 = vand.u32 2147483647, %v10185_v63  ;;  %v10343_v57 = vor.u32 1.1754944e-38, %v4724_v26  ;;  %v4194_v26 = vpop.f32.mrf.mxu3 }
 0x436   : > { %v4674_v46 = vmul.f32 %v10317_v24, %v10227_v4  ;;  %5895 = vmatpush.bf16.msra.mxu1 %v6501_v44  ;;  %v6472_v42 = vclamps-f32 %v4607_v30, 1.0  ;;  %vm4718_vm0 = vweird.f32 %v10185_v63  ;;  %v4778_v21 = vmul.f32 %v4777_v45, %v10107_v27 }
 0x437   : > { %v4864_v52 = vadd.f32 0.001143296, %v4863_v17  ;;  %v10350_v41 = vmul.f32 0.70710677, %v10322_v48  ;;  %v4716_v50 = vmul.f32 %v10256_v7, %v4715_v47  ;;  %v10353_v20 = vadd.f32 1.0, %v4791_v10 }
 0x438   : > { %v4736_v33 = vmul.f32 %v4735_v3, %v10149_v14  ;;  %v6505_v25 = vor.u32 %v6664_v34, %v6502_v32  ;;  %v4661_v36 = vadd.f32 1.1283791, %v4660_v16  ;;  %v4751_v23 = vmul.f32 %v4750_v60, %v10149_v14 }
 0x439   : > { %v4865_v8 = vmul.f32 %v4864_v52, %v10314_v9  ;;  %v4810_v0 = vmul.f32 %v10350_v41, %v10350_v41  ;;  %v4675_v43 = vsub.f32 1.0, %v4674_v46  ;;  %v4852_v58 = vmul.f32 2.1237322e-06, %v10314_v9 }
 0x43a   : > { %5993 = vmatpush.bf16.msra.mxu3 %v6505_v25  ;;  %v10362_v49 = vadd.f32 %v4243_v29, %v9515_v31  ;;  %v5674_v62 = vpack.c.bf16 %v10285_v12, %v10243_v56  ;;  %v5616_v51 = vadd.f32 1.0, %v6472_v42  ;;  %v4779_v30 = vadd.f32 0.18741608, %v4778_v21 }
 0x43b   : > { %v4866_v47 = vadd.f32 0.014752088, %v4865_v8  ;;  %v10366_v45 = vmin.f32 %v4810_v0, 16.0  ;;  %v4717_v3 = vadd.f32 %v10256_v7, %v4716_v50  ;;  %vm4719_vm1 = vweird.f32 %v10256_v7 }
 0x43c   : > { %vm10370_vm2 = vcmp.eq.f32.partialorder %v4722_v18, 8.507059e+37  ;;  %6948 = vrcp.f32 %v10353_v20  ;;  %v4737_v17 = vadd.f32 0.05243302, %v4736_v33  ;;  %5896 = vmatmul.bf16.vlgmr.msra.gmra.mxu1 %v5674_v62  ;;  %v10375_v44 = vadd.f32 1.0, %v4751_v23  ;;  %vm10398_vm3 = vmor %vm4718_vm0, %vm4719_vm1 }
 0x43d   : > { %v4867_v56 = vmul.f32 %v4866_v47, %v10314_v9  ;;  %v4823_v12 = vmul.f32 3.8918573e-05, %v10366_v45  ;;  %5994 = vmatmul.bf16.vlgmr.msra.gmra.mxu3 %v5674_v62  ;;  %v10380_v55 = vadd.f32 %v4194_v26, %v9528_v15  ;;  %v10383_v16 = vmul.f32 %v4661_v36, %v10022_v61 }
 0x43e   : > { %v4676_v60 = vmul.f32 %v10317_v24, %v4675_v43  ;;  %v4853_v34 = vadd.f32 0.00028619796, %v4852_v58  ;;  %v10387_v32 = vmul.f32 0.70710677, %v10362_v49  ;;  %v10390_v18 = vmul.f32 %v5616_v51, %v10155_v40 }
 0x43f   : > { %v4682_v46 = vand.u32 2147483647, %v10227_v4  ;;  %v4780_v42 = vmul.f32 %v4779_v30, %v10107_v27  ;;  %v4868_v21 = vadd.f32 0.112945676, %v4867_v56  ;;  %vm4679_vm4 = vweird.f32 %v10317_v24 }
 0x440   : > { %v4738_v52 = vmul.f32 %v4737_v17, %v10149_v14  ;;  %v4824_v29 = vadd.f32 0.001143296, %v4823_v12  ;;  %v4930_v40 = vmul.f32 %v10387_v32, %v10387_v32  ;;  %v4721_v27 = vsel %vm10398_vm3, %v10256_v7, %v4717_v3 }
 0x441   : > { %6950 = vrcp.f32 %v10375_v44  ;;  %v4869_v63 = vmul.f32 %v4868_v21, %v10314_v9  ;;  %v10412_v50 = vmul.f32 0.70710677, %v10380_v55  ;;  %v4677_v25 = vadd.f32 %v10317_v24, %v4676_v60 }
 0x442   : > { %v10414_v33 = vpop.eup %6948  ;;  %v4854_v36 = vmul.f32 %v4853_v34, %v10314_v9  ;;  %v4825_v23 = vmul.f32 %v4824_v29, %v10366_v45  ;;  %v10419_v8 = vmin.f32 %v4930_v40, 16.0  ;;  %vm10421_vm5 = vcmp.eq.f32.partialorder %v4682_v46, 8.507059e+37 }
 0x443   : > { %v4684_v7 = vand.u32 2147483648, %v10227_v4  ;;  %v4870_v43 = vadd.f32 0.4994258, %v4869_v63  ;;  %v4812_v58 = vmul.f32 2.1237322e-06, %v10366_v45  ;;  %vm4678_vm6 = vweird.f32 %v10227_v4 }
 0x444   : > { %v4781_v62 = vadd.f32 1.1283791, %v4780_v42  ;;  %v4739_v26 = vadd.f32 0.18741608, %v4738_v52  ;;  %v4826_v51 = vadd.f32 0.014752088, %v4825_v23  ;;  %v4726_v30 = vsel %vm10370_vm2, %v10343_v57, %v4721_v27  ;;  %vm10433_vm7 = vmor %vm4678_vm6, %vm4679_vm4 }
 0x445   : > { %v4871_v3 = vmul.f32 %v4870_v43, %v10314_v9  ;;  %v4943_v17 = vmul.f32 3.8918573e-05, %v10419_v8  ;;  %v4890_v4 = vmul.f32 %v10412_v50, %v10412_v50  ;;  %v4681_v56 = vsel %vm10433_vm7, %v10317_v24, %v4677_v25 }
 0x446   : > { %v4794_v57 = vmul.f32 %v10414_v33, %v10353_v20  ;;  %v4855_v10 = vadd.f32 0.0036580483, %v4854_v36  ;;  %v4827_v12 = vmul.f32 %v4826_v51, %v10366_v45  ;;  %v4685_v34 = vor.u32 1.1754944e-38, %v4684_v7  ;;  %v4246_v36 = vpop.f32.mrf.mxu0 }
 0x447   : > { %v10447_v60 = vpop.eup %6950  ;;  %v10449_v46 = vadd.f32 1.0, %v4871_v3  ;;  %v4813_v42 = vadd.f32 0.00028619796, %v4812_v58  ;;  %v4944_v21 = vadd.f32 0.001143296, %v4943_v17  ;;  %v4727_v61 = vmul.f32 %v4726_v30, %v10340_v54 }
 0x448   : > { %v10453_v52 = vmul.f32 %v4781_v62, %v10086_v5  ;;  %v4740_v24 = vmul.f32 %v4739_v26, %v10149_v14  ;;  %v4828_v29 = vadd.f32 0.112945676, %v4827_v12  ;;  %v4686_v40 = vsel %vm10421_vm5, %v4685_v34, %v4681_v56 }
 0x449   : > { %v4802_v27 = vand.u32 2147483647, %v10353_v20  ;;  %v10460_v63 = vmul.f32 0.5, %v10236_v28  ;;  %v10462_v25 = vmin.f32 %v4890_v4, 16.0  ;;  %v4795_v23 = vsub.f32 1.0, %v4794_v57 }
 0x44a   : > { %v4754_v54 = vmul.f32 %v10447_v60, %v10375_v44  ;;  %v4856_v5 = vmul.f32 %v4855_v10, %v10314_v9  ;;  %v4829_v14 = vmul.f32 %v4828_v29, %v10366_v45  ;;  %v4804_v7 = vand.u32 2147483648, %v10353_v20 }
 0x44b   : > { %6952 = vrcp.f32 %v10449_v46  ;;  %v4814_v0 = vmul.f32 %v4813_v42, %v10366_v45  ;;  %v4945_v28 = vmul.f32 %v4944_v21, %v10419_v8  ;;  %v6475_v43 = vclamps-f32 %v4727_v61, 1.0 }
 0x44c   : > { %v4741_v58 = vadd.f32 1.1283791, %v4740_v24  ;;  %v4830_v62 = vadd.f32 0.4994258, %v4829_v14  ;;  %v10473_v26 = vadd.f32 %v4246_v36, %v9515_v31  ;;  %v4687_v51 = vmul.f32 %v4686_v40, %v10383_v16 }
 0x44d   : > { %vm4798_vm8 = vweird.f32 %v10353_v20  ;;  %v4946_v30 = vadd.f32 0.014752088, %v4945_v28  ;;  %v4903_v47 = vmul.f32 3.8918573e-05, %v10462_v25  ;;  %v4796_v3 = vmul.f32 %v10414_v33, %v4795_v23 }
 0x44e   : > { %v4755_v17 = vsub.f32 1.0, %v4754_v54  ;;  %v4857_v4 = vadd.f32 0.05243302, %v4856_v5  ;;  %v4831_v56 = vmul.f32 %v4830_v62, %v10366_v45  ;;  %v4815_v57 = vadd.f32 0.0036580483, %v4814_v0 }
 0x44f   : > { %v4932_v10 = vmul.f32 2.1237322e-06, %v10419_v8  ;;  %v4947_v12 = vmul.f32 %v4946_v30, %v10419_v8  ;;  %v4904_v34 = vadd.f32 0.001143296, %v4903_v47  ;;  %v5619_v42 = vadd.f32 1.0, %v6475_v43 }
 0x450   : > { %vm10482_vm9 = vcmp.eq.f32.partialorder %v4802_v27, 8.507059e+37  ;;  %v4805_v21 = vor.u32 1.1754944e-38, %v4804_v7  ;;  %v10487_v61 = vmul.f32 %v4741_v58, %v10114_v38  ;;  %v10490_v24 = vmul.f32 0.70710677, %v10473_v26 }
 0x451   : > { %v10492_v29 = vpop.eup %6952  ;;  %v6474_v40 = vclamps-f32 %v4687_v51, 1.0  ;;  %v10494_v36 = vadd.f32 1.0, %v4831_v56  ;;  %v4948_v23 = vadd.f32 0.112945676, %v4947_v12  ;;  %v4905_v54 = vmul.f32 %v4904_v34, %v10462_v25 }
 0x452   : > { %v4797_v27 = vadd.f32 %v10414_v33, %v4796_v3  ;;  %vm4799_vm10 = vweird.f32 %v10414_v33  ;;  %v4756_v5 = vmul.f32 %v10447_v60, %v4755_v17  ;;  %v4858_v38 = vmul.f32 %v4857_v4, %v10314_v9 }
 0x453   : > { %v4816_v14 = vmul.f32 %v4815_v57, %v10366_v45  ;;  %v4933_v7 = vadd.f32 0.00028619796, %v4932_v10  ;;  %v4949_v0 = vmul.f32 %v4948_v23, %v10419_v8  ;;  %v4892_v28 = vmul.f32 2.1237322e-06, %v10462_v25  ;;  %vm10512_vm11 = vmor %vm4798_vm8, %vm4799_vm10 }
 0x454   : > { %v4762_v43 = vand.u32 2147483647, %v10375_v44  ;;  %v4764_v58 = vand.u32 2147483648, %v10375_v44  ;;  %v4874_v62 = vmul.f32 %v10492_v29, %v10449_v46  ;;  %v5010_v51 = vmul.f32 %v10490_v24, %v10490_v24 }
 0x455   : > { %v5618_v30 = vadd.f32 1.0, %v6474_v40  ;;  %6954 = vrcp.f32 %v10494_v36  ;;  %v4950_v3 = vadd.f32 0.4994258, %v4949_v0  ;;  %v4906_v17 = vadd.f32 0.014752088, %v4905_v54 }
 0x456   : > { %v4801_v4 = vsel %vm10512_vm11, %v10414_v33, %v4797_v27  ;;  %v4757_v56 = vadd.f32 %v10447_v60, %v4756_v5  ;;  %vm4759_vm12 = vweird.f32 %v10447_v60  ;;  %v4859_v57 = vadd.f32 0.18741608, %v4858_v38 }
 0x457   : > { %v4817_v10 = vadd.f32 0.05243302, %v4816_v14  ;;  %v4934_v20 = vmul.f32 %v4933_v7, %v10419_v8  ;;  %v4893_v12 = vadd.f32 0.00028619796, %v4892_v28  ;;  %v10523_v34 = vmin.f32 %v5010_v51, 16.0 }
 0x458   : > { %v10526_v40 = vmul.f32 %v5619_v42, %v10163_v2  ;;  %vm4758_vm13 = vweird.f32 %v10375_v44  ;;  %v4875_v23 = vsub.f32 1.0, %v4874_v62  ;;  %v10530_v54 = vmul.f32 0.5, %v10322_v48 }
 0x459   : > { %v4806_v33 = vsel %vm10482_vm9, %v4805_v21, %v4801_v4  ;;  %vm10534_vm14 = vmor %vm4758_vm13, %vm4759_vm12  ;;  %vm10538_vm15 = vcmp.eq.f32.partialorder %v4762_v43, 8.507059e+37  ;;  %v4951_v2 = vmul.f32 %v4950_v3, %v10419_v8  ;;  %v4907_v42 = vmul.f32 %v4906_v17, %v10462_v25 }
 0x45a   : > { %v10545_v44 = vmul.f32 %v5618_v30, %v10180_v35  ;;  %v4761_v48 = vsel %vm10534_vm14, %v10447_v60, %v4757_v56  ;;  %v4765_v16 = vor.u32 1.1754944e-38, %v4764_v58  ;;  %v4860_v21 = vmul.f32 %v4859_v57, %v10314_v9 }
 0x45b   : > { %v10551_v38 = vpop.eup %6954  ;;  %v4818_v14 = vmul.f32 %v4817_v10, %v10366_v45  ;;  %v4935_v7 = vadd.f32 0.0036580483, %v4934_v20  ;;  %v4894_v0 = vmul.f32 %v4893_v12, %v10462_v25  ;;  %v5023_v28 = vmul.f32 3.8918573e-05, %v10523_v34 }
 0x45c   : > { %v10557_v43 = vmul.f32 %v4806_v33, %v10453_v52  ;;  %v4876_v35 = vmul.f32 %v10492_v29, %v4875_v23  ;;  %v10561_v62 = vmul.f32 0.5, %v10362_v49  ;;  %v4543_v60 = vmul.f32 3.8918573e-05, %v9715_v13 }
 0x45d   : > { %v4766_v9 = vsel %vm10538_vm15, %v4765_v16, %v4761_v48  ;;  %v10566_v58 = vadd.f32 1.0, %v4951_v2  ;;  %v4908_v51 = vadd.f32 0.112945676, %v4907_v42  ;;  %v5012_v30 = vmul.f32 2.1237322e-06, %v10523_v34 }
 0x45e   : > { %v4861_v47 = vadd.f32 1.1283791, %v4860_v21  ;;  %v4834_v52 = vmul.f32 %v10551_v38, %v10494_v36  ;;  %v5024_v3 = vadd.f32 0.001143296, %v5023_v28  ;;  %v4623_v17 = vmul.f32 3.8918573e-05, %v9872_v1 }
 0x45f   : > { %vm4878_vm0 = vweird.f32 %v10449_v46  ;;  %v4819_v49 = vadd.f32 0.18741608, %v4818_v14  ;;  %v4936_v4 = vmul.f32 %v4935_v7, %v10419_v8  ;;  %v4895_v56 = vadd.f32 0.0036580483, %v4894_v0 }
 0x460   : > { %v4877_v57 = vadd.f32 %v10492_v29, %v4876_v35  ;;  %vm4879_vm1 = vweird.f32 %v10492_v29  ;;  %v5025_v10 = vmul.f32 %v5024_v3, %v10523_v34  ;;  %v4544_v20 = vadd.f32 0.001143296, %v4543_v60 }
 0x461   : > { %v4884_v12 = vand.u32 2147483648, %v10449_v46  ;;  %6956 = vrcp.f32 %v10566_v58  ;;  %v4909_v23 = vmul.f32 %v4908_v51, %v10462_v25  ;;  %v5013_v33 = vadd.f32 0.00028619796, %v5012_v30  ;;  %vm10584_vm2 = vmor %vm4878_vm0, %vm4879_vm1 }
 0x462   : > { %v4835_v27 = vsub.f32 1.0, %v4834_v52  ;;  %v5026_v5 = vadd.f32 0.014752088, %v5025_v10  ;;  %v4545_v2 = vmul.f32 %v4544_v20, %v9715_v13  ;;  %v4624_v42 = vadd.f32 0.001143296, %v4623_v17 }
 0x463   : > { %v6477_v48 = vclamps-f32 %v10557_v43, 1.0  ;;  %v4882_v21 = vand.u32 2147483647, %v10449_v46  ;;  %v10590_v14 = vmul.f32 0.5, %v10380_v55  ;;  %v4896_v7 = vmul.f32 %v4895_v56, %v10462_v25 }
 0x464   : > { %v10594_v0 = vmul.f32 %v4766_v9, %v10487_v61  ;;  %v4881_v28 = vsel %vm10584_vm2, %v10492_v29, %v4877_v57  ;;  %v4820_v35 = vmul.f32 %v4819_v49, %v10366_v45  ;;  %v4937_v60 = vadd.f32 0.05243302, %v4936_v4 }
 0x465   : > { %v4910_v51 = vadd.f32 0.4994258, %v4909_v23  ;;  %v5014_v30 = vmul.f32 %v5013_v33, %v10523_v34  ;;  %v5027_v46 = vmul.f32 %v5026_v5, %v10523_v34  ;;  %v4546_v52 = vadd.f32 0.014752088, %v4545_v2 }
 0x466   : > { %v4862_v55 = vmul.f32 %v4861_v47, %v10289_v39  ;;  %v4885_v3 = vor.u32 1.1754944e-38, %v4884_v12  ;;  %v4836_v17 = vmul.f32 %v10551_v38, %v4835_v27  ;;  %v4625_v61 = vmul.f32 %v4624_v42, %v9872_v1 }
 0x467   : > { %v10605_v9 = vpop.eup %6956  ;;  %vm4883_vm3 = vcmp.eq.f32.partialorder %v4882_v21, 8.507059e+37  ;;  %v4897_v29 = vadd.f32 0.05243302, %v4896_v7  ;;  %v5028_v56 = vadd.f32 0.112945676, %v5027_v46  ;;  %v4547_v45 = vmul.f32 %v4546_v52, %v9715_v13 }
 0x468   : > { %v4886_v49 = vsel %vm4883_vm3, %v4885_v3, %v4881_v28  ;;  %v4821_v4 = vadd.f32 1.1283791, %v4820_v35  ;;  %v4938_v57 = vmul.f32 %v4937_v60, %v10419_v8  ;;  %v4626_v10 = vadd.f32 0.014752088, %v4625_v61 }
 0x469   : > { %v4911_v20 = vmul.f32 %v4910_v51, %v10462_v25  ;;  %v5015_v39 = vadd.f32 0.0036580483, %v5014_v30  ;;  %v5029_v47 = vmul.f32 %v5028_v56, %v10523_v34  ;;  %v4548_v12 = vadd.f32 0.112945676, %v4547_v45 }
 0x46a   : > { %v4837_v23 = vadd.f32 %v10551_v38, %v4836_v17  ;;  %vm4839_vm4 = vweird.f32 %v10551_v38  ;;  %v4954_v33 = vmul.f32 %v10605_v9, %v10566_v58  ;;  %v4627_v27 = vmul.f32 %v4626_v10, %v9872_v1 }
 0x46b   : > { %v4844_v5 = vand.u32 2147483648, %v10494_v36  ;;  %v4898_v2 = vmul.f32 %v4897_v29, %v10462_v25  ;;  %v5030_v42 = vadd.f32 0.4994258, %v5029_v47  ;;  %v4549_v16 = vmul.f32 %v4548_v12, %v9715_v13 }
 0x46c   : > { %vm4838_vm5 = vweird.f32 %v10494_v36  ;;  %v4842_v21 = vand.u32 2147483647, %v10494_v36  ;;  %v4939_v7 = vadd.f32 0.18741608, %v4938_v57  ;;  %v4628_v28 = vadd.f32 0.112945676, %v4627_v27 }
 0x46d   : > { %v4887_v35 = vmul.f32 %v4886_v49, %v4862_v55  ;;  %vm10621_vm6 = vmor %vm4838_vm5, %vm4839_vm4  ;;  %v10625_v51 = vadd.f32 1.0, %v4911_v20  ;;  %v5016_v30 = vmul.f32 %v5015_v39, %v10523_v34  ;;  %v4550_v46 = vadd.f32 0.4994258, %v4549_v16 }
 0x46e   : > { %v4841_v52 = vsel %vm10621_vm6, %v10551_v38, %v4837_v23  ;;  %v4955_v3 = vsub.f32 1.0, %v4954_v33  ;;  %v5031_v17 = vmul.f32 %v5030_v42, %v10523_v34  ;;  %v4629_v36 = vmul.f32 %v4628_v28, %v9872_v1 }
 0x46f   : > { %v6476_v55 = vclamps-f32 %v10594_v0, 1.0  ;;  %v4845_v61 = vor.u32 1.1754944e-38, %v4844_v5  ;;  %v4899_v29 = vadd.f32 0.18741608, %v4898_v2  ;;  %v4551_v56 = vmul.f32 %v4550_v46, %v9715_v13  ;;  %v4197_v13 = vpop.f32.mrf.mxu3 }
 0x470   : > { %v4822_v45 = vmul.f32 %v4821_v4, %v10350_v41  ;;  %vm4843_vm7 = vcmp.eq.f32.partialorder %v4842_v21, 8.507059e+37  ;;  %v4940_v49 = vmul.f32 %v4939_v7, %v10419_v8  ;;  %v4630_v57 = vadd.f32 0.4994258, %v4629_v36 }
 0x471   : > { %v6479_v10 = vclamps-f32 %v4887_v35, 1.0  ;;  %v4846_v20 = vsel %vm4843_vm7, %v4845_v61, %v4841_v52  ;;  %6958 = vrcp.f32 %v10625_v51  ;;  %v5017_v38 = vadd.f32 0.05243302, %v5016_v30 }
 0x472   : > { %v4956_v39 = vmul.f32 %v10605_v9, %v4955_v3  ;;  %v10639_v47 = vadd.f32 1.0, %v5031_v17  ;;  %v10641_v0 = vadd.f32 1.0, %v4551_v56  ;;  %v4631_v12 = vmul.f32 %v4630_v57, %v9872_v1 }
 0x473   : > { %v5621_v41 = vadd.f32 1.0, %v6477_v48  ;;  %v5620_v4 = vadd.f32 1.0, %v6476_v55  ;;  %v4900_v8 = vmul.f32 %v4899_v29, %v10462_v25  ;;  %v10648_v23 = vadd.f32 %v4197_v13, %v9528_v15 }
 0x474   : > { %v4847_v33 = vmul.f32 %v4846_v20, %v4822_v45  ;;  %v4941_v27 = vadd.f32 1.1283791, %v4940_v49  ;;  %v4962_v5 = vand.u32 2147483647, %v10566_v58  ;;  %6960 = vrcp.f32 %v10641_v0 }
 0x475   : > { %v5623_v2 = vadd.f32 1.0, %v6479_v10  ;;  %v4964_v42 = vand.u32 2147483648, %v10566_v58  ;;  %v5018_v1 = vmul.f32 %v5017_v38, %v10523_v34  ;;  %v10654_v16 = vadd.f32 1.0, %v4631_v12 }
 0x476   : > { %v4957_v43 = vadd.f32 %v10605_v9, %v4956_v39  ;;  %vm4959_vm8 = vweird.f32 %v10605_v9  ;;  %6962 = vrcp.f32 %v10639_v47  ;;  %v10660_v25 = vmul.f32 0.70710677, %v10648_v23 }
 0x477   : > { %v10662_v48 = vpop.eup %6958  ;;  %v10665_v21 = vmul.f32 %v5621_v41, %v10188_v37  ;;  %v10668_v7 = vmul.f32 %v5620_v4, %v10263_v6  ;;  %v4901_v28 = vadd.f32 1.1283791, %v4900_v8  ;;  %6964 = vrcp.f32 %v10654_v16  ;;  %v4248_v8 = vpop.f32.mrf.mxu0 }
 0x478   : > { %v6478_v35 = vclamps-f32 %v4847_v33, 1.0  ;;  %vm4958_vm9 = vweird.f32 %v10566_v58  ;;  %v4924_v60 = vand.u32 2147483648, %v10625_v51  ;;  %v10674_v30 = vmul.f32 0.5, %v10473_v26 }
 0x479   : > { %v10677_v46 = vmul.f32 %v4941_v27, %v10387_v32  ;;  %vm10679_vm10 = vmor %vm4958_vm9, %vm4959_vm8  ;;  %vm10683_vm11 = vcmp.eq.f32.partialorder %v4962_v5, 8.507059e+37  ;;  %v5019_v52 = vadd.f32 0.18741608, %v5018_v1  ;;  %v4970_v58 = vmul.f32 %v10660_v25, %v10660_v25 }
 0x47a   : > { %v6961_v3 = vpop.eup %6960  ;;  %v10690_v17 = vmul.f32 %v5623_v2, %v10460_v63  ;;  %v4961_v32 = vsel %vm10679_vm10, %v10605_v9, %v4957_v43  ;;  %v4965_v26 = vor.u32 1.1754944e-38, %v4964_v42  ;;  %v4914_v36 = vmul.f32 %v10662_v48, %v10625_v51 }
 0x47b   : > { %v10698_v55 = vmul.f32 %v4901_v28, %v10412_v50  ;;  %v4922_v61 = vand.u32 2147483647, %v10625_v51  ;;  %v4554_v29 = vmul.f32 %v6961_v3, %v10641_v0  ;;  %v10702_v56 = vmin.f32 %v4970_v58, 16.0 }
 0x47c   : > { %v10704_v45 = vpop.eup %6962  ;;  %v10706_v63 = vadd.f32 1.0, %v6478_v35  ;;  %v10708_v49 = vor.u32 1.1754944e-38, %v4924_v60  ;;  %v4564_v9 = vand.u32 2147483648, %v10641_v0  ;;  %v5676_v57 = vpack.c.bf16 %v10390_v18, %v10326_v59 }
 0x47d   : > { %v6965_v10 = vpop.eup %6964  ;;  %v4966_v50 = vsel %vm10683_vm11, %v4965_v26, %v4961_v32  ;;  %v10716_v20 = vmul.f32 %v5019_v52, %v10523_v34  ;;  %v4555_v38 = vsub.f32 1.0, %v4554_v29  ;;  %v4983_v39 = vmul.f32 3.8918573e-05, %v10702_v56  ;;  %v4199_v26 = vpop.f32.mrf.mxu3 }
 0x47e   : > { %v4915_v12 = vsub.f32 1.0, %v4914_v36  ;;  %v4562_v13 = vand.u32 2147483647, %v10641_v0  ;;  %v4634_v41 = vmul.f32 %v6965_v10, %v10654_v16  ;;  %v4972_v4 = vmul.f32 2.1237322e-06, %v10702_v56  ;;  %5901 = vmatmul.bf16.gmra.mxu1 %v5676_v57  ;;  %5999 = vmatmul.bf16.gmra.mxu3 %v5676_v57 }
 0x47f   : > { %v4556_v59 = vmul.f32 %v6961_v3, %v4555_v38  ;;  %vm4559_vm12 = vweird.f32 %v6961_v3  ;;  %v4984_v18 = vadd.f32 0.001143296, %v4983_v39  ;;  %v10723_v33 = vadd.f32 %v4248_v8, %v9515_v31 }
 0x480   : > { %vm4919_vm13 = vweird.f32 %v10662_v48  ;;  %v5034_v34 = vmul.f32 %v10704_v45, %v10639_v47  ;;  %vm4558_vm14 = vweird.f32 %v10641_v0  ;;  %v4565_v27 = vor.u32 1.1754944e-38, %v4564_v9 }
 0x481   : > { %v4635_v5 = vsub.f32 1.0, %v4634_v41  ;;  %v4557_v2 = vadd.f32 %v6961_v3, %v4556_v59  ;;  %v4642_v42 = vand.u32 2147483647, %v10654_v16  ;;  %v4644_v1 = vand.u32 2147483648, %v10654_v16  ;;  %vm4560_vm0 = vmor %vm4558_vm14, %vm4559_vm12 }
 0x482   : > { %v4985_v43 = vmul.f32 %v4984_v18, %v10702_v56  ;;  %vm4918_vm15 = vweird.f32 %v10625_v51  ;;  %vm4639_vm1 = vweird.f32 %v6965_v10  ;;  %v4973_v35 = vadd.f32 0.00028619796, %v4972_v4 }
 0x483   : > { %v4636_v28 = vmul.f32 %v6965_v10, %v4635_v5  ;;  %v10734_v60 = vmul.f32 0.70710677, %v10723_v33  ;;  %v4916_v0 = vmul.f32 %v10662_v48, %v4915_v12  ;;  %v4561_v37 = vsel %vm4560_vm0, %v6961_v3, %v4557_v2  ;;  %vm10764_vm7 = vmor %vm4918_vm15, %vm4919_vm13 }
 0x484   : > { %vm4563_vm2 = vcmp.eq.f32.partialorder %v4562_v13, 8.507059e+37  ;;  %v4986_v6 = vadd.f32 0.014752088, %v4985_v43  ;;  %vm4638_vm3 = vweird.f32 %v10654_v16  ;;  %v5035_v36 = vsub.f32 1.0, %v5034_v34 }
 0x485   : > { %v4566_v52 = vsel %vm4563_vm2, %v4565_v27, %v4561_v37  ;;  %v4637_v58 = vadd.f32 %v6965_v10, %v4636_v28  ;;  %v5090_v32 = vmul.f32 %v10734_v60, %v10734_v60  ;;  %vm4640_vm4 = vmor %vm4638_vm3, %vm4639_vm1  ;;  %v4645_v9 = vor.u32 1.1754944e-38, %v4644_v1 }
 0x486   : > { %v4567_v29 = vmul.f32 %v4566_v52, %v10273_v11  ;;  %v4987_v57 = vmul.f32 %v4986_v6, %v10702_v56  ;;  %vm10742_vm5 = vcmp.eq.f32.partialorder %v4922_v61, 8.507059e+37  ;;  %vm4643_vm6 = vcmp.eq.f32.partialorder %v4642_v42, 8.507059e+37 }
 0x487   : > { %v4641_v3 = vsel %vm4640_vm4, %v6965_v10, %v4637_v58  ;;  %v4974_v39 = vmul.f32 %v4973_v35, %v10702_v56  ;;  %v10747_v16 = vmin.f32 %v5090_v32, 16.0  ;;  %v10750_v4 = vadd.f32 %v4199_v26, %v9528_v15 }
 0x488   : > { %v6471_v12 = vclamps-f32 %v4567_v29, 1.0  ;;  %v4646_v13 = vsel %vm4643_vm6, %v4645_v9, %v4641_v3  ;;  %v4988_v41 = vadd.f32 0.112945676, %v4987_v57  ;;  %v4917_v11 = vadd.f32 %v10662_v48, %v4916_v0 }
 0x489   : > { %v4647_v8 = vmul.f32 %v4646_v13, %v10330_v22  ;;  %v5092_v61 = vmul.f32 2.1237322e-06, %v10747_v16  ;;  %v5103_v59 = vmul.f32 3.8918573e-05, %v10747_v16  ;;  %v4967_v10 = vmul.f32 %v4966_v50, %v10677_v46 }
 0x48a   : > { %v5036_v18 = vmul.f32 %v10704_v45, %v5035_v36  ;;  %v5042_v34 = vand.u32 2147483647, %v10639_v47  ;;  %v4989_v27 = vmul.f32 %v4988_v41, %v10702_v56  ;;  %v5615_v2 = vadd.f32 1.0, %v6471_v12  ;;  %v4251_v36 = vpop.f32.mrf.mxu0 }
 0x48b   : > { %v6473_v5 = vclamps-f32 %v4647_v8, 1.0  ;;  %v4975_v42 = vadd.f32 0.0036580483, %v4974_v39  ;;  %v5104_v1 = vadd.f32 0.001143296, %v5103_v59  ;;  %vm5038_vm8 = vweird.f32 %v10639_v47 }
 0x48c   : > { %v4990_v46 = vadd.f32 0.4994258, %v4989_v27  ;;  %v5093_v50 = vadd.f32 0.00028619796, %v5092_v61  ;;  %v10770_v43 = vmul.f32 0.70710677, %v10750_v4  ;;  %v4921_v28 = vsel %vm10764_vm7, %v10662_v48, %v4917_v11 }
 0x48d   : > { %v5044_v35 = vand.u32 2147483648, %v10639_v47  ;;  %v5617_v0 = vadd.f32 1.0, %v6473_v5  ;;  %v5105_v51 = vmul.f32 %v5104_v1, %v10747_v16  ;;  %v5037_v37 = vadd.f32 %v10704_v45, %v5036_v18 }
 0x48e   : > { %vm5039_vm9 = vweird.f32 %v10704_v45  ;;  %v4991_v6 = vmul.f32 %v4990_v46, %v10702_v56  ;;  %v5050_v52 = vmul.f32 %v10770_v43, %v10770_v43  ;;  %v5647_v58 = vmul.f32 %v5615_v2, %v10131_v53 }
 0x48f   : > { %v5649_v32 = vmul.f32 %v5617_v0, %v10152_v19  ;;  %v4976_v48 = vmul.f32 %v4975_v42, %v10702_v56  ;;  %v5106_v26 = vadd.f32 0.014752088, %v5105_v51  ;;  %v4926_v29 = vsel %vm10742_vm5, %v10708_v49, %v4921_v28  ;;  %vm10795_vm10 = vmor %vm5038_vm8, %vm5039_vm9 }
 0x490   : > { %v10788_v9 = vadd.f32 1.0, %v4991_v6  ;;  %v5094_v57 = vmul.f32 %v5093_v50, %v10747_v16  ;;  %v10791_v3 = vmin.f32 %v5050_v52, 16.0  ;;  %v10801_v12 = vadd.f32 %v4251_v36, %v9515_v31 }
 0x491   : > { %v5677_v19 = vpack.c.bf16 %v5649_v32, %v5647_v58  ;;  %v5107_v39 = vmul.f32 %v5106_v26, %v10747_v16  ;;  %v5678_v49 = vpack.c.bf16 %v10668_v7, %v10545_v44  ;;  %v10807_v38 = vmul.f32 %v10706_v63, %v10530_v54 }
 0x492   : > { %v5021_v13 = vadd.f32 1.1283791, %v10716_v20  ;;  %v5041_v47 = vsel %vm10795_vm10, %v10704_v45, %v5037_v37  ;;  %6966 = vrcp.f32 %v10788_v9  ;;  %v6481_v41 = vclamps-f32 %v4967_v10, 1.0  ;;  %v4202_v10 = vpop.f32.mrf.mxu3 }
 0x493   : > { %v5045_v11 = vor.u32 1.1754944e-38, %v5044_v35  ;;  %5950 = vmatmul.bf16.gmra.mxu2 %v5677_v19  ;;  %6048 = vmatmul.bf16.gmra.mxu0 %v5677_v19  ;;  %v4977_v8 = vadd.f32 0.05243302, %v4976_v48  ;;  %v5108_v61 = vadd.f32 0.112945676, %v5107_v39  ;;  %v4927_v44 = vmul.f32 %v4926_v29, %v10698_v55 }
 0x494   : > { %vm5043_vm11 = vcmp.eq.f32.partialorder %v5042_v34, 8.507059e+37  ;;  %v5052_v54 = vmul.f32 2.1237322e-06, %v10791_v3  ;;  %v5063_v7 = vmul.f32 3.8918573e-05, %v10791_v3  ;;  %5906 = vmatmul.bf16.gmra.mxu1 %v5678_v49  ;;  %6004 = vmatmul.bf16.gmra.mxu3 %v5678_v49  ;;  %v5022_v18 = vmul.f32 %v5021_v13, %v10490_v24 }
 0x495   : > { %v5046_v63 = vsel %vm5043_vm11, %v5045_v11, %v5041_v47  ;;  %v5095_v20 = vadd.f32 0.0036580483, %v5094_v57  ;;  %v5109_v45 = vmul.f32 %v5108_v61, %v10747_v16  ;;  %v10819_v59 = vmul.f32 0.70710677, %v10801_v12 }
 0x496   : > { %v5053_v27 = vadd.f32 0.00028619796, %v5052_v54  ;;  %v5064_v5 = vadd.f32 0.001143296, %v5063_v7  ;;  %v10823_v55 = vadd.f32 %v4202_v10, %v9528_v15  ;;  %v5625_v34 = vadd.f32 1.0, %v6481_v41 }
 0x497   : > { %v4978_v2 = vmul.f32 %v4977_v8, %v10702_v56  ;;  %v5110_v42 = vadd.f32 0.4994258, %v5109_v45  ;;  %v5170_v1 = vmul.f32 %v10819_v59, %v10819_v59  ;;  %v5047_v46 = vmul.f32 %v5046_v63, %v5022_v18 }
 0x498   : > { %v10828_v22 = vpop.eup %6966  ;;  %v5054_v50 = vmul.f32 %v5053_v27, %v10791_v3  ;;  %v5065_v28 = vmul.f32 %v5064_v5, %v10791_v3  ;;  %v10833_v24 = vmul.f32 0.70710677, %v10823_v55  ;;  %v6480_v35 = vclamps-f32 %v4927_v44, 1.0 }
 0x499   : > { %v4994_v0 = vmul.f32 %v10828_v22, %v10788_v9  ;;  %v5096_v51 = vmul.f32 %v5095_v20, %v10747_v16  ;;  %v5111_v37 = vmul.f32 %v5110_v42, %v10747_v16  ;;  %v10839_v58 = vmin.f32 %v5170_v1, 16.0 }
 0x49a   : > { %v5055_v6 = vadd.f32 0.0036580483, %v5054_v50  ;;  %v5066_v52 = vadd.f32 0.014752088, %v5065_v28  ;;  %v5130_v32 = vmul.f32 %v10833_v24, %v10833_v24  ;;  %v10844_v48 = vmul.f32 %v5625_v34, %v10561_v62 }
 0x49b   : > { %v4979_v26 = vadd.f32 0.18741608, %v4978_v2  ;;  %v4995_v36 = vsub.f32 1.0, %v4994_v0  ;;  %v10846_v29 = vadd.f32 1.0, %v5111_v37  ;;  %v6483_v57 = vclamps-f32 %v5047_v46, 1.0 }
 0x49c   : > { %v5067_v53 = vmul.f32 %v5066_v52, %v10791_v3  ;;  %v5172_v19 = vmul.f32 2.1237322e-06, %v10839_v58  ;;  %v5183_v39 = vmul.f32 3.8918573e-05, %v10839_v58  ;;  %v5624_v49 = vadd.f32 1.0, %v6480_v35  ;;  %v4253_v35 = vpop.f32.mrf.mxu0 }
 0x49d   : > { %v10852_v13 = vmul.f32 0.5, %v10648_v23  ;;  %v5097_v47 = vadd.f32 0.05243302, %v5096_v51  ;;  %6968 = vrcp.f32 %v10846_v29  ;;  %v4996_v62 = vmul.f32 %v10828_v22, %v4995_v36 }
 0x49e   : > { %v5056_v41 = vmul.f32 %v5055_v6, %v10791_v3  ;;  %v5679_v11 = vpack.c.bf16 %v10665_v21, %v10526_v40  ;;  %v10859_v8 = vmin.f32 %v5130_v32, 16.0  ;;  %v4980_v61 = vmul.f32 %v4979_v26, %v10702_v56 }
 0x49f   : > { %v5068_v44 = vadd.f32 0.112945676, %v5067_v53  ;;  %v5173_v54 = vadd.f32 0.00028619796, %v5172_v19  ;;  %v5184_v7 = vadd.f32 0.001143296, %v5183_v39  ;;  %v5098_v10 = vmul.f32 %v5097_v47, %v10747_v16 }
 0x4a0   : > { %v10862_v63 = vadd.f32 1.0, %v6483_v57  ;;  %v5004_v23 = vand.u32 2147483648, %v10788_v9  ;;  %v10866_v20 = vmul.f32 0.5, %v10723_v33  ;;  %v5132_v45 = vmul.f32 2.1237322e-06, %v10859_v8 }
 0x4a1   : > { %v5069_v40 = vmul.f32 %v5068_v44, %v10791_v3  ;;  %v5174_v21 = vmul.f32 %v5173_v54, %v10839_v58  ;;  %v5185_v56 = vmul.f32 %v5184_v7, %v10839_v58  ;;  %v4997_v18 = vadd.f32 %v10828_v22, %v4996_v62 }
 0x4a2   : > { %vm4999_vm12 = vweird.f32 %v10828_v22  ;;  %v5057_v27 = vadd.f32 0.05243302, %v5056_v41  ;;  %v5133_v5 = vadd.f32 0.00028619796, %v5132_v45  ;;  %v10878_v33 = vmul.f32 %v5624_v49, %v10590_v14  ;;  %v4204_v14 = vpop.f32.mrf.mxu3 }
 0x4a3   : > { %v10875_v34 = vpop.eup %6968  ;;  %v4981_v2 = vadd.f32 1.1283791, %v4980_v61  ;;  %v5070_v42 = vadd.f32 0.4994258, %v5069_v40  ;;  %5955 = vmatmul.bf16.gmra.mxu2 %v5679_v11  ;;  %6053 = vmatmul.bf16.gmra.mxu0 %v5679_v11  ;;  %v5186_v1 = vadd.f32 0.014752088, %v5185_v56  ;;  %vm4998_vm13 = vweird.f32 %v10788_v9 }
 0x4a4   : > { %v5002_v46 = vand.u32 2147483647, %v10788_v9  ;;  %v5114_v50 = vmul.f32 %v10875_v34, %v10846_v29  ;;  %v5143_v28 = vmul.f32 3.8918573e-05, %v10859_v8  ;;  %vm10887_vm14 = vmor %vm4998_vm13, %vm4999_vm12  ;;  %v5099_v0 = vadd.f32 0.18741608, %v5098_v10 }
 0x4a5   : > { %v5071_v51 = vmul.f32 %v5070_v42, %v10791_v3  ;;  %v5175_v37 = vadd.f32 0.0036580483, %v5174_v21  ;;  %v5187_v6 = vmul.f32 %v5186_v1, %v10839_v58  ;;  %v5001_v9 = vsel %vm10887_vm14, %v10828_v22, %v4997_v18 }
 0x4a6   : > { %v5005_v52 = vor.u32 1.1754944e-38, %v5004_v23  ;;  %v5058_v32 = vmul.f32 %v5057_v27, %v10791_v3  ;;  %v5134_v26 = vmul.f32 %v5133_v5, %v10859_v8  ;;  %v5115_v36 = vsub.f32 1.0, %v5114_v50 }
 0x4a7   : > { %v10898_v57 = vadd.f32 1.0, %v5071_v51  ;;  %v5188_v53 = vadd.f32 0.112945676, %v5187_v6  ;;  %v4254_v19 = vadd.f32 %v4253_v35, %v9515_v31  ;;  %v4982_v39 = vmul.f32 %v4981_v2, %v10660_v25 }
 0x4a8   : > { %vm5003_vm15 = vcmp.eq.f32.partialorder %v5002_v46, 8.507059e+37  ;;  %v10903_v49 = vmul.f32 0.5, %v10750_v4  ;;  %v5144_v47 = vadd.f32 0.001143296, %v5143_v28  ;;  %v5100_v22 = vmul.f32 %v5099_v0, %v10747_v16 }
 0x4a9   : > { %v5006_v62 = vsel %vm5003_vm15, %v5005_v52, %v5001_v9  ;;  %6970 = vrcp.f32 %v10898_v57  ;;  %v5176_v41 = vmul.f32 %v5175_v37, %v10839_v58  ;;  %v5059_v11 = vadd.f32 0.18741608, %v5058_v32  ;;  %v4256_v9 = vpop.f32.mrf.mxu0 }
 0x4aa   : > { %v10909_v61 = vmul.f32 0.5, %v10801_v12  ;;  %v5189_v44 = vmul.f32 %v5188_v53, %v10839_v58  ;;  %v5135_v54 = vadd.f32 0.0036580483, %v5134_v26  ;;  %v5116_v25 = vmul.f32 %v10875_v34, %v5115_v36 }
 0x4ab   : > { %v10914_v4 = vmul.f32 0.5, %v10823_v55  ;;  %v5145_v7 = vmul.f32 %v5144_v47, %v10859_v8  ;;  %v10917_v23 = vmul.f32 0.70710677, %v4254_v19  ;;  %v5007_v16 = vmul.f32 %v5006_v62, %v4982_v39 }
 0x4ac   : > { %v5122_v45 = vand.u32 2147483647, %v10846_v29  ;;  %v5124_v10 = vand.u32 2147483648, %v10846_v29  ;;  %v5190_v40 = vadd.f32 0.4994258, %v5189_v44  ;;  %vm5118_vm0 = vweird.f32 %v10846_v29 }
 0x4ad   : > { %v5101_v12 = vadd.f32 1.1283791, %v5100_v22  ;;  %v5177_v21 = vadd.f32 0.05243302, %v5176_v41  ;;  %v5146_v56 = vadd.f32 0.014752088, %v5145_v7  ;;  %v5250_v18 = vmul.f32 %v10917_v23, %v10917_v23 }
 0x4ae   : > { %v5060_v55 = vmul.f32 %v5059_v11, %v10791_v3  ;;  %v5191_v27 = vmul.f32 %v5190_v40, %v10839_v58  ;;  %v5136_v5 = vmul.f32 %v5135_v54, %v10859_v8  ;;  %v5117_v42 = vadd.f32 %v10875_v34, %v5116_v25 }
 0x4af   : > { %v10927_v2 = vpop.eup %6970  ;;  %vm5119_vm1 = vweird.f32 %v10875_v34  ;;  %v5147_v1 = vmul.f32 %v5146_v56, %v10859_v8  ;;  %v10932_v46 = vmin.f32 %v5250_v18, 16.0  ;;  %v6482_v50 = vclamps-f32 %v5007_v16, 1.0 }
 0x4b0   : > { %vm10934_vm2 = vcmp.eq.f32.partialorder %v5122_v45, 8.507059e+37  ;;  %v5125_v3 = vor.u32 1.1754944e-38, %v5124_v10  ;;  %v5074_v35 = vmul.f32 %v10927_v2, %v10898_v57  ;;  %v5178_v0 = vmul.f32 %v5177_v21, %v10839_v58  ;;  %vm10950_vm3 = vmor %vm5118_vm0, %vm5119_vm1 }
 0x4b1   : > { %v10941_v51 = vadd.f32 1.0, %v5191_v27  ;;  %v5148_v37 = vadd.f32 0.112945676, %v5147_v1  ;;  %v5252_v6 = vmul.f32 2.1237322e-06, %v10932_v46  ;;  %v10946_v52 = vmul.f32 %v10862_v63, %v10674_v30 }
 0x4b2   : > { %v5061_v26 = vadd.f32 1.1283791, %v5060_v55  ;;  %v5137_v36 = vadd.f32 0.05243302, %v5136_v5  ;;  %v5263_v53 = vmul.f32 3.8918573e-05, %v10932_v46  ;;  %v5121_v39 = vsel %vm10950_vm3, %v10875_v34, %v5117_v42 }
 0x4b3   : > { %6972 = vrcp.f32 %v10941_v51  ;;  %v10959_v47 = vmul.f32 0.5, %v4254_v19  ;;  %v10962_v30 = vadd.f32 %v4204_v14, %v9528_v15  ;;  %v5626_v29 = vadd.f32 1.0, %v6482_v50 }
 0x4b4   : > { %v5075_v63 = vsub.f32 1.0, %v5074_v35  ;;  %v5149_v62 = vmul.f32 %v5148_v37, %v10859_v8  ;;  %v10966_v22 = vadd.f32 %v4256_v9, %v9515_v31  ;;  %v5102_v41 = vmul.f32 %v5101_v12, %v10734_v60 }
 0x4b5   : > { %v5179_v11 = vadd.f32 0.18741608, %v5178_v0  ;;  %v5253_v44 = vadd.f32 0.00028619796, %v5252_v6  ;;  %v5264_v54 = vadd.f32 0.001143296, %v5263_v53  ;;  %v5126_v34 = vsel %vm10934_vm2, %v5125_v3, %v5121_v39 }
 0x4b6   : > { %v10972_v19 = vmul.f32 %v5061_v26, %v10770_v43  ;;  %v5138_v25 = vmul.f32 %v5137_v36, %v10859_v8  ;;  %v5150_v7 = vadd.f32 0.4994258, %v5149_v62  ;;  %v5082_v16 = vand.u32 2147483647, %v10898_v57 }
 0x4b7   : > { %v5254_v45 = vmul.f32 %v5253_v44, %v10932_v46  ;;  %v5265_v10 = vmul.f32 %v5264_v54, %v10932_v46  ;;  %v10979_v60 = vmul.f32 0.70710677, %v10962_v30  ;;  %v5076_v40 = vmul.f32 %v10927_v2, %v5075_v63 }
 0x4b8   : > { %v5151_v12 = vmul.f32 %v5150_v7, %v10859_v8  ;;  %v10984_v21 = vmul.f32 0.70710677, %v10966_v22  ;;  %v5681_v43 = vpack.c.bf16 %v10844_v48, %v10690_v17  ;;  %v5127_v18 = vmul.f32 %v5126_v34, %v5102_v41 }
 0x4b9   : > { %v10988_v56 = vpop.eup %6972  ;;  %v5180_v55 = vmul.f32 %v5179_v11, %v10839_v58  ;;  %v5266_v27 = vadd.f32 0.014752088, %v5265_v10  ;;  %v5210_v5 = vmul.f32 %v10979_v60, %v10979_v60  ;;  %v5084_v42 = vand.u32 2147483648, %v10898_v57 }
 0x4ba   : > { %v5194_v1 = vmul.f32 %v10988_v56, %v10941_v51  ;;  %v5139_v50 = vadd.f32 0.18741608, %v5138_v25  ;;  %v10996_v28 = vadd.f32 1.0, %v5151_v12  ;;  %5960 = vmatmul.bf16.gmra.mxu2 %v5681_v43  ;;  %6058 = vmatmul.bf16.gmra.mxu0 %v5681_v43  ;;  %v5255_v17 = vadd.f32 0.0036580483, %v5254_v45 }
 0x4bb   : > { %v5267_v48 = vmul.f32 %v5266_v27, %v10932_v46  ;;  %v10999_v3 = vmin.f32 %v5210_v5, 16.0  ;;  %v5330_v58 = vmul.f32 %v10984_v21, %v10984_v21  ;;  %v5077_v35 = vadd.f32 %v10927_v2, %v5076_v40 }
 0x4bc   : > { %vm5079_vm4 = vweird.f32 %v10927_v2  ;;  %v5195_v14 = vsub.f32 1.0, %v5194_v1  ;;  %6974 = vrcp.f32 %v10996_v28  ;;  %v11007_v0 = vmul.f32 %v5626_v29, %v10852_v13  ;;  %v4207_v1 = vpop.f32.mrf.mxu3 }
 0x4bd   : > { %v6485_v37 = vclamps-f32 %v5127_v18, 1.0  ;;  %v5181_v6 = vadd.f32 1.1283791, %v5180_v55  ;;  %v11009_v9 = vmin.f32 %v5330_v58, 16.0  ;;  %vm5078_vm5 = vweird.f32 %v10898_v57 }
 0x4be   : > { %vm11012_vm6 = vcmp.eq.f32.partialorder %v5082_v16, 8.507059e+37  ;;  %v5268_v26 = vadd.f32 0.112945676, %v5267_v48  ;;  %v5212_v36 = vmul.f32 2.1237322e-06, %v10999_v3  ;;  %vm11017_vm7 = vmor %vm5078_vm5, %vm5079_vm4  ;;  %v5085_v39 = vor.u32 1.1754944e-38, %v5084_v42 }
 0x4bf   : > { %v5140_v13 = vmul.f32 %v5139_v50, %v10859_v8  ;;  %v5256_v29 = vmul.f32 %v5255_v17, %v10932_v46  ;;  %v5223_v63 = vmul.f32 3.8918573e-05, %v10999_v3  ;;  %v5081_v57 = vsel %vm11017_vm7, %v10927_v2, %v5077_v35 }
 0x4c0   : > { %v5196_v62 = vmul.f32 %v10988_v56, %v5195_v14  ;;  %v5269_v41 = vmul.f32 %v5268_v26, %v10932_v46  ;;  %v5213_v11 = vadd.f32 0.00028619796, %v5212_v36  ;;  %v5629_v44 = vadd.f32 1.0, %v6485_v37 }
 0x4c1   : > { %v11030_v54 = vmul.f32 %v5181_v6, %v10819_v59  ;;  %v5224_v34 = vadd.f32 0.001143296, %v5223_v63  ;;  %v5332_v8 = vmul.f32 2.1237322e-06, %v11009_v9  ;;  %v5202_v7 = vand.u32 2147483647, %v10941_v51 }
 0x4c2   : > { %v11033_v25 = vpop.eup %6974  ;;  %v5204_v16 = vand.u32 2147483648, %v10941_v51  ;;  %v5270_v45 = vadd.f32 0.4994258, %v5269_v41  ;;  %v5214_v2 = vmul.f32 %v5213_v11, %v10999_v3  ;;  %v5086_v10 = vsel %vm11012_vm6, %v5085_v39, %v5081_v57 }
 0x4c3   : > { %v5154_v40 = vmul.f32 %v11033_v25, %v10996_v28  ;;  %v5257_v59 = vadd.f32 0.05243302, %v5256_v29  ;;  %v5343_v12 = vmul.f32 3.8918573e-05, %v11009_v9  ;;  %v5197_v43 = vadd.f32 %v10988_v56, %v5196_v62 }
 0x4c4   : > { %vm5199_vm8 = vweird.f32 %v10988_v56  ;;  %v5271_v18 = vmul.f32 %v5270_v45, %v10932_v46  ;;  %v5225_v55 = vmul.f32 %v5224_v34, %v10999_v3  ;;  %vm5198_vm9 = vweird.f32 %v10941_v51 }
 0x4c5   : > { %v5155_v27 = vsub.f32 1.0, %v5154_v40  ;;  %v5215_v5 = vadd.f32 0.0036580483, %v5214_v2  ;;  %v5333_v42 = vadd.f32 0.00028619796, %v5332_v8  ;;  %v11049_v50 = vmul.f32 %v5629_v44, %v10866_v20  ;;  %vm11054_vm10 = vmor %vm5198_vm9, %vm5199_vm8 }
 0x4c6   : > { %v5087_v17 = vmul.f32 %v5086_v10, %v10972_v19  ;;  %v11052_v48 = vadd.f32 1.0, %v5271_v18  ;;  %v5226_v58 = vadd.f32 0.014752088, %v5225_v55  ;;  %vm11058_vm11 = vcmp.eq.f32.partialorder %v5202_v7, 8.507059e+37  ;;  %v4258_v18 = vpop.f32.mrf.mxu0 }
 0x4c7   : > { %v5141_v51 = vadd.f32 1.1283791, %v5140_v13  ;;  %v5258_v37 = vmul.f32 %v5257_v59, %v10932_v46  ;;  %v5344_v6 = vadd.f32 0.001143296, %v5343_v12  ;;  %v5201_v20 = vsel %vm11054_vm10, %v10988_v56, %v5197_v43 }
 0x4c8   : > { %v5205_v19 = vor.u32 1.1754944e-38, %v5204_v16  ;;  %6976 = vrcp.f32 %v11052_v48  ;;  %v11068_v32 = vadd.f32 %v4207_v1, %v9528_v15  ;;  %v5156_v26 = vmul.f32 %v11033_v25, %v5155_v27 }
 0x4c9   : > { %v5216_v36 = vmul.f32 %v5215_v5, %v10999_v3  ;;  %v5227_v53 = vmul.f32 %v5226_v58, %v10999_v3  ;;  %v5334_v39 = vmul.f32 %v5333_v42, %v11009_v9  ;;  %v6484_v13 = vclamps-f32 %v5087_v17, 1.0 }
 0x4ca   : > { %v11075_v29 = vmul.f32 0.5, %v10962_v30  ;;  %v11078_v56 = vmul.f32 0.5, %v10966_v22  ;;  %v5345_v63 = vmul.f32 %v5344_v6, %v11009_v9  ;;  %v5142_v57 = vmul.f32 %v5141_v51, %v10833_v24  ;;  %v4209_v6 = vpop.f32.mrf.mxu3 }
 0x4cb   : > { %v5162_v62 = vand.u32 2147483647, %v10996_v28  ;;  %v5259_v41 = vadd.f32 0.18741608, %v5258_v37  ;;  %v5228_v11 = vadd.f32 0.112945676, %v5227_v53  ;;  %v5206_v44 = vsel %vm11058_vm11, %v5205_v19, %v5201_v20 }
 0x4cc   : > { %vm5159_vm12 = vweird.f32 %v11033_v25  ;;  %v5346_v34 = vadd.f32 0.014752088, %v5345_v63  ;;  %v11087_v30 = vmul.f32 0.70710677, %v11068_v32  ;;  %v5157_v22 = vadd.f32 %v11033_v25, %v5156_v26 }
 0x4cd   : > { %v5217_v8 = vadd.f32 0.05243302, %v5216_v36  ;;  %v5229_v7 = vmul.f32 %v5228_v11, %v10999_v3  ;;  %v5335_v16 = vadd.f32 0.0036580483, %v5334_v39  ;;  %vm5158_vm13 = vweird.f32 %v10996_v28 }
 0x4ce   : > { %v11091_v24 = vpop.eup %6976  ;;  %v5347_v45 = vmul.f32 %v5346_v34, %v11009_v9  ;;  %v5290_v2 = vmul.f32 %v11087_v30, %v11087_v30  ;;  %v5680_v10 = vpack.c.bf16 %v10878_v33, %v10807_v38  ;;  %v5628_v40 = vadd.f32 1.0, %v6484_v13  ;;  %vm11106_vm14 = vmor %vm5158_vm13, %vm5159_vm12 }
 0x4cf   : > { %v5164_v59 = vand.u32 2147483648, %v10996_v28  ;;  %v5260_v12 = vmul.f32 %v5259_v41, %v10932_v46  ;;  %v5274_v43 = vmul.f32 %v11091_v24, %v11052_v48  ;;  %v5207_v55 = vmul.f32 %v5206_v44, %v11030_v54 }
 0x4d0   : > { %v5230_v5 = vadd.f32 0.4994258, %v5229_v7  ;;  %v5348_v42 = vadd.f32 0.112945676, %v5347_v45  ;;  %v11110_v38 = vmin.f32 %v5290_v2, 16.0  ;;  %5911 = vmatmul.bf16.gmra.mxu1 %v5680_v10  ;;  %6009 = vmatmul.bf16.gmra.mxu3 %v5680_v10  ;;  %v5161_v33 = vsel %vm11106_vm14, %v11033_v25, %v5157_v22 }
 0x4d1   : > { %vm11115_vm15 = vcmp.eq.f32.partialorder %v5162_v62, 8.507059e+37  ;;  %v5218_v28 = vmul.f32 %v5217_v8, %v10999_v3  ;;  %v5336_v54 = vmul.f32 %v5335_v16, %v11009_v9  ;;  %v11125_v35 = vadd.f32 %v4258_v18, %v9515_v31 }
 0x4d2   : > { %v5231_v1 = vmul.f32 %v5230_v5, %v10999_v3  ;;  %v5349_v17 = vmul.f32 %v5348_v42, %v11009_v9  ;;  %v5292_v58 = vmul.f32 2.1237322e-06, %v11110_v38  ;;  %v5165_v14 = vor.u32 1.1754944e-38, %v5164_v59 }
 0x4d3   : > { %v5261_v51 = vadd.f32 1.1283791, %v5260_v12  ;;  %v5275_v25 = vsub.f32 1.0, %v5274_v43  ;;  %v5303_v37 = vmul.f32 3.8918573e-05, %v11110_v38  ;;  %v6487_v20 = vclamps-f32 %v5207_v55, 1.0 }
 0x4d4   : > { %v11128_v19 = vadd.f32 1.0, %v5231_v1  ;;  %v5350_v26 = vadd.f32 0.4994258, %v5349_v17  ;;  %v5293_v36 = vadd.f32 0.00028619796, %v5292_v58  ;;  %v11131_v53 = vmul.f32 %v5628_v40, %v10903_v49 }
 0x4d5   : > { %v5166_v39 = vsel %vm11115_vm15, %v5165_v14, %v5161_v33  ;;  %v5219_v13 = vadd.f32 0.18741608, %v5218_v28  ;;  %v5304_v63 = vadd.f32 0.001143296, %v5303_v37  ;;  %v5337_v62 = vadd.f32 0.05243302, %v5336_v54 }
 0x4d6   : > { %6978 = vrcp.f32 %v11128_v19  ;;  %v11137_v41 = vmul.f32 0.70710677, %v11125_v35  ;;  %v11140_v11 = vadd.f32 %v4209_v6, %v9528_v15  ;;  %v11143_v44 = vmul.f32 %v5261_v51, %v10917_v23 }
 0x4d7   : > { %v5276_v49 = vmul.f32 %v11091_v24, %v5275_v25  ;;  %v5351_v34 = vmul.f32 %v5350_v26, %v11009_v9  ;;  %v5294_v22 = vmul.f32 %v5293_v36, %v11110_v38  ;;  %v5631_v8 = vadd.f32 1.0, %v6487_v20 }
 0x4d8   : > { %v5282_v7 = vand.u32 2147483647, %v11052_v48  ;;  %v5284_v16 = vand.u32 2147483648, %v11052_v48  ;;  %v5305_v45 = vmul.f32 %v5304_v63, %v11110_v38  ;;  %v11151_v2 = vmul.f32 %v5166_v39, %v5142_v57 }
 0x4d9   : > { %v5220_v10 = vmul.f32 %v5219_v13, %v10999_v3  ;;  %v11154_v40 = vadd.f32 1.0, %v5351_v34  ;;  %v5295_v23 = vadd.f32 0.0036580483, %v5294_v22  ;;  %v5338_v59 = vmul.f32 %v5337_v62, %v11009_v9 }
 0x4da   : > { %v5306_v12 = vadd.f32 0.014752088, %v5305_v45  ;;  %v5410_v43 = vmul.f32 %v11137_v41, %v11137_v41  ;;  %v11160_v18 = vmul.f32 0.70710677, %v11140_v11  ;;  %v5277_v55 = vadd.f32 %v11091_v24, %v5276_v49 }
 0x4db   : > { %vm5278_vm0 = vweird.f32 %v11052_v48  ;;  %vm5279_vm1 = vweird.f32 %v11091_v24  ;;  %6980 = vrcp.f32 %v11154_v40  ;;  %v11169_v57 = vmul.f32 %v5631_v8, %v10909_v61 }
 0x4dc   : > { %v11166_v3 = vpop.eup %6978  ;;  %vm11171_vm2 = vcmp.eq.f32.partialorder %v5282_v7, 8.507059e+37  ;;  %v5307_v5 = vmul.f32 %v5306_v12, %v11110_v38  ;;  %v11176_v42 = vmin.f32 %v5410_v43, 16.0  ;;  %v6486_v33 = vclamps-f32 %v11151_v2, 1.0  ;;  %vm11182_vm3 = vmor %vm5278_vm0, %vm5279_vm1 }
 0x4dd   : > { %v5285_v48 = vor.u32 1.1754944e-38, %v5284_v16  ;;  %v5234_v46 = vmul.f32 %v11166_v3, %v11128_v19  ;;  %v5296_v28 = vmul.f32 %v5295_v23, %v11110_v38  ;;  %v5221_v61 = vadd.f32 1.1283791, %v5220_v10 }
 0x4de   : > { %v5339_v1 = vadd.f32 0.18741608, %v5338_v59  ;;  %v5308_v17 = vadd.f32 0.112945676, %v5307_v5  ;;  %v5370_v58 = vmul.f32 %v11160_v18, %v11160_v18  ;;  %v5281_v14 = vsel %vm11182_vm3, %v11091_v24, %v5277_v55 }
 0x4df   : > { %v5235_v51 = vsub.f32 1.0, %v5234_v46  ;;  %v5412_v25 = vmul.f32 2.1237322e-06, %v11176_v42  ;;  %v5423_v37 = vmul.f32 3.8918573e-05, %v11176_v42  ;;  %vm5238_vm4 = vweird.f32 %v11128_v19 }
 0x4e0   : > { %v5309_v6 = vmul.f32 %v5308_v17, %v11110_v38  ;;  %v11195_v20 = vmin.f32 %v5370_v58, 16.0  ;;  %v5683_v26 = vpack.c.bf16 %v11049_v50, %v10946_v52  ;;  %v5297_v13 = vadd.f32 0.05243302, %v5296_v28 }
 0x4e1   : > { %v11199_v36 = vpop.eup %6980  ;;  %v5236_v39 = vmul.f32 %v11166_v3, %v5235_v51  ;;  %v5413_v24 = vadd.f32 0.00028619796, %v5412_v25  ;;  %v5424_v63 = vadd.f32 0.001143296, %v5423_v37  ;;  %v5286_v62 = vsel %vm11171_vm2, %v5285_v48, %v5281_v14 }
 0x4e2   : > { %vm5239_vm5 = vweird.f32 %v11166_v3  ;;  %v5354_v49 = vmul.f32 %v11199_v36, %v11154_v40  ;;  %v5310_v34 = vadd.f32 0.4994258, %v5309_v6  ;;  %5965 = vmatmul.bf16.gmra.mxu2 %v5683_v26  ;;  %6063 = vmatmul.bf16.gmra.mxu0 %v5683_v26  ;;  %v5372_v8 = vmul.f32 2.1237322e-06, %v11195_v20 }
 0x4e3   : > { %v5237_v52 = vadd.f32 %v11166_v3, %v5236_v39  ;;  %v5414_v50 = vmul.f32 %v5413_v24, %v11176_v42  ;;  %v5425_v22 = vmul.f32 %v5424_v63, %v11176_v42  ;;  %v5242_v7 = vand.u32 2147483647, %v11128_v19  ;;  %vm11216_vm6 = vmor %vm5238_vm4, %vm5239_vm5 }
 0x4e4   : > { %v5244_v16 = vand.u32 2147483648, %v11128_v19  ;;  %v5355_v45 = vsub.f32 1.0, %v5354_v49  ;;  %v5311_v2 = vmul.f32 %v5310_v34, %v11110_v38  ;;  %v5298_v23 = vmul.f32 %v5297_v13, %v11110_v38  ;;  %v4261_v19 = vpop.f32.mrf.mxu0 }
 0x4e5   : > { %v5415_v59 = vadd.f32 0.0036580483, %v5414_v50  ;;  %v5426_v12 = vadd.f32 0.014752088, %v5425_v22  ;;  %v5373_v43 = vadd.f32 0.00028619796, %v5372_v8  ;;  %v5287_v55 = vmul.f32 %v5286_v62, %v11143_v44 }
 0x4e6   : > { %v5241_v27 = vsel %vm11216_vm6, %v11166_v3, %v5237_v52  ;;  %v11225_v5 = vadd.f32 1.0, %v5311_v2  ;;  %v5383_v48 = vmul.f32 3.8918573e-05, %v11195_v20  ;;  %v5356_v46 = vmul.f32 %v11199_v36, %v5355_v45 }
 0x4e7   : > { %v5416_v28 = vmul.f32 %v5415_v59, %v11176_v42  ;;  %v5427_v54 = vmul.f32 %v5426_v12, %v11176_v42  ;;  %v5374_v17 = vmul.f32 %v5373_v43, %v11195_v20  ;;  %v11232_v58 = vadd.f32 1.0, %v6486_v33 }
 0x4e8   : > { %v5222_v44 = vmul.f32 %v5221_v61, %v10979_v60  ;;  %v5245_v14 = vor.u32 1.1754944e-38, %v5244_v16  ;;  %6982 = vrcp.f32 %v11225_v5  ;;  %vm5243_vm7 = vcmp.eq.f32.partialorder %v5242_v7, 8.507059e+37 }
 0x4e9   : > { %v5340_v3 = vmul.f32 %v5339_v1, %v11009_v9  ;;  %v5299_v51 = vadd.f32 0.18741608, %v5298_v23  ;;  %v11238_v25 = vadd.f32 %v4261_v19, %v9515_v31  ;;  %v5428_v6 = vadd.f32 0.112945676, %v5427_v54 }
 0x4ea   : > { %v5246_v37 = vsel %vm5243_vm7, %v5245_v14, %v5241_v27  ;;  %v5375_v26 = vadd.f32 0.0036580483, %v5374_v17  ;;  %v5384_v39 = vadd.f32 0.001143296, %v5383_v48  ;;  %v6489_v13 = vclamps-f32 %v5287_v55, 1.0 }
 0x4eb   : > { %v5357_v33 = vadd.f32 %v11199_v36, %v5356_v46  ;;  %vm5359_vm8 = vweird.f32 %v11199_v36  ;;  %v5417_v60 = vadd.f32 0.05243302, %v5416_v28  ;;  %vm5358_vm9 = vweird.f32 %v11154_v40 }
 0x4ec   : > { %v5362_v61 = vand.u32 2147483647, %v11154_v40  ;;  %v5364_v9 = vand.u32 2147483648, %v11154_v40  ;;  %v5429_v1 = vmul.f32 %v5428_v6, %v11176_v42  ;;  %v5247_v24 = vmul.f32 %v5246_v37, %v5222_v44  ;;  %vm11253_vm10 = vmor %vm5358_vm9, %vm5359_vm8  ;;  %v4263_v17 = vpop.f32.mrf.mxu0 }
 0x4ed   : > { %v5300_v63 = vmul.f32 %v5299_v51, %v11110_v38  ;;  %v5385_v62 = vmul.f32 %v5384_v39, %v11195_v20  ;;  %v11249_v49 = vmul.f32 0.70710677, %v11238_v25  ;;  %v5341_v52 = vadd.f32 1.1283791, %v5340_v3 }
 0x4ee   : > { %v11251_v34 = vpop.eup %6982  ;;  %v5430_v22 = vadd.f32 0.4994258, %v5429_v1  ;;  %v5376_v40 = vmul.f32 %v5375_v26, %v11195_v20  ;;  %v5682_v8 = vpack.c.bf16 %v11131_v53, %v11007_v0  ;;  %v5633_v7 = vadd.f32 1.0, %v6489_v13 }
 0x4ef   : > { %v5361_v38 = vsel %vm11253_vm10, %v11199_v36, %v5357_v33  ;;  %v5418_v16 = vmul.f32 %v5417_v60, %v11176_v42  ;;  %v5386_v45 = vadd.f32 0.014752088, %v5385_v62  ;;  %vm5363_vm11 = vcmp.eq.f32.partialorder %v5362_v61, 8.507059e+37  ;;  %v4212_v36 = vpop.f32.mrf.mxu3 }
 0x4f0   : > { %v5365_v2 = vor.u32 1.1754944e-38, %v5364_v9  ;;  %v5431_v10 = vmul.f32 %v5430_v22, %v11176_v42  ;;  %v5490_v23 = vmul.f32 %v11249_v49, %v11249_v49  ;;  %5916 = vmatmul.bf16.gmra.mxu1 %v5682_v8  ;;  %6014 = vmatmul.bf16.gmra.mxu3 %v5682_v8  ;;  %v6488_v59 = vclamps-f32 %v5247_v24, 1.0 }
 0x4f1   : > { %v5301_v12 = vadd.f32 1.1283791, %v5300_v63  ;;  %v5314_v0 = vmul.f32 %v11251_v34, %v11225_v5  ;;  %v5387_v53 = vmul.f32 %v5386_v45, %v11195_v20  ;;  %v5377_v27 = vadd.f32 0.05243302, %v5376_v40 }
 0x4f2   : > { %v5366_v43 = vsel %vm5363_vm11, %v5365_v2, %v5361_v38  ;;  %v11270_v55 = vadd.f32 1.0, %v5431_v10  ;;  %v11272_v48 = vmin.f32 %v5490_v23, 16.0  ;;  %v5342_v19 = vmul.f32 %v5341_v52, %v10984_v21 }
 0x4f3   : > { %v11276_v46 = vmul.f32 0.5, %v11125_v35  ;;  %v5419_v28 = vadd.f32 0.18741608, %v5418_v16  ;;  %v5388_v54 = vadd.f32 0.112945676, %v5387_v53  ;;  %v11279_v44 = vmul.f32 %v5633_v7, %v10959_v47 }
 0x4f4   : > { %v5324_v14 = vand.u32 2147483648, %v11225_v5  ;;  %6984 = vrcp.f32 %v11270_v55  ;;  %v11284_v3 = vadd.f32 %v4212_v36, %v9528_v15  ;;  %v5632_v51 = vadd.f32 1.0, %v6488_v59 }
 0x4f5   : > { %v5367_v37 = vmul.f32 %v5366_v43, %v5342_v19  ;;  %v5315_v6 = vsub.f32 1.0, %v5314_v0  ;;  %v5389_v21 = vmul.f32 %v5388_v54, %v11195_v20  ;;  %v11288_v35 = vmul.f32 %v5301_v12, %v11087_v30 }
 0x4f6   : > { %v5378_v26 = vmul.f32 %v5377_v27, %v11195_v20  ;;  %v5503_v47 = vmul.f32 3.8918573e-05, %v11272_v48  ;;  %v11293_v39 = vadd.f32 %v4263_v17, %v9515_v31  ;;  %v5322_v13 = vand.u32 2147483647, %v11225_v5 }
 0x4f7   : > { %v5420_v33 = vmul.f32 %v5419_v28, %v11176_v42  ;;  %v5390_v60 = vadd.f32 0.4994258, %v5389_v21  ;;  %v5492_v61 = vmul.f32 2.1237322e-06, %v11272_v48  ;;  %vm5318_vm12 = vweird.f32 %v11225_v5 }
 0x4f8   : > { %v5325_v9 = vor.u32 1.1754944e-38, %v5324_v14  ;;  %v5504_v1 = vadd.f32 0.001143296, %v5503_v47  ;;  %v11300_v30 = vmul.f32 0.70710677, %v11284_v3  ;;  %v11303_v24 = vmul.f32 %v5632_v51, %v11075_v29 }
 0x4f9   : > { %v6491_v63 = vclamps-f32 %v5367_v37, 1.0  ;;  %v5316_v31 = vmul.f32 %v11251_v34, %v5315_v6  ;;  %v5391_v62 = vmul.f32 %v5390_v60, %v11195_v20  ;;  %v5379_v42 = vadd.f32 0.18741608, %v5378_v26 }
 0x4fa   : > { %v6985_v52 = vpop.eup %6984  ;;  %v5505_v50 = vmul.f32 %v5504_v1, %v11272_v48  ;;  %v5450_v22 = vmul.f32 %v11300_v30, %v11300_v30  ;;  %v11311_v40 = vmul.f32 0.70710677, %v11293_v39  ;;  %vm11313_vm13 = vcmp.eq.f32.partialorder %v5322_v13, 8.507059e+37 }
 0x4fb   : > { %v5421_v29 = vadd.f32 1.1283791, %v5420_v33  ;;  %v5434_v7 = vmul.f32 %v6985_v52, %v11270_v55  ;;  %v11318_v38 = vadd.f32 1.0, %v5391_v62  ;;  %v5493_v16 = vadd.f32 0.00028619796, %v5492_v61 }
 0x4fc   : > { %vm5319_vm14 = vweird.f32 %v11251_v34  ;;  %v5442_v45 = vand.u32 2147483647, %v11270_v55  ;;  %v5506_v2 = vadd.f32 0.014752088, %v5505_v50  ;;  %v11322_v10 = vmin.f32 %v5450_v22, 16.0 }
 0x4fd   : > { %v5317_v23 = vadd.f32 %v11251_v34, %v5316_v31  ;;  %v5435_v59 = vsub.f32 1.0, %v5434_v7  ;;  %6986 = vrcp.f32 %v11318_v38  ;;  %v5570_v12 = vmul.f32 %v11311_v40, %v11311_v40  ;;  %vm11339_vm0 = vmor %vm5318_vm12, %vm5319_vm14 }
 0x4fe   : > { %v11328_v0 = vadd.f32 1.0, %v6491_v63  ;;  %v5444_v53 = vand.u32 2147483648, %v11270_v55  ;;  %v5380_v36 = vmul.f32 %v5379_v42, %v11195_v20  ;;  %v5507_v43 = vmul.f32 %v5506_v2, %v11272_v48 }
 0x4ff   : > { %v5436_v27 = vmul.f32 %v6985_v52, %v5435_v59  ;;  %vm5439_vm15 = vweird.f32 %v6985_v52  ;;  %v5494_v19 = vmul.f32 %v5493_v16, %v11272_v48  ;;  %v5463_v28 = vmul.f32 3.8918573e-05, %v11322_v10  ;;  %v4214_v59 = vpop.f32.mrf.mxu3 }
 0x500   : > { %v5422_v17 = vmul.f32 %v5421_v29, %v11137_v41  ;;  %vm5438_vm1 = vweird.f32 %v11270_v55  ;;  %vm11345_vm2 = vcmp.eq.f32.partialorder %v5442_v45, 8.507059e+37  ;;  %v5508_v14 = vadd.f32 0.112945676, %v5507_v43 }
 0x501   : > { %v5321_v51 = vsel %vm11339_vm0, %v11251_v34, %v5317_v23  ;;  %v5437_v37 = vadd.f32 %v6985_v52, %v5436_v27  ;;  %v5464_v6 = vadd.f32 0.001143296, %v5463_v28  ;;  %v11352_v5 = vmin.f32 %v5570_v12, 16.0  ;;  %vm5440_vm3 = vmor %vm5438_vm1, %vm5439_vm15 }
 0x502   : > { %v5445_v21 = vor.u32 1.1754944e-38, %v5444_v53  ;;  %v5381_v26 = vadd.f32 1.1283791, %v5380_v36  ;;  %v5509_v41 = vmul.f32 %v5508_v14, %v11272_v48  ;;  %v5685_v55 = vpack.c.bf16 %v11279_v44, %v11169_v57 }
 0x503   : > { %v6987_v47 = vpop.eup %6986  ;;  %v5441_v13 = vsel %vm5440_vm3, %v6985_v52, %v5437_v37  ;;  %v5495_v33 = vadd.f32 0.0036580483, %v5494_v19  ;;  %v5465_v60 = vmul.f32 %v5464_v6, %v11322_v10  ;;  %v5572_v61 = vmul.f32 2.1237322e-06, %v11352_v5 }
 0x504   : > { %v5326_v34 = vsel %vm11313_vm13, %v5325_v9, %v5321_v51  ;;  %v5446_v1 = vsel %vm11345_vm2, %v5445_v21, %v5441_v13  ;;  %v5394_v63 = vmul.f32 %v6987_v47, %v11318_v38  ;;  %v5452_v31 = vmul.f32 2.1237322e-06, %v11322_v10  ;;  %5970 = vmatmul.bf16.gmra.mxu2 %v5685_v55  ;;  %6068 = vmatmul.bf16.gmra.mxu0 %v5685_v55 }
 0x505   : > { %v5447_v57 = vmul.f32 %v5446_v1, %v5422_v17  ;;  %v5402_v44 = vand.u32 2147483647, %v11318_v38  ;;  %v5510_v62 = vadd.f32 0.4994258, %v5509_v41  ;;  %v5466_v52 = vadd.f32 0.014752088, %v5465_v60 }
 0x506   : > { %v5395_v42 = vsub.f32 1.0, %v5394_v63  ;;  %v5404_v50 = vand.u32 2147483648, %v11318_v38  ;;  %v5573_v22 = vadd.f32 0.00028619796, %v5572_v61  ;;  %v5583_v9 = vmul.f32 3.8918573e-05, %v11352_v5  ;;  %v5897_v63 = vpop.f32.mrf.mxu1 }
 0x507   : > { %v6493_v8 = vclamps-f32 %v5447_v57, 1.0  ;;  %v5496_v29 = vmul.f32 %v5495_v33, %v11272_v48  ;;  %v5511_v7 = vmul.f32 %v5510_v62, %v11272_v48  ;;  %v5467_v16 = vmul.f32 %v5466_v52, %v11322_v10 }
 0x508   : > { %v5396_v45 = vmul.f32 %v6987_v47, %v5395_v42  ;;  %vm5399_vm4 = vweird.f32 %v6987_v47  ;;  %v5453_v2 = vadd.f32 0.00028619796, %v5452_v31  ;;  %v5584_v23 = vadd.f32 0.001143296, %v5583_v9  ;;  %v5946_v31 = vpop.f32.mrf.mxu2 }
 0x509   : > { %v5637_v12 = vadd.f32 1.0, %v6493_v8  ;;  %v11371_v53 = vadd.f32 1.0, %v5511_v7  ;;  %v5468_v36 = vadd.f32 0.112945676, %v5467_v16  ;;  %v5574_v43 = vmul.f32 %v5573_v22, %v11352_v5 }
 0x50a   : > { %v5382_v27 = vmul.f32 %v5381_v26, %v11160_v18  ;;  %v5397_v19 = vadd.f32 %v6987_v47, %v5396_v45  ;;  %vm5398_vm5 = vweird.f32 %v11318_v38  ;;  %v5585_v28 = vmul.f32 %v5584_v23, %v11352_v5 }
 0x50b   : > { %vm5400_vm6 = vmor %vm5398_vm5, %vm5399_vm4  ;;  %vm5403_vm7 = vcmp.eq.f32.partialorder %v5402_v44, 8.507059e+37  ;;  %v5405_v54 = vor.u32 1.1754944e-38, %v5404_v50  ;;  %6988 = vrcp.f32 %v11371_v53  ;;  %v11379_v17 = vadd.f32 %v4214_v59, %v9528_v15 }
 0x50c   : > { %v5401_v20 = vsel %vm5400_vm6, %v6987_v47, %v5397_v19  ;;  %v5497_v14 = vadd.f32 0.05243302, %v5496_v29  ;;  %v5454_v51 = vmul.f32 %v5453_v2, %v11322_v10  ;;  %v5469_v37 = vmul.f32 %v5468_v36, %v11322_v10 }
 0x50d   : > { %v5669_v18 = vmul.f32 %v5637_v12, %v11276_v46  ;;  %v5406_v6 = vsel %vm5403_vm7, %v5405_v54, %v5401_v20  ;;  %v5575_v38 = vadd.f32 0.0036580483, %v5574_v43  ;;  %v5586_v21 = vadd.f32 0.014752088, %v5585_v28 }
 0x50e   : > { %v5662_v26 = vmul.f32 %v11232_v58, %v10914_v4  ;;  %v5407_v41 = vmul.f32 %v5406_v6, %v5382_v27  ;;  %v5470_v55 = vadd.f32 0.4994258, %v5469_v37  ;;  %v5667_v15 = vmul.f32 %v11328_v0, %v11078_v56  ;;  %v11396_v4 = vpop.f32.mrf.mxu0  ;;  %v5995_v27 = vpop.f32.mrf.mxu3 }
 0x50f   : > { %v5327_v47 = vmul.f32 %v5326_v34, %v11288_v35  ;;  %v5587_v13 = vmul.f32 %v5586_v21, %v11352_v5  ;;  %v11391_v33 = vmul.f32 0.70710677, %v11379_v17  ;;  %v5498_v46 = vmul.f32 %v5497_v14, %v11272_v48  ;;  %v5899_v37 = vpop.f32.mrf.mxu1 }
 0x510   : > { %v5455_v60 = vadd.f32 0.0036580483, %v5454_v51  ;;  %v5471_v61 = vmul.f32 %v5470_v55, %v11322_v10  ;;  %v5684_v1 = vpack.c.bf16 %v11303_v24, %v5662_v26  ;;  %v5576_v56 = vmul.f32 %v5575_v38, %v11352_v5  ;;  %v5722_v24 = vld [vmem:[%s11591_s12] sm:$0x3] }
 0x511   : > { %v11398_v58 = vpop.eup %6988  ;;  %v5588_v0 = vadd.f32 0.112945676, %v5587_v13  ;;  %v5530_v35 = vmul.f32 %v11391_v33, %v11391_v33  ;;  %v5687_v34 = vpack.c.bf16 %v5669_v18, %v5667_v15  ;;  %v6492_v57 = vclamps-f32 %v5407_v41, 1.0  ;;  %v5948_v18 = vpop.f32.mrf.mxu2 }
 0x512   : > { %v5514_v44 = vmul.f32 %v11398_v58, %v11371_v53  ;;  %5921 = vmatmul.bf16.gmra.mxu1 %v5684_v1  ;;  %6019 = vmatmul.bf16.gmra.mxu3 %v5684_v1  ;;  %v6490_v62 = vclamps-f32 %v5327_v47, 1.0  ;;  %v11408_v52 = vadd.f32 1.0, %v5471_v61  ;;  %v5499_v22 = vadd.f32 0.18741608, %v5498_v46 }
 0x513   : > { %v5589_v42 = vmul.f32 %v5588_v0, %v11352_v5  ;;  %v11411_v50 = vmin.f32 %v5530_v35, 16.0  ;;  %v5456_v8 = vmul.f32 %v5455_v60, %v11322_v10  ;;  %v4290_v29 = vmul.f32 0.5, %v11068_v32 }
 0x514   : > { %v5515_v9 = vsub.f32 1.0, %v5514_v44  ;;  %5975 = vmatmul.bf16.gmra.mxu2 %v5687_v34  ;;  %6073 = vmatmul.bf16.gmra.mxu0 %v5687_v34  ;;  %v5577_v7 = vadd.f32 0.05243302, %v5576_v56  ;;  %v11415_v16 = vperm.slane %v5722_v24, 0  ;;  %v4292_v45 = vmul.f32 0.5, %v11140_v11 }
 0x515   : > { %v5636_v2 = vadd.f32 1.0, %v6492_v57  ;;  %v5590_v23 = vadd.f32 0.4994258, %v5589_v42  ;;  %v5532_v59 = vmul.f32 2.1237322e-06, %v11411_v50  ;;  %v5634_v12 = vadd.f32 1.0, %v6490_v62 }
 0x516   : > { %v5516_v36 = vmul.f32 %v11398_v58, %v5515_v9  ;;  %6990 = vrcp.f32 %v11408_v52  ;;  %v5543_v43 = vmul.f32 3.8918573e-05, %v11411_v50  ;;  %v5500_v19 = vmul.f32 %v5499_v22, %v11272_v48  ;;  %v6046_v55 = vpop.f32.mrf.mxu0  ;;  %v5997_v44 = vpop.f32.mrf.mxu3 }
 0x517   : > { %v5457_v32 = vadd.f32 0.05243302, %v5456_v8  ;;  %v5591_v28 = vmul.f32 %v5590_v23, %v11352_v5  ;;  %v5533_v54 = vadd.f32 0.00028619796, %v5532_v59  ;;  %v5578_v11 = vmul.f32 %v5577_v7, %v11352_v5 }
 0x518   : > { %v5544_v20 = vadd.f32 0.001143296, %v5543_v43  ;;  %v5898_v14 = vadd.f32 %v5897_v63, %v11415_v16  ;;  %v11426_v51 = vperm.slane %v5722_v24, 1  ;;  %v5668_v6 = vmul.f32 %v5636_v2, %v4292_v45  ;;  %v5902_v2 = vpop.f32.mrf.mxu1 }
 0x519   : > { %vm5519_vm8 = vweird.f32 %v11398_v58  ;;  %v11429_v38 = vadd.f32 1.0, %v5591_v28  ;;  %v5534_v48 = vmul.f32 %v5533_v54, %v11411_v50  ;;  %v5517_v21 = vadd.f32 %v11398_v58, %v5516_v36  ;;  %v5951_v23 = vpop.f32.mrf.mxu2 }
 0x51a   : > { %v5545_v26 = vmul.f32 %v5544_v20, %v11411_v50  ;;  %v11434_v41 = vadd.f32 %v5946_v31, %v5898_v14  ;;  %v5996_v15 = vadd.f32 %v5995_v27, %v11426_v51  ;;  %v5666_v47 = vmul.f32 %v5634_v12, %v4290_v29 }
 0x51b   : > { %v5524_v13 = vand.u32 2147483648, %v11371_v53  ;;  %6992 = vrcp.f32 %v11429_v38  ;;  %vm5518_vm9 = vweird.f32 %v11371_v53  ;;  %v5522_v60 = vand.u32 2147483647, %v11371_v53 }
 0x51c   : > { %v11439_v46 = vpop.eup %6990  ;;  %v5579_v61 = vadd.f32 0.18741608, %v5578_v11  ;;  %vm11445_vm10 = vmor %vm5518_vm9, %vm5519_vm8  ;;  %v5535_v56 = vadd.f32 0.0036580483, %v5534_v48  ;;  %v5546_v0 = vadd.f32 0.014752088, %v5545_v26  ;;  %v5686_v35 = vpack.c.bf16 %v5668_v6, %v5666_v47 }
 0x51d   : > { %v11450_v34 = vadd.f32 %v11396_v4, %v5996_v15  ;;  %v5501_v63 = vadd.f32 1.1283791, %v5500_v19  ;;  %v5521_v31 = vsel %vm11445_vm10, %v11398_v58, %v5517_v21  ;;  %v5458_v53 = vmul.f32 %v5457_v32, %v11322_v10 }
 0x51e   : > { %v5900_v57 = vadd.f32 %v5899_v37, %v11415_v16  ;;  %v5525_v24 = vor.u32 1.1754944e-38, %v5524_v13  ;;  %v5474_v62 = vmul.f32 %v11439_v46, %v11408_v52  ;;  %v5547_v42 = vmul.f32 %v5546_v0, %v11411_v50  ;;  %v6049_v54 = vpop.f32.mrf.mxu0  ;;  %v6000_v48 = vpop.f32.mrf.mxu3 }
 0x51f   : > { %v5998_v22 = vadd.f32 %v5997_v44, %v11426_v51  ;;  %vm5523_vm11 = vcmp.eq.f32.partialorder %v5522_v60, 8.507059e+37  ;;  %v5580_v4 = vmul.f32 %v5579_v61, %v11352_v5  ;;  %v5536_v29 = vmul.f32 %v5535_v56, %v11411_v50 }
 0x520   : > { %v11462_v9 = vadd.f32 %v5948_v18, %v5900_v57  ;;  %v5526_v58 = vsel %vm5523_vm11, %v5525_v24, %v5521_v31  ;;  %v5548_v7 = vadd.f32 0.112945676, %v5547_v42  ;;  %v5502_v59 = vmul.f32 %v5501_v63, %v11249_v49  ;;  %v5904_v0 = vpop.f32.mrf.mxu1 }
 0x521   : > { %v6993_v8 = vpop.eup %6992  ;;  %v11465_v45 = vadd.f32 %v6046_v55, %v5998_v22  ;;  %v5903_v36 = vadd.f32 %v5902_v2, %v11415_v16  ;;  %v5459_v5 = vadd.f32 0.18741608, %v5458_v53  ;;  %v5475_v43 = vsub.f32 1.0, %v5474_v62 }
 0x522   : > { %5926 = vmatmul.bf16.gmra.mxu1 %v5686_v35  ;;  %6024 = vmatmul.bf16.gmra.mxu3 %v5686_v35  ;;  %v5594_v12 = vmul.f32 %v6993_v8, %v11429_v38  ;;  %v5549_v27 = vmul.f32 %v5548_v7, %v11411_v50  ;;  %v5527_v19 = vmul.f32 %v5526_v58, %v5502_v59  ;;  %v5581_v32 = vadd.f32 1.1283791, %v5580_v4  ;;  %v5953_v35 = vpop.f32.mrf.mxu2 }
 0x523   : > { %v11471_v11 = vadd.f32 %v5951_v23, %v5903_v36  ;;  %v5604_v20 = vand.u32 2147483648, %v11429_v38  ;;  %v5537_v14 = vadd.f32 0.05243302, %v5536_v29  ;;  %vm5599_vm12 = vweird.f32 %v6993_v8 }
 0x524   : > { %v5595_v28 = vsub.f32 1.0, %v5594_v12  ;;  %v5550_v37 = vadd.f32 0.4994258, %v5549_v27  ;;  %v5602_v49 = vand.u32 2147483647, %v11429_v38  ;;  %v5476_v21 = vmul.f32 %v11439_v46, %v5475_v43 }
 0x525   : > { %v6084_v6 = vmax.f32 %v11434_v41, %v11471_v11  ;;  %v6001_v55 = vadd.f32 %v6000_v48, %v11426_v51  ;;  %v6495_v15 = vclamps-f32 %v5527_v19, 1.0  ;;  %v5460_v47 = vmul.f32 %v5459_v5, %v11322_v10 }
 0x526   : > { %v5596_v18 = vmul.f32 %v6993_v8, %v5595_v28  ;;  %v5551_v26 = vmul.f32 %v5550_v37, %v11411_v50  ;;  %vm5598_vm13 = vweird.f32 %v11429_v38  ;;  %v5605_v60 = vor.u32 1.1754944e-38, %v5604_v20  ;;  %v6051_v29 = vpop.f32.mrf.mxu0  ;;  %v6002_v7 = vpop.f32.mrf.mxu3 }
 0x527   : > { %vm5600_vm14 = vmor %vm5598_vm13, %vm5599_vm12  ;;  %v5538_v61 = vmul.f32 %v5537_v14, %v11411_v50  ;;  %v11485_v56 = vadd.f32 %v6049_v54, %v6001_v55  ;;  %v5582_v63 = vmul.f32 %v5581_v32, %v11311_v40  ;;  %vm5603_vm15 = vcmp.eq.f32.partialorder %v5602_v49, 8.507059e+37 }
 0x528   : > { %v5597_v13 = vadd.f32 %v6993_v8, %v5596_v18  ;;  %v11483_v1 = vadd.f32 1.0, %v5551_v26  ;;  %v5905_v53 = vadd.f32 %v5904_v0, %v11415_v16  ;;  %v5477_v10 = vadd.f32 %v11439_v46, %v5476_v21  ;;  %v5907_v19 = vpop.f32.mrf.mxu1 }
 0x529   : > { %vm5479_vm0 = vweird.f32 %v11439_v46  ;;  %vm5478_vm1 = vweird.f32 %v11408_v52  ;;  %v5484_v57 = vand.u32 2147483648, %v11408_v52  ;;  %v6097_v24 = vmax.f32 %v11450_v34, %v11485_v56 }
 0x52a   : > { %v5601_v31 = vsel %vm5600_vm14, %v6993_v8, %v5597_v13  ;;  %6994 = vrcp.f32 %v11483_v1  ;;  %v5639_v40 = vadd.f32 1.0, %v6495_v15  ;;  %v5482_v62 = vand.u32 2147483647, %v11408_v52  ;;  %vm11498_vm2 = vmor %vm5478_vm1, %vm5479_vm0  ;;  %v5956_v32 = vpop.f32.mrf.mxu2 }
 0x52b   : > { %v5606_v38 = vsel %vm5603_vm15, %v5605_v60, %v5601_v31  ;;  %v5539_v42 = vadd.f32 0.18741608, %v5538_v61  ;;  %v5954_v22 = vadd.f32 %v5953_v35, %v5905_v53  ;;  %v4295_v4 = vmul.f32 0.5, %v11238_v25 }
 0x52c   : > { %v5607_v44 = vmul.f32 %v5606_v38, %v5582_v63  ;;  %v5461_v2 = vadd.f32 1.1283791, %v5460_v47  ;;  %v5481_v23 = vsel %vm11498_vm2, %v11439_v46, %v5477_v10  ;;  %v6003_v52 = vadd.f32 %v6002_v7, %v11426_v51 }
 0x52d   : > { %v6085_v34 = vmax.f32 %v11462_v9, %v5954_v22  ;;  %v5485_v59 = vor.u32 1.1754944e-38, %v5484_v57  ;;  %v4297_v12 = vmul.f32 0.5, %v11293_v39  ;;  %v5671_v5 = vmul.f32 %v5639_v40, %v4295_v4 }
 0x52e   : > { %v6497_v58 = vclamps-f32 %v5607_v44, 1.0  ;;  %vm5483_vm3 = vcmp.eq.f32.partialorder %v5482_v62, 8.507059e+37  ;;  %v5540_v43 = vmul.f32 %v5539_v42, %v11411_v50  ;;  %v6052_v27 = vadd.f32 %v6051_v29, %v6003_v52  ;;  %v6054_v55 = vpop.f32.mrf.mxu0  ;;  %v6005_v15 = vpop.f32.mrf.mxu3 }
 0x52f   : > { %v5486_v28 = vsel %vm5483_vm3, %v5485_v59, %v5481_v23  ;;  %v5908_v9 = vadd.f32 %v5907_v19, %v11415_v16  ;;  %v5462_v20 = vmul.f32 %v5461_v2, %v11300_v30  ;;  %v5564_v50 = vand.u32 2147483648, %v11483_v1 }
 0x530   : > { %v5641_v25 = vadd.f32 1.0, %v6497_v58  ;;  %v6995_v36 = vpop.eup %6994  ;;  %v6098_v14 = vmax.f32 %v11465_v45, %v6052_v27  ;;  %v5541_v48 = vadd.f32 1.1283791, %v5540_v43  ;;  %v5562_v26 = vand.u32 2147483647, %v11483_v1  ;;  %v5909_v56 = vpop.f32.mrf.mxu1 }
 0x531   : > { %v5554_v46 = vmul.f32 %v6995_v36, %v11483_v1  ;;  %v5957_v18 = vadd.f32 %v5956_v32, %v5908_v9  ;;  %v5487_v49 = vmul.f32 %v5486_v28, %v5462_v20  ;;  %vm5559_vm4 = vweird.f32 %v6995_v36 }
 0x532   : > { %v5673_v54 = vmul.f32 %v5641_v25, %v4297_v12  ;;  %v6006_v45 = vadd.f32 %v6005_v15, %v11426_v51  ;;  %vm5558_vm5 = vweird.f32 %v11483_v1  ;;  %v5565_v60 = vor.u32 1.1754944e-38, %v5564_v50  ;;  %v5958_v11 = vpop.f32.mrf.mxu2 }
 0x533   : > { %v5555_v39 = vsub.f32 1.0, %v5554_v46  ;;  %v6086_v30 = vmax.f32 %v6084_v6, %v5957_v18  ;;  %v6494_v13 = vclamps-f32 %v5487_v49, 1.0  ;;  %vm5560_vm6 = vmor %vm5558_vm5, %vm5559_vm4  ;;  %v5542_v0 = vmul.f32 %v5541_v48, %v11391_v33 }
 0x534   : > { %v5689_v37 = vpack.c.bf16 %v5673_v54, %v5671_v5  ;;  %v6055_v61 = vadd.f32 %v6054_v55, %v6006_v45  ;;  %vm5563_vm7 = vcmp.eq.f32.partialorder %v5562_v26, 8.507059e+37  ;;  %v5910_v63 = vadd.f32 %v5909_v56, %v11415_v16 }
 0x535   : > { %v5556_v21 = vmul.f32 %v6995_v36, %v5555_v39  ;;  %v5638_v10 = vadd.f32 1.0, %v6494_v13  ;;  %v4294_v40 = vmul.f32 0.5, %v11284_v3  ;;  %v4296_v62 = vmul.f32 0.5, %v11379_v17 }
 0x536   : > { %5980 = vmatmul.bf16.gmra.mxu2 %v5689_v37  ;;  %6078 = vmatmul.bf16.gmra.mxu0 %v5689_v37  ;;  %v6099_v41 = vmax.f32 %v6097_v24, %v6055_v61  ;;  %v5959_v53 = vadd.f32 %v5958_v11, %v5910_v63  ;;  %v6007_v1 = vpop.f32.mrf.mxu3  ;;  %v6056_v42 = vpop.f32.mrf.mxu0  ;;  %vm6136_vm8 = vcmask 1040384   ;;  %vm6143_vm9 = vcmask 1041408  }
 0x537   : > { %v5557_v47 = vadd.f32 %v6995_v36, %v5556_v21  ;;  %v6008_v44 = vadd.f32 %v6007_v1, %v11426_v51  ;;  %v5670_v4 = vmul.f32 %v5638_v10, %v4294_v40 }
 0x538   : > { %v6087_v57 = vmax.f32 %v6085_v34, %v5959_v53 }
 0x539   : > { %v5561_v35 = vsel %vm5560_vm6, %v6995_v36, %v5557_v47  ;;  %v6057_v22 = vadd.f32 %v6056_v42, %v6008_v44 }
 0x53a   : > { %v5566_v31 = vsel %vm5563_vm7, %v5565_v60, %v5561_v35 }
 0x53b   : > { %v5567_v6 = vmul.f32 %v5566_v31, %v5542_v0  ;;  %v6100_v58 = vmax.f32 %v6098_v14, %v6057_v22 }
 0x53d   : > { %v6496_v38 = vclamps-f32 %v5567_v6, 1.0  ;;  %v5961_v7 = vpop.f32.mrf.mxu2 }
 0x53e   : > { %v6059_v52 = vpop.f32.mrf.mxu0 }
 0x53f   : > { %v5640_v33 = vadd.f32 1.0, %v6496_v38 }
 0x541   : > { %v5672_v8 = vmul.f32 %v5640_v33, %v4296_v62 }
 0x543   : > { %v5688_v24 = vpack.c.bf16 %v5672_v8, %v5670_v4 }
 0x545   : > { %5931 = vmatmul.bf16.gmra.mxu1 %v5688_v24  ;;  %6029 = vmatmul.bf16.gmra.mxu3 %v5688_v24  ;;  %v5963_v36 = vpop.f32.mrf.mxu2 }
 0x546   : > { %v6061_v54 = vpop.f32.mrf.mxu0 }
 0x54d   : > { %v5912_v29 = vpop.f32.mrf.mxu1 }
 0x54e   : > { %v5913_v2 = vadd.f32 %v5912_v29, %v11415_v16 }
 0x550   : > { %v5962_v23 = vadd.f32 %v5961_v7, %v5913_v2 }
 0x552   : > { %v6088_v34 = vmax.f32 %v6086_v30, %v5962_v23 }
 0x553   : > { %v6010_v59 = vpop.f32.mrf.mxu3 }
 0x554   : > { %v6011_v3 = vadd.f32 %v6010_v59, %v11426_v51 }
 0x555   : > { %v5914_v17 = vpop.f32.mrf.mxu1 }
 0x556   : > { %v6060_v12 = vadd.f32 %v6059_v52, %v6011_v3  ;;  %v5915_v25 = vadd.f32 %v5914_v17, %v11415_v16 }
 0x558   : > { %v6101_v5 = vmax.f32 %v6099_v41, %v6060_v12  ;;  %v5964_v43 = vadd.f32 %v5963_v36, %v5915_v25 }
 0x55a   : > { %v6089_v27 = vmax.f32 %v6087_v57, %v5964_v43 }
 0x55b   : > { %v6012_v19 = vpop.f32.mrf.mxu3 }
 0x55c   : > { %v11528_v32 = vmax.f32 %v6088_v34, %v6089_v27  ;;  %v6013_v28 = vadd.f32 %v6012_v19, %v11426_v51 }
 0x55e   : > { %v6062_v46 = vadd.f32 %v6061_v54, %v6013_v28 }
 0x55f   : > { %v6064_v37 = vpop.f32.mrf.mxu0 }
 0x560   : > { %v6102_v9 = vmax.f32 %v6100_v58, %v6062_v46 }
 0x562   : > { %v11531_v20 = vmax.f32 %v6101_v5, %v6102_v9 }
 0x564   : > { %v6104_v9 = vrot.slane %v11531_v20, 4 }
 0x565   : > { %v5966_v39 = vpop.f32.mrf.mxu2 }
 0x567   : > { %v6066_v50 = vpop.f32.mrf.mxu0 }
 0x56d   : > { %v5917_v14 = vpop.f32.mrf.mxu1  ;;  %v5968_v48 = vpop.f32.mrf.mxu2 }
 0x56e   : > { %v5918_v57 = vadd.f32 %v5917_v14, %v11415_v16 }
 0x570   : > { %v5967_v22 = vadd.f32 %v5966_v39, %v5918_v57 }
 0x573   : > { %v6015_v18 = vpop.f32.mrf.mxu3 }
 0x574   : > { %v6016_v23 = vadd.f32 %v6015_v18, %v11426_v51 }
 0x575   : > { %v5919_v49 = vpop.f32.mrf.mxu1 }
 0x576   : > { %v5920_v1 = vadd.f32 %v5919_v49, %v11415_v16  ;;  %v6065_v14 = vadd.f32 %v6064_v37, %v6016_v23 }
 0x578   : > { %v5969_v4 = vadd.f32 %v5968_v48, %v5920_v1 }
 0x57b   : > { %v6017_v21 = vpop.f32.mrf.mxu3 }
 0x57c   : > { %v6018_v34 = vadd.f32 %v6017_v21, %v11426_v51 }
 0x57e   : > { %v6067_v39 = vadd.f32 %v6066_v50, %v6018_v34 }
 0x581   : > { %v6069_v30 = vpop.f32.mrf.mxu0 }
 0x587   : > { %v5971_v55 = vpop.f32.mrf.mxu2 }
 0x589   : > { %v6071_v13 = vpop.f32.mrf.mxu0 }
 0x58f   : > { %v5922_v26 = vpop.f32.mrf.mxu1  ;;  %v5973_v47 = vpop.f32.mrf.mxu2 }
 0x590   : > { %v5923_v6 = vadd.f32 %v5922_v26, %v11415_v16  ;;  %v6091_v26 = vrot.slane %v11528_v32, 4 }
 0x591   : > { %v6074_v0 = vpop.f32.mrf.mxu0 }
 0x592   : > { %v5972_v62 = vadd.f32 %v5971_v55, %v5923_v6 }
 0x594   : > { %v6110_v52 = vmax.f32 %v5967_v22, %v5972_v62 }
 0x595   : > { %v6020_v15 = vpop.f32.mrf.mxu3 }
 0x596   : > { %v6021_v8 = vadd.f32 %v6020_v15, %v11426_v51 }
 0x597   : > { %v5924_v45 = vpop.f32.mrf.mxu1  ;;  %v5976_v56 = vpop.f32.mrf.mxu2 }
 0x598   : > { %v5925_v53 = vadd.f32 %v5924_v45, %v11415_v16  ;;  %v6070_v5 = vadd.f32 %v6069_v30, %v6021_v8 }
 0x599   : > { %v6076_v41 = vpop.f32.mrf.mxu0 }
 0x59a   : > { %v5974_v33 = vadd.f32 %v5973_v47, %v5925_v53  ;;  %v6123_v55 = vmax.f32 %v6065_v14, %v6070_v5 }
 0x59c   : > { %v6111_v59 = vmax.f32 %v5969_v4, %v5974_v33 }
 0x59d   : > { %v6022_v60 = vpop.f32.mrf.mxu3 }
 0x59e   : > { %v6023_v58 = vadd.f32 %v6022_v60, %v11426_v51 }
 0x59f   : > { %v5927_v61 = vpop.f32.mrf.mxu1  ;;  %v5978_v31 = vpop.f32.mrf.mxu2 }
 0x5a0   : > { %v5928_v44 = vadd.f32 %v5927_v61, %v11415_v16  ;;  %v6072_v43 = vadd.f32 %v6071_v13, %v6023_v58  ;;  %v6105_v13 = vmax.f32 %v11531_v20, %v6104_v9 }
 0x5a2   : > { %v5977_v7 = vadd.f32 %v5976_v56, %v5928_v44  ;;  %v6124_v30 = vmax.f32 %v6067_v39, %v6072_v43 }
 0x5a4   : > { %v6112_v19 = vmax.f32 %v6110_v52, %v5977_v7 }
 0x5a5   : > { %v6025_v35 = vpop.f32.mrf.mxu3 }
 0x5a6   : > { %v6026_v17 = vadd.f32 %v6025_v35, %v11426_v51 }
 0x5a7   : > { %v5929_v63 = vpop.f32.mrf.mxu1 }
 0x5a8   : > { %v5930_v40 = vadd.f32 %v5929_v63, %v11415_v16  ;;  %v6075_v18 = vadd.f32 %v6074_v0, %v6026_v17  ;;  %v6092_v0 = vmax.f32 %v11528_v32, %v6091_v26 }
 0x5aa   : > { %v5979_v2 = vadd.f32 %v5978_v31, %v5930_v40  ;;  %v6125_v61 = vmax.f32 %v6123_v55, %v6075_v18  ;;  %v6093_v53 = vrot.slane %v6092_v0, 2 }
 0x5ac   : > { %v6113_v28 = vmax.f32 %v6111_v59, %v5979_v2  ;;  %v6094_v1 = vmax.f32 %v6092_v0, %v6093_v53 }
 0x5ad   : > { %v6027_v11 = vpop.f32.mrf.mxu3 }
 0x5ae   : > { %v6028_v12 = vadd.f32 %v6027_v11, %v11426_v51  ;;  %v6095_v33 = vrot.slane %v6094_v1, 1 }
 0x5b0   : > { %v6077_v49 = vadd.f32 %v6076_v41, %v6028_v12  ;;  %v6106_v41 = vrot.slane %v6105_v13, 2  ;;  %v6096_v8 = vmax.f32 %v6094_v1, %v6095_v33 }
 0x5b2   : > { %v6126_v56 = vmax.f32 %v6124_v30, %v6077_v49 }
 0x5b3   : > { %v6079_v24 = vpop.f32.mrf.mxu0 }
 0x5b9   : > { %v5981_v38 = vpop.f32.mrf.mxu2 }
 0x5bb   : > { %v6081_v60 = vpop.f32.mrf.mxu0 }
 0x5c1   : > { %v5983_v27 = vpop.f32.mrf.mxu2 }
 0x5c2   : > { %v5932_v10 = vpop.f32.mrf.mxu1 }
 0x5c3   : > { %v5933_v42 = vadd.f32 %v5932_v10, %v11415_v16 }
 0x5c5   : > { %v5982_v25 = vadd.f32 %v5981_v38, %v5933_v42  ;;  %v6107_v38 = vmax.f32 %v6105_v13, %v6106_v41 }
 0x5c7   : > { %v6114_v48 = vmax.f32 %v6112_v19, %v5982_v25  ;;  %v6108_v44 = vrot.slane %v6107_v38, 1 }
 0x5c8   : > { %v6030_v29 = vpop.f32.mrf.mxu3 }
 0x5c9   : > { %v6031_v54 = vadd.f32 %v6030_v29, %v11426_v51  ;;  %v6109_v22 = vmax.f32 %v6107_v38, %v6108_v44 }
 0x5ca   : > { %v5934_v3 = vpop.f32.mrf.mxu1 }
 0x5cb   : > { %v5935_v36 = vadd.f32 %v5934_v3, %v11415_v16  ;;  %v6080_v15 = vadd.f32 %v6079_v24, %v6031_v54  ;;  %v6139_v24 = vld [vmem:[#allocation2] sm:$0xf] }
 0x5cd   : > { %v5984_v46 = vadd.f32 %v5983_v27, %v5935_v36  ;;  %v6127_v35 = vmax.f32 %v6125_v61, %v6080_v15 }
 0x5cf   : > { %v6115_v21 = vmax.f32 %v6113_v28, %v5984_v46 }
 0x5d0   : > { %v6032_v16 = vpop.f32.mrf.mxu3 }
 0x5d1   : > { %v6116_v45 = vmax.f32 %v6114_v48, %v6115_v21  ;;  %v6033_v47 = vadd.f32 %v6032_v16, %v11426_v51 }
 0x5d3   : > { %v6117_v37 = vrot.slane %v6116_v45, 4  ;;  %v6082_v50 = vadd.f32 %v6081_v60, %v6033_v47 }
 0x5d5   : > { %v6118_v63 = vmax.f32 %v6116_v45, %v6117_v37  ;;  %v6128_v31 = vmax.f32 %v6126_v56, %v6082_v50 }
 0x5d7   : > { %v6119_v11 = vrot.slane %v6118_v63, 2  ;;  %v6129_v6 = vmax.f32 %v6127_v35, %v6128_v31 }
 0x5d9   : > { %v6130_v10 = vrot.slane %v6129_v6, 4  ;;  %v6120_v57 = vmax.f32 %v6118_v63, %v6119_v11 }
 0x5db   : > { %v6131_v51 = vmax.f32 %v6129_v6, %v6130_v10  ;;  %v6121_v40 = vrot.slane %v6120_v57, 1 }
 0x5dd   : > { %v6132_v20 = vrot.slane %v6131_v51, 2  ;;  %v6122_v32 = vmax.f32 %v6120_v57, %v6121_v40 }
 0x5df   : > { %v6133_v62 = vmax.f32 %v6131_v51, %v6132_v20  ;;  %v6137_v7 = vsel %vm6136_vm8, %v6096_v8, %v6122_v32 }
 0x5e1   : > { %v6134_v42 = vrot.slane %v6133_v62, 1 }
 0x5e3   : > { %v6135_v4 = vmax.f32 %v6133_v62, %v6134_v42 }
 0x5e5   : > { %v6138_v58 = vsel %vm6136_vm8, %v6109_v22, %v6135_v4 }
 0x5e6   : > { %v6142_v29 = vrot.slane %v6138_v58, 6 }
 0x5e7   : > { %6151 = sbr.rel (%p6626_p10) target bundleno = 1530 (0x5fa), region = 118 }
 0x5e8   : > { %v6144_v2 = vsel %vm6143_vm9, %v6137_v7, %v6142_v29 }
 0x5e9   : > { %v6146_v23 = vmax.f32 %v6139_v24, %v6144_v2 }
 0x5eb   : > { %6147 = vst [vmem:[#allocation2] sm:$0xf] %v6146_v23 }
 0x5ec   : > { %vm6158_vm10 = vcmask 1042434   ;;  %v6170_v52 = vlaneseq  ;;  %vm6161_vm11 = vcmask 1041409   ;;  %vm6163_vm12 = vcmask 1043459  }
 0x5ed   : > { %vm6165_vm13 = vcmask 1042433  }
 0x5ee   : > { %vm6172_vm14 = vcmp.lt.s32.totalorder %v6170_v52, 256 }
 0x5f2   : > { %v6152_v34 = vld [vmem:[#allocation2] sm:$0xf] }
 0x5f3   : > { %v6154_v59 = vrot.slane %v6152_v34, 1  ;;  %v6155_v3 = vrot.slane %v6152_v34, 2  ;;  %v6156_v17 = vrot.slane %v6152_v34, 3 }
 0x5f5   : > { %v6157_v12 = vsel %vm6136_vm8, %v6152_v34, %v6154_v59  ;;  %v6159_v25 = vsel %vm6158_vm10, %v6155_v3, %v6156_v17  ;;  %v6162_v36 = vsel %vm6161_vm11, %v6152_v34, %v6154_v59  ;;  %v6164_v5 = vsel %vm6163_vm12, %v6155_v3, %v6156_v17 }
 0x5f6   : > { %v6160_v43 = vsel %vm6143_vm9, %v6157_v12, %v6159_v25  ;;  %v6166_v27 = vsel %vm6165_vm13, %v6162_v36, %v6164_v5 }
 0x5f7   : > { %6174 = vst.msk [vmem:[#allocation4] sm:$0x3] %vm6172_vm14, %v6160_v43  ;;  %v6167_v19 = vrot.slane %v6166_v27, 1 }
 0x5f9   : > { %6175 = vst.msk [vmem:[#allocation4 + $0x2] sm:$0x3] %vm6172_vm14, %v6167_v19 }
 0x5fa PF: > { %p6712_p11 = scmp.eq.s32.totalorder %s6249_s30, 3  ;;  %s6186_s15 = sshll.u32 %s11592_s13, 4  ;;  %s6187_s15 = int_to_ptr.hbm [resolvable:$true] %s6186_s15 }
 0x5fb   : > { %s7076_s16 = smov [#allocation4]   ;;  %s7077_s25 = smov 32  }
 0x5fc   : > { %s6184_s18 = sshll.u32 %s7076_s16, 4  ;;  %s7078_s19 = smov 2   ;;  %s6185_s18 = int_to_ptr.vmem [resolvable:$true] %s6184_s18 }
 0x5fd   : > { %6709 = dma.vmem_to_hbm [thread:$0]  (%p6712_p11), %s6185_s18, 64, %s6187_s15, [#allocation5], %s7077_s25, %s7077_s25, %s7078_s19  }
 0x5fe   : > { %7049 = dma.done.wait (%p6712_p11), [#allocation5], 64  }
 0x5ff   : > { %7051 = vsyncadd (%p6712_p11), [#allocation5], 4294967232 }
 0x600 PF: > { %s24_s29 = sadd.s32 1, %s7070_s29   ;;  %s11742_s25 = smov %s7058_s26 }
 0x601   : > { %p21_p12 = scmp.ge.s32.totalorder %s24_s29, 6   ;;  %s11743_s26 = smov %s7185_s17 }
 0x602   : > { %s11744_s27 = smov %s7066_s28  ;;  %s11745_s28 = smov %s11747_s14 }
 0x603   :  { %23 = sbr.rel (!%p21_p12) target bundleno = 3 (0x3), region = 151 }
 0x608   :  { %6203 = vsyncpa [#allocation5], 1 }
 0x609   :  { %6205 = vsyncpa [#allocation5 + $0x1], 1 }

</bundles_post_ra>
